<compile_context>
chip_gen: v5e
topology: v5e:2x2
jax: 0.10.0
libtpu: 0.0.40
codegen_flags: <defaults>
</compile_context>

<pallas_src>
import numpy as np
import jax
import jax.numpy as jnp
from jax.experimental import pallas as pl
from jax.experimental.pallas import tpu as pltpu

EPS = float(jnp.finfo(jnp.float32).eps)   # == torch.finfo(torch.float32).eps

# ---------------- configuration (small, forward-consistent shapes) ----------------
BATCH      = 2
NUM_CH     = 8                      # mic channels (IPDs pha[4..7]-pha[0..3] need >= 8)
SRC_CH     = 2                      # reference sources
NCH        = NUM_CH + SRC_CH        # mics + sources, STFT'd together
FRAME_LEN  = 32
FRAME_HOP  = 16
NUM_BINS   = FRAME_LEN // 2 + 1     # F = 17
T_FRAMES   = 8
RNN_HIDDEN = 32
RNN_LAYERS = 3

F_PAD     = 128                     # lane-padded frequency slab width
FRAME_PAD = 128                     # lane-dense STFT LHS width (frame_len zero-padded)
HPAD      = 128                     # lane-padded hidden slab width
H         = RNN_HIDDEN              # 32
G         = 4 * H                   # 128 gates per LSTM direction
NFEAT     = 5 * F_PAD               # 640: [mag0 | ipd1..ipd4], one 128-lane slab each


# ---------------- the single fused forward kernel ----------------
def _mvdr_kernel(frames_ref, basis_ref,
                 w0_ref, b0_ref, w1_ref, b1_ref, w2_ref, b2_ref,
                 whf0_ref, whb0_ref, whf1_ref, whb1_ref, whf2_ref, whb2_ref,
                 wout_ref, bout_ref,
                 mask_ref, srcm_ref,
                 spec_scr, gate_scr, hseq_scr):
    N, T, TN = BATCH, T_FRAMES, BATCH * T_FRAMES

    # ---- STFT: one lane-dense windowed real-DFT matmul for all (mic + src) channels ----
    # rows ordered (channel, time, batch); real spectrum in lanes [0:128), imag in [128:256)
    spec_scr[...] = jnp.dot(frames_ref[...], basis_ref[...],
                            preferred_element_type=jnp.float32)

    def spec_re(c):
        return spec_scr[c * TN:(c + 1) * TN, 0:F_PAD]

    def spec_im(c):
        return spec_scr[c * TN:(c + 1) * TN, F_PAD:2 * F_PAD]

    # ---- mic-0 magnitude + src ratio masks, fused over batch*time ((16,128) slabs) ----
    re0 = spec_re(0)
    im0 = spec_im(0)
    mag0 = jnp.sqrt(jnp.maximum(re0 * re0 + im0 * im0, EPS))
    for s in range(SRC_CH):
        sr = spec_re(NUM_CH + s)
        si = spec_im(NUM_CH + s)
        dr = re0 - sr
        di = im0 - si
        smag2 = jnp.maximum(sr * sr + si * si, EPS)
        infm2 = jnp.maximum(dr * dr + di * di, EPS)
        # smag / max(sqrt(smag^2 + infm^2), EPS); outer clamp is inert since smag^2 >= EPS
        srcm_ref[s] = jnp.sqrt(smag2) * jax.lax.rsqrt(smag2 + infm2)

    # ---- IPD features, one (k, k+4) channel pair at a time (low vreg pressure) ----
    feats = [mag0]
    for k in range(4):
        ra = spec_re(4 + k) + EPS
        ia = spec_im(4 + k) + EPS
        rb = spec_re(k) + EPS
        ib = spec_im(k) + EPS
        # cos(pha_a - pha_b) computed analytically from (re+eps, im+eps) -- identical to
        # cos(atan2(i+eps, r+eps) - atan2(...)) of the reference module.
        ipd = (ra * rb + ia * ib) * (jax.lax.rsqrt(ra * ra + ia * ia)
                                     * jax.lax.rsqrt(rb * rb + ib * ib))
        feats.append(ipd)
    x_in = jnp.concatenate(feats, axis=1)                 # (TN, 640), register value

    # ---- 3-layer bidirectional LSTM ----
    w_in = (w0_ref, w1_ref, w2_ref)
    b_in = (b0_ref, b1_ref, b2_ref)
    w_hf = (whf0_ref, whf1_ref, whf2_ref)
    w_hb = (whb0_ref, whb1_ref, whb2_ref)

    # zero the lane-padded hidden slab once so never-written pad lanes (which only hit zero
    # weight rows) can never inject scratch garbage (NaN * 0 = NaN) into later matmuls
    hseq_scr[...] = jnp.zeros(hseq_scr.shape, hseq_scr.dtype)

    for l in range(RNN_LAYERS):
        # fused fwd|bwd input projection for the whole sequence, once per layer
        gate_scr[...] = (jnp.dot(x_in, w_in[l][...], preferred_element_type=jnp.float32)
                         + b_in[l][...])                  # (TN, 2G): fwd [0:G), bwd [G:2G)
        whf = w_hf[l][...]                                # (H, G), kept resident
        whb = w_hb[l][...]
        h_f = jnp.zeros((N, H), jnp.float32)
        c_f = jnp.zeros((N, H), jnp.float32)
        h_b = jnp.zeros((N, H), jnp.float32)
        c_b = jnp.zeros((N, H), jnp.float32)
        for s in range(T):
            sb = T - 1 - s
            # split recurrent dots (no per-step concat, no zero-block MACs)
            rec_f = jnp.dot(h_f, whf, preferred_element_type=jnp.float32)   # (N, G)
            rec_b = jnp.dot(h_b, whb, preferred_element_type=jnp.float32)
            # gate loads are recurrence-independent -> hoisted off the serial chain
            g_f = gate_scr[pl.ds(N * s, N), 0:G] + rec_f          # fwd gates @ time s
            g_b = gate_scr[pl.ds(N * sb, N), G:2 * G] + rec_b     # bwd gates @ time T-1-s
            g = jnp.concatenate([g_f, g_b], axis=1)               # (N, 2G), aligned concat
            sg = jax.nn.sigmoid(g)                                # one EUP slab (i, f, o)
            tg = jnp.tanh(g)                                      # one EUP slab (g)
            # PyTorch LSTM gate order: i, f, g, o
            c_f = sg[:, H:2 * H] * c_f + sg[:, 0:H] * tg[:, 2 * H:3 * H]
            c_b = (sg[:, G + H:G + 2 * H] * c_b
                   + sg[:, G:G + H] * tg[:, G + 2 * H:G + 3 * H])
            h_f = sg[:, 3 * H:4 * H] * jnp.tanh(c_f)
            h_b = sg[:, G + 3 * H:G + 4 * H] * jnp.tanh(c_b)
            # lane-aligned 128-wide hidden slots: fwd -> slab 0, bwd -> slab 1
            hseq_scr[pl.ds(N * s, N), 0:H] = h_f
            hseq_scr[pl.ds(N * sb, N), HPAD:HPAD + H] = h_b
        x_in = hseq_scr[...]                                      # (TN, 2*HPAD)

    # ---- output linear + sigmoid; mask_s1 on lanes [0:F), mask_s2 on lanes [128:128+F) ----
    logits = jnp.dot(x_in, wout_ref[...], preferred_element_type=jnp.float32) + bout_ref[...]
    mask_ref[...] = jax.nn.sigmoid(logits)


def _full_spec(shape):
    nd = len(shape)
    return pl.BlockSpec(shape, lambda i, _nd=nd: (0,) * _nd)


def mvdr_pallas_call(frames, basis, pk):
    TN = BATCH * T_FRAMES
    inputs = (frames, basis,
              pk["w_in"][0], pk["b_in"][0], pk["w_in"][1], pk["b_in"][1],
              pk["w_in"][2], pk["b_in"][2],
              pk["w_hf"][0], pk["w_hb"][0], pk["w_hf"][1], pk["w_hb"][1],
              pk["w_hf"][2], pk["w_hb"][2],
              pk["w_out"], pk["b_out"])
    return pl.pallas_call(
        _mvdr_kernel,
        out_shape=(jax.ShapeDtypeStruct((TN, 2 * F_PAD), jnp.float32),
                   jax.ShapeDtypeStruct((SRC_CH, TN, F_PAD), jnp.float32)),
        grid=(1,),
        in_specs=[_full_spec(a.shape) for a in inputs],
        out_specs=(pl.BlockSpec((TN, 2 * F_PAD), lambda i: (0, 0)),
                   pl.BlockSpec((SRC_CH, TN, F_PAD), lambda i: (0, 0, 0))),
        scratch_shapes=[
            pltpu.VMEM((NCH * TN, 2 * F_PAD), jnp.float32),   # spectra (real|imag slabs)
            pltpu.VMEM((TN, 2 * G), jnp.float32),             # per-layer gate pre-activations
            pltpu.VMEM((TN, 2 * HPAD), jnp.float32),          # lane-padded hidden sequence
        ],
        compiler_params=pltpu.CompilerParams(dimension_semantics=("arbitrary",)),
    )(*inputs)


# ---------------- full forward (decode=False path) ----------------
def mvdr_forward(x, src, pk, basis):
    sig = jnp.concatenate([x, src], axis=1).astype(jnp.float32)            # (N, 10, S)
    S = sig.shape[-1]
    T = (S - FRAME_LEN) // FRAME_HOP + 1
    assert T == T_FRAMES, (T, T_FRAMES)
    idx = jnp.arange(T)[:, None] * FRAME_HOP + jnp.arange(FRAME_LEN)[None, :]
    # channel-major / time-major / batch-minor rows; lane-pad 32 -> 128 (basis rows are zero)
    frames = sig[..., idx].transpose(1, 2, 0, 3).reshape(-1, FRAME_LEN)
    frames = jnp.pad(frames, ((0, 0), (0, FRAME_PAD - FRAME_LEN)))

    mask_pad, src_pad = mvdr_pallas_call(frames, basis, pk)

    # tiny epilogue: slice valid bins and produce the module's (N, 2, F, T) layout
    mask_pad = mask_pad.reshape(T_FRAMES, BATCH, 2 * F_PAD)
    m1 = mask_pad[..., 0:NUM_BINS]                                         # (T, N, F)
    m2 = mask_pad[..., F_PAD:F_PAD + NUM_BINS]
    beam_out = jnp.stack([m1, m2], axis=0).transpose(2, 0, 3, 1)           # (N, 2, F, T)
    src_pad = src_pad.reshape(SRC_CH, T_FRAMES, BATCH, F_PAD)
    src_out = src_pad[..., 0:NUM_BINS].transpose(2, 0, 3, 1)               # (N, 2, F, T)
    return beam_out, src_out


# ---------------- lane-padded windowed real-DFT basis (rows >= FRAME_LEN are zero) ----------------
def make_basis():
    n = np.arange(FRAME_LEN)
    k = np.arange(NUM_BINS)
    window = 0.5 - 0.5 * np.cos(2.0 * np.pi * n / FRAME_LEN)   # periodic Hann
    ang = 2.0 * np.pi * np.outer(n, k) / FRAME_LEN
    basis = np.zeros((FRAME_PAD, 2 * F_PAD), np.float32)
    basis[:FRAME_LEN, 0:NUM_BINS] = np.cos(ang) * window[:, None]
    basis[:FRAME_LEN, F_PAD:F_PAD + NUM_BINS] = -np.sin(ang) * window[:, None]
    return jnp.asarray(basis)


# ---------------- deterministic parameter init (PyTorch-style uniform) ----------------
def init_params(key):
    params = {"rnn": {}}
    din0 = 5 * NUM_BINS
    for l in range(RNN_LAYERS):
        layer_in = din0 if l == 0 else 2 * H
        for d in range(2):
            key, k1, k2, k3, k4 = jax.random.split(key, 5)
            bound = 1.0 / np.sqrt(H)
            params["rnn"][f"l{l}_d{d}"] = dict(
                w_ih=jax.random.uniform(k1, (4 * H, layer_in), jnp.float32, -bound, bound),
                w_hh=jax.random.uniform(k2, (4 * H, H), jnp.float32, -bound, bound),
                b_ih=jax.random.uniform(k3, (4 * H,), jnp.float32, -bound, bound),
                b_hh=jax.random.uniform(k4, (4 * H,), jnp.float32, -bound, bound),
            )
    key, k1, k2 = jax.random.split(key, 3)
    bound = 1.0 / np.sqrt(2 * H)
    params["w_out"] = jax.random.uniform(k1, (2 * NUM_BINS, 2 * H), jnp.float32, -bound, bound)
    params["b_out"] = jax.random.uniform(k2, (2 * NUM_BINS,), jnp.float32, -bound, bound)
    return params


# ---------------- pack PyTorch-layout params into lane-padded, direction-fused matrices ----------------
def pack_params(params):
    rp = params["rnn"]
    pk = {"w_in": [], "b_in": [], "w_hf": [], "w_hb": []}

    # layer 0 input projection: rows placed on the 5 lane-aligned feature slabs (zero padding)
    wf = np.asarray(rp["l0_d0"]["w_ih"]).T            # (5F, 4H)
    wb = np.asarray(rp["l0_d1"]["w_ih"]).T
    w0 = np.zeros((NFEAT, 2 * G), np.float32)
    for s5 in range(5):
        w0[s5 * F_PAD:s5 * F_PAD + NUM_BINS, 0:G] = wf[s5 * NUM_BINS:(s5 + 1) * NUM_BINS]
        w0[s5 * F_PAD:s5 * F_PAD + NUM_BINS, G:2 * G] = wb[s5 * NUM_BINS:(s5 + 1) * NUM_BINS]
    pk["w_in"].append(jnp.asarray(w0))

    # layers 1..2 input projection: rows on 2 lane-aligned hidden slabs (fwd [0:H), bwd [128:128+H))
    for l in range(1, RNN_LAYERS):
        wf = np.asarray(rp[f"l{l}_d0"]["w_ih"]).T     # (2H, 4H): rows [fwd h | bwd h]
        wb = np.asarray(rp[f"l{l}_d1"]["w_ih"]).T
        wl = np.zeros((2 * HPAD, 2 * G), np.float32)
        wl[0:H, 0:G] = wf[0:H]
        wl[HPAD:HPAD + H, 0:G] = wf[H:2 * H]
        wl[0:H, G:2 * G] = wb[0:H]
        wl[HPAD:HPAD + H, G:2 * G] = wb[H:2 * H]
        pk["w_in"].append(jnp.asarray(wl))

    for l in range(RNN_LAYERS):
        bf = np.asarray(rp[f"l{l}_d0"]["b_ih"]) + np.asarray(rp[f"l{l}_d0"]["b_hh"])
        bb = np.asarray(rp[f"l{l}_d1"]["b_ih"]) + np.asarray(rp[f"l{l}_d1"]["b_hh"])
        pk["b_in"].append(jnp.asarray(
            np.concatenate([bf, bb]).reshape(1, 2 * G).astype(np.float32)))
        # split recurrent weights per direction (no block-diagonal zero padding)
        pk["w_hf"].append(jnp.asarray(np.asarray(rp[f"l{l}_d0"]["w_hh"]).T.astype(np.float32)))
        pk["w_hb"].append(jnp.asarray(np.asarray(rp[f"l{l}_d1"]["w_hh"]).T.astype(np.float32)))

    # output linear over the lane-padded hidden slabs
    wo = np.asarray(params["w_out"]).T                # (2H, 2F): rows [fwd h | bwd h]
    bo = np.asarray(params["b_out"])
    w_out = np.zeros((2 * HPAD, 2 * F_PAD), np.float32)
    b_out = np.zeros((1, 2 * F_PAD), np.float32)
    w_out[0:H, 0:NUM_BINS] = wo[0:H, 0:NUM_BINS]
    w_out[HPAD:HPAD + H, 0:NUM_BINS] = wo[H:2 * H, 0:NUM_BINS]
    w_out[0:H, F_PAD:F_PAD + NUM_BINS] = wo[0:H, NUM_BINS:2 * NUM_BINS]
    w_out[HPAD:HPAD + H, F_PAD:F_PAD + NUM_BINS] = wo[H:2 * H, NUM_BINS:2 * NUM_BINS]
    b_out[0, 0:NUM_BINS] = bo[0:NUM_BINS]
    b_out[0, F_PAD:F_PAD + NUM_BINS] = bo[NUM_BINS:2 * NUM_BINS]
    pk["w_out"] = jnp.asarray(w_out)
    pk["b_out"] = jnp.asarray(b_out)
    return pk


# ---------------- pure-JAX reference (same math, original PyTorch-layout params) ----------------
def mvdr_reference(x, src, params, basis):
    sig = jnp.concatenate([x, src], axis=1).astype(jnp.float32)
    S = sig.shape[-1]
    T = (S - FRAME_LEN) // FRAME_HOP + 1
    idx = jnp.arange(T)[:, None] * FRAME_HOP + jnp.arange(FRAME_LEN)[None, :]
    frames = sig[..., idx]                                               # (N, NCH, T, L)
    spec = jnp.einsum("nctl,lf->nctf", frames, basis[:FRAME_LEN])
    re = spec[..., 0:NUM_BINS]
    im = spec[..., F_PAD:F_PAD + NUM_BINS]
    inp_r, inp_i = re[:, :NUM_CH], im[:, :NUM_CH]
    src_r, src_i = re[:, NUM_CH:], im[:, NUM_CH:]

    mag = jnp.sqrt(jnp.maximum(inp_r ** 2 + inp_i ** 2, EPS))
    pha = jnp.arctan2(inp_i + EPS, inp_r + EPS)
    ipds = [jnp.cos(pha[:, 4 + k] - pha[:, k]) for k in range(4)]
    magipd = jnp.concatenate([mag[:, 0]] + ipds, axis=-1)                # (N, T, 5F)

    def lstm_dir(xseq, p, reverse):
        n_b, t_len, _ = xseq.shape
        h = jnp.zeros((n_b, H), jnp.float32)
        c = jnp.zeros((n_b, H), jnp.float32)
        order = range(t_len - 1, -1, -1) if reverse else range(t_len)
        outs = [None] * t_len
        for t in order:
            g = xseq[:, t] @ p["w_ih"].T + p["b_ih"] + h @ p["w_hh"].T + p["b_hh"]
            i_g = jax.nn.sigmoid(g[:, 0:H])
            f_g = jax.nn.sigmoid(g[:, H:2 * H])
            g_g = jnp.tanh(g[:, 2 * H:3 * H])
            o_g = jax.nn.sigmoid(g[:, 3 * H:4 * H])
            c = f_g * c + i_g * g_g
            h = o_g * jnp.tanh(c)
            outs[t] = h
        return jnp.stack(outs, axis=1)

    inp = magipd
    for l in range(RNN_LAYERS):
        hf = lstm_dir(inp, params["rnn"][f"l{l}_d0"], False)
        hb = lstm_dir(inp, params["rnn"][f"l{l}_d1"], True)
        inp = jnp.concatenate([hf, hb], axis=-1)
    x_mask = jax.nn.sigmoid(inp @ params["w_out"].T + params["b_out"])
    m1, m2 = x_mask[..., :NUM_BINS], x_mask[..., NUM_BINS:]
    beam_out = jnp.stack([m1, m2], axis=1).transpose(0, 1, 3, 2)

    smag = jnp.sqrt(jnp.maximum(src_r ** 2 + src_i ** 2, EPS))
    r0, i0 = inp_r[:, 0], inp_i[:, 0]
    outs = []
    for s in range(SRC_CH):
        infm = jnp.sqrt(jnp.maximum((r0 - src_r[:, s]) ** 2 + (i0 - src_i[:, s]) ** 2, EPS))
        outs.append(smag[:, s] / jnp.maximum(jnp.sqrt(smag[:, s] ** 2 + infm ** 2), EPS))
    src_out = jnp.stack(outs, axis=1).transpose(0, 1, 3, 2)
    return beam_out, src_out


if __name__ == "__main__":
    key = jax.random.PRNGKey(0)
    kx, ks, kp = jax.random.split(key, 3)

    n_samples = FRAME_LEN + FRAME_HOP * (T_FRAMES - 1)       # 144
    x = jax.random.normal(kx, (BATCH, NUM_CH, n_samples), jnp.float32)
    src = jax.random.normal(ks, (BATCH, SRC_CH, n_samples), jnp.float32)
    params = init_params(kp)
    packed = pack_params(params)
    basis = make_basis()

    fwd = jax.jit(lambda a, b: mvdr_forward(a, b, packed, basis))
    beam_out, src_out = fwd(x, src)
    jax.block_until_ready((beam_out, src_out))

    assert beam_out.shape == (BATCH, 2, NUM_BINS, T_FRAMES), beam_out.shape
    assert src_out.shape == (BATCH, 2, NUM_BINS, T_FRAMES), src_out.shape
    assert bool(jnp.all(jnp.isfinite(beam_out))) and bool(jnp.all(jnp.isfinite(src_out)))

    # correctness check against a pure-JAX reference of the same forward math
    beam_ref, src_ref = mvdr_reference(x, src, params, basis)
    err_b = float(jnp.max(jnp.abs(beam_out - beam_ref)))
    err_s = float(jnp.max(jnp.abs(src_out - src_ref)))
    assert err_b < 1e-2 and err_s < 1e-2, (err_b, err_s)

    print("KERNEL_OK")
</pallas_src>

<mosaic_0001>
module attributes {stable_mosaic.version = 11 : i64} {
  func.func @_mvdr_kernel(%arg0: i32, %arg1: memref<160x128xf32, #tpu.memory_space<vmem>>, %arg2: memref<128x256xf32, #tpu.memory_space<vmem>>, %arg3: memref<640x256xf32, #tpu.memory_space<vmem>>, %arg4: memref<1x256xf32, #tpu.memory_space<vmem>>, %arg5: memref<256x256xf32, #tpu.memory_space<vmem>>, %arg6: memref<1x256xf32, #tpu.memory_space<vmem>>, %arg7: memref<256x256xf32, #tpu.memory_space<vmem>>, %arg8: memref<1x256xf32, #tpu.memory_space<vmem>>, %arg9: memref<32x128xf32, #tpu.memory_space<vmem>>, %arg10: memref<32x128xf32, #tpu.memory_space<vmem>>, %arg11: memref<32x128xf32, #tpu.memory_space<vmem>>, %arg12: memref<32x128xf32, #tpu.memory_space<vmem>>, %arg13: memref<32x128xf32, #tpu.memory_space<vmem>>, %arg14: memref<32x128xf32, #tpu.memory_space<vmem>>, %arg15: memref<256x256xf32, #tpu.memory_space<vmem>>, %arg16: memref<1x256xf32, #tpu.memory_space<vmem>>, %arg17: memref<16x256xf32, #tpu.memory_space<vmem>>, %arg18: memref<2x16x128xf32, #tpu.memory_space<vmem>>, %arg19: memref<160x256xf32, #tpu.memory_space<vmem>>, %arg20: memref<16x256xf32, #tpu.memory_space<vmem>>, %arg21: memref<16x256xf32, #tpu.memory_space<vmem>>) attributes {dimension_semantics = [#tpu.dimension_semantics<arbitrary>], iteration_bounds = array<i64: 1>, scalar_prefetch = 0 : i64, scratch_operands = 3 : i64, tpu.core_type = #tpu.core_type<tc>, window_params = [{pipeline_mode = #tpu.pipeline_mode<synchronous>, transform_indices = @transform_0, window_bounds = array<i64: 160, 128>}, {pipeline_mode = #tpu.pipeline_mode<synchronous>, transform_indices = @transform_1, window_bounds = array<i64: 128, 256>}, {pipeline_mode = #tpu.pipeline_mode<synchronous>, transform_indices = @transform_2, window_bounds = array<i64: 640, 256>}, {pipeline_mode = #tpu.pipeline_mode<synchronous>, transform_indices = @transform_3, window_bounds = array<i64: 1, 256>}, {pipeline_mode = #tpu.pipeline_mode<synchronous>, transform_indices = @transform_4, window_bounds = array<i64: 256, 256>}, {pipeline_mode = #tpu.pipeline_mode<synchronous>, transform_indices = @transform_5, window_bounds = array<i64: 1, 256>}, {pipeline_mode = #tpu.pipeline_mode<synchronous>, transform_indices = @transform_6, window_bounds = array<i64: 256, 256>}, {pipeline_mode = #tpu.pipeline_mode<synchronous>, transform_indices = @transform_7, window_bounds = array<i64: 1, 256>}, {pipeline_mode = #tpu.pipeline_mode<synchronous>, transform_indices = @transform_8, window_bounds = array<i64: 32, 128>}, {pipeline_mode = #tpu.pipeline_mode<synchronous>, transform_indices = @transform_9, window_bounds = array<i64: 32, 128>}, {pipeline_mode = #tpu.pipeline_mode<synchronous>, transform_indices = @transform_10, window_bounds = array<i64: 32, 128>}, {pipeline_mode = #tpu.pipeline_mode<synchronous>, transform_indices = @transform_11, window_bounds = array<i64: 32, 128>}, {pipeline_mode = #tpu.pipeline_mode<synchronous>, transform_indices = @transform_12, window_bounds = array<i64: 32, 128>}, {pipeline_mode = #tpu.pipeline_mode<synchronous>, transform_indices = @transform_13, window_bounds = array<i64: 32, 128>}, {pipeline_mode = #tpu.pipeline_mode<synchronous>, transform_indices = @transform_14, window_bounds = array<i64: 256, 256>}, {pipeline_mode = #tpu.pipeline_mode<synchronous>, transform_indices = @transform_15, window_bounds = array<i64: 1, 256>}, {pipeline_mode = #tpu.pipeline_mode<synchronous>, transform_indices = @transform_16, window_bounds = array<i64: 16, 256>}, {pipeline_mode = #tpu.pipeline_mode<synchronous>, transform_indices = @transform_17, window_bounds = array<i64: 2, 16, 128>}]} {
    %c0 = arith.constant 0 : index
    %c0_0 = arith.constant 0 : index
    %0 = vector.load %arg1[%c0, %c0_0] : memref<160x128xf32, #tpu.memory_space<vmem>>, vector<160x128xf32>
    %c0_1 = arith.constant 0 : index
    %c0_2 = arith.constant 0 : index
    %1 = vector.load %arg2[%c0_1, %c0_2] : memref<128x256xf32, #tpu.memory_space<vmem>>, vector<128x256xf32>
    %cst = arith.constant dense<0.000000e+00> : vector<160x256xf32>
    %2 = tpu.matmul %0, %1, %cst {dimension_numbers = #tpu.dot_dimension_numbers<[1], [0], [0], [1], [0, 0, 1, 1], [], []>} : vector<160x128xf32>, vector<128x256xf32>, vector<160x256xf32> -> vector<160x256xf32>
    %c0_3 = arith.constant 0 : index
    %c0_4 = arith.constant 0 : index
    %3 = vector.load %arg19[%c0_3, %c0_4] : memref<160x256xf32, #tpu.memory_space<vmem>>, vector<160x256xf32>
    tpu.vector_store %arg19[%c0_3, %c0_4], %2 {strides = array<i32>} : memref<160x256xf32, #tpu.memory_space<vmem>>, vector<160x256xf32>,
    %c0_5 = arith.constant 0 : index
    %c0_6 = arith.constant 0 : index
    %4 = vector.load %arg19[%c0_5, %c0_6] : memref<160x256xf32, #tpu.memory_space<vmem>>, vector<16x128xf32>
    %c0_7 = arith.constant 0 : index
    %c128 = arith.constant 128 : index
    %5 = vector.load %arg19[%c0_7, %c128] : memref<160x256xf32, #tpu.memory_space<vmem>>, vector<16x128xf32>
    %6 = arith.mulf %4, %4 : vector<16x128xf32>
    %7 = arith.mulf %5, %5 : vector<16x128xf32>
    %8 = arith.addf %6, %7 : vector<16x128xf32>
    %cst_8 = arith.constant 1.1920929E-7 : f32
    %9 = vector.broadcast %cst_8 : f32 to vector<16x128xf32>
    %10 = arith.maximumf %8, %9 : vector<16x128xf32>
    %11 = math.sqrt %10 : vector<16x128xf32>
    %c128_9 = arith.constant 128 : index
    %c0_10 = arith.constant 0 : index
    %12 = vector.load %arg19[%c128_9, %c0_10] : memref<160x256xf32, #tpu.memory_space<vmem>>, vector<16x128xf32>
    %c128_11 = arith.constant 128 : index
    %c128_12 = arith.constant 128 : index
    %13 = vector.load %arg19[%c128_11, %c128_12] : memref<160x256xf32, #tpu.memory_space<vmem>>, vector<16x128xf32>
    %14 = arith.subf %4, %12 : vector<16x128xf32>
    %15 = arith.subf %5, %13 : vector<16x128xf32>
    %16 = arith.mulf %12, %12 : vector<16x128xf32>
    %17 = arith.mulf %13, %13 : vector<16x128xf32>
    %18 = arith.addf %16, %17 : vector<16x128xf32>
    %cst_13 = arith.constant 1.1920929E-7 : f32
    %19 = vector.broadcast %cst_13 : f32 to vector<16x128xf32>
    %20 = arith.maximumf %18, %19 : vector<16x128xf32>
    %21 = arith.mulf %14, %14 : vector<16x128xf32>
    %22 = arith.mulf %15, %15 : vector<16x128xf32>
    %23 = arith.addf %21, %22 : vector<16x128xf32>
    %cst_14 = arith.constant 1.1920929E-7 : f32
    %24 = vector.broadcast %cst_14 : f32 to vector<16x128xf32>
    %25 = arith.maximumf %23, %24 : vector<16x128xf32>
    %26 = math.sqrt %20 : vector<16x128xf32>
    %27 = arith.addf %20, %25 : vector<16x128xf32>
    %28 = math.rsqrt %27 : vector<16x128xf32>
    %29 = arith.mulf %26, %28 : vector<16x128xf32>
    %c0_15 = arith.constant 0 : index
    %c0_16 = arith.constant 0 : index
    %c0_17 = arith.constant 0 : index
    %30 = vector.load %arg18[%c0_15, %c0_16, %c0_17] : memref<2x16x128xf32, #tpu.memory_space<vmem>>, vector<1x16x128xf32>
    %31 = vector.shape_cast %30 : vector<1x16x128xf32> to vector<16x128xf32>
    %32 = vector.shape_cast %29 : vector<16x128xf32> to vector<1x16x128xf32>
    tpu.vector_store %arg18[%c0_15, %c0_16, %c0_17], %32 {strides = array<i32>} : memref<2x16x128xf32, #tpu.memory_space<vmem>>, vector<1x16x128xf32>,
    %c144 = arith.constant 144 : index
    %c0_18 = arith.constant 0 : index
    %33 = vector.load %arg19[%c144, %c0_18] : memref<160x256xf32, #tpu.memory_space<vmem>>, vector<16x128xf32>
    %c144_19 = arith.constant 144 : index
    %c128_20 = arith.constant 128 : index
    %34 = vector.load %arg19[%c144_19, %c128_20] : memref<160x256xf32, #tpu.memory_space<vmem>>, vector<16x128xf32>
    %35 = arith.subf %4, %33 : vector<16x128xf32>
    %36 = arith.subf %5, %34 : vector<16x128xf32>
    %37 = arith.mulf %33, %33 : vector<16x128xf32>
    %38 = arith.mulf %34, %34 : vector<16x128xf32>
    %39 = arith.addf %37, %38 : vector<16x128xf32>
    %cst_21 = arith.constant 1.1920929E-7 : f32
    %40 = vector.broadcast %cst_21 : f32 to vector<16x128xf32>
    %41 = arith.maximumf %39, %40 : vector<16x128xf32>
    %42 = arith.mulf %35, %35 : vector<16x128xf32>
    %43 = arith.mulf %36, %36 : vector<16x128xf32>
    %44 = arith.addf %42, %43 : vector<16x128xf32>
    %cst_22 = arith.constant 1.1920929E-7 : f32
    %45 = vector.broadcast %cst_22 : f32 to vector<16x128xf32>
    %46 = arith.maximumf %44, %45 : vector<16x128xf32>
    %47 = math.sqrt %41 : vector<16x128xf32>
    %48 = arith.addf %41, %46 : vector<16x128xf32>
    %49 = math.rsqrt %48 : vector<16x128xf32>
    %50 = arith.mulf %47, %49 : vector<16x128xf32>
    %c1 = arith.constant 1 : index
    %c0_23 = arith.constant 0 : index
    %c0_24 = arith.constant 0 : index
    %51 = vector.load %arg18[%c1, %c0_23, %c0_24] : memref<2x16x128xf32, #tpu.memory_space<vmem>>, vector<1x16x128xf32>
    %52 = vector.shape_cast %51 : vector<1x16x128xf32> to vector<16x128xf32>
    %53 = vector.shape_cast %50 : vector<16x128xf32> to vector<1x16x128xf32>
    tpu.vector_store %arg18[%c1, %c0_23, %c0_24], %53 {strides = array<i32>} : memref<2x16x128xf32, #tpu.memory_space<vmem>>, vector<1x16x128xf32>,
    %c64 = arith.constant 64 : index
    %c0_25 = arith.constant 0 : index
    %54 = vector.load %arg19[%c64, %c0_25] : memref<160x256xf32, #tpu.memory_space<vmem>>, vector<16x128xf32>
    %cst_26 = arith.constant 1.1920929E-7 : f32
    %55 = vector.broadcast %cst_26 : f32 to vector<16x128xf32>
    %56 = arith.addf %54, %55 : vector<16x128xf32>
    %c64_27 = arith.constant 64 : index
    %c128_28 = arith.constant 128 : index
    %57 = vector.load %arg19[%c64_27, %c128_28] : memref<160x256xf32, #tpu.memory_space<vmem>>, vector<16x128xf32>
    %cst_29 = arith.constant 1.1920929E-7 : f32
    %58 = vector.broadcast %cst_29 : f32 to vector<16x128xf32>
    %59 = arith.addf %57, %58 : vector<16x128xf32>
    %c0_30 = arith.constant 0 : index
    %c0_31 = arith.constant 0 : index
    %60 = vector.load %arg19[%c0_30, %c0_31] : memref<160x256xf32, #tpu.memory_space<vmem>>, vector<16x128xf32>
    %cst_32 = arith.constant 1.1920929E-7 : f32
    %61 = vector.broadcast %cst_32 : f32 to vector<16x128xf32>
    %62 = arith.addf %60, %61 : vector<16x128xf32>
    %c0_33 = arith.constant 0 : index
    %c128_34 = arith.constant 128 : index
    %63 = vector.load %arg19[%c0_33, %c128_34] : memref<160x256xf32, #tpu.memory_space<vmem>>, vector<16x128xf32>
    %cst_35 = arith.constant 1.1920929E-7 : f32
    %64 = vector.broadcast %cst_35 : f32 to vector<16x128xf32>
    %65 = arith.addf %63, %64 : vector<16x128xf32>
    %66 = arith.mulf %56, %62 : vector<16x128xf32>
    %67 = arith.mulf %59, %65 : vector<16x128xf32>
    %68 = arith.addf %66, %67 : vector<16x128xf32>
    %69 = arith.mulf %56, %56 : vector<16x128xf32>
    %70 = arith.mulf %59, %59 : vector<16x128xf32>
    %71 = arith.addf %69, %70 : vector<16x128xf32>
    %72 = math.rsqrt %71 : vector<16x128xf32>
    %73 = arith.mulf %62, %62 : vector<16x128xf32>
    %74 = arith.mulf %65, %65 : vector<16x128xf32>
    %75 = arith.addf %73, %74 : vector<16x128xf32>
    %76 = math.rsqrt %75 : vector<16x128xf32>
    %77 = arith.mulf %72, %76 : vector<16x128xf32>
    %78 = arith.mulf %68, %77 : vector<16x128xf32>
    %c80 = arith.constant 80 : index
    %c0_36 = arith.constant 0 : index
    %79 = vector.load %arg19[%c80, %c0_36] : memref<160x256xf32, #tpu.memory_space<vmem>>, vector<16x128xf32>
    %cst_37 = arith.constant 1.1920929E-7 : f32
    %80 = vector.broadcast %cst_37 : f32 to vector<16x128xf32>
    %81 = arith.addf %79, %80 : vector<16x128xf32>
    %c80_38 = arith.constant 80 : index
    %c128_39 = arith.constant 128 : index
    %82 = vector.load %arg19[%c80_38, %c128_39] : memref<160x256xf32, #tpu.memory_space<vmem>>, vector<16x128xf32>
    %cst_40 = arith.constant 1.1920929E-7 : f32
    %83 = vector.broadcast %cst_40 : f32 to vector<16x128xf32>
    %84 = arith.addf %82, %83 : vector<16x128xf32>
    %c16 = arith.constant 16 : index
    %c0_41 = arith.constant 0 : index
    %85 = vector.load %arg19[%c16, %c0_41] : memref<160x256xf32, #tpu.memory_space<vmem>>, vector<16x128xf32>
    %cst_42 = arith.constant 1.1920929E-7 : f32
    %86 = vector.broadcast %cst_42 : f32 to vector<16x128xf32>
    %87 = arith.addf %85, %86 : vector<16x128xf32>
    %c16_43 = arith.constant 16 : index
    %c128_44 = arith.constant 128 : index
    %88 = vector.load %arg19[%c16_43, %c128_44] : memref<160x256xf32, #tpu.memory_space<vmem>>, vector<16x128xf32>
    %cst_45 = arith.constant 1.1920929E-7 : f32
    %89 = vector.broadcast %cst_45 : f32 to vector<16x128xf32>
    %90 = arith.addf %88, %89 : vector<16x128xf32>
    %91 = arith.mulf %81, %87 : vector<16x128xf32>
    %92 = arith.mulf %84, %90 : vector<16x128xf32>
    %93 = arith.addf %91, %92 : vector<16x128xf32>
    %94 = arith.mulf %81, %81 : vector<16x128xf32>
    %95 = arith.mulf %84, %84 : vector<16x128xf32>
    %96 = arith.addf %94, %95 : vector<16x128xf32>
    %97 = math.rsqrt %96 : vector<16x128xf32>
    %98 = arith.mulf %87, %87 : vector<16x128xf32>
    %99 = arith.mulf %90, %90 : vector<16x128xf32>
    %100 = arith.addf %98, %99 : vector<16x128xf32>
    %101 = math.rsqrt %100 : vector<16x128xf32>
    %102 = arith.mulf %97, %101 : vector<16x128xf32>
    %103 = arith.mulf %93, %102 : vector<16x128xf32>
    %c96 = arith.constant 96 : index
    %c0_46 = arith.constant 0 : index
    %104 = vector.load %arg19[%c96, %c0_46] : memref<160x256xf32, #tpu.memory_space<vmem>>, vector<16x128xf32>
    %cst_47 = arith.constant 1.1920929E-7 : f32
    %105 = vector.broadcast %cst_47 : f32 to vector<16x128xf32>
    %106 = arith.addf %104, %105 : vector<16x128xf32>
    %c96_48 = arith.constant 96 : index
    %c128_49 = arith.constant 128 : index
    %107 = vector.load %arg19[%c96_48, %c128_49] : memref<160x256xf32, #tpu.memory_space<vmem>>, vector<16x128xf32>
    %cst_50 = arith.constant 1.1920929E-7 : f32
    %108 = vector.broadcast %cst_50 : f32 to vector<16x128xf32>
    %109 = arith.addf %107, %108 : vector<16x128xf32>
    %c32 = arith.constant 32 : index
    %c0_51 = arith.constant 0 : index
    %110 = vector.load %arg19[%c32, %c0_51] : memref<160x256xf32, #tpu.memory_space<vmem>>, vector<16x128xf32>
    %cst_52 = arith.constant 1.1920929E-7 : f32
    %111 = vector.broadcast %cst_52 : f32 to vector<16x128xf32>
    %112 = arith.addf %110, %111 : vector<16x128xf32>
    %c32_53 = arith.constant 32 : index
    %c128_54 = arith.constant 128 : index
    %113 = vector.load %arg19[%c32_53, %c128_54] : memref<160x256xf32, #tpu.memory_space<vmem>>, vector<16x128xf32>
    %cst_55 = arith.constant 1.1920929E-7 : f32
    %114 = vector.broadcast %cst_55 : f32 to vector<16x128xf32>
    %115 = arith.addf %113, %114 : vector<16x128xf32>
    %116 = arith.mulf %106, %112 : vector<16x128xf32>
    %117 = arith.mulf %109, %115 : vector<16x128xf32>
    %118 = arith.addf %116, %117 : vector<16x128xf32>
    %119 = arith.mulf %106, %106 : vector<16x128xf32>
    %120 = arith.mulf %109, %109 : vector<16x128xf32>
    %121 = arith.addf %119, %120 : vector<16x128xf32>
    %122 = math.rsqrt %121 : vector<16x128xf32>
    %123 = arith.mulf %112, %112 : vector<16x128xf32>
    %124 = arith.mulf %115, %115 : vector<16x128xf32>
    %125 = arith.addf %123, %124 : vector<16x128xf32>
    %126 = math.rsqrt %125 : vector<16x128xf32>
    %127 = arith.mulf %122, %126 : vector<16x128xf32>
    %128 = arith.mulf %118, %127 : vector<16x128xf32>
    %c112 = arith.constant 112 : index
    %c0_56 = arith.constant 0 : index
    %129 = vector.load %arg19[%c112, %c0_56] : memref<160x256xf32, #tpu.memory_space<vmem>>, vector<16x128xf32>
    %cst_57 = arith.constant 1.1920929E-7 : f32
    %130 = vector.broadcast %cst_57 : f32 to vector<16x128xf32>
    %131 = arith.addf %129, %130 : vector<16x128xf32>
    %c112_58 = arith.constant 112 : index
    %c128_59 = arith.constant 128 : index
    %132 = vector.load %arg19[%c112_58, %c128_59] : memref<160x256xf32, #tpu.memory_space<vmem>>, vector<16x128xf32>
    %cst_60 = arith.constant 1.1920929E-7 : f32
    %133 = vector.broadcast %cst_60 : f32 to vector<16x128xf32>
    %134 = arith.addf %132, %133 : vector<16x128xf32>
    %c48 = arith.constant 48 : index
    %c0_61 = arith.constant 0 : index
    %135 = vector.load %arg19[%c48, %c0_61] : memref<160x256xf32, #tpu.memory_space<vmem>>, vector<16x128xf32>
    %cst_62 = arith.constant 1.1920929E-7 : f32
    %136 = vector.broadcast %cst_62 : f32 to vector<16x128xf32>
    %137 = arith.addf %135, %136 : vector<16x128xf32>
    %c48_63 = arith.constant 48 : index
    %c128_64 = arith.constant 128 : index
    %138 = vector.load %arg19[%c48_63, %c128_64] : memref<160x256xf32, #tpu.memory_space<vmem>>, vector<16x128xf32>
    %cst_65 = arith.constant 1.1920929E-7 : f32
    %139 = vector.broadcast %cst_65 : f32 to vector<16x128xf32>
    %140 = arith.addf %138, %139 : vector<16x128xf32>
    %141 = arith.mulf %131, %137 : vector<16x128xf32>
    %142 = arith.mulf %134, %140 : vector<16x128xf32>
    %143 = arith.addf %141, %142 : vector<16x128xf32>
    %144 = arith.mulf %131, %131 : vector<16x128xf32>
    %145 = arith.mulf %134, %134 : vector<16x128xf32>
    %146 = arith.addf %144, %145 : vector<16x128xf32>
    %147 = math.rsqrt %146 : vector<16x128xf32>
    %148 = arith.mulf %137, %137 : vector<16x128xf32>
    %149 = arith.mulf %140, %140 : vector<16x128xf32>
    %150 = arith.addf %148, %149 : vector<16x128xf32>
    %151 = math.rsqrt %150 : vector<16x128xf32>
    %152 = arith.mulf %147, %151 : vector<16x128xf32>
    %153 = arith.mulf %143, %152 : vector<16x128xf32>
    %154 = tpu.concatenate %11, %78, %103, %128, %153 in 1 : vector<16x128xf32>, vector<16x128xf32>, vector<16x128xf32>, vector<16x128xf32>, vector<16x128xf32> -> vector<16x640xf32>
    %cst_66 = arith.constant 0.000000e+00 : f32
    %155 = vector.broadcast %cst_66 : f32 to vector<16x256xf32>
    %c0_67 = arith.constant 0 : index
    %c0_68 = arith.constant 0 : index
    %156 = vector.load %arg21[%c0_67, %c0_68] : memref<16x256xf32, #tpu.memory_space<vmem>>, vector<16x256xf32>
    tpu.vector_store %arg21[%c0_67, %c0_68], %155 {strides = array<i32>} : memref<16x256xf32, #tpu.memory_space<vmem>>, vector<16x256xf32>,
    %c0_69 = arith.constant 0 : index
    %c0_70 = arith.constant 0 : index
    %157 = vector.load %arg3[%c0_69, %c0_70] : memref<640x256xf32, #tpu.memory_space<vmem>>, vector<640x256xf32>
    %cst_71 = arith.constant dense<0.000000e+00> : vector<16x256xf32>
    %158 = tpu.matmul %154, %157, %cst_71 {dimension_numbers = #tpu.dot_dimension_numbers<[1], [0], [0], [1], [0, 0, 1, 1], [], []>} : vector<16x640xf32>, vector<640x256xf32>, vector<16x256xf32> -> vector<16x256xf32>
    %c0_72 = arith.constant 0 : index
    %c0_73 = arith.constant 0 : index
    %159 = vector.load %arg4[%c0_72, %c0_73] : memref<1x256xf32, #tpu.memory_space<vmem>>, vector<1x256xf32>
    %160 = vector.broadcast %159 : vector<1x256xf32> to vector<16x256xf32>
    %161 = arith.addf %158, %160 : vector<16x256xf32>
    %c0_74 = arith.constant 0 : index
    %c0_75 = arith.constant 0 : index
    %162 = vector.load %arg20[%c0_74, %c0_75] : memref<16x256xf32, #tpu.memory_space<vmem>>, vector<16x256xf32>
    tpu.vector_store %arg20[%c0_74, %c0_75], %161 {strides = array<i32>} : memref<16x256xf32, #tpu.memory_space<vmem>>, vector<16x256xf32>,
    %c0_76 = arith.constant 0 : index
    %c0_77 = arith.constant 0 : index
    %163 = vector.load %arg9[%c0_76, %c0_77] : memref<32x128xf32, #tpu.memory_space<vmem>>, vector<32x128xf32>
    %c0_78 = arith.constant 0 : index
    %c0_79 = arith.constant 0 : index
    %164 = vector.load %arg10[%c0_78, %c0_79] : memref<32x128xf32, #tpu.memory_space<vmem>>, vector<32x128xf32>
    %cst_80 = arith.constant 0.000000e+00 : f32
    %165 = vector.broadcast %cst_80 : f32 to vector<2x32xf32>
    %cst_81 = arith.constant 0.000000e+00 : f32
    %166 = vector.broadcast %cst_81 : f32 to vector<2x32xf32>
    %cst_82 = arith.constant 0.000000e+00 : f32
    %167 = vector.broadcast %cst_82 : f32 to vector<2x32xf32>
    %cst_83 = arith.constant 0.000000e+00 : f32
    %168 = vector.broadcast %cst_83 : f32 to vector<2x32xf32>
    %cst_84 = arith.constant dense<0.000000e+00> : vector<2x128xf32>
    %169 = tpu.matmul %165, %163, %cst_84 {dimension_numbers = #tpu.dot_dimension_numbers<[1], [0], [0], [1], [0, 0, 1, 1], [], []>} : vector<2x32xf32>, vector<32x128xf32>, vector<2x128xf32> -> vector<2x128xf32>
    %cst_85 = arith.constant dense<0.000000e+00> : vector<2x128xf32>
    %170 = tpu.matmul %167, %164, %cst_85 {dimension_numbers = #tpu.dot_dimension_numbers<[1], [0], [0], [1], [0, 0, 1, 1], [], []>} : vector<2x32xf32>, vector<32x128xf32>, vector<2x128xf32> -> vector<2x128xf32>
    %c0_86 = arith.constant 0 : index
    %c0_87 = arith.constant 0 : index
    %171 = vector.load %arg20[%c0_86, %c0_87] : memref<16x256xf32, #tpu.memory_space<vmem>>, vector<2x128xf32>
    %172 = arith.addf %171, %169 : vector<2x128xf32>
    %c14 = arith.constant 14 : index
    %c128_88 = arith.constant 128 : index
    %173 = vector.load %arg20[%c14, %c128_88] : memref<16x256xf32, #tpu.memory_space<vmem>>, vector<2x128xf32>
    %174 = arith.addf %173, %170 : vector<2x128xf32>
    %175 = tpu.concatenate %172, %174 in 1 : vector<2x128xf32>, vector<2x128xf32> -> vector<2x256xf32>
    %176 = arith.negf %175 : vector<2x256xf32>
    %177 = math.exp %176 : vector<2x256xf32>
    %cst_89 = arith.constant 1.000000e+00 : f32
    %178 = vector.broadcast %cst_89 : f32 to vector<2x256xf32>
    %179 = arith.addf %178, %177 : vector<2x256xf32>
    %180 = arith.divf %178, %179 : vector<2x256xf32>
    %181 = math.tanh %175 : vector<2x256xf32>
    %182 = vector.extract_strided_slice %180 {offsets = [0, 32], sizes = [2, 32], strides = [1, 1]} : vector<2x256xf32> to vector<2x32xf32>
    %183 = arith.mulf %182, %166 : vector<2x32xf32>
    %184 = vector.extract_strided_slice %180 {offsets = [0, 0], sizes = [2, 32], strides = [1, 1]} : vector<2x256xf32> to vector<2x32xf32>
    %185 = vector.extract_strided_slice %181 {offsets = [0, 64], sizes = [2, 32], strides = [1, 1]} : vector<2x256xf32> to vector<2x32xf32>
    %186 = arith.mulf %184, %185 : vector<2x32xf32>
    %187 = arith.addf %183, %186 : vector<2x32xf32>
    %188 = vector.extract_strided_slice %180 {offsets = [0, 160], sizes = [2, 32], strides = [1, 1]} : vector<2x256xf32> to vector<2x32xf32>
    %189 = arith.mulf %188, %168 : vector<2x32xf32>
    %190 = vector.extract_strided_slice %180 {offsets = [0, 128], sizes = [2, 32], strides = [1, 1]} : vector<2x256xf32> to vector<2x32xf32>
    %191 = vector.extract_strided_slice %181 {offsets = [0, 192], sizes = [2, 32], strides = [1, 1]} : vector<2x256xf32> to vector<2x32xf32>
    %192 = arith.mulf %190, %191 : vector<2x32xf32>
    %193 = arith.addf %189, %192 : vector<2x32xf32>
    %194 = vector.extract_strided_slice %180 {offsets = [0, 96], sizes = [2, 32], strides = [1, 1]} : vector<2x256xf32> to vector<2x32xf32>
    %195 = math.tanh %187 : vector<2x32xf32>
    %196 = arith.mulf %194, %195 : vector<2x32xf32>
    %197 = vector.extract_strided_slice %180 {offsets = [0, 224], sizes = [2, 32], strides = [1, 1]} : vector<2x256xf32> to vector<2x32xf32>
    %198 = math.tanh %193 : vector<2x32xf32>
    %199 = arith.mulf %197, %198 : vector<2x32xf32>
    %c0_90 = arith.constant 0 : index
    %c0_91 = arith.constant 0 : index
    %200 = vector.load %arg21[%c0_90, %c0_91] : memref<16x256xf32, #tpu.memory_space<vmem>>, vector<2x32xf32>
    tpu.vector_store %arg21[%c0_90, %c0_91], %196 {strides = array<i32>} : memref<16x256xf32, #tpu.memory_space<vmem>>, vector<2x32xf32>,
    %c14_92 = arith.constant 14 : index
    %c128_93 = arith.constant 128 : index
    %201 = vector.load %arg21[%c14_92, %c128_93] : memref<16x256xf32, #tpu.memory_space<vmem>>, vector<2x32xf32>
    tpu.vector_store %arg21[%c14_92, %c128_93], %199 {strides = array<i32>} : memref<16x256xf32, #tpu.memory_space<vmem>>, vector<2x32xf32>,
    %cst_94 = arith.constant dense<0.000000e+00> : vector<2x128xf32>
    %202 = tpu.matmul %196, %163, %cst_94 {dimension_numbers = #tpu.dot_dimension_numbers<[1], [0], [0], [1], [0, 0, 1, 1], [], []>} : vector<2x32xf32>, vector<32x128xf32>, vector<2x128xf32> -> vector<2x128xf32>
    %cst_95 = arith.constant dense<0.000000e+00> : vector<2x128xf32>
    %203 = tpu.matmul %199, %164, %cst_95 {dimension_numbers = #tpu.dot_dimension_numbers<[1], [0], [0], [1], [0, 0, 1, 1], [], []>} : vector<2x32xf32>, vector<32x128xf32>, vector<2x128xf32> -> vector<2x128xf32>
    %c2 = arith.constant 2 : index
    %c0_96 = arith.constant 0 : index
    %204 = vector.load %arg20[%c2, %c0_96] : memref<16x256xf32, #tpu.memory_space<vmem>>, vector<2x128xf32>
    %205 = arith.addf %204, %202 : vector<2x128xf32>
    %c12 = arith.constant 12 : index
    %c128_97 = arith.constant 128 : index
    %206 = vector.load %arg20[%c12, %c128_97] : memref<16x256xf32, #tpu.memory_space<vmem>>, vector<2x128xf32>
    %207 = arith.addf %206, %203 : vector<2x128xf32>
    %208 = tpu.concatenate %205, %207 in 1 : vector<2x128xf32>, vector<2x128xf32> -> vector<2x256xf32>
    %209 = arith.negf %208 : vector<2x256xf32>
    %210 = math.exp %209 : vector<2x256xf32>
    %cst_98 = arith.constant 1.000000e+00 : f32
    %211 = vector.broadcast %cst_98 : f32 to vector<2x256xf32>
    %212 = arith.addf %211, %210 : vector<2x256xf32>
    %213 = arith.divf %211, %212 : vector<2x256xf32>
    %214 = math.tanh %208 : vector<2x256xf32>
    %215 = vector.extract_strided_slice %213 {offsets = [0, 32], sizes = [2, 32], strides = [1, 1]} : vector<2x256xf32> to vector<2x32xf32>
    %216 = arith.mulf %215, %187 : vector<2x32xf32>
    %217 = vector.extract_strided_slice %213 {offsets = [0, 0], sizes = [2, 32], strides = [1, 1]} : vector<2x256xf32> to vector<2x32xf32>
    %218 = vector.extract_strided_slice %214 {offsets = [0, 64], sizes = [2, 32], strides = [1, 1]} : vector<2x256xf32> to vector<2x32xf32>
    %219 = arith.mulf %217, %218 : vector<2x32xf32>
    %220 = arith.addf %216, %219 : vector<2x32xf32>
    %221 = vector.extract_strided_slice %213 {offsets = [0, 160], sizes = [2, 32], strides = [1, 1]} : vector<2x256xf32> to vector<2x32xf32>
    %222 = arith.mulf %221, %193 : vector<2x32xf32>
    %223 = vector.extract_strided_slice %213 {offsets = [0, 128], sizes = [2, 32], strides = [1, 1]} : vector<2x256xf32> to vector<2x32xf32>
    %224 = vector.extract_strided_slice %214 {offsets = [0, 192], sizes = [2, 32], strides = [1, 1]} : vector<2x256xf32> to vector<2x32xf32>
    %225 = arith.mulf %223, %224 : vector<2x32xf32>
    %226 = arith.addf %222, %225 : vector<2x32xf32>
    %227 = vector.extract_strided_slice %213 {offsets = [0, 96], sizes = [2, 32], strides = [1, 1]} : vector<2x256xf32> to vector<2x32xf32>
    %228 = math.tanh %220 : vector<2x32xf32>
    %229 = arith.mulf %227, %228 : vector<2x32xf32>
    %230 = vector.extract_strided_slice %213 {offsets = [0, 224], sizes = [2, 32], strides = [1, 1]} : vector<2x256xf32> to vector<2x32xf32>
    %231 = math.tanh %226 : vector<2x32xf32>
    %232 = arith.mulf %230, %231 : vector<2x32xf32>
    %c2_99 = arith.constant 2 : index
    %c0_100 = arith.constant 0 : index
    %233 = vector.load %arg21[%c2_99, %c0_100] : memref<16x256xf32, #tpu.memory_space<vmem>>, vector<2x32xf32>
    tpu.vector_store %arg21[%c2_99, %c0_100], %229 {strides = array<i32>} : memref<16x256xf32, #tpu.memory_space<vmem>>, vector<2x32xf32>,
    %c12_101 = arith.constant 12 : index
    %c128_102 = arith.constant 128 : index
    %234 = vector.load %arg21[%c12_101, %c128_102] : memref<16x256xf32, #tpu.memory_space<vmem>>, vector<2x32xf32>
    tpu.vector_store %arg21[%c12_101, %c128_102], %232 {strides = array<i32>} : memref<16x256xf32, #tpu.memory_space<vmem>>, vector<2x32xf32>,
    %cst_103 = arith.constant dense<0.000000e+00> : vector<2x128xf32>
    %235 = tpu.matmul %229, %163, %cst_103 {dimension_numbers = #tpu.dot_dimension_numbers<[1], [0], [0], [1], [0, 0, 1, 1], [], []>} : vector<2x32xf32>, vector<32x128xf32>, vector<2x128xf32> -> vector<2x128xf32>
    %cst_104 = arith.constant dense<0.000000e+00> : vector<2x128xf32>
    %236 = tpu.matmul %232, %164, %cst_104 {dimension_numbers = #tpu.dot_dimension_numbers<[1], [0], [0], [1], [0, 0, 1, 1], [], []>} : vector<2x32xf32>, vector<32x128xf32>, vector<2x128xf32> -> vector<2x128xf32>
    %c4 = arith.constant 4 : index
    %c0_105 = arith.constant 0 : index
    %237 = vector.load %arg20[%c4, %c0_105] : memref<16x256xf32, #tpu.memory_space<vmem>>, vector<2x128xf32>
    %238 = arith.addf %237, %235 : vector<2x128xf32>
    %c10 = arith.constant 10 : index
    %c128_106 = arith.constant 128 : index
    %239 = vector.load %arg20[%c10, %c128_106] : memref<16x256xf32, #tpu.memory_space<vmem>>, vector<2x128xf32>
    %240 = arith.addf %239, %236 : vector<2x128xf32>
    %241 = tpu.concatenate %238, %240 in 1 : vector<2x128xf32>, vector<2x128xf32> -> vector<2x256xf32>
    %242 = arith.negf %241 : vector<2x256xf32>
    %243 = math.exp %242 : vector<2x256xf32>
    %cst_107 = arith.constant 1.000000e+00 : f32
    %244 = vector.broadcast %cst_107 : f32 to vector<2x256xf32>
    %245 = arith.addf %244, %243 : vector<2x256xf32>
    %246 = arith.divf %244, %245 : vector<2x256xf32>
    %247 = math.tanh %241 : vector<2x256xf32>
    %248 = vector.extract_strided_slice %246 {offsets = [0, 32], sizes = [2, 32], strides = [1, 1]} : vector<2x256xf32> to vector<2x32xf32>
    %249 = arith.mulf %248, %220 : vector<2x32xf32>
    %250 = vector.extract_strided_slice %246 {offsets = [0, 0], sizes = [2, 32], strides = [1, 1]} : vector<2x256xf32> to vector<2x32xf32>
    %251 = vector.extract_strided_slice %247 {offsets = [0, 64], sizes = [2, 32], strides = [1, 1]} : vector<2x256xf32> to vector<2x32xf32>
    %252 = arith.mulf %250, %251 : vector<2x32xf32>
    %253 = arith.addf %249, %252 : vector<2x32xf32>
    %254 = vector.extract_strided_slice %246 {offsets = [0, 160], sizes = [2, 32], strides = [1, 1]} : vector<2x256xf32> to vector<2x32xf32>
    %255 = arith.mulf %254, %226 : vector<2x32xf32>
    %256 = vector.extract_strided_slice %246 {offsets = [0, 128], sizes = [2, 32], strides = [1, 1]} : vector<2x256xf32> to vector<2x32xf32>
    %257 = vector.extract_strided_slice %247 {offsets = [0, 192], sizes = [2, 32], strides = [1, 1]} : vector<2x256xf32> to vector<2x32xf32>
    %258 = arith.mulf %256, %257 : vector<2x32xf32>
    %259 = arith.addf %255, %258 : vector<2x32xf32>
    %260 = vector.extract_strided_slice %246 {offsets = [0, 96], sizes = [2, 32], strides = [1, 1]} : vector<2x256xf32> to vector<2x32xf32>
    %261 = math.tanh %253 : vector<2x32xf32>
    %262 = arith.mulf %260, %261 : vector<2x32xf32>
    %263 = vector.extract_strided_slice %246 {offsets = [0, 224], sizes = [2, 32], strides = [1, 1]} : vector<2x256xf32> to vector<2x32xf32>
    %264 = math.tanh %259 : vector<2x32xf32>
    %265 = arith.mulf %263, %264 : vector<2x32xf32>
    %c4_108 = arith.constant 4 : index
    %c0_109 = arith.constant 0 : index
    %266 = vector.load %arg21[%c4_108, %c0_109] : memref<16x256xf32, #tpu.memory_space<vmem>>, vector<2x32xf32>
    tpu.vector_store %arg21[%c4_108, %c0_109], %262 {strides = array<i32>} : memref<16x256xf32, #tpu.memory_space<vmem>>, vector<2x32xf32>,
    %c10_110 = arith.constant 10 : index
    %c128_111 = arith.constant 128 : index
    %267 = vector.load %arg21[%c10_110, %c128_111] : memref<16x256xf32, #tpu.memory_space<vmem>>, vector<2x32xf32>
    tpu.vector_store %arg21[%c10_110, %c128_111], %265 {strides = array<i32>} : memref<16x256xf32, #tpu.memory_space<vmem>>, vector<2x32xf32>,
    %cst_112 = arith.constant dense<0.000000e+00> : vector<2x128xf32>
    %268 = tpu.matmul %262, %163, %cst_112 {dimension_numbers = #tpu.dot_dimension_numbers<[1], [0], [0], [1], [0, 0, 1, 1], [], []>} : vector<2x32xf32>, vector<32x128xf32>, vector<2x128xf32> -> vector<2x128xf32>
    %cst_113 = arith.constant dense<0.000000e+00> : vector<2x128xf32>
    %269 = tpu.matmul %265, %164, %cst_113 {dimension_numbers = #tpu.dot_dimension_numbers<[1], [0], [0], [1], [0, 0, 1, 1], [], []>} : vector<2x32xf32>, vector<32x128xf32>, vector<2x128xf32> -> vector<2x128xf32>
    %c6 = arith.constant 6 : index
    %c0_114 = arith.constant 0 : index
    %270 = vector.load %arg20[%c6, %c0_114] : memref<16x256xf32, #tpu.memory_space<vmem>>, vector<2x128xf32>
    %271 = arith.addf %270, %268 : vector<2x128xf32>
    %c8 = arith.constant 8 : index
    %c128_115 = arith.constant 128 : index
    %272 = vector.load %arg20[%c8, %c128_115] : memref<16x256xf32, #tpu.memory_space<vmem>>, vector<2x128xf32>
    %273 = arith.addf %272, %269 : vector<2x128xf32>
    %274 = tpu.concatenate %271, %273 in 1 : vector<2x128xf32>, vector<2x128xf32> -> vector<2x256xf32>
    %275 = arith.negf %274 : vector<2x256xf32>
    %276 = math.exp %275 : vector<2x256xf32>
    %cst_116 = arith.constant 1.000000e+00 : f32
    %277 = vector.broadcast %cst_116 : f32 to vector<2x256xf32>
    %278 = arith.addf %277, %276 : vector<2x256xf32>
    %279 = arith.divf %277, %278 : vector<2x256xf32>
    %280 = math.tanh %274 : vector<2x256xf32>
    %281 = vector.extract_strided_slice %279 {offsets = [0, 32], sizes = [2, 32], strides = [1, 1]} : vector<2x256xf32> to vector<2x32xf32>
    %282 = arith.mulf %281, %253 : vector<2x32xf32>
    %283 = vector.extract_strided_slice %279 {offsets = [0, 0], sizes = [2, 32], strides = [1, 1]} : vector<2x256xf32> to vector<2x32xf32>
    %284 = vector.extract_strided_slice %280 {offsets = [0, 64], sizes = [2, 32], strides = [1, 1]} : vector<2x256xf32> to vector<2x32xf32>
    %285 = arith.mulf %283, %284 : vector<2x32xf32>
    %286 = arith.addf %282, %285 : vector<2x32xf32>
    %287 = vector.extract_strided_slice %279 {offsets = [0, 160], sizes = [2, 32], strides = [1, 1]} : vector<2x256xf32> to vector<2x32xf32>
    %288 = arith.mulf %287, %259 : vector<2x32xf32>
    %289 = vector.extract_strided_slice %279 {offsets = [0, 128], sizes = [2, 32], strides = [1, 1]} : vector<2x256xf32> to vector<2x32xf32>
    %290 = vector.extract_strided_slice %280 {offsets = [0, 192], sizes = [2, 32], strides = [1, 1]} : vector<2x256xf32> to vector<2x32xf32>
    %291 = arith.mulf %289, %290 : vector<2x32xf32>
    %292 = arith.addf %288, %291 : vector<2x32xf32>
    %293 = vector.extract_strided_slice %279 {offsets = [0, 96], sizes = [2, 32], strides = [1, 1]} : vector<2x256xf32> to vector<2x32xf32>
    %294 = math.tanh %286 : vector<2x32xf32>
    %295 = arith.mulf %293, %294 : vector<2x32xf32>
    %296 = vector.extract_strided_slice %279 {offsets = [0, 224], sizes = [2, 32], strides = [1, 1]} : vector<2x256xf32> to vector<2x32xf32>
    %297 = math.tanh %292 : vector<2x32xf32>
    %298 = arith.mulf %296, %297 : vector<2x32xf32>
    %c6_117 = arith.constant 6 : index
    %c0_118 = arith.constant 0 : index
    %299 = vector.load %arg21[%c6_117, %c0_118] : memref<16x256xf32, #tpu.memory_space<vmem>>, vector<2x32xf32>
    tpu.vector_store %arg21[%c6_117, %c0_118], %295 {strides = array<i32>} : memref<16x256xf32, #tpu.memory_space<vmem>>, vector<2x32xf32>,
    %c8_119 = arith.constant 8 : index
    %c128_120 = arith.constant 128 : index
    %300 = vector.load %arg21[%c8_119, %c128_120] : memref<16x256xf32, #tpu.memory_space<vmem>>, vector<2x32xf32>
    tpu.vector_store %arg21[%c8_119, %c128_120], %298 {strides = array<i32>} : memref<16x256xf32, #tpu.memory_space<vmem>>, vector<2x32xf32>,
    %cst_121 = arith.constant dense<0.000000e+00> : vector<2x128xf32>
    %301 = tpu.matmul %295, %163, %cst_121 {dimension_numbers = #tpu.dot_dimension_numbers<[1], [0], [0], [1], [0, 0, 1, 1], [], []>} : vector<2x32xf32>, vector<32x128xf32>, vector<2x128xf32> -> vector<2x128xf32>
    %cst_122 = arith.constant dense<0.000000e+00> : vector<2x128xf32>
    %302 = tpu.matmul %298, %164, %cst_122 {dimension_numbers = #tpu.dot_dimension_numbers<[1], [0], [0], [1], [0, 0, 1, 1], [], []>} : vector<2x32xf32>, vector<32x128xf32>, vector<2x128xf32> -> vector<2x128xf32>
    %c8_123 = arith.constant 8 : index
    %c0_124 = arith.constant 0 : index
    %303 = vector.load %arg20[%c8_123, %c0_124] : memref<16x256xf32, #tpu.memory_space<vmem>>, vector<2x128xf32>
    %304 = arith.addf %303, %301 : vector<2x128xf32>
    %c6_125 = arith.constant 6 : index
    %c128_126 = arith.constant 128 : index
    %305 = vector.load %arg20[%c6_125, %c128_126] : memref<16x256xf32, #tpu.memory_space<vmem>>, vector<2x128xf32>
    %306 = arith.addf %305, %302 : vector<2x128xf32>
    %307 = tpu.concatenate %304, %306 in 1 : vector<2x128xf32>, vector<2x128xf32> -> vector<2x256xf32>
    %308 = arith.negf %307 : vector<2x256xf32>
    %309 = math.exp %308 : vector<2x256xf32>
    %cst_127 = arith.constant 1.000000e+00 : f32
    %310 = vector.broadcast %cst_127 : f32 to vector<2x256xf32>
    %311 = arith.addf %310, %309 : vector<2x256xf32>
    %312 = arith.divf %310, %311 : vector<2x256xf32>
    %313 = math.tanh %307 : vector<2x256xf32>
    %314 = vector.extract_strided_slice %312 {offsets = [0, 32], sizes = [2, 32], strides = [1, 1]} : vector<2x256xf32> to vector<2x32xf32>
    %315 = arith.mulf %314, %286 : vector<2x32xf32>
    %316 = vector.extract_strided_slice %312 {offsets = [0, 0], sizes = [2, 32], strides = [1, 1]} : vector<2x256xf32> to vector<2x32xf32>
    %317 = vector.extract_strided_slice %313 {offsets = [0, 64], sizes = [2, 32], strides = [1, 1]} : vector<2x256xf32> to vector<2x32xf32>
    %318 = arith.mulf %316, %317 : vector<2x32xf32>
    %319 = arith.addf %315, %318 : vector<2x32xf32>
    %320 = vector.extract_strided_slice %312 {offsets = [0, 160], sizes = [2, 32], strides = [1, 1]} : vector<2x256xf32> to vector<2x32xf32>
    %321 = arith.mulf %320, %292 : vector<2x32xf32>
    %322 = vector.extract_strided_slice %312 {offsets = [0, 128], sizes = [2, 32], strides = [1, 1]} : vector<2x256xf32> to vector<2x32xf32>
    %323 = vector.extract_strided_slice %313 {offsets = [0, 192], sizes = [2, 32], strides = [1, 1]} : vector<2x256xf32> to vector<2x32xf32>
    %324 = arith.mulf %322, %323 : vector<2x32xf32>
    %325 = arith.addf %321, %324 : vector<2x32xf32>
    %326 = vector.extract_strided_slice %312 {offsets = [0, 96], sizes = [2, 32], strides = [1, 1]} : vector<2x256xf32> to vector<2x32xf32>
    %327 = math.tanh %319 : vector<2x32xf32>
    %328 = arith.mulf %326, %327 : vector<2x32xf32>
    %329 = vector.extract_strided_slice %312 {offsets = [0, 224], sizes = [2, 32], strides = [1, 1]} : vector<2x256xf32> to vector<2x32xf32>
    %330 = math.tanh %325 : vector<2x32xf32>
    %331 = arith.mulf %329, %330 : vector<2x32xf32>
    %c8_128 = arith.constant 8 : index
    %c0_129 = arith.constant 0 : index
    %332 = vector.load %arg21[%c8_128, %c0_129] : memref<16x256xf32, #tpu.memory_space<vmem>>, vector<2x32xf32>
    tpu.vector_store %arg21[%c8_128, %c0_129], %328 {strides = array<i32>} : memref<16x256xf32, #tpu.memory_space<vmem>>, vector<2x32xf32>,
    %c6_130 = arith.constant 6 : index
    %c128_131 = arith.constant 128 : index
    %333 = vector.load %arg21[%c6_130, %c128_131] : memref<16x256xf32, #tpu.memory_space<vmem>>, vector<2x32xf32>
    tpu.vector_store %arg21[%c6_130, %c128_131], %331 {strides = array<i32>} : memref<16x256xf32, #tpu.memory_space<vmem>>, vector<2x32xf32>,
    %cst_132 = arith.constant dense<0.000000e+00> : vector<2x128xf32>
    %334 = tpu.matmul %328, %163, %cst_132 {dimension_numbers = #tpu.dot_dimension_numbers<[1], [0], [0], [1], [0, 0, 1, 1], [], []>} : vector<2x32xf32>, vector<32x128xf32>, vector<2x128xf32> -> vector<2x128xf32>
    %cst_133 = arith.constant dense<0.000000e+00> : vector<2x128xf32>
    %335 = tpu.matmul %331, %164, %cst_133 {dimension_numbers = #tpu.dot_dimension_numbers<[1], [0], [0], [1], [0, 0, 1, 1], [], []>} : vector<2x32xf32>, vector<32x128xf32>, vector<2x128xf32> -> vector<2x128xf32>
    %c10_134 = arith.constant 10 : index
    %c0_135 = arith.constant 0 : index
    %336 = vector.load %arg20[%c10_134, %c0_135] : memref<16x256xf32, #tpu.memory_space<vmem>>, vector<2x128xf32>
    %337 = arith.addf %336, %334 : vector<2x128xf32>
    %c4_136 = arith.constant 4 : index
    %c128_137 = arith.constant 128 : index
    %338 = vector.load %arg20[%c4_136, %c128_137] : memref<16x256xf32, #tpu.memory_space<vmem>>, vector<2x128xf32>
    %339 = arith.addf %338, %335 : vector<2x128xf32>
    %340 = tpu.concatenate %337, %339 in 1 : vector<2x128xf32>, vector<2x128xf32> -> vector<2x256xf32>
    %341 = arith.negf %340 : vector<2x256xf32>
    %342 = math.exp %341 : vector<2x256xf32>
    %cst_138 = arith.constant 1.000000e+00 : f32
    %343 = vector.broadcast %cst_138 : f32 to vector<2x256xf32>
    %344 = arith.addf %343, %342 : vector<2x256xf32>
    %345 = arith.divf %343, %344 : vector<2x256xf32>
    %346 = math.tanh %340 : vector<2x256xf32>
    %347 = vector.extract_strided_slice %345 {offsets = [0, 32], sizes = [2, 32], strides = [1, 1]} : vector<2x256xf32> to vector<2x32xf32>
    %348 = arith.mulf %347, %319 : vector<2x32xf32>
    %349 = vector.extract_strided_slice %345 {offsets = [0, 0], sizes = [2, 32], strides = [1, 1]} : vector<2x256xf32> to vector<2x32xf32>
    %350 = vector.extract_strided_slice %346 {offsets = [0, 64], sizes = [2, 32], strides = [1, 1]} : vector<2x256xf32> to vector<2x32xf32>
    %351 = arith.mulf %349, %350 : vector<2x32xf32>
    %352 = arith.addf %348, %351 : vector<2x32xf32>
    %353 = vector.extract_strided_slice %345 {offsets = [0, 160], sizes = [2, 32], strides = [1, 1]} : vector<2x256xf32> to vector<2x32xf32>
    %354 = arith.mulf %353, %325 : vector<2x32xf32>
    %355 = vector.extract_strided_slice %345 {offsets = [0, 128], sizes = [2, 32], strides = [1, 1]} : vector<2x256xf32> to vector<2x32xf32>
    %356 = vector.extract_strided_slice %346 {offsets = [0, 192], sizes = [2, 32], strides = [1, 1]} : vector<2x256xf32> to vector<2x32xf32>
    %357 = arith.mulf %355, %356 : vector<2x32xf32>
    %358 = arith.addf %354, %357 : vector<2x32xf32>
    %359 = vector.extract_strided_slice %345 {offsets = [0, 96], sizes = [2, 32], strides = [1, 1]} : vector<2x256xf32> to vector<2x32xf32>
    %360 = math.tanh %352 : vector<2x32xf32>
    %361 = arith.mulf %359, %360 : vector<2x32xf32>
    %362 = vector.extract_strided_slice %345 {offsets = [0, 224], sizes = [2, 32], strides = [1, 1]} : vector<2x256xf32> to vector<2x32xf32>
    %363 = math.tanh %358 : vector<2x32xf32>
    %364 = arith.mulf %362, %363 : vector<2x32xf32>
    %c10_139 = arith.constant 10 : index
    %c0_140 = arith.constant 0 : index
    %365 = vector.load %arg21[%c10_139, %c0_140] : memref<16x256xf32, #tpu.memory_space<vmem>>, vector<2x32xf32>
    tpu.vector_store %arg21[%c10_139, %c0_140], %361 {strides = array<i32>} : memref<16x256xf32, #tpu.memory_space<vmem>>, vector<2x32xf32>,
    %c4_141 = arith.constant 4 : index
    %c128_142 = arith.constant 128 : index
    %366 = vector.load %arg21[%c4_141, %c128_142] : memref<16x256xf32, #tpu.memory_space<vmem>>, vector<2x32xf32>
    tpu.vector_store %arg21[%c4_141, %c128_142], %364 {strides = array<i32>} : memref<16x256xf32, #tpu.memory_space<vmem>>, vector<2x32xf32>,
    %cst_143 = arith.constant dense<0.000000e+00> : vector<2x128xf32>
    %367 = tpu.matmul %361, %163, %cst_143 {dimension_numbers = #tpu.dot_dimension_numbers<[1], [0], [0], [1], [0, 0, 1, 1], [], []>} : vector<2x32xf32>, vector<32x128xf32>, vector<2x128xf32> -> vector<2x128xf32>
    %cst_144 = arith.constant dense<0.000000e+00> : vector<2x128xf32>
    %368 = tpu.matmul %364, %164, %cst_144 {dimension_numbers = #tpu.dot_dimension_numbers<[1], [0], [0], [1], [0, 0, 1, 1], [], []>} : vector<2x32xf32>, vector<32x128xf32>, vector<2x128xf32> -> vector<2x128xf32>
    %c12_145 = arith.constant 12 : index
    %c0_146 = arith.constant 0 : index
    %369 = vector.load %arg20[%c12_145, %c0_146] : memref<16x256xf32, #tpu.memory_space<vmem>>, vector<2x128xf32>
    %370 = arith.addf %369, %367 : vector<2x128xf32>
    %c2_147 = arith.constant 2 : index
    %c128_148 = arith.constant 128 : index
    %371 = vector.load %arg20[%c2_147, %c128_148] : memref<16x256xf32, #tpu.memory_space<vmem>>, vector<2x128xf32>
    %372 = arith.addf %371, %368 : vector<2x128xf32>
    %373 = tpu.concatenate %370, %372 in 1 : vector<2x128xf32>, vector<2x128xf32> -> vector<2x256xf32>
    %374 = arith.negf %373 : vector<2x256xf32>
    %375 = math.exp %374 : vector<2x256xf32>
    %cst_149 = arith.constant 1.000000e+00 : f32
    %376 = vector.broadcast %cst_149 : f32 to vector<2x256xf32>
    %377 = arith.addf %376, %375 : vector<2x256xf32>
    %378 = arith.divf %376, %377 : vector<2x256xf32>
    %379 = math.tanh %373 : vector<2x256xf32>
    %380 = vector.extract_strided_slice %378 {offsets = [0, 32], sizes = [2, 32], strides = [1, 1]} : vector<2x256xf32> to vector<2x32xf32>
    %381 = arith.mulf %380, %352 : vector<2x32xf32>
    %382 = vector.extract_strided_slice %378 {offsets = [0, 0], sizes = [2, 32], strides = [1, 1]} : vector<2x256xf32> to vector<2x32xf32>
    %383 = vector.extract_strided_slice %379 {offsets = [0, 64], sizes = [2, 32], strides = [1, 1]} : vector<2x256xf32> to vector<2x32xf32>
    %384 = arith.mulf %382, %383 : vector<2x32xf32>
    %385 = arith.addf %381, %384 : vector<2x32xf32>
    %386 = vector.extract_strided_slice %378 {offsets = [0, 160], sizes = [2, 32], strides = [1, 1]} : vector<2x256xf32> to vector<2x32xf32>
    %387 = arith.mulf %386, %358 : vector<2x32xf32>
    %388 = vector.extract_strided_slice %378 {offsets = [0, 128], sizes = [2, 32], strides = [1, 1]} : vector<2x256xf32> to vector<2x32xf32>
    %389 = vector.extract_strided_slice %379 {offsets = [0, 192], sizes = [2, 32], strides = [1, 1]} : vector<2x256xf32> to vector<2x32xf32>
    %390 = arith.mulf %388, %389 : vector<2x32xf32>
    %391 = arith.addf %387, %390 : vector<2x32xf32>
    %392 = vector.extract_strided_slice %378 {offsets = [0, 96], sizes = [2, 32], strides = [1, 1]} : vector<2x256xf32> to vector<2x32xf32>
    %393 = math.tanh %385 : vector<2x32xf32>
    %394 = arith.mulf %392, %393 : vector<2x32xf32>
    %395 = vector.extract_strided_slice %378 {offsets = [0, 224], sizes = [2, 32], strides = [1, 1]} : vector<2x256xf32> to vector<2x32xf32>
    %396 = math.tanh %391 : vector<2x32xf32>
    %397 = arith.mulf %395, %396 : vector<2x32xf32>
    %c12_150 = arith.constant 12 : index
    %c0_151 = arith.constant 0 : index
    %398 = vector.load %arg21[%c12_150, %c0_151] : memref<16x256xf32, #tpu.memory_space<vmem>>, vector<2x32xf32>
    tpu.vector_store %arg21[%c12_150, %c0_151], %394 {strides = array<i32>} : memref<16x256xf32, #tpu.memory_space<vmem>>, vector<2x32xf32>,
    %c2_152 = arith.constant 2 : index
    %c128_153 = arith.constant 128 : index
    %399 = vector.load %arg21[%c2_152, %c128_153] : memref<16x256xf32, #tpu.memory_space<vmem>>, vector<2x32xf32>
    tpu.vector_store %arg21[%c2_152, %c128_153], %397 {strides = array<i32>} : memref<16x256xf32, #tpu.memory_space<vmem>>, vector<2x32xf32>,
    %cst_154 = arith.constant dense<0.000000e+00> : vector<2x128xf32>
    %400 = tpu.matmul %394, %163, %cst_154 {dimension_numbers = #tpu.dot_dimension_numbers<[1], [0], [0], [1], [0, 0, 1, 1], [], []>} : vector<2x32xf32>, vector<32x128xf32>, vector<2x128xf32> -> vector<2x128xf32>
    %cst_155 = arith.constant dense<0.000000e+00> : vector<2x128xf32>
    %401 = tpu.matmul %397, %164, %cst_155 {dimension_numbers = #tpu.dot_dimension_numbers<[1], [0], [0], [1], [0, 0, 1, 1], [], []>} : vector<2x32xf32>, vector<32x128xf32>, vector<2x128xf32> -> vector<2x128xf32>
    %c14_156 = arith.constant 14 : index
    %c0_157 = arith.constant 0 : index
    %402 = vector.load %arg20[%c14_156, %c0_157] : memref<16x256xf32, #tpu.memory_space<vmem>>, vector<2x128xf32>
    %403 = arith.addf %402, %400 : vector<2x128xf32>
    %c0_158 = arith.constant 0 : index
    %c128_159 = arith.constant 128 : index
    %404 = vector.load %arg20[%c0_158, %c128_159] : memref<16x256xf32, #tpu.memory_space<vmem>>, vector<2x128xf32>
    %405 = arith.addf %404, %401 : vector<2x128xf32>
    %406 = tpu.concatenate %403, %405 in 1 : vector<2x128xf32>, vector<2x128xf32> -> vector<2x256xf32>
    %407 = arith.negf %406 : vector<2x256xf32>
    %408 = math.exp %407 : vector<2x256xf32>
    %cst_160 = arith.constant 1.000000e+00 : f32
    %409 = vector.broadcast %cst_160 : f32 to vector<2x256xf32>
    %410 = arith.addf %409, %408 : vector<2x256xf32>
    %411 = arith.divf %409, %410 : vector<2x256xf32>
    %412 = math.tanh %406 : vector<2x256xf32>
    %413 = vector.extract_strided_slice %411 {offsets = [0, 32], sizes = [2, 32], strides = [1, 1]} : vector<2x256xf32> to vector<2x32xf32>
    %414 = arith.mulf %413, %385 : vector<2x32xf32>
    %415 = vector.extract_strided_slice %411 {offsets = [0, 0], sizes = [2, 32], strides = [1, 1]} : vector<2x256xf32> to vector<2x32xf32>
    %416 = vector.extract_strided_slice %412 {offsets = [0, 64], sizes = [2, 32], strides = [1, 1]} : vector<2x256xf32> to vector<2x32xf32>
    %417 = arith.mulf %415, %416 : vector<2x32xf32>
    %418 = arith.addf %414, %417 : vector<2x32xf32>
    %419 = vector.extract_strided_slice %411 {offsets = [0, 160], sizes = [2, 32], strides = [1, 1]} : vector<2x256xf32> to vector<2x32xf32>
    %420 = arith.mulf %419, %391 : vector<2x32xf32>
    %421 = vector.extract_strided_slice %411 {offsets = [0, 128], sizes = [2, 32], strides = [1, 1]} : vector<2x256xf32> to vector<2x32xf32>
    %422 = vector.extract_strided_slice %412 {offsets = [0, 192], sizes = [2, 32], strides = [1, 1]} : vector<2x256xf32> to vector<2x32xf32>
    %423 = arith.mulf %421, %422 : vector<2x32xf32>
    %424 = arith.addf %420, %423 : vector<2x32xf32>
    %425 = vector.extract_strided_slice %411 {offsets = [0, 96], sizes = [2, 32], strides = [1, 1]} : vector<2x256xf32> to vector<2x32xf32>
    %426 = math.tanh %418 : vector<2x32xf32>
    %427 = arith.mulf %425, %426 : vector<2x32xf32>
    %428 = vector.extract_strided_slice %411 {offsets = [0, 224], sizes = [2, 32], strides = [1, 1]} : vector<2x256xf32> to vector<2x32xf32>
    %429 = math.tanh %424 : vector<2x32xf32>
    %430 = arith.mulf %428, %429 : vector<2x32xf32>
    %c14_161 = arith.constant 14 : index
    %c0_162 = arith.constant 0 : index
    %431 = vector.load %arg21[%c14_161, %c0_162] : memref<16x256xf32, #tpu.memory_space<vmem>>, vector<2x32xf32>
    tpu.vector_store %arg21[%c14_161, %c0_162], %427 {strides = array<i32>} : memref<16x256xf32, #tpu.memory_space<vmem>>, vector<2x32xf32>,
    %c0_163 = arith.constant 0 : index
    %c128_164 = arith.constant 128 : index
    %432 = vector.load %arg21[%c0_163, %c128_164] : memref<16x256xf32, #tpu.memory_space<vmem>>, vector<2x32xf32>
    tpu.vector_store %arg21[%c0_163, %c128_164], %430 {strides = array<i32>} : memref<16x256xf32, #tpu.memory_space<vmem>>, vector<2x32xf32>,
    %c0_165 = arith.constant 0 : index
    %c0_166 = arith.constant 0 : index
    %433 = vector.load %arg21[%c0_165, %c0_166] : memref<16x256xf32, #tpu.memory_space<vmem>>, vector<16x256xf32>
    %c0_167 = arith.constant 0 : index
    %c0_168 = arith.constant 0 : index
    %434 = vector.load %arg5[%c0_167, %c0_168] : memref<256x256xf32, #tpu.memory_space<vmem>>, vector<256x256xf32>
    %cst_169 = arith.constant dense<0.000000e+00> : vector<16x256xf32>
    %435 = tpu.matmul %433, %434, %cst_169 {dimension_numbers = #tpu.dot_dimension_numbers<[1], [0], [0], [1], [0, 0, 1, 1], [], []>} : vector<16x256xf32>, vector<256x256xf32>, vector<16x256xf32> -> vector<16x256xf32>
    %c0_170 = arith.constant 0 : index
    %c0_171 = arith.constant 0 : index
    %436 = vector.load %arg6[%c0_170, %c0_171] : memref<1x256xf32, #tpu.memory_space<vmem>>, vector<1x256xf32>
    %437 = vector.broadcast %436 : vector<1x256xf32> to vector<16x256xf32>
    %438 = arith.addf %435, %437 : vector<16x256xf32>
    %c0_172 = arith.constant 0 : index
    %c0_173 = arith.constant 0 : index
    %439 = vector.load %arg20[%c0_172, %c0_173] : memref<16x256xf32, #tpu.memory_space<vmem>>, vector<16x256xf32>
    tpu.vector_store %arg20[%c0_172, %c0_173], %438 {strides = array<i32>} : memref<16x256xf32, #tpu.memory_space<vmem>>, vector<16x256xf32>,
    %c0_174 = arith.constant 0 : index
    %c0_175 = arith.constant 0 : index
    %440 = vector.load %arg11[%c0_174, %c0_175] : memref<32x128xf32, #tpu.memory_space<vmem>>, vector<32x128xf32>
    %c0_176 = arith.constant 0 : index
    %c0_177 = arith.constant 0 : index
    %441 = vector.load %arg12[%c0_176, %c0_177] : memref<32x128xf32, #tpu.memory_space<vmem>>, vector<32x128xf32>
    %cst_178 = arith.constant 0.000000e+00 : f32
    %442 = vector.broadcast %cst_178 : f32 to vector<2x32xf32>
    %cst_179 = arith.constant 0.000000e+00 : f32
    %443 = vector.broadcast %cst_179 : f32 to vector<2x32xf32>
    %cst_180 = arith.constant 0.000000e+00 : f32
    %444 = vector.broadcast %cst_180 : f32 to vector<2x32xf32>
    %cst_181 = arith.constant 0.000000e+00 : f32
    %445 = vector.broadcast %cst_181 : f32 to vector<2x32xf32>
    %cst_182 = arith.constant dense<0.000000e+00> : vector<2x128xf32>
    %446 = tpu.matmul %442, %440, %cst_182 {dimension_numbers = #tpu.dot_dimension_numbers<[1], [0], [0], [1], [0, 0, 1, 1], [], []>} : vector<2x32xf32>, vector<32x128xf32>, vector<2x128xf32> -> vector<2x128xf32>
    %cst_183 = arith.constant dense<0.000000e+00> : vector<2x128xf32>
    %447 = tpu.matmul %444, %441, %cst_183 {dimension_numbers = #tpu.dot_dimension_numbers<[1], [0], [0], [1], [0, 0, 1, 1], [], []>} : vector<2x32xf32>, vector<32x128xf32>, vector<2x128xf32> -> vector<2x128xf32>
    %c0_184 = arith.constant 0 : index
    %c0_185 = arith.constant 0 : index
    %448 = vector.load %arg20[%c0_184, %c0_185] : memref<16x256xf32, #tpu.memory_space<vmem>>, vector<2x128xf32>
    %449 = arith.addf %448, %446 : vector<2x128xf32>
    %c14_186 = arith.constant 14 : index
    %c128_187 = arith.constant 128 : index
    %450 = vector.load %arg20[%c14_186, %c128_187] : memref<16x256xf32, #tpu.memory_space<vmem>>, vector<2x128xf32>
    %451 = arith.addf %450, %447 : vector<2x128xf32>
    %452 = tpu.concatenate %449, %451 in 1 : vector<2x128xf32>, vector<2x128xf32> -> vector<2x256xf32>
    %453 = arith.negf %452 : vector<2x256xf32>
    %454 = math.exp %453 : vector<2x256xf32>
    %cst_188 = arith.constant 1.000000e+00 : f32
    %455 = vector.broadcast %cst_188 : f32 to vector<2x256xf32>
    %456 = arith.addf %455, %454 : vector<2x256xf32>
    %457 = arith.divf %455, %456 : vector<2x256xf32>
    %458 = math.tanh %452 : vector<2x256xf32>
    %459 = vector.extract_strided_slice %457 {offsets = [0, 32], sizes = [2, 32], strides = [1, 1]} : vector<2x256xf32> to vector<2x32xf32>
    %460 = arith.mulf %459, %443 : vector<2x32xf32>
    %461 = vector.extract_strided_slice %457 {offsets = [0, 0], sizes = [2, 32], strides = [1, 1]} : vector<2x256xf32> to vector<2x32xf32>
    %462 = vector.extract_strided_slice %458 {offsets = [0, 64], sizes = [2, 32], strides = [1, 1]} : vector<2x256xf32> to vector<2x32xf32>
    %463 = arith.mulf %461, %462 : vector<2x32xf32>
    %464 = arith.addf %460, %463 : vector<2x32xf32>
    %465 = vector.extract_strided_slice %457 {offsets = [0, 160], sizes = [2, 32], strides = [1, 1]} : vector<2x256xf32> to vector<2x32xf32>
    %466 = arith.mulf %465, %445 : vector<2x32xf32>
    %467 = vector.extract_strided_slice %457 {offsets = [0, 128], sizes = [2, 32], strides = [1, 1]} : vector<2x256xf32> to vector<2x32xf32>
    %468 = vector.extract_strided_slice %458 {offsets = [0, 192], sizes = [2, 32], strides = [1, 1]} : vector<2x256xf32> to vector<2x32xf32>
    %469 = arith.mulf %467, %468 : vector<2x32xf32>
    %470 = arith.addf %466, %469 : vector<2x32xf32>
    %471 = vector.extract_strided_slice %457 {offsets = [0, 96], sizes = [2, 32], strides = [1, 1]} : vector<2x256xf32> to vector<2x32xf32>
    %472 = math.tanh %464 : vector<2x32xf32>
    %473 = arith.mulf %471, %472 : vector<2x32xf32>
    %474 = vector.extract_strided_slice %457 {offsets = [0, 224], sizes = [2, 32], strides = [1, 1]} : vector<2x256xf32> to vector<2x32xf32>
    %475 = math.tanh %470 : vector<2x32xf32>
    %476 = arith.mulf %474, %475 : vector<2x32xf32>
    %c0_189 = arith.constant 0 : index
    %c0_190 = arith.constant 0 : index
    %477 = vector.load %arg21[%c0_189, %c0_190] : memref<16x256xf32, #tpu.memory_space<vmem>>, vector<2x32xf32>
    tpu.vector_store %arg21[%c0_189, %c0_190], %473 {strides = array<i32>} : memref<16x256xf32, #tpu.memory_space<vmem>>, vector<2x32xf32>,
    %c14_191 = arith.constant 14 : index
    %c128_192 = arith.constant 128 : index
    %478 = vector.load %arg21[%c14_191, %c128_192] : memref<16x256xf32, #tpu.memory_space<vmem>>, vector<2x32xf32>
    tpu.vector_store %arg21[%c14_191, %c128_192], %476 {strides = array<i32>} : memref<16x256xf32, #tpu.memory_space<vmem>>, vector<2x32xf32>,
    %cst_193 = arith.constant dense<0.000000e+00> : vector<2x128xf32>
    %479 = tpu.matmul %473, %440, %cst_193 {dimension_numbers = #tpu.dot_dimension_numbers<[1], [0], [0], [1], [0, 0, 1, 1], [], []>} : vector<2x32xf32>, vector<32x128xf32>, vector<2x128xf32> -> vector<2x128xf32>
    %cst_194 = arith.constant dense<0.000000e+00> : vector<2x128xf32>
    %480 = tpu.matmul %476, %441, %cst_194 {dimension_numbers = #tpu.dot_dimension_numbers<[1], [0], [0], [1], [0, 0, 1, 1], [], []>} : vector<2x32xf32>, vector<32x128xf32>, vector<2x128xf32> -> vector<2x128xf32>
    %c2_195 = arith.constant 2 : index
    %c0_196 = arith.constant 0 : index
    %481 = vector.load %arg20[%c2_195, %c0_196] : memref<16x256xf32, #tpu.memory_space<vmem>>, vector<2x128xf32>
    %482 = arith.addf %481, %479 : vector<2x128xf32>
    %c12_197 = arith.constant 12 : index
    %c128_198 = arith.constant 128 : index
    %483 = vector.load %arg20[%c12_197, %c128_198] : memref<16x256xf32, #tpu.memory_space<vmem>>, vector<2x128xf32>
    %484 = arith.addf %483, %480 : vector<2x128xf32>
    %485 = tpu.concatenate %482, %484 in 1 : vector<2x128xf32>, vector<2x128xf32> -> vector<2x256xf32>
    %486 = arith.negf %485 : vector<2x256xf32>
    %487 = math.exp %486 : vector<2x256xf32>
    %cst_199 = arith.constant 1.000000e+00 : f32
    %488 = vector.broadcast %cst_199 : f32 to vector<2x256xf32>
    %489 = arith.addf %488, %487 : vector<2x256xf32>
    %490 = arith.divf %488, %489 : vector<2x256xf32>
    %491 = math.tanh %485 : vector<2x256xf32>
    %492 = vector.extract_strided_slice %490 {offsets = [0, 32], sizes = [2, 32], strides = [1, 1]} : vector<2x256xf32> to vector<2x32xf32>
    %493 = arith.mulf %492, %464 : vector<2x32xf32>
    %494 = vector.extract_strided_slice %490 {offsets = [0, 0], sizes = [2, 32], strides = [1, 1]} : vector<2x256xf32> to vector<2x32xf32>
    %495 = vector.extract_strided_slice %491 {offsets = [0, 64], sizes = [2, 32], strides = [1, 1]} : vector<2x256xf32> to vector<2x32xf32>
    %496 = arith.mulf %494, %495 : vector<2x32xf32>
    %497 = arith.addf %493, %496 : vector<2x32xf32>
    %498 = vector.extract_strided_slice %490 {offsets = [0, 160], sizes = [2, 32], strides = [1, 1]} : vector<2x256xf32> to vector<2x32xf32>
    %499 = arith.mulf %498, %470 : vector<2x32xf32>
    %500 = vector.extract_strided_slice %490 {offsets = [0, 128], sizes = [2, 32], strides = [1, 1]} : vector<2x256xf32> to vector<2x32xf32>
    %501 = vector.extract_strided_slice %491 {offsets = [0, 192], sizes = [2, 32], strides = [1, 1]} : vector<2x256xf32> to vector<2x32xf32>
    %502 = arith.mulf %500, %501 : vector<2x32xf32>
    %503 = arith.addf %499, %502 : vector<2x32xf32>
    %504 = vector.extract_strided_slice %490 {offsets = [0, 96], sizes = [2, 32], strides = [1, 1]} : vector<2x256xf32> to vector<2x32xf32>
    %505 = math.tanh %497 : vector<2x32xf32>
    %506 = arith.mulf %504, %505 : vector<2x32xf32>
    %507 = vector.extract_strided_slice %490 {offsets = [0, 224], sizes = [2, 32], strides = [1, 1]} : vector<2x256xf32> to vector<2x32xf32>
    %508 = math.tanh %503 : vector<2x32xf32>
    %509 = arith.mulf %507, %508 : vector<2x32xf32>
    %c2_200 = arith.constant 2 : index
    %c0_201 = arith.constant 0 : index
    %510 = vector.load %arg21[%c2_200, %c0_201] : memref<16x256xf32, #tpu.memory_space<vmem>>, vector<2x32xf32>
    tpu.vector_store %arg21[%c2_200, %c0_201], %506 {strides = array<i32>} : memref<16x256xf32, #tpu.memory_space<vmem>>, vector<2x32xf32>,
    %c12_202 = arith.constant 12 : index
    %c128_203 = arith.constant 128 : index
    %511 = vector.load %arg21[%c12_202, %c128_203] : memref<16x256xf32, #tpu.memory_space<vmem>>, vector<2x32xf32>
    tpu.vector_store %arg21[%c12_202, %c128_203], %509 {strides = array<i32>} : memref<16x256xf32, #tpu.memory_space<vmem>>, vector<2x32xf32>,
    %cst_204 = arith.constant dense<0.000000e+00> : vector<2x128xf32>
    %512 = tpu.matmul %506, %440, %cst_204 {dimension_numbers = #tpu.dot_dimension_numbers<[1], [0], [0], [1], [0, 0, 1, 1], [], []>} : vector<2x32xf32>, vector<32x128xf32>, vector<2x128xf32> -> vector<2x128xf32>
    %cst_205 = arith.constant dense<0.000000e+00> : vector<2x128xf32>
    %513 = tpu.matmul %509, %441, %cst_205 {dimension_numbers = #tpu.dot_dimension_numbers<[1], [0], [0], [1], [0, 0, 1, 1], [], []>} : vector<2x32xf32>, vector<32x128xf32>, vector<2x128xf32> -> vector<2x128xf32>
    %c4_206 = arith.constant 4 : index
    %c0_207 = arith.constant 0 : index
    %514 = vector.load %arg20[%c4_206, %c0_207] : memref<16x256xf32, #tpu.memory_space<vmem>>, vector<2x128xf32>
    %515 = arith.addf %514, %512 : vector<2x128xf32>
    %c10_208 = arith.constant 10 : index
    %c128_209 = arith.constant 128 : index
    %516 = vector.load %arg20[%c10_208, %c128_209] : memref<16x256xf32, #tpu.memory_space<vmem>>, vector<2x128xf32>
    %517 = arith.addf %516, %513 : vector<2x128xf32>
    %518 = tpu.concatenate %515, %517 in 1 : vector<2x128xf32>, vector<2x128xf32> -> vector<2x256xf32>
    %519 = arith.negf %518 : vector<2x256xf32>
    %520 = math.exp %519 : vector<2x256xf32>
    %cst_210 = arith.constant 1.000000e+00 : f32
    %521 = vector.broadcast %cst_210 : f32 to vector<2x256xf32>
    %522 = arith.addf %521, %520 : vector<2x256xf32>
    %523 = arith.divf %521, %522 : vector<2x256xf32>
    %524 = math.tanh %518 : vector<2x256xf32>
    %525 = vector.extract_strided_slice %523 {offsets = [0, 32], sizes = [2, 32], strides = [1, 1]} : vector<2x256xf32> to vector<2x32xf32>
    %526 = arith.mulf %525, %497 : vector<2x32xf32>
    %527 = vector.extract_strided_slice %523 {offsets = [0, 0], sizes = [2, 32], strides = [1, 1]} : vector<2x256xf32> to vector<2x32xf32>
    %528 = vector.extract_strided_slice %524 {offsets = [0, 64], sizes = [2, 32], strides = [1, 1]} : vector<2x256xf32> to vector<2x32xf32>
    %529 = arith.mulf %527, %528 : vector<2x32xf32>
    %530 = arith.addf %526, %529 : vector<2x32xf32>
    %531 = vector.extract_strided_slice %523 {offsets = [0, 160], sizes = [2, 32], strides = [1, 1]} : vector<2x256xf32> to vector<2x32xf32>
    %532 = arith.mulf %531, %503 : vector<2x32xf32>
    %533 = vector.extract_strided_slice %523 {offsets = [0, 128], sizes = [2, 32], strides = [1, 1]} : vector<2x256xf32> to vector<2x32xf32>
    %534 = vector.extract_strided_slice %524 {offsets = [0, 192], sizes = [2, 32], strides = [1, 1]} : vector<2x256xf32> to vector<2x32xf32>
    %535 = arith.mulf %533, %534 : vector<2x32xf32>
    %536 = arith.addf %532, %535 : vector<2x32xf32>
    %537 = vector.extract_strided_slice %523 {offsets = [0, 96], sizes = [2, 32], strides = [1, 1]} : vector<2x256xf32> to vector<2x32xf32>
    %538 = math.tanh %530 : vector<2x32xf32>
    %539 = arith.mulf %537, %538 : vector<2x32xf32>
    %540 = vector.extract_strided_slice %523 {offsets = [0, 224], sizes = [2, 32], strides = [1, 1]} : vector<2x256xf32> to vector<2x32xf32>
    %541 = math.tanh %536 : vector<2x32xf32>
    %542 = arith.mulf %540, %541 : vector<2x32xf32>
    %c4_211 = arith.constant 4 : index
    %c0_212 = arith.constant 0 : index
    %543 = vector.load %arg21[%c4_211, %c0_212] : memref<16x256xf32, #tpu.memory_space<vmem>>, vector<2x32xf32>
    tpu.vector_store %arg21[%c4_211, %c0_212], %539 {strides = array<i32>} : memref<16x256xf32, #tpu.memory_space<vmem>>, vector<2x32xf32>,
    %c10_213 = arith.constant 10 : index
    %c128_214 = arith.constant 128 : index
    %544 = vector.load %arg21[%c10_213, %c128_214] : memref<16x256xf32, #tpu.memory_space<vmem>>, vector<2x32xf32>
    tpu.vector_store %arg21[%c10_213, %c128_214], %542 {strides = array<i32>} : memref<16x256xf32, #tpu.memory_space<vmem>>, vector<2x32xf32>,
    %cst_215 = arith.constant dense<0.000000e+00> : vector<2x128xf32>
    %545 = tpu.matmul %539, %440, %cst_215 {dimension_numbers = #tpu.dot_dimension_numbers<[1], [0], [0], [1], [0, 0, 1, 1], [], []>} : vector<2x32xf32>, vector<32x128xf32>, vector<2x128xf32> -> vector<2x128xf32>
    %cst_216 = arith.constant dense<0.000000e+00> : vector<2x128xf32>
    %546 = tpu.matmul %542, %441, %cst_216 {dimension_numbers = #tpu.dot_dimension_numbers<[1], [0], [0], [1], [0, 0, 1, 1], [], []>} : vector<2x32xf32>, vector<32x128xf32>, vector<2x128xf32> -> vector<2x128xf32>
    %c6_217 = arith.constant 6 : index
    %c0_218 = arith.constant 0 : index
    %547 = vector.load %arg20[%c6_217, %c0_218] : memref<16x256xf32, #tpu.memory_space<vmem>>, vector<2x128xf32>
    %548 = arith.addf %547, %545 : vector<2x128xf32>
    %c8_219 = arith.constant 8 : index
    %c128_220 = arith.constant 128 : index
    %549 = vector.load %arg20[%c8_219, %c128_220] : memref<16x256xf32, #tpu.memory_space<vmem>>, vector<2x128xf32>
    %550 = arith.addf %549, %546 : vector<2x128xf32>
    %551 = tpu.concatenate %548, %550 in 1 : vector<2x128xf32>, vector<2x128xf32> -> vector<2x256xf32>
    %552 = arith.negf %551 : vector<2x256xf32>
    %553 = math.exp %552 : vector<2x256xf32>
    %cst_221 = arith.constant 1.000000e+00 : f32
    %554 = vector.broadcast %cst_221 : f32 to vector<2x256xf32>
    %555 = arith.addf %554, %553 : vector<2x256xf32>
    %556 = arith.divf %554, %555 : vector<2x256xf32>
    %557 = math.tanh %551 : vector<2x256xf32>
    %558 = vector.extract_strided_slice %556 {offsets = [0, 32], sizes = [2, 32], strides = [1, 1]} : vector<2x256xf32> to vector<2x32xf32>
    %559 = arith.mulf %558, %530 : vector<2x32xf32>
    %560 = vector.extract_strided_slice %556 {offsets = [0, 0], sizes = [2, 32], strides = [1, 1]} : vector<2x256xf32> to vector<2x32xf32>
    %561 = vector.extract_strided_slice %557 {offsets = [0, 64], sizes = [2, 32], strides = [1, 1]} : vector<2x256xf32> to vector<2x32xf32>
    %562 = arith.mulf %560, %561 : vector<2x32xf32>
    %563 = arith.addf %559, %562 : vector<2x32xf32>
    %564 = vector.extract_strided_slice %556 {offsets = [0, 160], sizes = [2, 32], strides = [1, 1]} : vector<2x256xf32> to vector<2x32xf32>
    %565 = arith.mulf %564, %536 : vector<2x32xf32>
    %566 = vector.extract_strided_slice %556 {offsets = [0, 128], sizes = [2, 32], strides = [1, 1]} : vector<2x256xf32> to vector<2x32xf32>
    %567 = vector.extract_strided_slice %557 {offsets = [0, 192], sizes = [2, 32], strides = [1, 1]} : vector<2x256xf32> to vector<2x32xf32>
    %568 = arith.mulf %566, %567 : vector<2x32xf32>
    %569 = arith.addf %565, %568 : vector<2x32xf32>
    %570 = vector.extract_strided_slice %556 {offsets = [0, 96], sizes = [2, 32], strides = [1, 1]} : vector<2x256xf32> to vector<2x32xf32>
    %571 = math.tanh %563 : vector<2x32xf32>
    %572 = arith.mulf %570, %571 : vector<2x32xf32>
    %573 = vector.extract_strided_slice %556 {offsets = [0, 224], sizes = [2, 32], strides = [1, 1]} : vector<2x256xf32> to vector<2x32xf32>
    %574 = math.tanh %569 : vector<2x32xf32>
    %575 = arith.mulf %573, %574 : vector<2x32xf32>
    %c6_222 = arith.constant 6 : index
    %c0_223 = arith.constant 0 : index
    %576 = vector.load %arg21[%c6_222, %c0_223] : memref<16x256xf32, #tpu.memory_space<vmem>>, vector<2x32xf32>
    tpu.vector_store %arg21[%c6_222, %c0_223], %572 {strides = array<i32>} : memref<16x256xf32, #tpu.memory_space<vmem>>, vector<2x32xf32>,
    %c8_224 = arith.constant 8 : index
    %c128_225 = arith.constant 128 : index
    %577 = vector.load %arg21[%c8_224, %c128_225] : memref<16x256xf32, #tpu.memory_space<vmem>>, vector<2x32xf32>
    tpu.vector_store %arg21[%c8_224, %c128_225], %575 {strides = array<i32>} : memref<16x256xf32, #tpu.memory_space<vmem>>, vector<2x32xf32>,
    %cst_226 = arith.constant dense<0.000000e+00> : vector<2x128xf32>
    %578 = tpu.matmul %572, %440, %cst_226 {dimension_numbers = #tpu.dot_dimension_numbers<[1], [0], [0], [1], [0, 0, 1, 1], [], []>} : vector<2x32xf32>, vector<32x128xf32>, vector<2x128xf32> -> vector<2x128xf32>
    %cst_227 = arith.constant dense<0.000000e+00> : vector<2x128xf32>
    %579 = tpu.matmul %575, %441, %cst_227 {dimension_numbers = #tpu.dot_dimension_numbers<[1], [0], [0], [1], [0, 0, 1, 1], [], []>} : vector<2x32xf32>, vector<32x128xf32>, vector<2x128xf32> -> vector<2x128xf32>
    %c8_228 = arith.constant 8 : index
    %c0_229 = arith.constant 0 : index
    %580 = vector.load %arg20[%c8_228, %c0_229] : memref<16x256xf32, #tpu.memory_space<vmem>>, vector<2x128xf32>
    %581 = arith.addf %580, %578 : vector<2x128xf32>
    %c6_230 = arith.constant 6 : index
    %c128_231 = arith.constant 128 : index
    %582 = vector.load %arg20[%c6_230, %c128_231] : memref<16x256xf32, #tpu.memory_space<vmem>>, vector<2x128xf32>
    %583 = arith.addf %582, %579 : vector<2x128xf32>
    %584 = tpu.concatenate %581, %583 in 1 : vector<2x128xf32>, vector<2x128xf32> -> vector<2x256xf32>
    %585 = arith.negf %584 : vector<2x256xf32>
    %586 = math.exp %585 : vector<2x256xf32>
    %cst_232 = arith.constant 1.000000e+00 : f32
    %587 = vector.broadcast %cst_232 : f32 to vector<2x256xf32>
    %588 = arith.addf %587, %586 : vector<2x256xf32>
    %589 = arith.divf %587, %588 : vector<2x256xf32>
    %590 = math.tanh %584 : vector<2x256xf32>
    %591 = vector.extract_strided_slice %589 {offsets = [0, 32], sizes = [2, 32], strides = [1, 1]} : vector<2x256xf32> to vector<2x32xf32>
    %592 = arith.mulf %591, %563 : vector<2x32xf32>
    %593 = vector.extract_strided_slice %589 {offsets = [0, 0], sizes = [2, 32], strides = [1, 1]} : vector<2x256xf32> to vector<2x32xf32>
    %594 = vector.extract_strided_slice %590 {offsets = [0, 64], sizes = [2, 32], strides = [1, 1]} : vector<2x256xf32> to vector<2x32xf32>
    %595 = arith.mulf %593, %594 : vector<2x32xf32>
    %596 = arith.addf %592, %595 : vector<2x32xf32>
    %597 = vector.extract_strided_slice %589 {offsets = [0, 160], sizes = [2, 32], strides = [1, 1]} : vector<2x256xf32> to vector<2x32xf32>
    %598 = arith.mulf %597, %569 : vector<2x32xf32>
    %599 = vector.extract_strided_slice %589 {offsets = [0, 128], sizes = [2, 32], strides = [1, 1]} : vector<2x256xf32> to vector<2x32xf32>
    %600 = vector.extract_strided_slice %590 {offsets = [0, 192], sizes = [2, 32], strides = [1, 1]} : vector<2x256xf32> to vector<2x32xf32>
    %601 = arith.mulf %599, %600 : vector<2x32xf32>
    %602 = arith.addf %598, %601 : vector<2x32xf32>
    %603 = vector.extract_strided_slice %589 {offsets = [0, 96], sizes = [2, 32], strides = [1, 1]} : vector<2x256xf32> to vector<2x32xf32>
    %604 = math.tanh %596 : vector<2x32xf32>
    %605 = arith.mulf %603, %604 : vector<2x32xf32>
    %606 = vector.extract_strided_slice %589 {offsets = [0, 224], sizes = [2, 32], strides = [1, 1]} : vector<2x256xf32> to vector<2x32xf32>
    %607 = math.tanh %602 : vector<2x32xf32>
    %608 = arith.mulf %606, %607 : vector<2x32xf32>
    %c8_233 = arith.constant 8 : index
    %c0_234 = arith.constant 0 : index
    %609 = vector.load %arg21[%c8_233, %c0_234] : memref<16x256xf32, #tpu.memory_space<vmem>>, vector<2x32xf32>
    tpu.vector_store %arg21[%c8_233, %c0_234], %605 {strides = array<i32>} : memref<16x256xf32, #tpu.memory_space<vmem>>, vector<2x32xf32>,
    %c6_235 = arith.constant 6 : index
    %c128_236 = arith.constant 128 : index
    %610 = vector.load %arg21[%c6_235, %c128_236] : memref<16x256xf32, #tpu.memory_space<vmem>>, vector<2x32xf32>
    tpu.vector_store %arg21[%c6_235, %c128_236], %608 {strides = array<i32>} : memref<16x256xf32, #tpu.memory_space<vmem>>, vector<2x32xf32>,
    %cst_237 = arith.constant dense<0.000000e+00> : vector<2x128xf32>
    %611 = tpu.matmul %605, %440, %cst_237 {dimension_numbers = #tpu.dot_dimension_numbers<[1], [0], [0], [1], [0, 0, 1, 1], [], []>} : vector<2x32xf32>, vector<32x128xf32>, vector<2x128xf32> -> vector<2x128xf32>
    %cst_238 = arith.constant dense<0.000000e+00> : vector<2x128xf32>
    %612 = tpu.matmul %608, %441, %cst_238 {dimension_numbers = #tpu.dot_dimension_numbers<[1], [0], [0], [1], [0, 0, 1, 1], [], []>} : vector<2x32xf32>, vector<32x128xf32>, vector<2x128xf32> -> vector<2x128xf32>
    %c10_239 = arith.constant 10 : index
    %c0_240 = arith.constant 0 : index
    %613 = vector.load %arg20[%c10_239, %c0_240] : memref<16x256xf32, #tpu.memory_space<vmem>>, vector<2x128xf32>
    %614 = arith.addf %613, %611 : vector<2x128xf32>
    %c4_241 = arith.constant 4 : index
    %c128_242 = arith.constant 128 : index
    %615 = vector.load %arg20[%c4_241, %c128_242] : memref<16x256xf32, #tpu.memory_space<vmem>>, vector<2x128xf32>
    %616 = arith.addf %615, %612 : vector<2x128xf32>
    %617 = tpu.concatenate %614, %616 in 1 : vector<2x128xf32>, vector<2x128xf32> -> vector<2x256xf32>
    %618 = arith.negf %617 : vector<2x256xf32>
    %619 = math.exp %618 : vector<2x256xf32>
    %cst_243 = arith.constant 1.000000e+00 : f32
    %620 = vector.broadcast %cst_243 : f32 to vector<2x256xf32>
    %621 = arith.addf %620, %619 : vector<2x256xf32>
    %622 = arith.divf %620, %621 : vector<2x256xf32>
    %623 = math.tanh %617 : vector<2x256xf32>
    %624 = vector.extract_strided_slice %622 {offsets = [0, 32], sizes = [2, 32], strides = [1, 1]} : vector<2x256xf32> to vector<2x32xf32>
    %625 = arith.mulf %624, %596 : vector<2x32xf32>
    %626 = vector.extract_strided_slice %622 {offsets = [0, 0], sizes = [2, 32], strides = [1, 1]} : vector<2x256xf32> to vector<2x32xf32>
    %627 = vector.extract_strided_slice %623 {offsets = [0, 64], sizes = [2, 32], strides = [1, 1]} : vector<2x256xf32> to vector<2x32xf32>
    %628 = arith.mulf %626, %627 : vector<2x32xf32>
    %629 = arith.addf %625, %628 : vector<2x32xf32>
    %630 = vector.extract_strided_slice %622 {offsets = [0, 160], sizes = [2, 32], strides = [1, 1]} : vector<2x256xf32> to vector<2x32xf32>
    %631 = arith.mulf %630, %602 : vector<2x32xf32>
    %632 = vector.extract_strided_slice %622 {offsets = [0, 128], sizes = [2, 32], strides = [1, 1]} : vector<2x256xf32> to vector<2x32xf32>
    %633 = vector.extract_strided_slice %623 {offsets = [0, 192], sizes = [2, 32], strides = [1, 1]} : vector<2x256xf32> to vector<2x32xf32>
    %634 = arith.mulf %632, %633 : vector<2x32xf32>
    %635 = arith.addf %631, %634 : vector<2x32xf32>
    %636 = vector.extract_strided_slice %622 {offsets = [0, 96], sizes = [2, 32], strides = [1, 1]} : vector<2x256xf32> to vector<2x32xf32>
    %637 = math.tanh %629 : vector<2x32xf32>
    %638 = arith.mulf %636, %637 : vector<2x32xf32>
    %639 = vector.extract_strided_slice %622 {offsets = [0, 224], sizes = [2, 32], strides = [1, 1]} : vector<2x256xf32> to vector<2x32xf32>
    %640 = math.tanh %635 : vector<2x32xf32>
    %641 = arith.mulf %639, %640 : vector<2x32xf32>
    %c10_244 = arith.constant 10 : index
    %c0_245 = arith.constant 0 : index
    %642 = vector.load %arg21[%c10_244, %c0_245] : memref<16x256xf32, #tpu.memory_space<vmem>>, vector<2x32xf32>
    tpu.vector_store %arg21[%c10_244, %c0_245], %638 {strides = array<i32>} : memref<16x256xf32, #tpu.memory_space<vmem>>, vector<2x32xf32>,
    %c4_246 = arith.constant 4 : index
    %c128_247 = arith.constant 128 : index
    %643 = vector.load %arg21[%c4_246, %c128_247] : memref<16x256xf32, #tpu.memory_space<vmem>>, vector<2x32xf32>
    tpu.vector_store %arg21[%c4_246, %c128_247], %641 {strides = array<i32>} : memref<16x256xf32, #tpu.memory_space<vmem>>, vector<2x32xf32>,
    %cst_248 = arith.constant dense<0.000000e+00> : vector<2x128xf32>
    %644 = tpu.matmul %638, %440, %cst_248 {dimension_numbers = #tpu.dot_dimension_numbers<[1], [0], [0], [1], [0, 0, 1, 1], [], []>} : vector<2x32xf32>, vector<32x128xf32>, vector<2x128xf32> -> vector<2x128xf32>
    %cst_249 = arith.constant dense<0.000000e+00> : vector<2x128xf32>
    %645 = tpu.matmul %641, %441, %cst_249 {dimension_numbers = #tpu.dot_dimension_numbers<[1], [0], [0], [1], [0, 0, 1, 1], [], []>} : vector<2x32xf32>, vector<32x128xf32>, vector<2x128xf32> -> vector<2x128xf32>
    %c12_250 = arith.constant 12 : index
    %c0_251 = arith.constant 0 : index
    %646 = vector.load %arg20[%c12_250, %c0_251] : memref<16x256xf32, #tpu.memory_space<vmem>>, vector<2x128xf32>
    %647 = arith.addf %646, %644 : vector<2x128xf32>
    %c2_252 = arith.constant 2 : index
    %c128_253 = arith.constant 128 : index
    %648 = vector.load %arg20[%c2_252, %c128_253] : memref<16x256xf32, #tpu.memory_space<vmem>>, vector<2x128xf32>
    %649 = arith.addf %648, %645 : vector<2x128xf32>
    %650 = tpu.concatenate %647, %649 in 1 : vector<2x128xf32>, vector<2x128xf32> -> vector<2x256xf32>
    %651 = arith.negf %650 : vector<2x256xf32>
    %652 = math.exp %651 : vector<2x256xf32>
    %cst_254 = arith.constant 1.000000e+00 : f32
    %653 = vector.broadcast %cst_254 : f32 to vector<2x256xf32>
    %654 = arith.addf %653, %652 : vector<2x256xf32>
    %655 = arith.divf %653, %654 : vector<2x256xf32>
    %656 = math.tanh %650 : vector<2x256xf32>
    %657 = vector.extract_strided_slice %655 {offsets = [0, 32], sizes = [2, 32], strides = [1, 1]} : vector<2x256xf32> to vector<2x32xf32>
    %658 = arith.mulf %657, %629 : vector<2x32xf32>
    %659 = vector.extract_strided_slice %655 {offsets = [0, 0], sizes = [2, 32], strides = [1, 1]} : vector<2x256xf32> to vector<2x32xf32>
    %660 = vector.extract_strided_slice %656 {offsets = [0, 64], sizes = [2, 32], strides = [1, 1]} : vector<2x256xf32> to vector<2x32xf32>
    %661 = arith.mulf %659, %660 : vector<2x32xf32>
    %662 = arith.addf %658, %661 : vector<2x32xf32>
    %663 = vector.extract_strided_slice %655 {offsets = [0, 160], sizes = [2, 32], strides = [1, 1]} : vector<2x256xf32> to vector<2x32xf32>
    %664 = arith.mulf %663, %635 : vector<2x32xf32>
    %665 = vector.extract_strided_slice %655 {offsets = [0, 128], sizes = [2, 32], strides = [1, 1]} : vector<2x256xf32> to vector<2x32xf32>
    %666 = vector.extract_strided_slice %656 {offsets = [0, 192], sizes = [2, 32], strides = [1, 1]} : vector<2x256xf32> to vector<2x32xf32>
    %667 = arith.mulf %665, %666 : vector<2x32xf32>
    %668 = arith.addf %664, %667 : vector<2x32xf32>
    %669 = vector.extract_strided_slice %655 {offsets = [0, 96], sizes = [2, 32], strides = [1, 1]} : vector<2x256xf32> to vector<2x32xf32>
    %670 = math.tanh %662 : vector<2x32xf32>
    %671 = arith.mulf %669, %670 : vector<2x32xf32>
    %672 = vector.extract_strided_slice %655 {offsets = [0, 224], sizes = [2, 32], strides = [1, 1]} : vector<2x256xf32> to vector<2x32xf32>
    %673 = math.tanh %668 : vector<2x32xf32>
    %674 = arith.mulf %672, %673 : vector<2x32xf32>
    %c12_255 = arith.constant 12 : index
    %c0_256 = arith.constant 0 : index
    %675 = vector.load %arg21[%c12_255, %c0_256] : memref<16x256xf32, #tpu.memory_space<vmem>>, vector<2x32xf32>
    tpu.vector_store %arg21[%c12_255, %c0_256], %671 {strides = array<i32>} : memref<16x256xf32, #tpu.memory_space<vmem>>, vector<2x32xf32>,
    %c2_257 = arith.constant 2 : index
    %c128_258 = arith.constant 128 : index
    %676 = vector.load %arg21[%c2_257, %c128_258] : memref<16x256xf32, #tpu.memory_space<vmem>>, vector<2x32xf32>
    tpu.vector_store %arg21[%c2_257, %c128_258], %674 {strides = array<i32>} : memref<16x256xf32, #tpu.memory_space<vmem>>, vector<2x32xf32>,
    %cst_259 = arith.constant dense<0.000000e+00> : vector<2x128xf32>
    %677 = tpu.matmul %671, %440, %cst_259 {dimension_numbers = #tpu.dot_dimension_numbers<[1], [0], [0], [1], [0, 0, 1, 1], [], []>} : vector<2x32xf32>, vector<32x128xf32>, vector<2x128xf32> -> vector<2x128xf32>
    %cst_260 = arith.constant dense<0.000000e+00> : vector<2x128xf32>
    %678 = tpu.matmul %674, %441, %cst_260 {dimension_numbers = #tpu.dot_dimension_numbers<[1], [0], [0], [1], [0, 0, 1, 1], [], []>} : vector<2x32xf32>, vector<32x128xf32>, vector<2x128xf32> -> vector<2x128xf32>
    %c14_261 = arith.constant 14 : index
    %c0_262 = arith.constant 0 : index
    %679 = vector.load %arg20[%c14_261, %c0_262] : memref<16x256xf32, #tpu.memory_space<vmem>>, vector<2x128xf32>
    %680 = arith.addf %679, %677 : vector<2x128xf32>
    %c0_263 = arith.constant 0 : index
    %c128_264 = arith.constant 128 : index
    %681 = vector.load %arg20[%c0_263, %c128_264] : memref<16x256xf32, #tpu.memory_space<vmem>>, vector<2x128xf32>
    %682 = arith.addf %681, %678 : vector<2x128xf32>
    %683 = tpu.concatenate %680, %682 in 1 : vector<2x128xf32>, vector<2x128xf32> -> vector<2x256xf32>
    %684 = arith.negf %683 : vector<2x256xf32>
    %685 = math.exp %684 : vector<2x256xf32>
    %cst_265 = arith.constant 1.000000e+00 : f32
    %686 = vector.broadcast %cst_265 : f32 to vector<2x256xf32>
    %687 = arith.addf %686, %685 : vector<2x256xf32>
    %688 = arith.divf %686, %687 : vector<2x256xf32>
    %689 = math.tanh %683 : vector<2x256xf32>
    %690 = vector.extract_strided_slice %688 {offsets = [0, 32], sizes = [2, 32], strides = [1, 1]} : vector<2x256xf32> to vector<2x32xf32>
    %691 = arith.mulf %690, %662 : vector<2x32xf32>
    %692 = vector.extract_strided_slice %688 {offsets = [0, 0], sizes = [2, 32], strides = [1, 1]} : vector<2x256xf32> to vector<2x32xf32>
    %693 = vector.extract_strided_slice %689 {offsets = [0, 64], sizes = [2, 32], strides = [1, 1]} : vector<2x256xf32> to vector<2x32xf32>
    %694 = arith.mulf %692, %693 : vector<2x32xf32>
    %695 = arith.addf %691, %694 : vector<2x32xf32>
    %696 = vector.extract_strided_slice %688 {offsets = [0, 160], sizes = [2, 32], strides = [1, 1]} : vector<2x256xf32> to vector<2x32xf32>
    %697 = arith.mulf %696, %668 : vector<2x32xf32>
    %698 = vector.extract_strided_slice %688 {offsets = [0, 128], sizes = [2, 32], strides = [1, 1]} : vector<2x256xf32> to vector<2x32xf32>
    %699 = vector.extract_strided_slice %689 {offsets = [0, 192], sizes = [2, 32], strides = [1, 1]} : vector<2x256xf32> to vector<2x32xf32>
    %700 = arith.mulf %698, %699 : vector<2x32xf32>
    %701 = arith.addf %697, %700 : vector<2x32xf32>
    %702 = vector.extract_strided_slice %688 {offsets = [0, 96], sizes = [2, 32], strides = [1, 1]} : vector<2x256xf32> to vector<2x32xf32>
    %703 = math.tanh %695 : vector<2x32xf32>
    %704 = arith.mulf %702, %703 : vector<2x32xf32>
    %705 = vector.extract_strided_slice %688 {offsets = [0, 224], sizes = [2, 32], strides = [1, 1]} : vector<2x256xf32> to vector<2x32xf32>
    %706 = math.tanh %701 : vector<2x32xf32>
    %707 = arith.mulf %705, %706 : vector<2x32xf32>
    %c14_266 = arith.constant 14 : index
    %c0_267 = arith.constant 0 : index
    %708 = vector.load %arg21[%c14_266, %c0_267] : memref<16x256xf32, #tpu.memory_space<vmem>>, vector<2x32xf32>
    tpu.vector_store %arg21[%c14_266, %c0_267], %704 {strides = array<i32>} : memref<16x256xf32, #tpu.memory_space<vmem>>, vector<2x32xf32>,
    %c0_268 = arith.constant 0 : index
    %c128_269 = arith.constant 128 : index
    %709 = vector.load %arg21[%c0_268, %c128_269] : memref<16x256xf32, #tpu.memory_space<vmem>>, vector<2x32xf32>
    tpu.vector_store %arg21[%c0_268, %c128_269], %707 {strides = array<i32>} : memref<16x256xf32, #tpu.memory_space<vmem>>, vector<2x32xf32>,
    %c0_270 = arith.constant 0 : index
    %c0_271 = arith.constant 0 : index
    %710 = vector.load %arg21[%c0_270, %c0_271] : memref<16x256xf32, #tpu.memory_space<vmem>>, vector<16x256xf32>
    %c0_272 = arith.constant 0 : index
    %c0_273 = arith.constant 0 : index
    %711 = vector.load %arg7[%c0_272, %c0_273] : memref<256x256xf32, #tpu.memory_space<vmem>>, vector<256x256xf32>
    %cst_274 = arith.constant dense<0.000000e+00> : vector<16x256xf32>
    %712 = tpu.matmul %710, %711, %cst_274 {dimension_numbers = #tpu.dot_dimension_numbers<[1], [0], [0], [1], [0, 0, 1, 1], [], []>} : vector<16x256xf32>, vector<256x256xf32>, vector<16x256xf32> -> vector<16x256xf32>
    %c0_275 = arith.constant 0 : index
    %c0_276 = arith.constant 0 : index
    %713 = vector.load %arg8[%c0_275, %c0_276] : memref<1x256xf32, #tpu.memory_space<vmem>>, vector<1x256xf32>
    %714 = vector.broadcast %713 : vector<1x256xf32> to vector<16x256xf32>
    %715 = arith.addf %712, %714 : vector<16x256xf32>
    %c0_277 = arith.constant 0 : index
    %c0_278 = arith.constant 0 : index
    %716 = vector.load %arg20[%c0_277, %c0_278] : memref<16x256xf32, #tpu.memory_space<vmem>>, vector<16x256xf32>
    tpu.vector_store %arg20[%c0_277, %c0_278], %715 {strides = array<i32>} : memref<16x256xf32, #tpu.memory_space<vmem>>, vector<16x256xf32>,
    %c0_279 = arith.constant 0 : index
    %c0_280 = arith.constant 0 : index
    %717 = vector.load %arg13[%c0_279, %c0_280] : memref<32x128xf32, #tpu.memory_space<vmem>>, vector<32x128xf32>
    %c0_281 = arith.constant 0 : index
    %c0_282 = arith.constant 0 : index
    %718 = vector.load %arg14[%c0_281, %c0_282] : memref<32x128xf32, #tpu.memory_space<vmem>>, vector<32x128xf32>
    %cst_283 = arith.constant 0.000000e+00 : f32
    %719 = vector.broadcast %cst_283 : f32 to vector<2x32xf32>
    %cst_284 = arith.constant 0.000000e+00 : f32
    %720 = vector.broadcast %cst_284 : f32 to vector<2x32xf32>
    %cst_285 = arith.constant 0.000000e+00 : f32
    %721 = vector.broadcast %cst_285 : f32 to vector<2x32xf32>
    %cst_286 = arith.constant 0.000000e+00 : f32
    %722 = vector.broadcast %cst_286 : f32 to vector<2x32xf32>
    %cst_287 = arith.constant dense<0.000000e+00> : vector<2x128xf32>
    %723 = tpu.matmul %719, %717, %cst_287 {dimension_numbers = #tpu.dot_dimension_numbers<[1], [0], [0], [1], [0, 0, 1, 1], [], []>} : vector<2x32xf32>, vector<32x128xf32>, vector<2x128xf32> -> vector<2x128xf32>
    %cst_288 = arith.constant dense<0.000000e+00> : vector<2x128xf32>
    %724 = tpu.matmul %721, %718, %cst_288 {dimension_numbers = #tpu.dot_dimension_numbers<[1], [0], [0], [1], [0, 0, 1, 1], [], []>} : vector<2x32xf32>, vector<32x128xf32>, vector<2x128xf32> -> vector<2x128xf32>
    %c0_289 = arith.constant 0 : index
    %c0_290 = arith.constant 0 : index
    %725 = vector.load %arg20[%c0_289, %c0_290] : memref<16x256xf32, #tpu.memory_space<vmem>>, vector<2x128xf32>
    %726 = arith.addf %725, %723 : vector<2x128xf32>
    %c14_291 = arith.constant 14 : index
    %c128_292 = arith.constant 128 : index
    %727 = vector.load %arg20[%c14_291, %c128_292] : memref<16x256xf32, #tpu.memory_space<vmem>>, vector<2x128xf32>
    %728 = arith.addf %727, %724 : vector<2x128xf32>
    %729 = tpu.concatenate %726, %728 in 1 : vector<2x128xf32>, vector<2x128xf32> -> vector<2x256xf32>
    %730 = arith.negf %729 : vector<2x256xf32>
    %731 = math.exp %730 : vector<2x256xf32>
    %cst_293 = arith.constant 1.000000e+00 : f32
    %732 = vector.broadcast %cst_293 : f32 to vector<2x256xf32>
    %733 = arith.addf %732, %731 : vector<2x256xf32>
    %734 = arith.divf %732, %733 : vector<2x256xf32>
    %735 = math.tanh %729 : vector<2x256xf32>
    %736 = vector.extract_strided_slice %734 {offsets = [0, 32], sizes = [2, 32], strides = [1, 1]} : vector<2x256xf32> to vector<2x32xf32>
    %737 = arith.mulf %736, %720 : vector<2x32xf32>
    %738 = vector.extract_strided_slice %734 {offsets = [0, 0], sizes = [2, 32], strides = [1, 1]} : vector<2x256xf32> to vector<2x32xf32>
    %739 = vector.extract_strided_slice %735 {offsets = [0, 64], sizes = [2, 32], strides = [1, 1]} : vector<2x256xf32> to vector<2x32xf32>
    %740 = arith.mulf %738, %739 : vector<2x32xf32>
    %741 = arith.addf %737, %740 : vector<2x32xf32>
    %742 = vector.extract_strided_slice %734 {offsets = [0, 160], sizes = [2, 32], strides = [1, 1]} : vector<2x256xf32> to vector<2x32xf32>
    %743 = arith.mulf %742, %722 : vector<2x32xf32>
    %744 = vector.extract_strided_slice %734 {offsets = [0, 128], sizes = [2, 32], strides = [1, 1]} : vector<2x256xf32> to vector<2x32xf32>
    %745 = vector.extract_strided_slice %735 {offsets = [0, 192], sizes = [2, 32], strides = [1, 1]} : vector<2x256xf32> to vector<2x32xf32>
    %746 = arith.mulf %744, %745 : vector<2x32xf32>
    %747 = arith.addf %743, %746 : vector<2x32xf32>
    %748 = vector.extract_strided_slice %734 {offsets = [0, 96], sizes = [2, 32], strides = [1, 1]} : vector<2x256xf32> to vector<2x32xf32>
    %749 = math.tanh %741 : vector<2x32xf32>
    %750 = arith.mulf %748, %749 : vector<2x32xf32>
    %751 = vector.extract_strided_slice %734 {offsets = [0, 224], sizes = [2, 32], strides = [1, 1]} : vector<2x256xf32> to vector<2x32xf32>
    %752 = math.tanh %747 : vector<2x32xf32>
    %753 = arith.mulf %751, %752 : vector<2x32xf32>
    %c0_294 = arith.constant 0 : index
    %c0_295 = arith.constant 0 : index
    %754 = vector.load %arg21[%c0_294, %c0_295] : memref<16x256xf32, #tpu.memory_space<vmem>>, vector<2x32xf32>
    tpu.vector_store %arg21[%c0_294, %c0_295], %750 {strides = array<i32>} : memref<16x256xf32, #tpu.memory_space<vmem>>, vector<2x32xf32>,
    %c14_296 = arith.constant 14 : index
    %c128_297 = arith.constant 128 : index
    %755 = vector.load %arg21[%c14_296, %c128_297] : memref<16x256xf32, #tpu.memory_space<vmem>>, vector<2x32xf32>
    tpu.vector_store %arg21[%c14_296, %c128_297], %753 {strides = array<i32>} : memref<16x256xf32, #tpu.memory_space<vmem>>, vector<2x32xf32>,
    %cst_298 = arith.constant dense<0.000000e+00> : vector<2x128xf32>
    %756 = tpu.matmul %750, %717, %cst_298 {dimension_numbers = #tpu.dot_dimension_numbers<[1], [0], [0], [1], [0, 0, 1, 1], [], []>} : vector<2x32xf32>, vector<32x128xf32>, vector<2x128xf32> -> vector<2x128xf32>
    %cst_299 = arith.constant dense<0.000000e+00> : vector<2x128xf32>
    %757 = tpu.matmul %753, %718, %cst_299 {dimension_numbers = #tpu.dot_dimension_numbers<[1], [0], [0], [1], [0, 0, 1, 1], [], []>} : vector<2x32xf32>, vector<32x128xf32>, vector<2x128xf32> -> vector<2x128xf32>
    %c2_300 = arith.constant 2 : index
    %c0_301 = arith.constant 0 : index
    %758 = vector.load %arg20[%c2_300, %c0_301] : memref<16x256xf32, #tpu.memory_space<vmem>>, vector<2x128xf32>
    %759 = arith.addf %758, %756 : vector<2x128xf32>
    %c12_302 = arith.constant 12 : index
    %c128_303 = arith.constant 128 : index
    %760 = vector.load %arg20[%c12_302, %c128_303] : memref<16x256xf32, #tpu.memory_space<vmem>>, vector<2x128xf32>
    %761 = arith.addf %760, %757 : vector<2x128xf32>
    %762 = tpu.concatenate %759, %761 in 1 : vector<2x128xf32>, vector<2x128xf32> -> vector<2x256xf32>
    %763 = arith.negf %762 : vector<2x256xf32>
    %764 = math.exp %763 : vector<2x256xf32>
    %cst_304 = arith.constant 1.000000e+00 : f32
    %765 = vector.broadcast %cst_304 : f32 to vector<2x256xf32>
    %766 = arith.addf %765, %764 : vector<2x256xf32>
    %767 = arith.divf %765, %766 : vector<2x256xf32>
    %768 = math.tanh %762 : vector<2x256xf32>
    %769 = vector.extract_strided_slice %767 {offsets = [0, 32], sizes = [2, 32], strides = [1, 1]} : vector<2x256xf32> to vector<2x32xf32>
    %770 = arith.mulf %769, %741 : vector<2x32xf32>
    %771 = vector.extract_strided_slice %767 {offsets = [0, 0], sizes = [2, 32], strides = [1, 1]} : vector<2x256xf32> to vector<2x32xf32>
    %772 = vector.extract_strided_slice %768 {offsets = [0, 64], sizes = [2, 32], strides = [1, 1]} : vector<2x256xf32> to vector<2x32xf32>
    %773 = arith.mulf %771, %772 : vector<2x32xf32>
    %774 = arith.addf %770, %773 : vector<2x32xf32>
    %775 = vector.extract_strided_slice %767 {offsets = [0, 160], sizes = [2, 32], strides = [1, 1]} : vector<2x256xf32> to vector<2x32xf32>
    %776 = arith.mulf %775, %747 : vector<2x32xf32>
    %777 = vector.extract_strided_slice %767 {offsets = [0, 128], sizes = [2, 32], strides = [1, 1]} : vector<2x256xf32> to vector<2x32xf32>
    %778 = vector.extract_strided_slice %768 {offsets = [0, 192], sizes = [2, 32], strides = [1, 1]} : vector<2x256xf32> to vector<2x32xf32>
    %779 = arith.mulf %777, %778 : vector<2x32xf32>
    %780 = arith.addf %776, %779 : vector<2x32xf32>
    %781 = vector.extract_strided_slice %767 {offsets = [0, 96], sizes = [2, 32], strides = [1, 1]} : vector<2x256xf32> to vector<2x32xf32>
    %782 = math.tanh %774 : vector<2x32xf32>
    %783 = arith.mulf %781, %782 : vector<2x32xf32>
    %784 = vector.extract_strided_slice %767 {offsets = [0, 224], sizes = [2, 32], strides = [1, 1]} : vector<2x256xf32> to vector<2x32xf32>
    %785 = math.tanh %780 : vector<2x32xf32>
    %786 = arith.mulf %784, %785 : vector<2x32xf32>
    %c2_305 = arith.constant 2 : index
    %c0_306 = arith.constant 0 : index
    %787 = vector.load %arg21[%c2_305, %c0_306] : memref<16x256xf32, #tpu.memory_space<vmem>>, vector<2x32xf32>
    tpu.vector_store %arg21[%c2_305, %c0_306], %783 {strides = array<i32>} : memref<16x256xf32, #tpu.memory_space<vmem>>, vector<2x32xf32>,
    %c12_307 = arith.constant 12 : index
    %c128_308 = arith.constant 128 : index
    %788 = vector.load %arg21[%c12_307, %c128_308] : memref<16x256xf32, #tpu.memory_space<vmem>>, vector<2x32xf32>
    tpu.vector_store %arg21[%c12_307, %c128_308], %786 {strides = array<i32>} : memref<16x256xf32, #tpu.memory_space<vmem>>, vector<2x32xf32>,
    %cst_309 = arith.constant dense<0.000000e+00> : vector<2x128xf32>
    %789 = tpu.matmul %783, %717, %cst_309 {dimension_numbers = #tpu.dot_dimension_numbers<[1], [0], [0], [1], [0, 0, 1, 1], [], []>} : vector<2x32xf32>, vector<32x128xf32>, vector<2x128xf32> -> vector<2x128xf32>
    %cst_310 = arith.constant dense<0.000000e+00> : vector<2x128xf32>
    %790 = tpu.matmul %786, %718, %cst_310 {dimension_numbers = #tpu.dot_dimension_numbers<[1], [0], [0], [1], [0, 0, 1, 1], [], []>} : vector<2x32xf32>, vector<32x128xf32>, vector<2x128xf32> -> vector<2x128xf32>
    %c4_311 = arith.constant 4 : index
    %c0_312 = arith.constant 0 : index
    %791 = vector.load %arg20[%c4_311, %c0_312] : memref<16x256xf32, #tpu.memory_space<vmem>>, vector<2x128xf32>
    %792 = arith.addf %791, %789 : vector<2x128xf32>
    %c10_313 = arith.constant 10 : index
    %c128_314 = arith.constant 128 : index
    %793 = vector.load %arg20[%c10_313, %c128_314] : memref<16x256xf32, #tpu.memory_space<vmem>>, vector<2x128xf32>
    %794 = arith.addf %793, %790 : vector<2x128xf32>
    %795 = tpu.concatenate %792, %794 in 1 : vector<2x128xf32>, vector<2x128xf32> -> vector<2x256xf32>
    %796 = arith.negf %795 : vector<2x256xf32>
    %797 = math.exp %796 : vector<2x256xf32>
    %cst_315 = arith.constant 1.000000e+00 : f32
    %798 = vector.broadcast %cst_315 : f32 to vector<2x256xf32>
    %799 = arith.addf %798, %797 : vector<2x256xf32>
    %800 = arith.divf %798, %799 : vector<2x256xf32>
    %801 = math.tanh %795 : vector<2x256xf32>
    %802 = vector.extract_strided_slice %800 {offsets = [0, 32], sizes = [2, 32], strides = [1, 1]} : vector<2x256xf32> to vector<2x32xf32>
    %803 = arith.mulf %802, %774 : vector<2x32xf32>
    %804 = vector.extract_strided_slice %800 {offsets = [0, 0], sizes = [2, 32], strides = [1, 1]} : vector<2x256xf32> to vector<2x32xf32>
    %805 = vector.extract_strided_slice %801 {offsets = [0, 64], sizes = [2, 32], strides = [1, 1]} : vector<2x256xf32> to vector<2x32xf32>
    %806 = arith.mulf %804, %805 : vector<2x32xf32>
    %807 = arith.addf %803, %806 : vector<2x32xf32>
    %808 = vector.extract_strided_slice %800 {offsets = [0, 160], sizes = [2, 32], strides = [1, 1]} : vector<2x256xf32> to vector<2x32xf32>
    %809 = arith.mulf %808, %780 : vector<2x32xf32>
    %810 = vector.extract_strided_slice %800 {offsets = [0, 128], sizes = [2, 32], strides = [1, 1]} : vector<2x256xf32> to vector<2x32xf32>
    %811 = vector.extract_strided_slice %801 {offsets = [0, 192], sizes = [2, 32], strides = [1, 1]} : vector<2x256xf32> to vector<2x32xf32>
    %812 = arith.mulf %810, %811 : vector<2x32xf32>
    %813 = arith.addf %809, %812 : vector<2x32xf32>
    %814 = vector.extract_strided_slice %800 {offsets = [0, 96], sizes = [2, 32], strides = [1, 1]} : vector<2x256xf32> to vector<2x32xf32>
    %815 = math.tanh %807 : vector<2x32xf32>
    %816 = arith.mulf %814, %815 : vector<2x32xf32>
    %817 = vector.extract_strided_slice %800 {offsets = [0, 224], sizes = [2, 32], strides = [1, 1]} : vector<2x256xf32> to vector<2x32xf32>
    %818 = math.tanh %813 : vector<2x32xf32>
    %819 = arith.mulf %817, %818 : vector<2x32xf32>
    %c4_316 = arith.constant 4 : index
    %c0_317 = arith.constant 0 : index
    %820 = vector.load %arg21[%c4_316, %c0_317] : memref<16x256xf32, #tpu.memory_space<vmem>>, vector<2x32xf32>
    tpu.vector_store %arg21[%c4_316, %c0_317], %816 {strides = array<i32>} : memref<16x256xf32, #tpu.memory_space<vmem>>, vector<2x32xf32>,
    %c10_318 = arith.constant 10 : index
    %c128_319 = arith.constant 128 : index
    %821 = vector.load %arg21[%c10_318, %c128_319] : memref<16x256xf32, #tpu.memory_space<vmem>>, vector<2x32xf32>
    tpu.vector_store %arg21[%c10_318, %c128_319], %819 {strides = array<i32>} : memref<16x256xf32, #tpu.memory_space<vmem>>, vector<2x32xf32>,
    %cst_320 = arith.constant dense<0.000000e+00> : vector<2x128xf32>
    %822 = tpu.matmul %816, %717, %cst_320 {dimension_numbers = #tpu.dot_dimension_numbers<[1], [0], [0], [1], [0, 0, 1, 1], [], []>} : vector<2x32xf32>, vector<32x128xf32>, vector<2x128xf32> -> vector<2x128xf32>
    %cst_321 = arith.constant dense<0.000000e+00> : vector<2x128xf32>
    %823 = tpu.matmul %819, %718, %cst_321 {dimension_numbers = #tpu.dot_dimension_numbers<[1], [0], [0], [1], [0, 0, 1, 1], [], []>} : vector<2x32xf32>, vector<32x128xf32>, vector<2x128xf32> -> vector<2x128xf32>
    %c6_322 = arith.constant 6 : index
    %c0_323 = arith.constant 0 : index
    %824 = vector.load %arg20[%c6_322, %c0_323] : memref<16x256xf32, #tpu.memory_space<vmem>>, vector<2x128xf32>
    %825 = arith.addf %824, %822 : vector<2x128xf32>
    %c8_324 = arith.constant 8 : index
    %c128_325 = arith.constant 128 : index
    %826 = vector.load %arg20[%c8_324, %c128_325] : memref<16x256xf32, #tpu.memory_space<vmem>>, vector<2x128xf32>
    %827 = arith.addf %826, %823 : vector<2x128xf32>
    %828 = tpu.concatenate %825, %827 in 1 : vector<2x128xf32>, vector<2x128xf32> -> vector<2x256xf32>
    %829 = arith.negf %828 : vector<2x256xf32>
    %830 = math.exp %829 : vector<2x256xf32>
    %cst_326 = arith.constant 1.000000e+00 : f32
    %831 = vector.broadcast %cst_326 : f32 to vector<2x256xf32>
    %832 = arith.addf %831, %830 : vector<2x256xf32>
    %833 = arith.divf %831, %832 : vector<2x256xf32>
    %834 = math.tanh %828 : vector<2x256xf32>
    %835 = vector.extract_strided_slice %833 {offsets = [0, 32], sizes = [2, 32], strides = [1, 1]} : vector<2x256xf32> to vector<2x32xf32>
    %836 = arith.mulf %835, %807 : vector<2x32xf32>
    %837 = vector.extract_strided_slice %833 {offsets = [0, 0], sizes = [2, 32], strides = [1, 1]} : vector<2x256xf32> to vector<2x32xf32>
    %838 = vector.extract_strided_slice %834 {offsets = [0, 64], sizes = [2, 32], strides = [1, 1]} : vector<2x256xf32> to vector<2x32xf32>
    %839 = arith.mulf %837, %838 : vector<2x32xf32>
    %840 = arith.addf %836, %839 : vector<2x32xf32>
    %841 = vector.extract_strided_slice %833 {offsets = [0, 160], sizes = [2, 32], strides = [1, 1]} : vector<2x256xf32> to vector<2x32xf32>
    %842 = arith.mulf %841, %813 : vector<2x32xf32>
    %843 = vector.extract_strided_slice %833 {offsets = [0, 128], sizes = [2, 32], strides = [1, 1]} : vector<2x256xf32> to vector<2x32xf32>
    %844 = vector.extract_strided_slice %834 {offsets = [0, 192], sizes = [2, 32], strides = [1, 1]} : vector<2x256xf32> to vector<2x32xf32>
    %845 = arith.mulf %843, %844 : vector<2x32xf32>
    %846 = arith.addf %842, %845 : vector<2x32xf32>
    %847 = vector.extract_strided_slice %833 {offsets = [0, 96], sizes = [2, 32], strides = [1, 1]} : vector<2x256xf32> to vector<2x32xf32>
    %848 = math.tanh %840 : vector<2x32xf32>
    %849 = arith.mulf %847, %848 : vector<2x32xf32>
    %850 = vector.extract_strided_slice %833 {offsets = [0, 224], sizes = [2, 32], strides = [1, 1]} : vector<2x256xf32> to vector<2x32xf32>
    %851 = math.tanh %846 : vector<2x32xf32>
    %852 = arith.mulf %850, %851 : vector<2x32xf32>
    %c6_327 = arith.constant 6 : index
    %c0_328 = arith.constant 0 : index
    %853 = vector.load %arg21[%c6_327, %c0_328] : memref<16x256xf32, #tpu.memory_space<vmem>>, vector<2x32xf32>
    tpu.vector_store %arg21[%c6_327, %c0_328], %849 {strides = array<i32>} : memref<16x256xf32, #tpu.memory_space<vmem>>, vector<2x32xf32>,
    %c8_329 = arith.constant 8 : index
    %c128_330 = arith.constant 128 : index
    %854 = vector.load %arg21[%c8_329, %c128_330] : memref<16x256xf32, #tpu.memory_space<vmem>>, vector<2x32xf32>
    tpu.vector_store %arg21[%c8_329, %c128_330], %852 {strides = array<i32>} : memref<16x256xf32, #tpu.memory_space<vmem>>, vector<2x32xf32>,
    %cst_331 = arith.constant dense<0.000000e+00> : vector<2x128xf32>
    %855 = tpu.matmul %849, %717, %cst_331 {dimension_numbers = #tpu.dot_dimension_numbers<[1], [0], [0], [1], [0, 0, 1, 1], [], []>} : vector<2x32xf32>, vector<32x128xf32>, vector<2x128xf32> -> vector<2x128xf32>
    %cst_332 = arith.constant dense<0.000000e+00> : vector<2x128xf32>
    %856 = tpu.matmul %852, %718, %cst_332 {dimension_numbers = #tpu.dot_dimension_numbers<[1], [0], [0], [1], [0, 0, 1, 1], [], []>} : vector<2x32xf32>, vector<32x128xf32>, vector<2x128xf32> -> vector<2x128xf32>
    %c8_333 = arith.constant 8 : index
    %c0_334 = arith.constant 0 : index
    %857 = vector.load %arg20[%c8_333, %c0_334] : memref<16x256xf32, #tpu.memory_space<vmem>>, vector<2x128xf32>
    %858 = arith.addf %857, %855 : vector<2x128xf32>
    %c6_335 = arith.constant 6 : index
    %c128_336 = arith.constant 128 : index
    %859 = vector.load %arg20[%c6_335, %c128_336] : memref<16x256xf32, #tpu.memory_space<vmem>>, vector<2x128xf32>
    %860 = arith.addf %859, %856 : vector<2x128xf32>
    %861 = tpu.concatenate %858, %860 in 1 : vector<2x128xf32>, vector<2x128xf32> -> vector<2x256xf32>
    %862 = arith.negf %861 : vector<2x256xf32>
    %863 = math.exp %862 : vector<2x256xf32>
    %cst_337 = arith.constant 1.000000e+00 : f32
    %864 = vector.broadcast %cst_337 : f32 to vector<2x256xf32>
    %865 = arith.addf %864, %863 : vector<2x256xf32>
    %866 = arith.divf %864, %865 : vector<2x256xf32>
    %867 = math.tanh %861 : vector<2x256xf32>
    %868 = vector.extract_strided_slice %866 {offsets = [0, 32], sizes = [2, 32], strides = [1, 1]} : vector<2x256xf32> to vector<2x32xf32>
    %869 = arith.mulf %868, %840 : vector<2x32xf32>
    %870 = vector.extract_strided_slice %866 {offsets = [0, 0], sizes = [2, 32], strides = [1, 1]} : vector<2x256xf32> to vector<2x32xf32>
    %871 = vector.extract_strided_slice %867 {offsets = [0, 64], sizes = [2, 32], strides = [1, 1]} : vector<2x256xf32> to vector<2x32xf32>
    %872 = arith.mulf %870, %871 : vector<2x32xf32>
    %873 = arith.addf %869, %872 : vector<2x32xf32>
    %874 = vector.extract_strided_slice %866 {offsets = [0, 160], sizes = [2, 32], strides = [1, 1]} : vector<2x256xf32> to vector<2x32xf32>
    %875 = arith.mulf %874, %846 : vector<2x32xf32>
    %876 = vector.extract_strided_slice %866 {offsets = [0, 128], sizes = [2, 32], strides = [1, 1]} : vector<2x256xf32> to vector<2x32xf32>
    %877 = vector.extract_strided_slice %867 {offsets = [0, 192], sizes = [2, 32], strides = [1, 1]} : vector<2x256xf32> to vector<2x32xf32>
    %878 = arith.mulf %876, %877 : vector<2x32xf32>
    %879 = arith.addf %875, %878 : vector<2x32xf32>
    %880 = vector.extract_strided_slice %866 {offsets = [0, 96], sizes = [2, 32], strides = [1, 1]} : vector<2x256xf32> to vector<2x32xf32>
    %881 = math.tanh %873 : vector<2x32xf32>
    %882 = arith.mulf %880, %881 : vector<2x32xf32>
    %883 = vector.extract_strided_slice %866 {offsets = [0, 224], sizes = [2, 32], strides = [1, 1]} : vector<2x256xf32> to vector<2x32xf32>
    %884 = math.tanh %879 : vector<2x32xf32>
    %885 = arith.mulf %883, %884 : vector<2x32xf32>
    %c8_338 = arith.constant 8 : index
    %c0_339 = arith.constant 0 : index
    %886 = vector.load %arg21[%c8_338, %c0_339] : memref<16x256xf32, #tpu.memory_space<vmem>>, vector<2x32xf32>
    tpu.vector_store %arg21[%c8_338, %c0_339], %882 {strides = array<i32>} : memref<16x256xf32, #tpu.memory_space<vmem>>, vector<2x32xf32>,
    %c6_340 = arith.constant 6 : index
    %c128_341 = arith.constant 128 : index
    %887 = vector.load %arg21[%c6_340, %c128_341] : memref<16x256xf32, #tpu.memory_space<vmem>>, vector<2x32xf32>
    tpu.vector_store %arg21[%c6_340, %c128_341], %885 {strides = array<i32>} : memref<16x256xf32, #tpu.memory_space<vmem>>, vector<2x32xf32>,
    %cst_342 = arith.constant dense<0.000000e+00> : vector<2x128xf32>
    %888 = tpu.matmul %882, %717, %cst_342 {dimension_numbers = #tpu.dot_dimension_numbers<[1], [0], [0], [1], [0, 0, 1, 1], [], []>} : vector<2x32xf32>, vector<32x128xf32>, vector<2x128xf32> -> vector<2x128xf32>
    %cst_343 = arith.constant dense<0.000000e+00> : vector<2x128xf32>
    %889 = tpu.matmul %885, %718, %cst_343 {dimension_numbers = #tpu.dot_dimension_numbers<[1], [0], [0], [1], [0, 0, 1, 1], [], []>} : vector<2x32xf32>, vector<32x128xf32>, vector<2x128xf32> -> vector<2x128xf32>
    %c10_344 = arith.constant 10 : index
    %c0_345 = arith.constant 0 : index
    %890 = vector.load %arg20[%c10_344, %c0_345] : memref<16x256xf32, #tpu.memory_space<vmem>>, vector<2x128xf32>
    %891 = arith.addf %890, %888 : vector<2x128xf32>
    %c4_346 = arith.constant 4 : index
    %c128_347 = arith.constant 128 : index
    %892 = vector.load %arg20[%c4_346, %c128_347] : memref<16x256xf32, #tpu.memory_space<vmem>>, vector<2x128xf32>
    %893 = arith.addf %892, %889 : vector<2x128xf32>
    %894 = tpu.concatenate %891, %893 in 1 : vector<2x128xf32>, vector<2x128xf32> -> vector<2x256xf32>
    %895 = arith.negf %894 : vector<2x256xf32>
    %896 = math.exp %895 : vector<2x256xf32>
    %cst_348 = arith.constant 1.000000e+00 : f32
    %897 = vector.broadcast %cst_348 : f32 to vector<2x256xf32>
    %898 = arith.addf %897, %896 : vector<2x256xf32>
    %899 = arith.divf %897, %898 : vector<2x256xf32>
    %900 = math.tanh %894 : vector<2x256xf32>
    %901 = vector.extract_strided_slice %899 {offsets = [0, 32], sizes = [2, 32], strides = [1, 1]} : vector<2x256xf32> to vector<2x32xf32>
    %902 = arith.mulf %901, %873 : vector<2x32xf32>
    %903 = vector.extract_strided_slice %899 {offsets = [0, 0], sizes = [2, 32], strides = [1, 1]} : vector<2x256xf32> to vector<2x32xf32>
    %904 = vector.extract_strided_slice %900 {offsets = [0, 64], sizes = [2, 32], strides = [1, 1]} : vector<2x256xf32> to vector<2x32xf32>
    %905 = arith.mulf %903, %904 : vector<2x32xf32>
    %906 = arith.addf %902, %905 : vector<2x32xf32>
    %907 = vector.extract_strided_slice %899 {offsets = [0, 160], sizes = [2, 32], strides = [1, 1]} : vector<2x256xf32> to vector<2x32xf32>
    %908 = arith.mulf %907, %879 : vector<2x32xf32>
    %909 = vector.extract_strided_slice %899 {offsets = [0, 128], sizes = [2, 32], strides = [1, 1]} : vector<2x256xf32> to vector<2x32xf32>
    %910 = vector.extract_strided_slice %900 {offsets = [0, 192], sizes = [2, 32], strides = [1, 1]} : vector<2x256xf32> to vector<2x32xf32>
    %911 = arith.mulf %909, %910 : vector<2x32xf32>
    %912 = arith.addf %908, %911 : vector<2x32xf32>
    %913 = vector.extract_strided_slice %899 {offsets = [0, 96], sizes = [2, 32], strides = [1, 1]} : vector<2x256xf32> to vector<2x32xf32>
    %914 = math.tanh %906 : vector<2x32xf32>
    %915 = arith.mulf %913, %914 : vector<2x32xf32>
    %916 = vector.extract_strided_slice %899 {offsets = [0, 224], sizes = [2, 32], strides = [1, 1]} : vector<2x256xf32> to vector<2x32xf32>
    %917 = math.tanh %912 : vector<2x32xf32>
    %918 = arith.mulf %916, %917 : vector<2x32xf32>
    %c10_349 = arith.constant 10 : index
    %c0_350 = arith.constant 0 : index
    %919 = vector.load %arg21[%c10_349, %c0_350] : memref<16x256xf32, #tpu.memory_space<vmem>>, vector<2x32xf32>
    tpu.vector_store %arg21[%c10_349, %c0_350], %915 {strides = array<i32>} : memref<16x256xf32, #tpu.memory_space<vmem>>, vector<2x32xf32>,
    %c4_351 = arith.constant 4 : index
    %c128_352 = arith.constant 128 : index
    %920 = vector.load %arg21[%c4_351, %c128_352] : memref<16x256xf32, #tpu.memory_space<vmem>>, vector<2x32xf32>
    tpu.vector_store %arg21[%c4_351, %c128_352], %918 {strides = array<i32>} : memref<16x256xf32, #tpu.memory_space<vmem>>, vector<2x32xf32>,
    %cst_353 = arith.constant dense<0.000000e+00> : vector<2x128xf32>
    %921 = tpu.matmul %915, %717, %cst_353 {dimension_numbers = #tpu.dot_dimension_numbers<[1], [0], [0], [1], [0, 0, 1, 1], [], []>} : vector<2x32xf32>, vector<32x128xf32>, vector<2x128xf32> -> vector<2x128xf32>
    %cst_354 = arith.constant dense<0.000000e+00> : vector<2x128xf32>
    %922 = tpu.matmul %918, %718, %cst_354 {dimension_numbers = #tpu.dot_dimension_numbers<[1], [0], [0], [1], [0, 0, 1, 1], [], []>} : vector<2x32xf32>, vector<32x128xf32>, vector<2x128xf32> -> vector<2x128xf32>
    %c12_355 = arith.constant 12 : index
    %c0_356 = arith.constant 0 : index
    %923 = vector.load %arg20[%c12_355, %c0_356] : memref<16x256xf32, #tpu.memory_space<vmem>>, vector<2x128xf32>
    %924 = arith.addf %923, %921 : vector<2x128xf32>
    %c2_357 = arith.constant 2 : index
    %c128_358 = arith.constant 128 : index
    %925 = vector.load %arg20[%c2_357, %c128_358] : memref<16x256xf32, #tpu.memory_space<vmem>>, vector<2x128xf32>
    %926 = arith.addf %925, %922 : vector<2x128xf32>
    %927 = tpu.concatenate %924, %926 in 1 : vector<2x128xf32>, vector<2x128xf32> -> vector<2x256xf32>
    %928 = arith.negf %927 : vector<2x256xf32>
    %929 = math.exp %928 : vector<2x256xf32>
    %cst_359 = arith.constant 1.000000e+00 : f32
    %930 = vector.broadcast %cst_359 : f32 to vector<2x256xf32>
    %931 = arith.addf %930, %929 : vector<2x256xf32>
    %932 = arith.divf %930, %931 : vector<2x256xf32>
    %933 = math.tanh %927 : vector<2x256xf32>
    %934 = vector.extract_strided_slice %932 {offsets = [0, 32], sizes = [2, 32], strides = [1, 1]} : vector<2x256xf32> to vector<2x32xf32>
    %935 = arith.mulf %934, %906 : vector<2x32xf32>
    %936 = vector.extract_strided_slice %932 {offsets = [0, 0], sizes = [2, 32], strides = [1, 1]} : vector<2x256xf32> to vector<2x32xf32>
    %937 = vector.extract_strided_slice %933 {offsets = [0, 64], sizes = [2, 32], strides = [1, 1]} : vector<2x256xf32> to vector<2x32xf32>
    %938 = arith.mulf %936, %937 : vector<2x32xf32>
    %939 = arith.addf %935, %938 : vector<2x32xf32>
    %940 = vector.extract_strided_slice %932 {offsets = [0, 160], sizes = [2, 32], strides = [1, 1]} : vector<2x256xf32> to vector<2x32xf32>
    %941 = arith.mulf %940, %912 : vector<2x32xf32>
    %942 = vector.extract_strided_slice %932 {offsets = [0, 128], sizes = [2, 32], strides = [1, 1]} : vector<2x256xf32> to vector<2x32xf32>
    %943 = vector.extract_strided_slice %933 {offsets = [0, 192], sizes = [2, 32], strides = [1, 1]} : vector<2x256xf32> to vector<2x32xf32>
    %944 = arith.mulf %942, %943 : vector<2x32xf32>
    %945 = arith.addf %941, %944 : vector<2x32xf32>
    %946 = vector.extract_strided_slice %932 {offsets = [0, 96], sizes = [2, 32], strides = [1, 1]} : vector<2x256xf32> to vector<2x32xf32>
    %947 = math.tanh %939 : vector<2x32xf32>
    %948 = arith.mulf %946, %947 : vector<2x32xf32>
    %949 = vector.extract_strided_slice %932 {offsets = [0, 224], sizes = [2, 32], strides = [1, 1]} : vector<2x256xf32> to vector<2x32xf32>
    %950 = math.tanh %945 : vector<2x32xf32>
    %951 = arith.mulf %949, %950 : vector<2x32xf32>
    %c12_360 = arith.constant 12 : index
    %c0_361 = arith.constant 0 : index
    %952 = vector.load %arg21[%c12_360, %c0_361] : memref<16x256xf32, #tpu.memory_space<vmem>>, vector<2x32xf32>
    tpu.vector_store %arg21[%c12_360, %c0_361], %948 {strides = array<i32>} : memref<16x256xf32, #tpu.memory_space<vmem>>, vector<2x32xf32>,
    %c2_362 = arith.constant 2 : index
    %c128_363 = arith.constant 128 : index
    %953 = vector.load %arg21[%c2_362, %c128_363] : memref<16x256xf32, #tpu.memory_space<vmem>>, vector<2x32xf32>
    tpu.vector_store %arg21[%c2_362, %c128_363], %951 {strides = array<i32>} : memref<16x256xf32, #tpu.memory_space<vmem>>, vector<2x32xf32>,
    %cst_364 = arith.constant dense<0.000000e+00> : vector<2x128xf32>
    %954 = tpu.matmul %948, %717, %cst_364 {dimension_numbers = #tpu.dot_dimension_numbers<[1], [0], [0], [1], [0, 0, 1, 1], [], []>} : vector<2x32xf32>, vector<32x128xf32>, vector<2x128xf32> -> vector<2x128xf32>
    %cst_365 = arith.constant dense<0.000000e+00> : vector<2x128xf32>
    %955 = tpu.matmul %951, %718, %cst_365 {dimension_numbers = #tpu.dot_dimension_numbers<[1], [0], [0], [1], [0, 0, 1, 1], [], []>} : vector<2x32xf32>, vector<32x128xf32>, vector<2x128xf32> -> vector<2x128xf32>
    %c14_366 = arith.constant 14 : index
    %c0_367 = arith.constant 0 : index
    %956 = vector.load %arg20[%c14_366, %c0_367] : memref<16x256xf32, #tpu.memory_space<vmem>>, vector<2x128xf32>
    %957 = arith.addf %956, %954 : vector<2x128xf32>
    %c0_368 = arith.constant 0 : index
    %c128_369 = arith.constant 128 : index
    %958 = vector.load %arg20[%c0_368, %c128_369] : memref<16x256xf32, #tpu.memory_space<vmem>>, vector<2x128xf32>
    %959 = arith.addf %958, %955 : vector<2x128xf32>
    %960 = tpu.concatenate %957, %959 in 1 : vector<2x128xf32>, vector<2x128xf32> -> vector<2x256xf32>
    %961 = arith.negf %960 : vector<2x256xf32>
    %962 = math.exp %961 : vector<2x256xf32>
    %cst_370 = arith.constant 1.000000e+00 : f32
    %963 = vector.broadcast %cst_370 : f32 to vector<2x256xf32>
    %964 = arith.addf %963, %962 : vector<2x256xf32>
    %965 = arith.divf %963, %964 : vector<2x256xf32>
    %966 = math.tanh %960 : vector<2x256xf32>
    %967 = vector.extract_strided_slice %965 {offsets = [0, 32], sizes = [2, 32], strides = [1, 1]} : vector<2x256xf32> to vector<2x32xf32>
    %968 = arith.mulf %967, %939 : vector<2x32xf32>
    %969 = vector.extract_strided_slice %965 {offsets = [0, 0], sizes = [2, 32], strides = [1, 1]} : vector<2x256xf32> to vector<2x32xf32>
    %970 = vector.extract_strided_slice %966 {offsets = [0, 64], sizes = [2, 32], strides = [1, 1]} : vector<2x256xf32> to vector<2x32xf32>
    %971 = arith.mulf %969, %970 : vector<2x32xf32>
    %972 = arith.addf %968, %971 : vector<2x32xf32>
    %973 = vector.extract_strided_slice %965 {offsets = [0, 160], sizes = [2, 32], strides = [1, 1]} : vector<2x256xf32> to vector<2x32xf32>
    %974 = arith.mulf %973, %945 : vector<2x32xf32>
    %975 = vector.extract_strided_slice %965 {offsets = [0, 128], sizes = [2, 32], strides = [1, 1]} : vector<2x256xf32> to vector<2x32xf32>
    %976 = vector.extract_strided_slice %966 {offsets = [0, 192], sizes = [2, 32], strides = [1, 1]} : vector<2x256xf32> to vector<2x32xf32>
    %977 = arith.mulf %975, %976 : vector<2x32xf32>
    %978 = arith.addf %974, %977 : vector<2x32xf32>
    %979 = vector.extract_strided_slice %965 {offsets = [0, 96], sizes = [2, 32], strides = [1, 1]} : vector<2x256xf32> to vector<2x32xf32>
    %980 = math.tanh %972 : vector<2x32xf32>
    %981 = arith.mulf %979, %980 : vector<2x32xf32>
    %982 = vector.extract_strided_slice %965 {offsets = [0, 224], sizes = [2, 32], strides = [1, 1]} : vector<2x256xf32> to vector<2x32xf32>
    %983 = math.tanh %978 : vector<2x32xf32>
    %984 = arith.mulf %982, %983 : vector<2x32xf32>
    %c14_371 = arith.constant 14 : index
    %c0_372 = arith.constant 0 : index
    %985 = vector.load %arg21[%c14_371, %c0_372] : memref<16x256xf32, #tpu.memory_space<vmem>>, vector<2x32xf32>
    tpu.vector_store %arg21[%c14_371, %c0_372], %981 {strides = array<i32>} : memref<16x256xf32, #tpu.memory_space<vmem>>, vector<2x32xf32>,
    %c0_373 = arith.constant 0 : index
    %c128_374 = arith.constant 128 : index
    %986 = vector.load %arg21[%c0_373, %c128_374] : memref<16x256xf32, #tpu.memory_space<vmem>>, vector<2x32xf32>
    tpu.vector_store %arg21[%c0_373, %c128_374], %984 {strides = array<i32>} : memref<16x256xf32, #tpu.memory_space<vmem>>, vector<2x32xf32>,
    %c0_375 = arith.constant 0 : index
    %c0_376 = arith.constant 0 : index
    %987 = vector.load %arg21[%c0_375, %c0_376] : memref<16x256xf32, #tpu.memory_space<vmem>>, vector<16x256xf32>
    %c0_377 = arith.constant 0 : index
    %c0_378 = arith.constant 0 : index
    %988 = vector.load %arg15[%c0_377, %c0_378] : memref<256x256xf32, #tpu.memory_space<vmem>>, vector<256x256xf32>
    %cst_379 = arith.constant dense<0.000000e+00> : vector<16x256xf32>
    %989 = tpu.matmul %987, %988, %cst_379 {dimension_numbers = #tpu.dot_dimension_numbers<[1], [0], [0], [1], [0, 0, 1, 1], [], []>} : vector<16x256xf32>, vector<256x256xf32>, vector<16x256xf32> -> vector<16x256xf32>
    %c0_380 = arith.constant 0 : index
    %c0_381 = arith.constant 0 : index
    %990 = vector.load %arg16[%c0_380, %c0_381] : memref<1x256xf32, #tpu.memory_space<vmem>>, vector<1x256xf32>
    %991 = vector.broadcast %990 : vector<1x256xf32> to vector<16x256xf32>
    %992 = arith.addf %989, %991 : vector<16x256xf32>
    %993 = arith.negf %992 : vector<16x256xf32>
    %994 = math.exp %993 : vector<16x256xf32>
    %cst_382 = arith.constant 1.000000e+00 : f32
    %995 = vector.broadcast %cst_382 : f32 to vector<16x256xf32>
    %996 = arith.addf %995, %994 : vector<16x256xf32>
    %997 = arith.divf %995, %996 : vector<16x256xf32>
    %c0_383 = arith.constant 0 : index
    %c0_384 = arith.constant 0 : index
    %998 = vector.load %arg17[%c0_383, %c0_384] : memref<16x256xf32, #tpu.memory_space<vmem>>, vector<16x256xf32>
    tpu.vector_store %arg17[%c0_383, %c0_384], %997 {strides = array<i32>} : memref<16x256xf32, #tpu.memory_space<vmem>>, vector<16x256xf32>,
    return
  }
  func.func @transform_0(%arg0: i32) -> (i32, i32) {
    %c0_i32 = arith.constant 0 : i32
    %c0_i32_0 = arith.constant 0 : i32
    %c0_i32_1 = arith.constant 0 : i32
    return %c0_i32, %c0_i32_0 : i32, i32
  }
  func.func @transform_1(%arg0: i32) -> (i32, i32) {
    %c0_i32 = arith.constant 0 : i32
    %c0_i32_0 = arith.constant 0 : i32
    %c0_i32_1 = arith.constant 0 : i32
    return %c0_i32, %c0_i32_0 : i32, i32
  }
  func.func @transform_2(%arg0: i32) -> (i32, i32) {
    %c0_i32 = arith.constant 0 : i32
    %c0_i32_0 = arith.constant 0 : i32
    %c0_i32_1 = arith.constant 0 : i32
    return %c0_i32, %c0_i32_0 : i32, i32
  }
  func.func @transform_3(%arg0: i32) -> (i32, i32) {
    %c0_i32 = arith.constant 0 : i32
    %c0_i32_0 = arith.constant 0 : i32
    %c0_i32_1 = arith.constant 0 : i32
    return %c0_i32, %c0_i32_0 : i32, i32
  }
  func.func @transform_4(%arg0: i32) -> (i32, i32) {
    %c0_i32 = arith.constant 0 : i32
    %c0_i32_0 = arith.constant 0 : i32
    %c0_i32_1 = arith.constant 0 : i32
    return %c0_i32, %c0_i32_0 : i32, i32
  }
  func.func @transform_5(%arg0: i32) -> (i32, i32) {
    %c0_i32 = arith.constant 0 : i32
    %c0_i32_0 = arith.constant 0 : i32
    %c0_i32_1 = arith.constant 0 : i32
    return %c0_i32, %c0_i32_0 : i32, i32
  }
  func.func @transform_6(%arg0: i32) -> (i32, i32) {
    %c0_i32 = arith.constant 0 : i32
    %c0_i32_0 = arith.constant 0 : i32
    %c0_i32_1 = arith.constant 0 : i32
    return %c0_i32, %c0_i32_0 : i32, i32
  }
  func.func @transform_7(%arg0: i32) -> (i32, i32) {
    %c0_i32 = arith.constant 0 : i32
    %c0_i32_0 = arith.constant 0 : i32
    %c0_i32_1 = arith.constant 0 : i32
    return %c0_i32, %c0_i32_0 : i32, i32
  }
  func.func @transform_8(%arg0: i32) -> (i32, i32) {
    %c0_i32 = arith.constant 0 : i32
    %c0_i32_0 = arith.constant 0 : i32
    %c0_i32_1 = arith.constant 0 : i32
    return %c0_i32, %c0_i32_0 : i32, i32
  }
  func.func @transform_9(%arg0: i32) -> (i32, i32) {
    %c0_i32 = arith.constant 0 : i32
    %c0_i32_0 = arith.constant 0 : i32
    %c0_i32_1 = arith.constant 0 : i32
    return %c0_i32, %c0_i32_0 : i32, i32
  }
  func.func @transform_10(%arg0: i32) -> (i32, i32) {
    %c0_i32 = arith.constant 0 : i32
    %c0_i32_0 = arith.constant 0 : i32
    %c0_i32_1 = arith.constant 0 : i32
    return %c0_i32, %c0_i32_0 : i32, i32
  }
  func.func @transform_11(%arg0: i32) -> (i32, i32) {
    %c0_i32 = arith.constant 0 : i32
    %c0_i32_0 = arith.constant 0 : i32
    %c0_i32_1 = arith.constant 0 : i32
    return %c0_i32, %c0_i32_0 : i32, i32
  }
  func.func @transform_12(%arg0: i32) -> (i32, i32) {
    %c0_i32 = arith.constant 0 : i32
    %c0_i32_0 = arith.constant 0 : i32
    %c0_i32_1 = arith.constant 0 : i32
    return %c0_i32, %c0_i32_0 : i32, i32
  }
  func.func @transform_13(%arg0: i32) -> (i32, i32) {
    %c0_i32 = arith.constant 0 : i32
    %c0_i32_0 = arith.constant 0 : i32
    %c0_i32_1 = arith.constant 0 : i32
    return %c0_i32, %c0_i32_0 : i32, i32
  }
  func.func @transform_14(%arg0: i32) -> (i32, i32) {
    %c0_i32 = arith.constant 0 : i32
    %c0_i32_0 = arith.constant 0 : i32
    %c0_i32_1 = arith.constant 0 : i32
    return %c0_i32, %c0_i32_0 : i32, i32
  }
  func.func @transform_15(%arg0: i32) -> (i32, i32) {
    %c0_i32 = arith.constant 0 : i32
    %c0_i32_0 = arith.constant 0 : i32
    %c0_i32_1 = arith.constant 0 : i32
    return %c0_i32, %c0_i32_0 : i32, i32
  }
  func.func @transform_16(%arg0: i32) -> (i32, i32) {
    %c0_i32 = arith.constant 0 : i32
    %c0_i32_0 = arith.constant 0 : i32
    %c0_i32_1 = arith.constant 0 : i32
    return %c0_i32, %c0_i32_0 : i32, i32
  }
  func.func @transform_17(%arg0: i32) -> (i32, i32, i32) {
    %c0_i32 = arith.constant 0 : i32
    %c0_i32_0 = arith.constant 0 : i32
    %c0_i32_1 = arith.constant 0 : i32
    %c0_i32_2 = arith.constant 0 : i32
    return %c0_i32, %c0_i32_0, %c0_i32_1 : i32, i32, i32
  }
}

</mosaic_0001>

<bundles_post_ra>
// kernel: _lambda_.1
= control target key start
LH: loop header
LB: loop body
LE: loop exit
PB: predicated region body
PF: predicated region fallthrough
CT: control target
= control target key end

     0   :  { %s9091_s0 = inlined_call_operand.vmem [shape: f32[160,128], index: 0, kind: input, shape index: {}]   ;;  %s9092_s1 = inlined_call_operand.vmem [shape: f32[128,256], index: 1, kind: input, shape index: {}]   ;;  %s9093_s2 = inlined_call_operand.vmem [shape: f32[640,256], index: 2, kind: input, shape index: {}]   ;;  %s9094_s3 = inlined_call_operand.vmem [shape: f32[1,256], index: 3, kind: input, shape index: {}]   ;;  %s9095_s4 = inlined_call_operand.vmem [shape: f32[256,256], index: 4, kind: input, shape index: {}]   ;;  %s9096_s5 = inlined_call_operand.vmem [shape: f32[1,256], index: 5, kind: input, shape index: {}]   ;;  %s9097_s6 = inlined_call_operand.vmem [shape: f32[256,256], index: 6, kind: input, shape index: {}]   ;;  %s9098_s7 = inlined_call_operand.vmem [shape: f32[1,256], index: 7, kind: input, shape index: {}]   ;;  %s9099_s8 = inlined_call_operand.vmem [shape: f32[32,128], index: 8, kind: input, shape index: {}]   ;;  %s9100_s9 = inlined_call_operand.vmem [shape: f32[32,128], index: 9, kind: input, shape index: {}]   ;;  %s9101_s10 = inlined_call_operand.hbm [shape: f32[32,128], index: 10, kind: input, shape index: {}]   ;;  %s9102_s11 = inlined_call_operand.hbm [shape: f32[32,128], index: 11, kind: input, shape index: {}]   ;;  %s9103_s12 = inlined_call_operand.hbm [shape: f32[32,128], index: 12, kind: input, shape index: {}]   ;;  %s9104_s13 = inlined_call_operand.hbm [shape: f32[32,128], index: 13, kind: input, shape index: {}]   ;;  %s9105_s14 = inlined_call_operand.vmem [shape: f32[256,256], index: 14, kind: input, shape index: {}]   ;;  %s9106_s15 = inlined_call_operand.vmem [shape: f32[1,256], index: 15, kind: input, shape index: {}]   ;;  %s9107_s16 = inlined_call_operand.vmem [shape: f32[16,256], index: 16, kind: output, shape index: {0}]   ;;  %s9108_s17 = inlined_call_operand.vmem [shape: f32[2,16,128], index: 17, kind: output, shape index: {1}]  }
   0x1   :  { %9111 = sst [smem:[#allocation15_spill]] %s9091_s0 }
   0x2   :  { %9112 = sst [smem:[#allocation16_spill]] %s9092_s1 }
   0x3   :  { %23 = vsyncpa [#allocation6], 0 }
   0x4   :  { %24 = vsyncpa [#allocation8], 0 }
   0x5   :  { %25 = vsyncpa [#allocation11], 0  ;;  %s63_s26 = sshll.u32 %s9102_s11, 4  ;;  %s6134_s27 = smov [#allocation7]   ;;  %s64_s26 = int_to_ptr.hbm [resolvable:$true] %s63_s26 }
   0x6   :  { %s65_s28 = sshll.u32 %s6134_s27, 4  ;;  %s50_s30 = sshll.u32 %s9101_s10, 4  ;;  %s66_s28 = int_to_ptr.vmem [resolvable:$true] %s65_s28  ;;  %s51_s30 = int_to_ptr.hbm [resolvable:$true] %s50_s30 }
   0x7   :  { %s6135_s18 = smov 128   ;;  %s6136_s19 = smov 8  }
   0x8   :  { %71 = dma.hbm_to_vmem [thread:$0]  %s64_s26, 512, %s66_s28, [#allocation8], %s6135_s18, %s6135_s18, %s6136_s19  }
   0x9   :  { %s6137_s1 = smov [#allocation5]   ;;  %s76_s23 = sshll.u32 %s9103_s12, 4  ;;  %s77_s23 = int_to_ptr.hbm [resolvable:$true] %s76_s23 }
   0xa   :  { %s52_s20 = sshll.u32 %s6137_s1, 4  ;;  %s89_s25 = sshll.u32 %s9104_s13, 4  ;;  %s53_s20 = int_to_ptr.vmem [resolvable:$true] %s52_s20  ;;  %s90_s25 = int_to_ptr.hbm [resolvable:$true] %s89_s25 }
   0xb   :  { %58 = dma.hbm_to_vmem [thread:$0]  %s51_s30, 512, %s53_s20, [#allocation6], %s6135_s18, %s6135_s18, %s6136_s19  }
   0xc   :  { %s6138_s27 = smov [#allocation9]   ;;  %s6139_s10 = smov [#allocation10]  }
   0xd   :  { %s78_s29 = sshll.u32 %s6138_s27, 4  ;;  %s91_s26 = sshll.u32 %s6139_s10, 4  ;;  %s79_s29 = int_to_ptr.vmem [resolvable:$true] %s78_s29  ;;  %s92_s26 = int_to_ptr.vmem [resolvable:$true] %s91_s26 }
   0xe   :  { %84 = dma.hbm_to_vmem [thread:$0]  %s77_s23, 512, %s79_s29, [#allocation8], %s6135_s18, %s6135_s18, %s6136_s19  }
   0xf   :  { %97 = dma.hbm_to_vmem [thread:$0]  %s90_s25, 512, %s92_s26, [#allocation11], %s6135_s18, %s6135_s18, %s6136_s19  }
  0x10   :  { %6128 = dma.done.wait [#allocation6], 512  }
  0x11   :  { %6129 = vsyncadd [#allocation6], 4294966784 }
  0x12   :  { %6130 = dma.done.wait [#allocation8], 1024  }
  0x13   :  { %6131 = vsyncadd [#allocation8], 4294966272 }
  0x14   :  { %6132 = dma.done.wait [#allocation11], 512  }
  0x15   :  { %6133 = vsyncadd [#allocation11], 4294966784  ;;  %s9113_s0 = sld [smem:[#allocation16_spill]]  ;;  %v895_v44 = vld [vmem:[%s9093_s2 + $0xf0] sm:$0xff]  ;;  %v893_v45 = vld [vmem:[%s9093_s2 + $0xe0] sm:$0xff]  ;;  %s6142_s26 = smov 32  }
  0x16   :  { %s9114_s24 = sld [smem:[#allocation15_spill]]  ;;  %1031 = vmatpush.msra.mxu2 %v895_v44  ;;  %v891_v47 = vld [vmem:[%s9093_s2 + $0xd0] sm:$0xff]  ;;  %v889_v48 = vld [vmem:[%s9093_s2 + $0xc0] sm:$0xff] }
  0x17   :  { %v887_v49 = vld [vmem:[%s9093_s2 + $0xb0] sm:$0xff]  ;;  %v885_v50 = vld [vmem:[%s9093_s2 + $0xa0] sm:$0xff] }
  0x18   :  { %1032 = vmatpush.msra.mxu2 %v893_v45  ;;  %v883_v52 = vld [vmem:[%s9093_s2 + $0x90] sm:$0xff]  ;;  %v881_v53 = vld [vmem:[%s9093_s2 + $0x80] sm:$0xff] }
  0x19   :  { %v879_v54 = vld [vmem:[%s9093_s2 + $0x70] sm:$0xff]  ;;  %v877_v55 = vld [vmem:[%s9093_s2 + $0x60] sm:$0xff] }
  0x1a   :  { %1033 = vmatpush.msra.mxu2 %v891_v47  ;;  %v875_v57 = vld [vmem:[%s9093_s2 + $0x50] sm:$0xff]  ;;  %v873_v58 = vld [vmem:[%s9093_s2 + $0x40] sm:$0xff] }
  0x1b   :  { %v168_v0 = vld [vmem:[%s9113_s0 + $0xf0] sm:$0xff]  ;;  %v169_v1 = vld [vmem:[%s9113_s0 + $0xf8] sm:$0xff]  ;;  %v166_v2 = vld [vmem:[%s9113_s0 + $0xe0] sm:$0xff] }
  0x1c   :  { %170 = vmatpush.msra.mxu0 %v168_v0  ;;  %247 = vmatpush.msra.mxu1 %v169_v1  ;;  %v167_v3 = vld [vmem:[%s9113_s0 + $0xe8] sm:$0xff]  ;;  %v164_v4 = vld [vmem:[%s9113_s0 + $0xd0] sm:$0xff]  ;;  %v165_v5 = vld [vmem:[%s9113_s0 + $0xd8] sm:$0xff] }
  0x1d   :  { %v162_v6 = vld [vmem:[%s9113_s0 + $0xc0] sm:$0xff]  ;;  %v163_v7 = vld [vmem:[%s9113_s0 + $0xc8] sm:$0xff]  ;;  %v160_v8 = vld [vmem:[%s9113_s0 + $0xb0] sm:$0xff]  ;;  %1034 = vmatpush.msra.mxu2 %v889_v48 }
  0x1e   :  { %171 = vmatpush.msra.mxu0 %v166_v2  ;;  %248 = vmatpush.msra.mxu1 %v167_v3  ;;  %v161_v9 = vld [vmem:[%s9113_s0 + $0xb8] sm:$0xff]  ;;  %v158_v10 = vld [vmem:[%s9113_s0 + $0xa0] sm:$0xff]  ;;  %v159_v11 = vld [vmem:[%s9113_s0 + $0xa8] sm:$0xff] }
  0x1f   :  { %v156_v12 = vld [vmem:[%s9113_s0 + $0x90] sm:$0xff]  ;;  %v157_v13 = vld [vmem:[%s9113_s0 + $0x98] sm:$0xff]  ;;  %v154_v14 = vld [vmem:[%s9113_s0 + $0x80] sm:$0xff]  ;;  %1035 = vmatpush.msra.mxu2 %v887_v49 }
  0x20   :  { %172 = vmatpush.msra.mxu0 %v164_v4  ;;  %249 = vmatpush.msra.mxu1 %v165_v5  ;;  %v155_v15 = vld [vmem:[%s9113_s0 + $0x88] sm:$0xff]  ;;  %v152_v16 = vld [vmem:[%s9113_s0 + $0x70] sm:$0xff]  ;;  %v153_v17 = vld [vmem:[%s9113_s0 + $0x78] sm:$0xff] }
  0x21   :  { %v150_v18 = vld [vmem:[%s9113_s0 + $0x60] sm:$0xff]  ;;  %v151_v19 = vld [vmem:[%s9113_s0 + $0x68] sm:$0xff]  ;;  %v148_v20 = vld [vmem:[%s9113_s0 + $0x50] sm:$0xff]  ;;  %1036 = vmatpush.msra.mxu2 %v885_v50 }
  0x22   :  { %173 = vmatpush.msra.mxu0 %v162_v6  ;;  %250 = vmatpush.msra.mxu1 %v163_v7  ;;  %v149_v21 = vld [vmem:[%s9113_s0 + $0x58] sm:$0xff]  ;;  %v146_v22 = vld [vmem:[%s9113_s0 + $0x40] sm:$0xff]  ;;  %v147_v23 = vld [vmem:[%s9113_s0 + $0x48] sm:$0xff] }
  0x23   :  { %v144_v24 = vld [vmem:[%s9113_s0 + $0x30] sm:$0xff]  ;;  %v145_v25 = vld [vmem:[%s9113_s0 + $0x38] sm:$0xff]  ;;  %v142_v26 = vld [vmem:[%s9113_s0 + $0x20] sm:$0xff]  ;;  %1037 = vmatpush.msra.mxu2 %v883_v52 }
  0x24   :  { %174 = vmatpush.msra.mxu0 %v160_v8  ;;  %251 = vmatpush.msra.mxu1 %v161_v9  ;;  %v143_v27 = vld [vmem:[%s9113_s0 + $0x28] sm:$0xff]  ;;  %v140_v28 = vld [vmem:[%s9113_s0 + $0x10] sm:$0xff]  ;;  %v141_v29 = vld [vmem:[%s9113_s0 + $0x18] sm:$0xff] }
  0x25   :  { %v138_v30 = vld [vmem:[%s9113_s0] sm:$0xff]  ;;  %v139_v31 = vld [vmem:[%s9113_s0 + $0x8] sm:$0xff]  ;;  %v120_v34 = vld [vmem:[%s9114_s24 + $0x10] sm:$0xff]  ;;  %1038 = vmatpush.msra.mxu2 %v881_v53 }
  0x26   :  { %175 = vmatpush.msra.mxu0 %v158_v10  ;;  %252 = vmatpush.msra.mxu1 %v159_v11  ;;  %v118_v32 = vld [vmem:[%s9114_s24] sm:$0xff]  ;;  %v119_v33 = vld [vmem:[%s9114_s24 + $0x8] sm:$0xff]  ;;  %v121_v35 = vld [vmem:[%s9114_s24 + $0x18] sm:$0xff] }
  0x27   :  { %v122_v36 = vld [vmem:[%s9114_s24 + $0x20] sm:$0xff]  ;;  %v123_v37 = vld [vmem:[%s9114_s24 + $0x28] sm:$0xff]  ;;  %v124_v38 = vld [vmem:[%s9114_s24 + $0x30] sm:$0xff]  ;;  %1039 = vmatpush.msra.mxu2 %v879_v54 }
  0x28   :  { %176 = vmatpush.msra.mxu0 %v156_v12  ;;  %253 = vmatpush.msra.mxu1 %v157_v13  ;;  %v125_v39 = vld [vmem:[%s9114_s24 + $0x38] sm:$0xff]  ;;  %v126_v40 = vld [vmem:[%s9114_s24 + $0x40] sm:$0xff]  ;;  %v127_v41 = vld [vmem:[%s9114_s24 + $0x48] sm:$0xff] }
  0x29   :  { %v128_v42 = vld [vmem:[%s9114_s24 + $0x50] sm:$0xff]  ;;  %v129_v43 = vld [vmem:[%s9114_s24 + $0x58] sm:$0xff]  ;;  %v130_v46 = vld [vmem:[%s9114_s24 + $0x60] sm:$0xff]  ;;  %1040 = vmatpush.msra.mxu2 %v877_v55 }
  0x2a   :  { %177 = vmatpush.msra.mxu0 %v154_v14  ;;  %254 = vmatpush.msra.mxu1 %v155_v15  ;;  %v131_v51 = vld [vmem:[%s9114_s24 + $0x68] sm:$0xff]  ;;  %v132_v56 = vld [vmem:[%s9114_s24 + $0x70] sm:$0xff]  ;;  %v869_v60 = vld [vmem:[%s9093_s2 + $0x20] sm:$0xff] }
  0x2b   :  { %1041 = vmatpush.msra.mxu2 %v875_v57  ;;  %v871_v59 = vld [vmem:[%s9093_s2 + $0x30] sm:$0xff]  ;;  %v133_v61 = vld [vmem:[%s9114_s24 + $0x78] sm:$0xff]  ;;  %v865_v63 = vld [vmem:[%s9093_s2] sm:$0xff] }
  0x2c   :  { %178 = vmatpush.msra.mxu0 %v152_v16  ;;  %255 = vmatpush.msra.mxu1 %v153_v17  ;;  %v867_v62 = vld [vmem:[%s9093_s2 + $0x10] sm:$0xff]  ;;  %v134_v3 = vld [vmem:[%s9114_s24 + $0x80] sm:$0xff]  ;;  %v135_v14 = vld [vmem:[%s9114_s24 + $0x88] sm:$0xff] }
  0x2d   :  { %1042 = vmatpush.msra.mxu2 %v873_v58  ;;  %v927_v0 = vld [vmem:[%s9093_s2 + $0x1f0] sm:$0xff]  ;;  %v925_v6 = vld [vmem:[%s9093_s2 + $0x1e0] sm:$0xff]  ;;  %v137_v44 = vld [vmem:[%s9114_s24 + $0x98] sm:$0xff] }
  0x2e   :  { %179 = vmatpush.msra.mxu0 %v150_v18  ;;  %256 = vmatpush.msra.mxu1 %v151_v19  ;;  %v923_v8 = vld [vmem:[%s9093_s2 + $0x1d0] sm:$0xff]  ;;  %v921_v10 = vld [vmem:[%s9093_s2 + $0x1c0] sm:$0xff] }
  0x2f   :  { %1043 = vmatpush.msra.mxu2 %v871_v59  ;;  %1054 = vmatpush.msra.mxu3 %v927_v0  ;;  %v919_v11 = vld [vmem:[%s9093_s2 + $0x1b0] sm:$0xff]  ;;  %v917_v17 = vld [vmem:[%s9093_s2 + $0x1a0] sm:$0xff] }
  0x30   :  { %180 = vmatpush.msra.mxu0 %v148_v20  ;;  %257 = vmatpush.msra.mxu1 %v149_v21  ;;  %v915_v19 = vld [vmem:[%s9093_s2 + $0x190] sm:$0xff]  ;;  %v901_v49 = vld [vmem:[%s9093_s2 + $0x120] sm:$0xff] }
  0x31   :  { %1044 = vmatpush.msra.mxu2 %v869_v60  ;;  %1055 = vmatpush.msra.mxu3 %v925_v6  ;;  %v951_v47 = vld [vmem:[%s9093_s2 + $0x2b0] sm:$0xff]  ;;  %v949_v52 = vld [vmem:[%s9093_s2 + $0x2a0] sm:$0xff] }
  0x32   :  { %181 = vmatpush.msra.mxu0 %v146_v22  ;;  %258 = vmatpush.msra.mxu1 %v147_v23  ;;  %v913_v22 = vld [vmem:[%s9093_s2 + $0x180] sm:$0xff]  ;;  %v899_v54 = vld [vmem:[%s9093_s2 + $0x110] sm:$0xff] }
  0x33   :  { %1045 = vmatpush.msra.mxu2 %v867_v62  ;;  %1056 = vmatpush.msra.mxu3 %v923_v8  ;;  %v897_v57 = vld [vmem:[%s9093_s2 + $0x100] sm:$0xff]  ;;  %v991_v60 = vld [vmem:[%s9093_s2 + $0x3f0] sm:$0xff] }
  0x34   :  { %182 = vmatpush.msra.mxu0 %v144_v24  ;;  %259 = vmatpush.msra.mxu1 %v145_v25  ;;  %v911_v24 = vld [vmem:[%s9093_s2 + $0x170] sm:$0xff]  ;;  %v945_v59 = vld [vmem:[%s9093_s2 + $0x280] sm:$0xff] }
  0x35   :  { %1046 = vmatpush.msra.mxu2 %v865_v63  ;;  %1057 = vmatpush.msra.mxu3 %v921_v10  ;;  %v987_v8 = vld [vmem:[%s9093_s2 + $0x3d0] sm:$0xff]  ;;  %v985_v10 = vld [vmem:[%s9093_s2 + $0x3c0] sm:$0xff] }
  0x36   :  { %183 = vmatpush.msra.mxu0 %v142_v26  ;;  %260 = vmatpush.msra.mxu1 %v143_v27  ;;  %v136_v27 = vld [vmem:[%s9114_s24 + $0x90] sm:$0xff] }
  0x37   :  { %1058 = vmatpush.msra.mxu3 %v919_v11  ;;  %v937_v11 = vld [vmem:[%s9093_s2 + $0x240] sm:$0xff] }
  0x38   :  { %184 = vmatpush.msra.mxu0 %v140_v28  ;;  %261 = vmatpush.msra.mxu1 %v141_v29  ;;  %v959_v29 = vld [vmem:[%s9093_s2 + $0x2f0] sm:$0xff] }
  0x39   :  { %1059 = vmatpush.msra.mxu3 %v917_v17  ;;  %1077 = vmatpush.msrb.mxu2 %v959_v29  ;;  %v935_v17 = vld [vmem:[%s9093_s2 + $0x230] sm:$0xff] }
  0x3a   :  { %185 = vmatpush.msra.mxu0 %v138_v30  ;;  %262 = vmatpush.msra.mxu1 %v139_v31  ;;  %v909_v30 = vld [vmem:[%s9093_s2 + $0x160] sm:$0xff] }
  0x3b   :  { %186 = vmatmul.f32.vlgmr.msra.gmra.mxu0 %v118_v32  ;;  %263 = vmatmul.f32.vlgmr.msra.gmra.mxu1 %v118_v32  ;;  %v957_v32 = vld [vmem:[%s9093_s2 + $0x2e0] sm:$0xff] }
  0x3c   :  { %1060 = vmatpush.msra.mxu3 %v915_v19  ;;  %1078 = vmatpush.msrb.mxu2 %v957_v32  ;;  %v933_v19 = vld [vmem:[%s9093_s2 + $0x220] sm:$0xff] }
  0x3d   :  { %v973_v32 = vld [vmem:[%s9093_s2 + $0x360] sm:$0xff] }
  0x3e   :  { %1061 = vmatpush.msra.mxu3 %v913_v22  ;;  %v977_v22 = vld [vmem:[%s9093_s2 + $0x380] sm:$0xff] }
  0x40   :  { %1062 = vmatpush.msra.mxu3 %v911_v24 }
  0x42   :  { %1063 = vmatpush.msra.mxu3 %v909_v30 }
  0x43   :  { %189 = vmatmul.f32.gmra.mxu0 %v119_v33  ;;  %266 = vmatmul.f32.gmra.mxu1 %v119_v33  ;;  %v907_v33 = vld [vmem:[%s9093_s2 + $0x150] sm:$0xff] }
  0x44   :  { %1064 = vmatpush.msra.mxu3 %v907_v33 }
  0x4b   :  { %192 = vmatmul.f32.gmra.mxu0 %v120_v34  ;;  %269 = vmatmul.f32.gmra.mxu1 %v120_v34 }
  0x53   :  { %195 = vmatmul.f32.gmra.mxu0 %v121_v35  ;;  %272 = vmatmul.f32.gmra.mxu1 %v121_v35  ;;  %v955_v35 = vld [vmem:[%s9093_s2 + $0x2d0] sm:$0xff] }
  0x54   :  { %1079 = vmatpush.msrb.mxu2 %v955_v35  ;;  %v1021_v35 = vld [vmem:[%s9093_s2 + $0x4e0] sm:$0xff] }
  0x5b   :  { %198 = vmatmul.f32.gmra.mxu0 %v122_v36  ;;  %275 = vmatmul.f32.gmra.mxu1 %v122_v36 }
  0x63   :  { %201 = vmatmul.f32.gmra.mxu0 %v123_v37  ;;  %278 = vmatmul.f32.gmra.mxu1 %v123_v37  ;;  %v905_v37 = vld [vmem:[%s9093_s2 + $0x140] sm:$0xff] }
  0x64   :  { %1065 = vmatpush.msra.mxu3 %v905_v37 }
  0x6b   :  { %204 = vmatmul.f32.gmra.mxu0 %v124_v38  ;;  %281 = vmatmul.f32.gmra.mxu1 %v124_v38 }
  0x73   :  { %207 = vmatmul.f32.gmra.mxu0 %v125_v39  ;;  %284 = vmatmul.f32.gmra.mxu1 %v125_v39 }
  0x7b   :  { %210 = vmatmul.f32.gmra.mxu0 %v126_v40  ;;  %287 = vmatmul.f32.gmra.mxu1 %v126_v40  ;;  %v953_v40 = vld [vmem:[%s9093_s2 + $0x2c0] sm:$0xff] }
  0x7c   :  { %1080 = vmatpush.msrb.mxu2 %v953_v40  ;;  %v969_v40 = vld [vmem:[%s9093_s2 + $0x340] sm:$0xff] }
  0x7e   :  { %1081 = vmatpush.msrb.mxu2 %v951_v47  ;;  %v967_v47 = vld [vmem:[%s9093_s2 + $0x330] sm:$0xff] }
  0x80   :  { %1082 = vmatpush.msrb.mxu2 %v949_v52 }
  0x83   :  { %213 = vmatmul.f32.gmra.mxu0 %v127_v41  ;;  %290 = vmatmul.f32.gmra.mxu1 %v127_v41  ;;  %v903_v41 = vld [vmem:[%s9093_s2 + $0x130] sm:$0xff] }
  0x84   :  { %1066 = vmatpush.msra.mxu3 %v903_v41 }
  0x86   :  { %1067 = vmatpush.msra.mxu3 %v901_v49 }
  0x88   :  { %1068 = vmatpush.msra.mxu3 %v899_v54 }
  0x8a   :  { %1069 = vmatpush.msra.mxu3 %v897_v57  ;;  %v963_v57 = vld [vmem:[%s9093_s2 + $0x310] sm:$0xff] }
  0x8b   :  { %216 = vmatmul.f32.gmra.mxu0 %v128_v42  ;;  %293 = vmatmul.f32.gmra.mxu1 %v128_v42 }
  0x8c   :  { %1100 = vmatpush.msrb.mxu3 %v991_v60  ;;  %v1009_v60 = vld [vmem:[%s9093_s2 + $0x480] sm:$0xff] }
  0x93   :  { %219 = vmatmul.f32.gmra.mxu0 %v129_v43  ;;  %296 = vmatmul.f32.gmra.mxu1 %v129_v43 }
  0x9b   :  { %222 = vmatmul.f32.gmra.mxu0 %v130_v46  ;;  %299 = vmatmul.f32.gmra.mxu1 %v130_v46 }
  0xa3   :  { %225 = vmatmul.f32.gmra.mxu0 %v131_v51  ;;  %302 = vmatmul.f32.gmra.mxu1 %v131_v51 }
  0xab   :  { %228 = vmatmul.f32.gmra.mxu0 %v132_v56  ;;  %305 = vmatmul.f32.gmra.mxu1 %v132_v56  ;;  %v947_v56 = vld [vmem:[%s9093_s2 + $0x290] sm:$0xff] }
  0xac   :  { %1083 = vmatpush.msrb.mxu2 %v947_v56 }
  0xae   :  { %1084 = vmatpush.msrb.mxu2 %v945_v59  ;;  %v961_v59 = vld [vmem:[%s9093_s2 + $0x300] sm:$0xff] }
  0xb3   :  { %231 = vmatmul.f32.gmra.mxu0 %v133_v61  ;;  %308 = vmatmul.f32.gmra.mxu1 %v133_v61 }
  0xb8   :  { %v6440_v1 = vpop.f32.mrf.mxu0  ;;  %v6442_v2 = vpop.f32.mrf.mxu1 }
  0xb9   :  { %v368_v4 = vmul.f32 %v6440_v1, %v6440_v1  ;;  %v370_v5 = vmul.f32 %v6442_v2, %v6442_v2  ;;  %v6626_v24 = vadd.f32 1.1920929e-07, %v6442_v2 }
  0xbb   :  { %v372_v7 = vadd.f32 %v370_v5, %v368_v4  ;;  %234 = vmatmul.f32.gmra.mxu0 %v134_v3  ;;  %311 = vmatmul.f32.gmra.mxu1 %v134_v3  ;;  %v943_v3 = vld [vmem:[%s9093_s2 + $0x270] sm:$0xff]  ;;  %v989_v4 = vld [vmem:[%s9093_s2 + $0x3e0] sm:$0xff] }
  0xbc   :  { %1101 = vmatpush.msrb.mxu3 %v989_v4  ;;  %1085 = vmatpush.msrb.mxu2 %v943_v3 }
  0xbd   :  { %v6457_v9 = vmax.f32 %v372_v7, 1.1920929e-07  ;;  %v941_v7 = vld [vmem:[%s9093_s2 + $0x260] sm:$0xff] }
  0xbe   :  { %1102 = vmatpush.msrb.mxu3 %v987_v8  ;;  %1086 = vmatpush.msrb.mxu2 %v941_v7  ;;  %v1007_v7 = vld [vmem:[%s9093_s2 + $0x470] sm:$0xff] }
  0xbf   :  { %5578 = vrsqrt.f32 %v6457_v9  ;;  %vm383_vm0 = vcmp.eq.f32.partialorder %v6457_v9, inf  ;;  %v386_v48 = vand.u32 2147483648, %v6457_v9  ;;  %vm385_vm1 = vcmp.eq.f32.partialorder %v6457_v9, 0.0 }
  0xc0   :  { %v6466_v12 = vpop.f32.mrf.mxu0  ;;  %v6468_v13 = vpop.f32.mrf.mxu1  ;;  %1103 = vmatpush.msrb.mxu3 %v985_v10 }
  0xc1   :  { %v369_v15 = vmul.f32 %v6466_v12, %v6466_v12  ;;  %v371_v16 = vmul.f32 %v6468_v13, %v6468_v13  ;;  %v6655_v37 = vadd.f32 1.1920929e-07, %v6468_v13 }
  0xc3   :  { %v373_v18 = vadd.f32 %v371_v16, %v369_v15  ;;  %237 = vmatmul.f32.gmra.mxu0 %v135_v14  ;;  %314 = vmatmul.f32.gmra.mxu1 %v135_v14  ;;  %v983_v14 = vld [vmem:[%s9093_s2 + $0x3b0] sm:$0xff] }
  0xc4   :  { %1104 = vmatpush.msrb.mxu3 %v983_v14  ;;  %v1005_v14 = vld [vmem:[%s9093_s2 + $0x460] sm:$0xff] }
  0xc5   :  { %v5579_v20 = vpop.eup %5578  ;;  %v6483_v21 = vmax.f32 %v373_v18, 1.1920929e-07  ;;  %v981_v18 = vld [vmem:[%s9093_s2 + $0x3a0] sm:$0xff] }
  0xc6   :  { %v377_v23 = vmul.f32 %v5579_v20, %v6457_v9  ;;  %1105 = vmatpush.msrb.mxu3 %v981_v18 }
  0xc7   :  { %5580 = vrsqrt.f32 %v6483_v21  ;;  %vm395_vm2 = vcmp.eq.f32.partialorder %v6483_v21, inf  ;;  %v398_v0 = vand.u32 2147483648, %v6483_v21  ;;  %vm397_vm3 = vcmp.eq.f32.partialorder %v6483_v21, 0.0 }
  0xc8   :  { %v6493_v25 = vpop.f32.mrf.mxu0  ;;  %v6495_v26 = vpop.f32.mrf.mxu1  ;;  %v378_v28 = vmul.f32 %v5579_v20, %v377_v23  ;;  %v6623_v23 = vadd.f32 1.1920929e-07, %v6440_v1 }
  0xc9   :  { %v6689_v52 = vadd.f32 1.1920929e-07, %v6493_v25  ;;  %v6692_v54 = vadd.f32 1.1920929e-07, %v6495_v26  ;;  %v1011_v25 = vld [vmem:[%s9093_s2 + $0x490] sm:$0xff] }
  0xca   :  { %v379_v31 = vmul.f32 0.5, %v378_v28  ;;  %v975_v28 = vld [vmem:[%s9093_s2 + $0x370] sm:$0xff]  ;;  %v597_v33 = vmul.f32 %v6623_v23, %v6623_v23 }
  0xcb   :  { %240 = vmatmul.f32.gmra.mxu0 %v136_v27  ;;  %317 = vmatmul.f32.gmra.mxu1 %v136_v27  ;;  %v929_v27 = vld [vmem:[%s9093_s2 + $0x200] sm:$0xff]  ;;  %v675_v26 = vmul.f32 %v6689_v52, %v6689_v52 }
  0xcc   :  { %v380_v34 = vsub.f32 1.5, %v379_v31  ;;  %v1023_v31 = vld [vmem:[%s9093_s2 + $0x4f0] sm:$0xff] }
  0xcd   :  { %v5581_v36 = vpop.eup %5580 }
  0xce   :  { %v381_v38 = vmul.f32 %v5579_v20, %v380_v34  ;;  %v389_v39 = vmul.f32 %v5581_v36, %v6483_v21  ;;  %v979_v20 = vld [vmem:[%s9093_s2 + $0x390] sm:$0xff]  ;;  %v599_v34 = vmul.f32 %v6626_v24, %v6626_v24 }
  0xcf   :  { %1106 = vmatpush.msrb.mxu3 %v979_v20 }
  0xd0   :  { %v6525_v42 = vpop.f32.mrf.mxu0  ;;  %v6527_v43 = vpop.f32.mrf.mxu1  ;;  %v382_v45 = vmul.f32 %v381_v38, %v6457_v9  ;;  %v390_v46 = vmul.f32 %v5581_v36, %v389_v39  ;;  %v971_v38 = vld [vmem:[%s9093_s2 + $0x350] sm:$0xff]  ;;  %v6666_v41 = vadd.f32 %v599_v34, %v597_v33 }
  0xd1   :  { %1107 = vmatpush.msrb.mxu3 %v977_v22  ;;  %v1019_v39 = vld [vmem:[%s9093_s2 + $0x4d0] sm:$0xff]  ;;  %v6746_v20 = vadd.f32 1.1920929e-07, %v6525_v42 }
  0xd2   :  { %v384_v50 = vsel %vm383_vm0, %v6457_v9, %v382_v45  ;;  %v391_v51 = vmul.f32 0.5, %v390_v46  ;;  %v939_v9 = vld [vmem:[%s9093_s2 + $0x250] sm:$0xff]  ;;  %v600_v46 = vmul.f32 %v6655_v37, %v6655_v37  ;;  %5582 = vrsqrt.f32 %v6666_v41 }
  0xd3   :  { %243 = vmatmul.f32.gmra.mxu0 %v137_v44  ;;  %320 = vmatmul.f32.gmra.mxu1 %v137_v44  ;;  %v6546_v53 = vsel %vm385_vm1, %v386_v48, %v384_v50  ;;  %v1017_v44 = vld [vmem:[%s9093_s2 + $0x4c0] sm:$0xff]  ;;  %v1015_v50 = vld [vmem:[%s9093_s2 + $0x4b0] sm:$0xff]  ;;  %v676_v34 = vmul.f32 %v6746_v20, %v6746_v20  ;;  %vm609_vm4 = vweird.f32 %v6666_v41 }
  0xd4   :  { %1047 = vmatmul.f32.vlgmr.msra.gmra.mxu2 %v6546_v53  ;;  %v392_v55 = vsub.f32 1.5, %v391_v51  ;;  %1108 = vmatpush.msrb.mxu3 %v975_v28  ;;  %v965_v51 = vld [vmem:[%s9093_s2 + $0x320] sm:$0xff] }
  0xd5   :  { %1087 = vmatpush.msrb.mxu2 %v939_v9 }
  0xd6   :  { %v393_v58 = vmul.f32 %v5581_v36, %v392_v55  ;;  %1109 = vmatpush.msrb.mxu3 %v973_v32  ;;  %v6652_v36 = vadd.f32 1.1920929e-07, %v6466_v12  ;;  %v1013_v55 = vld [vmem:[%s9093_s2 + $0x4a0] sm:$0xff] }
  0xd7   :  { %1088 = vmatpush.msrb.mxu2 %v937_v11 }
  0xd8   :  { %v6564_v61 = vpop.f32.mrf.mxu0  ;;  %v6566_v62 = vpop.f32.mrf.mxu1  ;;  %v394_v63 = vmul.f32 %v393_v58, %v6483_v21  ;;  %1110 = vmatpush.msrb.mxu3 %v971_v38  ;;  %v598_v45 = vmul.f32 %v6652_v36, %v6652_v36  ;;  %v677_v58 = vmul.f32 %v6692_v54, %v6692_v54 }
  0xd9   :  { %1089 = vmatpush.msrb.mxu2 %v935_v17 }
  0xda   :  { %v396_v5 = vsel %vm395_vm2, %v6483_v21, %v394_v63  ;;  %v931_v21 = vld [vmem:[%s9093_s2 + $0x210] sm:$0xff]  ;;  %1111 = vmatpush.msrb.mxu3 %v969_v40  ;;  %v6698_v56 = vadd.f32 %v600_v46, %v598_v45  ;;  %v6717_v63 = vpop.eup %5582  ;;  %v6726_v8 = vadd.f32 %v677_v58, %v675_v26 }
  0xdb   :  { %v6579_v6 = vsel %vm397_vm3, %v398_v0, %v396_v5  ;;  %1090 = vmatpush.msrb.mxu2 %v933_v19  ;;  %v604_v11 = vmul.f32 %v6717_v63, %v6666_v41  ;;  %v1003_v19 = vld [vmem:[%s9093_s2 + $0x450] sm:$0xff]  ;;  %vm610_vm5 = vweird.f32 %v6717_v63 }
  0xdc   :  { %1050 = vmatmul.f32.gmra.mxu2 %v6579_v6  ;;  %1112 = vmatpush.msrb.mxu3 %v967_v47  ;;  %5584 = vrsqrt.f32 %v6698_v56  ;;  %vm619_vm7 = vweird.f32 %v6698_v56  ;;  %vm6844_vm9 = vmor %vm609_vm4, %vm610_vm5  ;;  %vm687_vm0 = vweird.f32 %v6726_v8 }
  0xdd   :  { %1091 = vmatpush.msrb.mxu2 %v931_v21  ;;  %5586 = vrsqrt.f32 %v6726_v8  ;;  %v6749_v21 = vadd.f32 1.1920929e-07, %v6527_v43  ;;  %v605_v22 = vmul.f32 %v6717_v63, %v604_v11  ;;  %v999_v43 = vld [vmem:[%s9093_s2 + $0x430] sm:$0xff] }
  0xde   :  { %1113 = vmatpush.msrb.mxu3 %v965_v51  ;;  %v6783_v51 = vadd.f32 1.1920929e-07, %v6566_v62  ;;  %v993_v62 = vld [vmem:[%s9093_s2 + $0x400] sm:$0xff] }
  0xdf   :  { %1092 = vmatpush.msrb.mxu2 %v929_v27  ;;  %v1001_v27 = vld [vmem:[%s9093_s2 + $0x440] sm:$0xff]  ;;  %v606_v40 = vmul.f32 0.5, %v605_v22 }
  0xe0   :  { %v6600_v15 = vpop.f32.mrf.mxu0  ;;  %v6602_v16 = vpop.f32.mrf.mxu1  ;;  %1114 = vmatpush.msrb.mxu3 %v963_v57  ;;  %v995_v57 = vld [vmem:[%s9093_s2 + $0x410] sm:$0xff]  ;;  %v755_v11 = vmul.f32 %v6783_v51, %v6783_v51 }
  0xe1   :  { %1123 = vmatpush.msra.mxu2 %v1023_v31 }
  0xe2   :  { %1115 = vmatpush.msrb.mxu3 %v961_v59  ;;  %v6737_v17 = vpop.eup %5584  ;;  %v6800_v59 = vadd.f32 1.1920929e-07, %v6600_v15 }
  0xe3   :  { %1124 = vmatpush.msra.mxu2 %v1021_v35  ;;  %v614_v32 = vmul.f32 %v6737_v17, %v6698_v56  ;;  %v678_v35 = vmul.f32 %v6749_v21, %v6749_v21  ;;  %v6776_v45 = vpop.eup %5586  ;;  %vm620_vm11 = vweird.f32 %v6737_v17  ;;  %v892_v56 = vld [vmem:[%s9093_s2 + $0xd8] sm:$0xff] }
  0xe4   :  { %v682_v58 = vmul.f32 %v6776_v45, %v6726_v8  ;;  %vm6910_vm14 = vmor %vm619_vm7, %vm620_vm11  ;;  %vm688_vm1 = vweird.f32 %v6776_v45 }
  0xe5   :  { %1125 = vmatpush.msra.mxu2 %v1019_v39  ;;  %v615_v46 = vmul.f32 %v6737_v17, %v614_v32  ;;  %vm6981_vm4 = vmor %vm687_vm0, %vm688_vm1 }
  0xe7   :  { %1126 = vmatpush.msra.mxu2 %v1017_v44  ;;  %v997_v44 = vld [vmem:[%s9093_s2 + $0x420] sm:$0xff] }
  0xe8   :  { %v6634_v29 = vpop.f32.mrf.mxu0  ;;  %v6636_v30 = vpop.f32.mrf.mxu1 }
  0xe9   :  { %1127 = vmatpush.msra.mxu2 %v1015_v50  ;;  %v6780_v50 = vadd.f32 1.1920929e-07, %v6564_v61  ;;  %v607_v61 = vsub.f32 1.5, %v606_v40  ;;  %v6860_v41 = vadd.f32 1.1920929e-07, %v6634_v29 }
  0xeb   :  { %1128 = vmatpush.msra.mxu2 %v1013_v55 }
  0xed   :  { %1129 = vmatpush.msra.mxu2 %v1011_v25  ;;  %v6790_v25 = vadd.f32 %v678_v35, %v676_v34 }
  0xef   :  { %1130 = vmatpush.msra.mxu2 %v1009_v60  ;;  %v6803_v60 = vadd.f32 1.1920929e-07, %v6602_v16  ;;  %v683_v16 = vmul.f32 %v6776_v45, %v682_v58 }
  0xf0   :  { %v6678_v48 = vpop.f32.mrf.mxu0  ;;  %v6680_v49 = vpop.f32.mrf.mxu1 }
  0xf1   :  { %1131 = vmatpush.msra.mxu2 %v1007_v7  ;;  %v756_v32 = vmul.f32 %v6803_v60, %v6803_v60 }
  0xf3   :  { %1132 = vmatpush.msra.mxu2 %v1005_v14 }
  0xf5   :  { %1133 = vmatpush.msra.mxu2 %v1003_v19 }
  0xf7   :  { %1134 = vmatpush.msra.mxu2 %v1001_v27 }
  0xf8   :  { %v211_v0 = vpop.f32.mrf.mxu0  ;;  %v288_v3 = vpop.f32.mrf.mxu1 }
  0xf9   :  { %v6719_v4 = vadd.f32 1.1920929e-07, %v211_v0  ;;  %v6721_v5 = vadd.f32 1.1920929e-07, %v288_v3  ;;  %1135 = vmatpush.msra.mxu2 %v999_v43 }
  0xfb   :  { %v571_v9 = vmul.f32 %v6719_v4, %v6719_v4  ;;  %v573_v10 = vmul.f32 %v6721_v5, %v6721_v5  ;;  %1136 = vmatpush.msra.mxu2 %v997_v44  ;;  %v567_v44 = vmul.f32 %v6626_v24, %v6721_v5 }
  0xfd   :  { %v6739_v18 = vadd.f32 %v573_v10, %v571_v9  ;;  %1137 = vmatpush.msra.mxu2 %v995_v57  ;;  %v616_v9 = vmul.f32 0.5, %v615_v46  ;;  %v753_v10 = vmul.f32 %v6780_v50, %v6780_v50 }
  0xff   :  { %5588 = vrsqrt.f32 %v6739_v18  ;;  %1138 = vmatpush.msra.mxu2 %v993_v62  ;;  %v6828_v35 = vadd.f32 %v755_v11, %v753_v10  ;;  %v617_v40 = vsub.f32 1.5, %v616_v9  ;;  %vm583_vm8 = vweird.f32 %v6739_v18 }
 0x100   :  { %v214_v28 = vpop.f32.mrf.mxu0  ;;  %v291_v31 = vpop.f32.mrf.mxu1 }
 0x101   :  { %v6758_v42 = vadd.f32 1.1920929e-07, %v214_v28  ;;  %v6760_v33 = vadd.f32 1.1920929e-07, %v291_v31  ;;  %v608_v28 = vmul.f32 %v6717_v63, %v607_v61  ;;  %v754_v31 = vmul.f32 %v6800_v59, %v6800_v59 }
 0x102   :  { %v618_v29 = vmul.f32 %v6737_v17, %v617_v40 }
 0x103   :  { %v572_v38 = vmul.f32 %v6758_v42, %v6758_v42  ;;  %v574_v39 = vmul.f32 %v6760_v33, %v6760_v33  ;;  %v612_v24 = vsel %vm6844_vm9, %v6717_v63, %v608_v28  ;;  %v568_v40 = vmul.f32 %v6655_v37, %v6760_v33 }
 0x105   :  { %v5589_v47 = vpop.eup %5588  ;;  %v6785_v55 = vadd.f32 %v574_v39, %v572_v38  ;;  %v565_v38 = vmul.f32 %v6623_v23, %v6719_v4  ;;  %v6848_v4 = vmul.f32 0.5, %v683_v16 }
 0x106   :  { %v578_v26 = vmul.f32 %v5589_v47, %v6739_v18  ;;  %vm584_vm6 = vweird.f32 %v5589_v47  ;;  %v6857_v18 = vadd.f32 %v756_v32, %v754_v31  ;;  %v831_v31 = vmul.f32 %v6860_v41, %v6860_v41 }
 0x107   :  { %5590 = vrsqrt.f32 %v6785_v55  ;;  %vm585_vm10 = vmor %vm583_vm8, %vm584_vm6  ;;  %v569_v9 = vadd.f32 %v567_v44, %v565_v38  ;;  %v685_v11 = vsub.f32 1.5, %v6848_v4  ;;  %vm593_vm13 = vweird.f32 %v6785_v55 }
 0x108   :  { %v217_v0 = vpop.f32.mrf.mxu0  ;;  %v294_v3 = vpop.f32.mrf.mxu1  ;;  %v579_v7 = vmul.f32 %v5589_v47, %v578_v26  ;;  %5592 = vrsqrt.f32 %v6790_v25  ;;  %vm697_vm6 = vweird.f32 %v6790_v25 }
 0x109   :  { %v6809_v14 = vadd.f32 1.1920929e-07, %v217_v0  ;;  %v6811_v19 = vadd.f32 1.1920929e-07, %v294_v3  ;;  %v6864_v0 = vadd.f32 1.1920929e-07, %v6636_v30 }
 0x10a   :  { %v580_v15 = vmul.f32 0.5, %v579_v7 }
 0x10b   :  { %v649_v22 = vmul.f32 %v6809_v14, %v6809_v14  ;;  %v651_v27 = vmul.f32 %v6811_v19, %v6811_v19  ;;  %v833_v32 = vmul.f32 %v6864_v0, %v6864_v0 }
 0x10c   :  { %v581_v43 = vsub.f32 1.5, %v580_v15 }
 0x10d   :  { %v6826_v34 = vpop.eup %5590  ;;  %v6832_v39 = vadd.f32 %v651_v27, %v649_v22  ;;  %v896_v22 = vld [vmem:[%s9093_s2 + $0xf8] sm:$0xff] }
 0x10e   :  { %v588_v46 = vmul.f32 %v6826_v34, %v6785_v55  ;;  %v582_v57 = vmul.f32 %v5589_v47, %v581_v43  ;;  %v6855_v5 = vpop.eup %5592  ;;  %vm594_vm12 = vweird.f32 %v6826_v34  ;;  %v566_v43 = vmul.f32 %v6652_v36, %v6758_v42 }
 0x10f   :  { %5594 = vrsqrt.f32 %v6832_v39  ;;  %vm595_vm15 = vmor %vm593_vm13, %vm594_vm12  ;;  %vm661_vm3 = vweird.f32 %v6832_v39  ;;  %vm698_vm7 = vweird.f32 %v6855_v5 }
 0x110   :  { %v220_v26 = vpop.f32.mrf.mxu0  ;;  %v297_v58 = vpop.f32.mrf.mxu1  ;;  %v586_v61 = vsel %vm585_vm10, %v5589_v47, %v582_v57  ;;  %v589_v62 = vmul.f32 %v6826_v34, %v588_v46  ;;  %5596 = vrsqrt.f32 %v6828_v35  ;;  %v692_v47 = vmul.f32 %v6855_v5, %v6790_v25  ;;  %v894_v46 = vld [vmem:[%s9093_s2 + $0xe8] sm:$0xff]  ;;  %vm7054_vm10 = vmor %vm697_vm6, %vm698_vm7  ;;  %v876_v25 = vld [vmem:[%s9093_s2 + $0x58] sm:$0xff] }
 0x111   :  { %v6866_v3 = vadd.f32 1.1920929e-07, %v220_v26  ;;  %v6868_v63 = vadd.f32 1.1920929e-07, %v297_v58  ;;  %v623_v7 = vmul.f32 %v612_v24, %v586_v61  ;;  %5598 = vrsqrt.f32 %v6857_v18 }
 0x112   :  { %v590_v10 = vmul.f32 0.5, %v589_v62  ;;  %v693_v37 = vmul.f32 %v6855_v5, %v692_v47  ;;  %v622_v24 = vsel %vm6910_vm14, %v6737_v17, %v618_v29  ;;  %v6929_v26 = vadd.f32 %v833_v32, %v831_v31 }
 0x113   :  { %v650_v30 = vmul.f32 %v6866_v3, %v6866_v3  ;;  %v652_v15 = vmul.f32 %v6868_v63, %v6868_v63  ;;  %v6880_v16 = vmul.f32 %v623_v7, %v569_v9  ;;  %v686_v17 = vmul.f32 %v6776_v45, %v685_v11  ;;  %v888_v11 = vld [vmem:[%s9093_s2 + $0xb8] sm:$0xff] }
 0x114   :  { %v591_v27 = vsub.f32 1.5, %v590_v10  ;;  %v570_v10 = vadd.f32 %v568_v40, %v566_v43  ;;  %v6961_v43 = vadd.f32 1.1920929e-07, %v6680_v49  ;;  %vm765_vm14 = vweird.f32 %v6828_v35 }
 0x115   :  { %v6886_v28 = vpop.eup %5594  ;;  %v6894_v38 = vadd.f32 %v652_v15, %v650_v30  ;;  %1070 = vmatmul.f32.vlgmr.msra.gmra.mxu3 %v6880_v16  ;;  %v694_v15 = vmul.f32 0.5, %v693_v37 }
 0x116   :  { %v656_v44 = vmul.f32 %v6886_v28, %v6832_v39  ;;  %v592_v57 = vmul.f32 %v6826_v34, %v591_v27  ;;  %1146 = vmatpush.msra.mxu3 %v896_v22  ;;  %v6918_v42 = vpop.eup %5596  ;;  %v6949_v22 = vadd.f32 1.1920929e-07, %v6678_v48  ;;  %vm662_vm2 = vweird.f32 %v6886_v28 }
 0x117   :  { %5600 = vrsqrt.f32 %v6894_v38  ;;  %v6935_v7 = vpop.eup %5598  ;;  %v760_v29 = vmul.f32 %v6918_v42, %v6828_v35  ;;  %v643_v48 = vmul.f32 %v6689_v52, %v6809_v14  ;;  %vm663_vm5 = vmor %vm661_vm3, %vm662_vm2  ;;  %v690_v14 = vsel %vm6981_vm4, %v6776_v45, %v686_v17 }
 0x118   :  { %v657_v33 = vmul.f32 %v6886_v28, %v656_v44  ;;  %v223_v55 = vpop.f32.mrf.mxu0  ;;  %v300_v23 = vpop.f32.mrf.mxu1  ;;  %v596_v4 = vsel %vm595_vm15, %v6826_v34, %v592_v57  ;;  %1147 = vmatpush.msra.mxu3 %v894_v46  ;;  %v890_v34 = vld [vmem:[%s9093_s2 + $0xc8] sm:$0xff]  ;;  %5602 = vrsqrt.f32 %v6929_v26  ;;  %v645_v44 = vmul.f32 %v6692_v54, %v6811_v19 }
 0x119   :  { %v6931_v58 = vadd.f32 1.1920929e-07, %v223_v55  ;;  %v6933_v61 = vadd.f32 1.1920929e-07, %v300_v23  ;;  %v624_v62 = vmul.f32 %v622_v24, %v596_v4  ;;  %v886_v57 = vld [vmem:[%s9093_s2 + $0xa8] sm:$0xff]  ;;  %v761_v54 = vmul.f32 %v6918_v42, %v760_v29 }
 0x11a   :  { %v658_v9 = vmul.f32 0.5, %v657_v33  ;;  %1148 = vmatpush.msra.mxu3 %v892_v56  ;;  %v695_v19 = vsub.f32 1.5, %v694_v15  ;;  %v770_v8 = vmul.f32 %v6935_v7, %v6857_v18  ;;  %v832_v39 = vmul.f32 %v6949_v22, %v6949_v22  ;;  %v884_v33 = vld [vmem:[%s9093_s2 + $0x98] sm:$0xff] }
 0x11b   :  { %v727_v47 = vmul.f32 %v6931_v58, %v6931_v58  ;;  %v729_v30 = vmul.f32 %v6933_v61, %v6933_v61  ;;  %v6951_v31 = vmul.f32 %v624_v62, %v570_v10  ;;  %v834_v45 = vmul.f32 %v6961_v43, %v6961_v43  ;;  %v880_v15 = vld [vmem:[%s9093_s2 + $0x78] sm:$0xff] }
 0x11c   :  { %v659_v27 = vsub.f32 1.5, %v658_v9  ;;  %1149 = vmatpush.msra.mxu3 %v890_v34  ;;  %v647_v62 = vadd.f32 %v645_v44, %v643_v48  ;;  %v882_v9 = vld [vmem:[%s9093_s2 + $0x88] sm:$0xff]  ;;  %v696_v29 = vmul.f32 %v6855_v5, %v695_v19  ;;  %v646_v52 = vmul.f32 %v6749_v21, %v6868_v63 }
 0x11d   :  { %v6957_v32 = vpop.eup %5600  ;;  %v6965_v40 = vadd.f32 %v729_v30, %v727_v47  ;;  %1073 = vmatmul.f32.gmra.mxu3 %v6951_v31  ;;  %v762_v47 = vmul.f32 0.5, %v761_v54  ;;  %v7030_v44 = vadd.f32 %v834_v45, %v832_v39  ;;  %vm671_vm9 = vweird.f32 %v6894_v38 }
 0x11e   :  { %v666_v46 = vmul.f32 %v6957_v32, %v6894_v38  ;;  %v660_v49 = vmul.f32 %v6886_v28, %v659_v27  ;;  %1150 = vmatpush.msra.mxu3 %v888_v11  ;;  %v928_v27 = vld [vmem:[%s9093_s2 + $0x1f8] sm:$0xff]  ;;  %vm672_vm8 = vweird.f32 %v6957_v32  ;;  %vm766_vm12 = vweird.f32 %v6918_v42 }
 0x11f   :  { %5604 = vrsqrt.f32 %v6965_v40  ;;  %vm673_vm11 = vmor %vm671_vm9, %vm672_vm8  ;;  %v763_v19 = vsub.f32 1.5, %v762_v47  ;;  %v922_v47 = vld [vmem:[%s9093_s2 + $0x1c8] sm:$0xff]  ;;  %vm739_vm15 = vweird.f32 %v6965_v40  ;;  %vm776_vm2 = vweird.f32 %v6935_v7 }
 0x120   :  { %v226_v36 = vpop.f32.mrf.mxu0  ;;  %v303_v37 = vpop.f32.mrf.mxu1  ;;  %v664_v55 = vsel %vm663_vm5, %v6886_v28, %v660_v49  ;;  %v667_v23 = vmul.f32 %v6957_v32, %v666_v46  ;;  %1151 = vmatpush.msra.mxu3 %v886_v57  ;;  %v644_v46 = vmul.f32 %v6746_v20, %v6866_v3  ;;  %v771_v49 = vmul.f32 %v6935_v7, %v770_v8  ;;  %v926_v20 = vld [vmem:[%s9093_s2 + $0x1e8] sm:$0xff]  ;;  %vm7120_vm0 = vmor %vm765_vm14, %vm766_vm12 }
 0x121   :  { %v7003_v56 = vadd.f32 1.1920929e-07, %v226_v36  ;;  %v7005_v4 = vadd.f32 1.1920929e-07, %v303_v37  ;;  %v701_v24 = vmul.f32 %v690_v14, %v664_v55  ;;  %v7011_v28 = vpop.eup %5602  ;;  %v878_v14 = vld [vmem:[%s9093_s2 + $0x68] sm:$0xff]  ;;  %v700_v37 = vsel %vm7054_vm10, %v6855_v5, %v696_v29 }
 0x122   :  { %v668_v34 = vmul.f32 0.5, %v667_v23  ;;  %1152 = vmatpush.msra.mxu3 %v884_v33  ;;  %v838_v63 = vmul.f32 %v7011_v28, %v6929_v26  ;;  %v924_v23 = vld [vmem:[%s9093_s2 + $0x1d8] sm:$0xff]  ;;  %v648_v5 = vadd.f32 %v646_v52, %v644_v46  ;;  %v721_v46 = vmul.f32 %v6780_v50, %v6931_v58  ;;  %v870_v50 = vld [vmem:[%s9093_s2 + $0x28] sm:$0xff] }
 0x123   :  { %v728_v10 = vmul.f32 %v7003_v56, %v7003_v56  ;;  %v730_v17 = vmul.f32 %v7005_v4, %v7005_v4  ;;  %v7019_v30 = vmul.f32 %v701_v24, %v647_v62  ;;  %v772_v24 = vmul.f32 0.5, %v771_v49 }
 0x124   :  { %v669_v11 = vsub.f32 1.5, %v668_v34  ;;  %1153 = vmatpush.msra.mxu3 %v882_v9  ;;  %v839_v9 = vmul.f32 %v7011_v28, %v838_v63  ;;  %v918_v63 = vld [vmem:[%s9093_s2 + $0x1a8] sm:$0xff]  ;;  %vm775_vm5 = vweird.f32 %v6857_v18  ;;  %vm844_vm7 = vweird.f32 %v7011_v28 }
 0x125   :  { %v7028_v48 = vpop.eup %5604  ;;  %v7034_v57 = vadd.f32 %v730_v17, %v728_v10  ;;  %1093 = vmatmul.f32.vlgmr.msrb.gmra.mxu2 %v7019_v30  ;;  %v773_v52 = vsub.f32 1.5, %v772_v24  ;;  %vm7185_vm6 = vmor %vm775_vm5, %vm776_vm2  ;;  %vm853_vm2 = vweird.f32 %v7030_v44 }
 0x126   :  { %v734_v54 = vmul.f32 %v7028_v48, %v6965_v40  ;;  %v670_v3 = vmul.f32 %v6957_v32, %v669_v11  ;;  %1154 = vmatpush.msra.mxu3 %v880_v15  ;;  %1169 = vmatpush.msrb.mxu2 %v928_v27  ;;  %v872_v15 = vld [vmem:[%s9093_s2 + $0x38] sm:$0xff]  ;;  %vm740_vm13 = vweird.f32 %v7028_v48  ;;  %v764_v27 = vmul.f32 %v6918_v42, %v763_v19 }
 0x127   :  { %5606 = vrsqrt.f32 %v7034_v57  ;;  %v840_v35 = vmul.f32 0.5, %v839_v9  ;;  %vm741_vm1 = vmor %vm739_vm15, %vm740_vm13  ;;  %vm749_vm3 = vweird.f32 %v7034_v57 }
 0x128   :  { %v735_v38 = vmul.f32 %v7028_v48, %v734_v54  ;;  %v229_v8 = vpop.f32.mrf.mxu0  ;;  %v306_v39 = vpop.f32.mrf.mxu1  ;;  %v674_v36 = vsel %vm673_vm11, %v6957_v32, %v670_v3  ;;  %1155 = vmatpush.msra.mxu3 %v878_v14  ;;  %1170 = vmatpush.msrb.mxu2 %v926_v20  ;;  %5608 = vrsqrt.f32 %v7030_v44  ;;  %v874_v32 = vld [vmem:[%s9093_s2 + $0x48] sm:$0xff]  ;;  %v723_v54 = vmul.f32 %v6783_v51, %v6933_v61  ;;  %v920_v20 = vld [vmem:[%s9093_s2 + $0x1b8] sm:$0xff] }
 0x129   :  { %v7071_v33 = vadd.f32 1.1920929e-07, %v229_v8  ;;  %v7073_v55 = vadd.f32 1.1920929e-07, %v306_v39  ;;  %v702_v45 = vmul.f32 %v700_v37, %v674_v36  ;;  %v910_v51 = vld [vmem:[%s9093_s2 + $0x168] sm:$0xff]  ;;  %vm843_vm11 = vweird.f32 %v6929_v26  ;;  %v904_v26 = vld [vmem:[%s9093_s2 + $0x138] sm:$0xff] }
 0x12a   :  { %v736_v62 = vmul.f32 0.5, %v735_v38  ;;  %1156 = vmatpush.msra.mxu3 %v876_v25  ;;  %1171 = vmatpush.msrb.mxu2 %v924_v23  ;;  %v768_v38 = vsel %vm7120_vm0, %v6918_v42, %v764_v27  ;;  %v868_v25 = vld [vmem:[%s9093_s2 + $0x18] sm:$0xff]  ;;  %v725_v37 = vadd.f32 %v723_v54, %v721_v46  ;;  %v841_v42 = vsub.f32 1.5, %v840_v35  ;;  %vm7247_vm12 = vmor %vm843_vm11, %vm844_vm7 }
 0x12b   :  { %v805_v34 = vmul.f32 %v7071_v33, %v7071_v33  ;;  %v807_v10 = vmul.f32 %v7073_v55, %v7073_v55  ;;  %v7088_v29 = vmul.f32 %v702_v45, %v648_v5  ;;  %v774_v45 = vmul.f32 %v6935_v7, %v773_v52  ;;  %v866_v5 = vld [vmem:[%s9093_s2 + $0x8] sm:$0xff]  ;;  %v912_v54 = vld [vmem:[%s9093_s2 + $0x178] sm:$0xff] }
 0x12c   :  { %v737_v17 = vsub.f32 1.5, %v736_v62  ;;  %1157 = vmatpush.msra.mxu3 %v874_v32  ;;  %1172 = vmatpush.msrb.mxu2 %v922_v47  ;;  %v722_v27 = vmul.f32 %v6800_v59, %v7003_v56  ;;  %v724_v46 = vmul.f32 %v6803_v60, %v7005_v4  ;;  %v958_v59 = vld [vmem:[%s9093_s2 + $0x2e8] sm:$0xff] }
 0x12d   :  { %v7098_v11 = vpop.eup %5606  ;;  %v7102_v49 = vadd.f32 %v807_v10, %v805_v34  ;;  %1096 = vmatmul.f32.gmra.mxu2 %v7088_v29  ;;  %v914_v34 = vld [vmem:[%s9093_s2 + $0x188] sm:$0xff]  ;;  %v778_v56 = vsel %vm7185_vm6, %v6935_v7, %v774_v45 }
 0x12e   :  { %v744_v14 = vmul.f32 %v7098_v11, %v7034_v57  ;;  %v738_v58 = vmul.f32 %v7028_v48, %v737_v17  ;;  %1158 = vmatpush.msra.mxu3 %v872_v15  ;;  %v7127_v61 = vpop.eup %5608  ;;  %1173 = vmatpush.msrb.mxu2 %v920_v20  ;;  %vm750_vm4 = vweird.f32 %v7098_v11  ;;  %v960_v15 = vld [vmem:[%s9093_s2 + $0x2f8] sm:$0xff]  ;;  %v842_v20 = vmul.f32 %v7011_v28, %v841_v42  ;;  %v954_v42 = vld [vmem:[%s9093_s2 + $0x2c8] sm:$0xff] }
 0x12f   :  { %5610 = vrsqrt.f32 %v7102_v49  ;;  %v848_v24 = vmul.f32 %v7127_v61, %v7030_v44  ;;  %vm7199_vm8 = vmor %vm749_vm3, %vm750_vm4  ;;  %vm817_vm9 = vweird.f32 %v7102_v49  ;;  %vm854_vm0 = vweird.f32 %v7127_v61 }
 0x130   :  { %v745_v3 = vmul.f32 %v7098_v11, %v744_v14  ;;  %v232_v21 = vpop.f32.mrf.mxu0  ;;  %v309_v40 = vpop.f32.mrf.mxu1  ;;  %v742_v19 = vsel %vm741_vm1, %v7028_v48, %v738_v58  ;;  %1159 = vmatpush.msra.mxu3 %v870_v50  ;;  %v916_v48 = vld [vmem:[%s9093_s2 + $0x198] sm:$0xff]  ;;  %1174 = vmatpush.msrb.mxu2 %v918_v63  ;;  %vm855_vm3 = vmor %vm853_vm2, %vm854_vm0 }
 0x131   :  { %v7137_v8 = vadd.f32 1.1920929e-07, %v232_v21  ;;  %v7139_v39 = vadd.f32 1.1920929e-07, %v309_v40  ;;  %v779_v36 = vmul.f32 %v768_v38, %v742_v19  ;;  %v849_v35 = vmul.f32 %v7127_v61, %v848_v24  ;;  %v956_v63 = vld [vmem:[%s9093_s2 + $0x2d8] sm:$0xff] }
 0x132   :  { %v746_v23 = vmul.f32 0.5, %v745_v3  ;;  %1160 = vmatpush.msra.mxu3 %v868_v25  ;;  %1175 = vmatpush.msrb.mxu2 %v916_v48  ;;  %v799_v19 = vmul.f32 %v6860_v41, %v7071_v33  ;;  %v726_v25 = vadd.f32 %v724_v46, %v722_v27  ;;  %v950_v46 = vld [vmem:[%s9093_s2 + $0x2a8] sm:$0xff] }
 0x133   :  { %v806_v62 = vmul.f32 %v7137_v8, %v7137_v8  ;;  %v808_v32 = vmul.f32 %v7139_v39, %v7139_v39  ;;  %v7158_v9 = vmul.f32 %v779_v36, %v725_v37  ;;  %v801_v37 = vmul.f32 %v6864_v0, %v7073_v55  ;;  %v906_v0 = vld [vmem:[%s9093_s2 + $0x148] sm:$0xff] }
 0x134   :  { %v747_v10 = vsub.f32 1.5, %v746_v23  ;;  %1161 = vmatpush.msra.mxu3 %v866_v5  ;;  %1176 = vmatpush.msrb.mxu2 %v914_v34 }
 0x135   :  { %v7165_v17 = vpop.eup %5610  ;;  %v7167_v47 = vadd.f32 %v808_v32, %v806_v62  ;;  %1116 = vmatmul.f32.vlgmr.msrb.gmra.mxu3 %v7158_v9  ;;  %v952_v32 = vld [vmem:[%s9093_s2 + $0x2b8] sm:$0xff] }
 0x136   :  { %v812_v52 = vmul.f32 %v7165_v17, %v7102_v49  ;;  %v748_v14 = vmul.f32 %v7098_v11, %v747_v10  ;;  %1192 = vmatpush.msrb.mxu3 %v960_v15  ;;  %1177 = vmatpush.msrb.mxu2 %v912_v54  ;;  %vm818_vm10 = vweird.f32 %v7165_v17  ;;  %v846_v15 = vsel %vm7247_vm12, %v7011_v28, %v842_v20  ;;  %v902_v28 = vld [vmem:[%s9093_s2 + $0x128] sm:$0xff] }
 0x137   :  { %5612 = vrsqrt.f32 %v7167_v47  ;;  %vm819_vm13 = vmor %vm817_vm9, %vm818_vm10  ;;  %vm827_vm14 = vweird.f32 %v7167_v47 }
 0x138   :  { %v813_v4 = vmul.f32 %v7165_v17, %v812_v52  ;;  %v235_v50 = vpop.f32.mrf.mxu0  ;;  %v312_v58 = vpop.f32.mrf.mxu1  ;;  %v752_v57 = vsel %vm7199_vm8, %v7098_v11, %v748_v14  ;;  %1193 = vmatpush.msrb.mxu3 %v958_v59  ;;  %v908_v11 = vld [vmem:[%s9093_s2 + $0x158] sm:$0xff]  ;;  %1178 = vmatpush.msrb.mxu2 %v910_v51  ;;  %v803_v52 = vadd.f32 %v801_v37, %v799_v19  ;;  %v850_v59 = vmul.f32 0.5, %v849_v35 }
 0x139   :  { %v404_v7 = vsub.f32 %v6440_v1, %v235_v50  ;;  %v408_v3 = vmul.f32 %v235_v50, %v235_v50  ;;  %v406_v21 = vsub.f32 %v6442_v2, %v312_v58  ;;  %v410_v40 = vmul.f32 %v312_v58, %v312_v58  ;;  %v900_v51 = vld [vmem:[%s9093_s2 + $0x118] sm:$0xff] }
 0x13a   :  { %v814_v38 = vmul.f32 0.5, %v813_v4  ;;  %v780_v36 = vmul.f32 %v778_v56, %v752_v57  ;;  %1194 = vmatpush.msrb.mxu3 %v956_v63  ;;  %1179 = vmatpush.msrb.mxu2 %v908_v11  ;;  %v898_v63 = vld [vmem:[%s9093_s2 + $0x108] sm:$0xff] }
 0x13b   :  { %v416_v48 = vmul.f32 %v404_v7, %v404_v7  ;;  %v412_v23 = vadd.f32 %v410_v40, %v408_v3  ;;  %v418_v45 = vmul.f32 %v406_v21, %v406_v21  ;;  %v946_v3 = vld [vmem:[%s9093_s2 + $0x288] sm:$0xff] }
 0x13c   :  { %v815_v41 = vsub.f32 1.5, %v814_v38  ;;  %v7232_v33 = vmul.f32 %v780_v36, %v726_v25  ;;  %1195 = vmatpush.msrb.mxu3 %v954_v42  ;;  %1180 = vmatpush.msrb.mxu2 %v906_v0  ;;  %v851_v38 = vsub.f32 1.5, %v850_v59  ;;  %v944_v25 = vld [vmem:[%s9093_s2 + $0x278] sm:$0xff]  ;;  %v990_v42 = vld [vmem:[%s9093_s2 + $0x3e8] sm:$0xff] }
 0x13d   :  { %v7237_v55 = vpop.eup %5612  ;;  %v7240_v24 = vmax.f32 %v412_v23, 1.1920929e-07  ;;  %v420_v62 = vadd.f32 %v418_v45, %v416_v48  ;;  %v992_v36 = vld [vmem:[%s9093_s2 + $0x3f8] sm:$0xff]  ;;  %v942_v45 = vld [vmem:[%s9093_s2 + $0x268] sm:$0xff] }
 0x13e   :  { %v816_v34 = vmul.f32 %v7165_v17, %v815_v41  ;;  %v822_v10 = vmul.f32 %v7237_v55, %v7167_v47  ;;  %1119 = vmatmul.f32.gmra.mxu3 %v7232_v33  ;;  %1181 = vmatpush.msrb.mxu2 %v904_v26  ;;  %vm828_vm15 = vweird.f32 %v7237_v55  ;;  %v852_v5 = vmul.f32 %v7127_v61, %v851_v38 }
 0x13f   :  { %v422_v27 = vmax.f32 %v420_v62, 1.1920929e-07  ;;  %5614 = vrsqrt.f32 %v7240_v24  ;;  %1196 = vmatpush.msrb.mxu3 %v952_v32  ;;  %v802_v26 = vmul.f32 %v6961_v43, %v7139_v39  ;;  %vm7339_vm1 = vmor %vm827_vm14, %vm828_vm15  ;;  %vm431_vm4 = vcmp.eq.f32.partialorder %v7240_v24, inf }
 0x140   :  { %v820_v54 = vsel %vm819_vm13, %v7165_v17, %v816_v34  ;;  %v823_v49 = vmul.f32 %v7237_v55, %v822_v10  ;;  %v238_v14 = vpop.f32.mrf.mxu0  ;;  %v315_v18 = vpop.f32.mrf.mxu1  ;;  %v948_v17 = vld [vmem:[%s9093_s2 + $0x298] sm:$0xff]  ;;  %1182 = vmatpush.msrb.mxu2 %v902_v28  ;;  %v800_v10 = vmul.f32 %v6949_v22, %v7137_v8  ;;  %vm433_vm5 = vcmp.eq.f32.partialorder %v7240_v24, 0.0 }
 0x141   :  { %v857_v60 = vmul.f32 %v846_v15, %v820_v54  ;;  %v7275_v56 = vadd.f32 %v422_v27, %v7240_v24  ;;  %v405_v4 = vsub.f32 %v6466_v12, %v238_v14  ;;  %v409_v20 = vmul.f32 %v238_v14, %v238_v14  ;;  %1197 = vmatpush.msrb.mxu3 %v950_v46  ;;  %v940_v46 = vld [vmem:[%s9093_s2 + $0x258] sm:$0xff]  ;;  %v938_v14 = vld [vmem:[%s9093_s2 + $0x248] sm:$0xff] }
 0x142   :  { %v407_v50 = vsub.f32 %v6468_v13, %v315_v18  ;;  %v411_v58 = vmul.f32 %v315_v18, %v315_v18  ;;  %v824_v57 = vmul.f32 0.5, %v823_v49  ;;  %1183 = vmatpush.msrb.mxu2 %v900_v51  ;;  %v986_v18 = vld [vmem:[%s9093_s2 + $0x3c8] sm:$0xff]  ;;  %v434_v51 = vand.u32 2147483648, %v7240_v24 }
 0x143   :  { %v7285_v35 = vmul.f32 %v857_v60, %v803_v52  ;;  %5616 = vrsqrt.f32 %v7275_v56  ;;  %v417_v7 = vmul.f32 %v405_v4, %v405_v4  ;;  %1198 = vmatpush.msrb.mxu3 %v948_v17  ;;  %v988_v52 = vld [vmem:[%s9093_s2 + $0x3d8] sm:$0xff]  ;;  %v804_v4 = vadd.f32 %v802_v26, %v800_v10 }
 0x144   :  { %v413_v21 = vadd.f32 %v411_v58, %v409_v20  ;;  %v419_v40 = vmul.f32 %v407_v50, %v407_v50  ;;  %v825_v19 = vsub.f32 1.5, %v824_v57  ;;  %1184 = vmatpush.msrb.mxu2 %v898_v63  ;;  %v984_v17 = vld [vmem:[%s9093_s2 + $0x3b8] sm:$0xff]  ;;  %v982_v63 = vld [vmem:[%s9093_s2 + $0x3a8] sm:$0xff]  ;;  %vm456_vm7 = vweird.f32 %v7275_v56 }
 0x145   :  { %v5615_v11 = vpop.eup %5614  ;;  %1199 = vmatpush.msrb.mxu3 %v946_v3  ;;  %1139 = vmatmul.f32.vlgmr.msra.gmra.mxu2 %v7285_v35 }
 0x146   :  { %v425_v37 = vmul.f32 %v5615_v11, %v7240_v24  ;;  %v7301_v48 = vmax.f32 %v413_v21, 1.1920929e-07  ;;  %v421_v23 = vadd.f32 %v419_v40, %v417_v7  ;;  %1162 = vmatmul.f32.vlgmr.msra.gmra.mxu3 %v6546_v53  ;;  %v826_v41 = vmul.f32 %v7237_v55, %v825_v19  ;;  %1215 = vmatpush.msra.mxu2 %v992_v36  ;;  %v934_v40 = vld [vmem:[%s9093_s2 + $0x228] sm:$0xff]  ;;  %v932_v36 = vld [vmem:[%s9093_s2 + $0x218] sm:$0xff] }
 0x147   :  { %1200 = vmatpush.msrb.mxu3 %v944_v25 }
 0x148   :  { %v426_v0 = vmul.f32 %v5615_v11, %v425_v37  ;;  %v423_v62 = vmax.f32 %v421_v23, 1.1920929e-07  ;;  %5618 = vrsqrt.f32 %v7301_v48  ;;  %v241_v53 = vpop.f32.mrf.mxu0  ;;  %v318_v32 = vpop.f32.mrf.mxu1  ;;  %1216 = vmatpush.msra.mxu2 %v990_v42  ;;  %v830_v47 = vsel %vm7339_vm1, %v7237_v55, %v826_v41  ;;  %v936_v55 = vld [vmem:[%s9093_s2 + $0x238] sm:$0xff] }
 0x149   :  { %v7317_v34 = vpop.eup %5616  ;;  %v478_v15 = vsub.f32 %v6440_v1, %v241_v53  ;;  %v482_v27 = vmul.f32 %v241_v53, %v241_v53  ;;  %1201 = vmatpush.msrb.mxu3 %v942_v45  ;;  %v480_v8 = vsub.f32 %v6442_v2, %v318_v32  ;;  %v484_v39 = vmul.f32 %v318_v32, %v318_v32  ;;  %v980_v41 = vld [vmem:[%s9093_s2 + $0x398] sm:$0xff]  ;;  %v930_v32 = vld [vmem:[%s9093_s2 + $0x208] sm:$0xff] }
 0x14a   :  { %v427_v54 = vmul.f32 0.5, %v426_v0  ;;  %v451_v49 = vmul.f32 %v7317_v34, %v7275_v56  ;;  %v7333_v22 = vadd.f32 %v423_v62, %v7301_v48  ;;  %1217 = vmatpush.msra.mxu2 %v988_v52  ;;  %v856_v2 = vsel %vm855_vm3, %v7127_v61, %v852_v5  ;;  %v7404_v0 = vld [vmem:[%s9099_s8 + $0x18] sm:$0xff] }
 0x14b   :  { %v490_v43 = vmul.f32 %v478_v15, %v478_v15  ;;  %1202 = vmatpush.msrb.mxu3 %v940_v46  ;;  %v486_v59 = vadd.f32 %v484_v39, %v482_v27  ;;  %v492_v60 = vmul.f32 %v480_v8, %v480_v8  ;;  %v858_v20 = vmul.f32 %v856_v2, %v830_v47  ;;  %v978_v15 = vld [vmem:[%s9093_s2 + $0x388] sm:$0xff]  ;;  %v1024_v27 = vld [vmem:[%s9093_s2 + $0x4f8] sm:$0xff]  ;;  %v7430_v46 = vld [vmem:[%s9099_s8 + $0x10] sm:$0xff] }
 0x14c   :  { %v428_v44 = vsub.f32 1.5, %v427_v54  ;;  %v452_v28 = vmul.f32 %v7317_v34, %v451_v49  ;;  %5620 = vrsqrt.f32 %v7333_v22  ;;  %1218 = vmatpush.msra.mxu2 %v986_v18  ;;  %vm457_vm6 = vweird.f32 %v7317_v34  ;;  %1583 = vmatpush.msrb.mxu0 %v7404_v0  ;;  %v976_v18 = vld [vmem:[%s9093_s2 + $0x378] sm:$0xff] }
 0x14d   :  { %1203 = vmatpush.msrb.mxu3 %v938_v14  ;;  %v7371_v7 = vmax.f32 %v486_v59, 1.1920929e-07  ;;  %v494_v3 = vadd.f32 %v492_v60, %v490_v43  ;;  %v7373_v21 = vmul.f32 %v858_v20, %v804_v4  ;;  %vm458_vm8 = vmor %vm456_vm7, %vm457_vm6  ;;  %vm443_vm9 = vcmp.eq.f32.partialorder %v7301_v48, inf  ;;  %v1022_v43 = vld [vmem:[%s9093_s2 + $0x4e8] sm:$0xff]  ;;  %v7452_v47 = vld [vmem:[%s9100_s9 + $0x18] sm:$0xff] }
 0x14e   :  { %v7365_v50 = vpop.eup %5618  ;;  %v429_v58 = vmul.f32 %v5615_v11, %v428_v44  ;;  %v453_v61 = vmul.f32 0.5, %v452_v28  ;;  %1165 = vmatmul.f32.gmra.mxu3 %v6579_v6  ;;  %1219 = vmatpush.msra.mxu2 %v984_v17  ;;  %vm445_vm10 = vcmp.eq.f32.partialorder %v7301_v48, 0.0  ;;  %v446_v44 = vand.u32 2147483648, %v7301_v48  ;;  %v1020_v59 = vld [vmem:[%s9093_s2 + $0x4d8] sm:$0xff]  ;;  %v7474_v17 = vld [vmem:[%s9100_s9 + $0x10] sm:$0xff] }
 0x14f   :  { %v437_v57 = vmul.f32 %v7365_v50, %v7301_v48  ;;  %1204 = vmatpush.msrb.mxu3 %v936_v55  ;;  %v496_v6 = vmax.f32 %v494_v3, 1.1920929e-07  ;;  %5622 = vrsqrt.f32 %v7371_v7  ;;  %1142 = vmatmul.f32.gmra.mxu2 %v7373_v21  ;;  %v6140_v60 = vmov 0.0  }
 0x150   :  { %v430_v19 = vmul.f32 %v429_v58, %v7240_v24  ;;  %v454_v38 = vsub.f32 1.5, %v453_v61  ;;  %v244_v25 = vpop.f32.mrf.mxu0  ;;  %v321_v42 = vpop.f32.mrf.mxu1  ;;  %1220 = vmatpush.msra.mxu2 %v982_v63  ;;  %1584 = vmatpush.msrb.mxu0 %v7430_v46  ;;  %861 = vst [vmem:[#allocation4] sm:$0xff] %v6140_v60  ;;  %vm466_vm12 = vweird.f32 %v7333_v22  ;;  %vm505_vm14 = vcmp.eq.f32.partialorder %v7371_v7, inf }
 0x151   :  { %v438_v11 = vmul.f32 %v7365_v50, %v437_v57  ;;  %1205 = vmatpush.msrb.mxu3 %v934_v40  ;;  %v7418_v10 = vadd.f32 %v496_v6, %v7371_v7  ;;  %v483_v26 = vmul.f32 %v244_v25, %v244_v25  ;;  %v485_v1 = vmul.f32 %v321_v42, %v321_v42  ;;  %v972_v40 = vld [vmem:[%s9093_s2 + $0x358] sm:$0xff] }
 0x152   :  { %v7391_v37 = vpop.eup %5620  ;;  %v432_v23 = vsel %vm431_vm4, %v7240_v24, %v430_v19  ;;  %v455_v45 = vmul.f32 %v7317_v34, %v454_v38  ;;  %v479_v24 = vsub.f32 %v6466_v12, %v244_v25  ;;  %v481_v12 = vsub.f32 %v6468_v13, %v321_v42  ;;  %1221 = vmatpush.msra.mxu2 %v980_v41  ;;  %v970_v25 = vld [vmem:[%s9093_s2 + $0x348] sm:$0xff] }
 0x153   :  { %v435_v62 = vsel %vm433_vm5, %v434_v51, %v432_v23  ;;  %v439_v53 = vmul.f32 0.5, %v438_v11  ;;  %v461_v56 = vmul.f32 %v7391_v37, %v7333_v22  ;;  %1206 = vmatpush.msrb.mxu3 %v932_v36  ;;  %5624 = vrsqrt.f32 %v7418_v10  ;;  %1608 = vmatpush.msrb.mxu1 %v7452_v47  ;;  %862 = vst [vmem:[#allocation4 + $0x8] sm:$0xff] %v6140_v60  ;;  %v7485_v51 = vld [vmem:[%s9099_s8 + $0x8] sm:$0xff]  ;;  %v1016_v22 = vld [vmem:[%s9093_s2 + $0x4b8] sm:$0xff]  ;;  %v7512_v11 = vld [vmem:[%s9099_s8] sm:$0xff] }
 0x154   :  { %v459_v5 = vsel %vm458_vm8, %v7317_v34, %v455_v45  ;;  %v491_v49 = vmul.f32 %v479_v24, %v479_v24  ;;  %v493_v14 = vmul.f32 %v481_v12, %v481_v12  ;;  %1222 = vmatpush.msra.mxu2 %v978_v15  ;;  %v487_v2 = vadd.f32 %v485_v1, %v483_v26  ;;  %v7530_v42 = vld [vmem:[%s9100_s9 + $0x8] sm:$0xff]  ;;  %v1008_v12 = vld [vmem:[%s9093_s2 + $0x478] sm:$0xff] }
 0x155   :  { %v470_v34 = vmul.f32 %v459_v5, %v435_v62  ;;  %v440_v52 = vsub.f32 1.5, %v439_v53  ;;  %v462_v54 = vmul.f32 %v7391_v37, %v461_v56  ;;  %1207 = vmatpush.msrb.mxu3 %v930_v32  ;;  %v7440_v8 = vpop.eup %5622  ;;  %vm467_vm11 = vweird.f32 %v7391_v37  ;;  %863 = vst [vmem:[#allocation4 + $0x10] sm:$0xff] %v6140_v60  ;;  %1609 = vmatpush.msrb.mxu1 %v7474_v17  ;;  %v968_v62 = vld [vmem:[%s9093_s2 + $0x338] sm:$0xff]  ;;  %v966_v24 = vld [vmem:[%s9093_s2 + $0x328] sm:$0xff] }
 0x156   :  { %v499_v28 = vmul.f32 %v7440_v8, %v7371_v7  ;;  %1208 = vmatmul.f32.vlgmr.msrb.gmra.mxu3 %v7019_v30  ;;  %v495_v55 = vadd.f32 %v493_v14, %v491_v49  ;;  %v974_v30 = vld [vmem:[%s9093_s2 + $0x368] sm:$0xff]  ;;  %v7477_v58 = vmax.f32 %v487_v2, 1.1920929e-07  ;;  %1223 = vmatpush.msra.mxu2 %v976_v18  ;;  %864 = vst [vmem:[#allocation4 + $0x18] sm:$0xff] %v6140_v60  ;;  %vm468_vm13 = vmor %vm466_vm12, %vm467_vm11  ;;  %v1012_v56 = vld [vmem:[%s9093_s2 + $0x498] sm:$0xff]  ;;  %v508_v32 = vand.u32 2147483648, %v7371_v7 }
 0x157   :  { %472 = vst [vmem:[%s9108_s17] sm:$0xff] %v470_v34  ;;  %v441_v13 = vmul.f32 %v7365_v50, %v440_v52  ;;  %v463_v39 = vmul.f32 0.5, %v462_v54  ;;  %1238 = vmatpush.msra.mxu3 %v1024_v27  ;;  %1185 = vmatmul.f32.vlgmr.msrb.gmra.mxu2 %v6880_v16  ;;  %v1018_v16 = vld [vmem:[%s9093_s2 + $0x4c8] sm:$0xff]  ;;  %vm507_vm15 = vcmp.eq.f32.partialorder %v7371_v7, 0.0  ;;  %v964_v52 = vld [vmem:[%s9093_s2 + $0x318] sm:$0xff]  ;;  %vm530_vm1 = vweird.f32 %v7418_v10 }
 0x158   :  { %v500_v50 = vmul.f32 %v7440_v8, %v499_v28  ;;  %v497_v3 = vmax.f32 %v495_v55, 1.1920929e-07  ;;  %1585 = vmatpush.msrb.mxu0 %v7485_v51  ;;  %5626 = vrsqrt.f32 %v7477_v58  ;;  %1224 = vmatpush.msra.mxu2 %v974_v30  ;;  %vm517_vm3 = vcmp.eq.f32.partialorder %v7477_v58, inf  ;;  %v1000_v55 = vld [vmem:[%s9093_s2 + $0x438] sm:$0xff] }
 0x159   :  { %v442_v4 = vmul.f32 %v441_v13, %v7301_v48  ;;  %v464_v20 = vsub.f32 1.5, %v463_v39  ;;  %1239 = vmatpush.msra.mxu3 %v1022_v43  ;;  %v7499_v63 = vpop.eup %5624  ;;  %1610 = vmatpush.msrb.mxu1 %v7530_v42  ;;  %v1006_v13 = vld [vmem:[%s9093_s2 + $0x468] sm:$0xff]  ;;  %vm519_vm4 = vcmp.eq.f32.partialorder %v7477_v58, 0.0 }
 0x15a   :  { %v501_v38 = vmul.f32 0.5, %v500_v50  ;;  %1586 = vmatpush.msrb.mxu0 %v7512_v11  ;;  %v7522_v45 = vadd.f32 %v497_v3, %v7477_v58  ;;  %1225 = vmatpush.msra.mxu2 %v972_v40  ;;  %vm531_vm0 = vweird.f32 %v7499_v63  ;;  %v996_v40 = vld [vmem:[%s9093_s2 + $0x418] sm:$0xff] }
 0x15b   :  { %v444_v61 = vsel %vm443_vm9, %v7301_v48, %v442_v4  ;;  %v465_v57 = vmul.f32 %v7391_v37, %v464_v20  ;;  %1240 = vmatpush.msra.mxu3 %v1020_v59  ;;  %v525_v48 = vmul.f32 %v7499_v63, %v7418_v10  ;;  %vm532_vm2 = vmor %vm530_vm1, %vm531_vm0  ;;  %v1002_v59 = vld [vmem:[%s9093_s2 + $0x448] sm:$0xff]  ;;  %vm1273_vm0 = vcmask 261120  }
 0x15c   :  { %v447_v19 = vsel %vm445_vm10, %v446_v44, %v444_v61  ;;  %v502_v23 = vsub.f32 1.5, %v501_v38  ;;  %1888 = vmatpush.msra.mxu0 %v7404_v0  ;;  %5628 = vrsqrt.f32 %v7522_v45  ;;  %1226 = vmatpush.msra.mxu2 %v970_v25  ;;  %v1004_v44 = vld [vmem:[%s9093_s2 + $0x458] sm:$0xff]  ;;  %vm540_vm6 = vweird.f32 %v7522_v45 }
 0x15d   :  { %v469_v6 = vsel %vm468_vm13, %v7391_v37, %v465_v57  ;;  %1241 = vmatpush.msra.mxu3 %v1018_v16  ;;  %v1014_v37 = vld [vmem:[%s9093_s2 + $0x4a8] sm:$0xff]  ;;  %v526_v41 = vmul.f32 %v7499_v63, %v525_v48  ;;  %vm1405_vm1 = vcmask 254976  }
 0x15e   :  { %v471_v36 = vmul.f32 %v469_v6, %v447_v19  ;;  %v503_v53 = vmul.f32 %v7440_v8, %v502_v23  ;;  %1211 = vmatmul.f32.gmra.mxu3 %v7088_v29  ;;  %v7556_v29 = vld [vmem:[%s9100_s9] sm:$0xff]  ;;  %v5627_v26 = vpop.eup %5626  ;;  %1227 = vmatpush.msra.mxu2 %v968_v62  ;;  %v962_v8 = vld [vmem:[%s9093_s2 + $0x308] sm:$0xff] }
 0x15f   :  { %1242 = vmatpush.msra.mxu3 %v1016_v22  ;;  %v527_v5 = vmul.f32 0.5, %v526_v41  ;;  %1188 = vmatmul.f32.gmra.mxu2 %v6951_v31  ;;  %v1010_v31 = vld [vmem:[%s9093_s2 + $0x488] sm:$0xff]  ;;  %v511_v34 = vmul.f32 %v5627_v26, %v7477_v58  ;;  %v1025_v6 = vld [vmem:[%s9094_s3] sm:$0x3]  ;;  %s6141_s3 = smov 64  }
 0x160   :  { %473 = vst [vmem:[%s9108_s17 + $0x8] sm:$0xff] %v471_v36  ;;  %v504_v15 = vmul.f32 %v503_v53, %v7371_v7  ;;  %1611 = vmatpush.msrb.mxu1 %v7556_v29  ;;  %1228 = vmatpush.msra.mxu2 %v966_v24  ;;  %v998_v16 = vld [vmem:[%s9093_s2 + $0x428] sm:$0xff]  ;;  %v1027_v48 = vperm.slane %v1025_v6, 0 }
 0x161   :  { %1243 = vmatpush.msra.mxu3 %v1014_v37  ;;  %v528_v27 = vsub.f32 1.5, %v527_v5  ;;  %1889 = vmatpush.msra.mxu0 %v7430_v46  ;;  %v512_v43 = vmul.f32 %v5627_v26, %v511_v34 }
 0x162   :  { %1910 = vmatpush.msra.mxu1 %v7452_v47  ;;  %v506_v54 = vsel %vm505_vm14, %v7371_v7, %v504_v15  ;;  %v5629_v7 = vpop.eup %5628  ;;  %1229 = vmatpush.msra.mxu2 %v964_v52 }
 0x163   :  { %1244 = vmatpush.msra.mxu3 %v1012_v56  ;;  %v509_v49 = vsel %vm507_vm15, %v508_v32, %v506_v54  ;;  %v529_v1 = vmul.f32 %v7499_v63, %v528_v27  ;;  %1890 = vmatpush.msra.mxu0 %v7485_v51  ;;  %v513_v39 = vmul.f32 0.5, %v512_v43  ;;  %v535_v14 = vmul.f32 %v5629_v7, %v7522_v45 }
 0x164   :  { %1911 = vmatpush.msra.mxu1 %v7474_v17  ;;  %1230 = vmatpush.msra.mxu2 %v962_v8  ;;  %vm541_vm5 = vweird.f32 %v5629_v7 }
 0x165   :  { %1245 = vmatpush.msra.mxu3 %v1010_v31  ;;  %v533_v10 = vsel %vm532_vm2, %v7499_v63, %v529_v1  ;;  %1891 = vmatpush.msra.mxu0 %v7512_v11  ;;  %v514_v28 = vsub.f32 1.5, %v513_v39  ;;  %v536_v2 = vmul.f32 %v5629_v7, %v535_v14  ;;  %vm542_vm7 = vmor %vm540_vm6, %vm541_vm5 }
 0x166   :  { %1912 = vmatpush.msra.mxu1 %v7530_v42  ;;  %v544_v18 = vmul.f32 %v533_v10, %v509_v49  ;;  %1289 = vmatpush.msrb.mxu2 %v7404_v0  ;;  %v1028_v49 = vperm.slane %v1025_v6, 1 }
 0x167   :  { %1246 = vmatpush.msra.mxu3 %v1008_v12  ;;  %1231 = vmatmul.f32.vlgmr.msra.gmra.mxu2 %v7158_v9  ;;  %v515_v4 = vmul.f32 %v5627_v26, %v514_v28  ;;  %v537_v20 = vmul.f32 0.5, %v536_v2  ;;  %v520_v9 = vand.u32 2147483648, %v7477_v58 }
 0x168   :  { %5473 = vst [vmem:[%s9108_s17 + $0x10] sm:$0xff] %v544_v18  ;;  %1913 = vmatpush.msra.mxu1 %v7556_v29  ;;  %1290 = vmatpush.msrb.mxu2 %v7430_v46 }
 0x169   :  { %1247 = vmatpush.msra.mxu3 %v1006_v13  ;;  %v516_v30 = vmul.f32 %v515_v4, %v7477_v58  ;;  %v538_v50 = vsub.f32 1.5, %v537_v20 }
 0x16a   :  { %1291 = vmatpush.msrb.mxu2 %v7485_v51 }
 0x16b   :  { %1248 = vmatpush.msra.mxu3 %v1004_v44  ;;  %v518_v61 = vsel %vm517_vm3, %v7477_v58, %v516_v30  ;;  %v539_v57 = vmul.f32 %v5629_v7, %v538_v50  ;;  %v994_v58 = vld [vmem:[%s9093_s2 + $0x408] sm:$0xff] }
 0x16c   :  { %v521_v3 = vsel %vm519_vm4, %v520_v9, %v518_v61  ;;  %1292 = vmatpush.msrb.mxu2 %v7512_v11 }
 0x16d   :  { %1249 = vmatpush.msra.mxu3 %v1002_v59  ;;  %v543_v63 = vsel %vm542_vm7, %v5629_v7, %v539_v57 }
 0x16e   :  { %v545_v19 = vmul.f32 %v543_v63, %v521_v3  ;;  %1428 = vmatpush.msra.mxu2 %v7404_v0 }
 0x16f   :  { %1250 = vmatpush.msra.mxu3 %v1000_v55  ;;  %1234 = vmatmul.f32.gmra.mxu2 %v7232_v33  ;;  %v1048_v33 = vpop.f32.mrf.mxu2 }
 0x170   :  { %5474 = vst [vmem:[%s9108_s17 + $0x18] sm:$0xff] %v545_v19  ;;  %1429 = vmatpush.msra.mxu2 %v7430_v46  ;;  %v1049_v23 = vadd.f32 %v1048_v33, %v1027_v48 }
 0x171   :  { %1251 = vmatpush.msra.mxu3 %v998_v16 }
 0x172   :  { %1430 = vmatpush.msra.mxu2 %v7485_v51 }
 0x173   :  { %1252 = vmatpush.msra.mxu3 %v996_v40 }
 0x174   :  { %1431 = vmatpush.msra.mxu2 %v7512_v11 }
 0x175   :  { %1253 = vmatpush.msra.mxu3 %v994_v58 }
 0x176   :  { %1254 = vmatmul.f32.vlgmr.msra.gmra.mxu3 %v7285_v35 }
 0x177   :  { %1309 = vmatpush.msrb.mxu3 %v7452_v47  ;;  %1293 = vmatmul.f32.vlgmr.msrb.gmra.mxu2 %v6140_v60 }
 0x178   :  { %1737 = vmatpush.msrb.mxu2 %v7404_v0 }
 0x179   :  { %1310 = vmatpush.msrb.mxu3 %v7474_v17 }
 0x17a   :  { %1738 = vmatpush.msrb.mxu2 %v7430_v46 }
 0x17b   :  { %1311 = vmatpush.msrb.mxu3 %v7530_v42 }
 0x17c   :  { %1739 = vmatpush.msrb.mxu2 %v7485_v51 }
 0x17d   :  { %1312 = vmatpush.msrb.mxu3 %v7556_v29 }
 0x17e   :  { %1257 = vmatmul.f32.gmra.mxu3 %v7373_v21  ;;  %1740 = vmatpush.msrb.mxu2 %v7512_v11  ;;  %v1051_v21 = vpop.f32.mrf.mxu2 }
 0x17f   :  { %1452 = vmatpush.msra.mxu3 %v7452_v47  ;;  %v1052_v32 = vadd.f32 %v1051_v21, %v1027_v48 }
 0x181   :  { %1453 = vmatpush.msra.mxu3 %v7474_v17 }
 0x183   :  { %1454 = vmatpush.msra.mxu3 %v7530_v42 }
 0x185   :  { %1455 = vmatpush.msra.mxu3 %v7556_v29 }
 0x186   :  { %1313 = vmatmul.f32.vlgmr.msrb.gmra.mxu3 %v6140_v60 }
 0x187   :  { %1762 = vmatpush.msrb.mxu3 %v7452_v47 }
 0x189   :  { %1763 = vmatpush.msrb.mxu3 %v7474_v17 }
 0x18b   :  { %1764 = vmatpush.msrb.mxu3 %v7530_v42 }
 0x18d   :  { %1765 = vmatpush.msrb.mxu3 %v7556_v29 }
 0x198   :  { %v1071_v35 = vpop.f32.mrf.mxu3 }
 0x199   :  { %v1072_v45 = vadd.f32 %v1071_v35, %v1049_v23 }
 0x1a0   :  { %v1074_v38 = vpop.f32.mrf.mxu3 }
 0x1a1   :  { %v1075_v5 = vadd.f32 %v1074_v38, %v1052_v32 }
 0x1a8   :  { %v1094_v22 = vpop.f32.mrf.mxu2 }
 0x1a9   :  { %v1095_v37 = vadd.f32 %v1094_v22, %v1072_v45 }
 0x1b0   :  { %v1097_v36 = vpop.f32.mrf.mxu2 }
 0x1b1   :  { %v1098_v24 = vadd.f32 %v1097_v36, %v1075_v5 }
 0x1b8   :  { %v1117_v25 = vpop.f32.mrf.mxu3 }
 0x1b9   :  { %v1118_v41 = vadd.f32 %v1117_v25, %v1095_v37 }
 0x1c1   :  { %v1120_v62 = vpop.f32.mrf.mxu3 }
 0x1c2   :  { %v1121_v26 = vadd.f32 %v1120_v62, %v1098_v24 }
 0x1c8   :  { %v1140_v53 = vpop.f32.mrf.mxu2 }
 0x1c9   :  { %v1141_v56 = vadd.f32 %v1140_v53, %v1118_v41  ;;  %v1163_v15 = vpop.f32.mrf.mxu3 }
 0x1ca   :  { %v1164_v1 = vadd.f32 %v1163_v15, %v1028_v49 }
 0x1cb   :  { %1261 = vst [vmem:[#allocation3 + $0x10] sm:$0xff] %v1141_v56 }
 0x1d1   :  { %v1166_v34 = vpop.f32.mrf.mxu3 }
 0x1d2   :  { %v1143_v31 = vpop.f32.mrf.mxu2  ;;  %v1167_v10 = vadd.f32 %v1166_v34, %v1028_v49  ;;  %v1317_v57 = vld [vmem:[#allocation3 + $0x10] sm:$0x3] }
 0x1d3   :  { %v1144_v27 = vadd.f32 %v1143_v31, %v1121_v26 }
 0x1d5   :  { %1263 = vst [vmem:[#allocation3 + $0x18] sm:$0xff] %v1144_v27 }
 0x1d9   :  { %v1209_v54 = vpop.f32.mrf.mxu3 }
 0x1da   :  { %v1186_v52 = vpop.f32.mrf.mxu2 }
 0x1db   :  { %v1187_v8 = vadd.f32 %v1186_v52, %v1164_v1 }
 0x1dd   :  { %v1210_v13 = vadd.f32 %v1209_v54, %v1187_v8 }
 0x1e1   :  { %v1212_v43 = vpop.f32.mrf.mxu3 }
 0x1e2   :  { %v1189_v12 = vpop.f32.mrf.mxu2 }
 0x1e3   :  { %v1190_v18 = vadd.f32 %v1189_v12, %v1167_v10 }
 0x1e5   :  { %v1213_v2 = vadd.f32 %v1212_v43, %v1190_v18 }
 0x1ea   :  { %v1232_v7 = vpop.f32.mrf.mxu2 }
 0x1eb   :  { %v1233_v39 = vadd.f32 %v1232_v7, %v1210_v13 }
 0x1f2   :  { %v1235_v28 = vpop.f32.mrf.mxu2 }
 0x1f3   :  { %v1236_v59 = vadd.f32 %v1235_v28, %v1213_v2 }
 0x1f9   :  { %v1255_v14 = vpop.f32.mrf.mxu3 }
 0x1fa   :  { %v1256_v44 = vadd.f32 %v1255_v14, %v1233_v39  ;;  %v1294_v61 = vpop.f32.mrf.mxu2 }
 0x1fb   :  { %v1318_v3 = vadd.f32 %v1317_v57, %v1294_v61  ;;  %v1460_v57 = vld [vmem:[#allocation3 + $0x10] sm:$0xc] }
 0x1fc   :  { %1262 = vst [vmem:[#allocation3] sm:$0xff] %v1256_v44 }
 0x1fd   :  { %v5475_v58 = vmul.f32 -1.442695, %v1318_v3 }
 0x201   :  { %v1258_v4 = vpop.f32.mrf.mxu3 }
 0x202   :  { %v1259_v20 = vadd.f32 %v1258_v4, %v1236_v59 }
 0x204   :  { %1264 = vst [vmem:[#allocation3 + $0x8] sm:$0xff] %v1259_v20 }
 0x209   :  { %v1314_v9 = vpop.f32.mrf.mxu3 }
 0x20a   :  { %v1321_v55 = vrot.slane %v1314_v9, 2 }
 0x20b   :  { %v1319_v30 = vld [vmem:[#allocation3 + $0x8] sm:$0xc0] }
 0x20c   :  { %v1323_v50 = vadd.f32 %v1321_v55, %v1319_v30  ;;  %v1465_v55 = vld [vmem:[#allocation3 + $0x8] sm:$0x30] }
 0x20e   :  { %v1325_v16 = vrot.slane %v1323_v50, 6 }
 0x210   :  { %5630 = vtanh.f32 %v1325_v16  ;;  %v5476_v19 = vmul.f32 -1.442695, %v1325_v16 }
 0x211   :  { %5632 = vtanh.f32 %v1318_v3 }
 0x212   :  { %5634 = vpow2.f32 %v5476_v19 }
 0x213   :  { %5636 = vpow2.f32 %v5475_v58 }
 0x216   :  { %v5631_v40 = vpop.eup %5630 }
 0x217   :  { %1380 = vrot.lane.b32.xlu0 %v5631_v40, %s6141_s3  ;;  %v5633_v63 = vpop.eup %5632 }
 0x218   :  { %v5635_v33 = vpop.eup %5634 }
 0x219   :  { %v1334_v35 = vadd.f32 1.0, %v5635_v33  ;;  %v5637_v21 = vpop.eup %5636 }
 0x21a   :  { %v1333_v38 = vadd.f32 1.0, %v5637_v21 }
 0x21b   :  { %5638 = vrcp.f32 %v1334_v35  ;;  %v1361_v41 = vand.u32 2147483648, %v1334_v35  ;;  %vm1355_vm9 = vweird.f32 %v1334_v35  ;;  %v1359_v62 = vand.u32 2147483647, %v1334_v35 }
 0x21c   :  { %5640 = vrcp.f32 %v1333_v38  ;;  %v1346_v31 = vand.u32 2147483648, %v1333_v38  ;;  %vm1340_vm13 = vweird.f32 %v1333_v38  ;;  %v1344_v27 = vand.u32 2147483647, %v1333_v38 }
 0x21d   :  { %v1362_v32 = vor.u32 1.1754944e-38, %v1361_v41  ;;  %vm1360_vm11 = vcmp.eq.f32.partialorder %v1359_v62, 8.507059e+37 }
 0x21e   :  { %v1347_v52 = vor.u32 1.1754944e-38, %v1346_v31  ;;  %vm1345_vm15 = vcmp.eq.f32.partialorder %v1344_v27, 8.507059e+37 }
 0x21f   :  { %1369 = vrot.lane.b32.xlu0 %v5633_v63, %s6141_s3 }
 0x221   :  { %v5639_v22 = vpop.eup %5638 }
 0x222   :  { %v1351_v6 = vmul.f32 %v5639_v22, %v1334_v35  ;;  %v5641_v25 = vpop.eup %5640  ;;  %vm1356_vm8 = vweird.f32 %v5639_v22 }
 0x223   :  { %v1336_v23 = vmul.f32 %v5641_v25, %v1333_v38  ;;  %vm1357_vm10 = vmor %vm1355_vm9, %vm1356_vm8  ;;  %vm1341_vm12 = vweird.f32 %v5641_v25 }
 0x224   :  { %v1352_v48 = vsub.f32 1.0, %v1351_v6  ;;  %vm1342_vm14 = vmor %vm1340_vm13, %vm1341_vm12 }
 0x225   :  { %v1337_v37 = vsub.f32 1.0, %v1336_v23 }
 0x226   :  { %v1353_v36 = vmul.f32 %v5639_v22, %v1352_v48 }
 0x227   :  { %v1338_v56 = vmul.f32 %v5641_v25, %v1337_v37 }
 0x228   :  { %v1354_v45 = vadd.f32 %v5639_v22, %v1353_v36 }
 0x229   :  { %v1339_v15 = vadd.f32 %v5641_v25, %v1338_v56 }
 0x22a   :  { %v1358_v53 = vsel %vm1357_vm10, %v5639_v22, %v1354_v45 }
 0x22b   :  { %v1363_v24 = vsel %vm1360_vm11, %v1362_v32, %v1358_v53  ;;  %v1343_v34 = vsel %vm1342_vm14, %v5641_v25, %v1339_v15 }
 0x22c   :  { %v1348_v54 = vsel %vm1345_vm15, %v1347_v52, %v1343_v34  ;;  %v1378_v1 = vmul.f32 0.0, %v1363_v24 }
 0x22d   :  { %v1367_v7 = vmul.f32 0.0, %v1348_v54 }
 0x289   :  { %v1381_v5 = vpop.permute.xlu0 %1380 }
 0x28a   :  { %v1383_v26 = vmul.f32 %v1381_v5, %v1363_v24 }
 0x28c   :  { %1385 = vrot.lane.b32.xlu1 %v1383_v26, %s6142_s26 }
 0x291   :  { %v1370_v12 = vpop.permute.xlu0 %1369 }
 0x292   :  { %v1372_v49 = vmul.f32 %v1370_v12, %v1348_v54 }
 0x294   :  { %1374 = vrot.lane.b32.xlu1 %v1372_v49, %s6142_s26 }
 0x2fe   :  { %v1386_v43 = vpop.permute.xlu1 %1385 }
 0x2ff   :  { %v7661_v8 = vadd.f32 %v1386_v43, %v1378_v1 }
 0x301   :  { %5642 = vtanh.f32 %v7661_v8  ;;  %v1528_v1 = vrot.slane %v7661_v8, 6 }
 0x306   :  { %v1375_v13 = vpop.permute.xlu1 %1374 }
 0x307   :  { %v5643_v10 = vpop.eup %5642  ;;  %v7664_v39 = vadd.f32 %v1375_v13, %v1367_v7 }
 0x308   :  { %1397 = vrot.lane.b32.xlu2 %v5643_v10, %s6141_s3 }
 0x309   :  { %5644 = vtanh.f32 %v7664_v39  ;;  %v1514_v10 = vrot.slane %v7664_v39, 6 }
 0x30f   :  { %v5645_v14 = vpop.eup %5644 }
 0x310   :  { %1391 = vrot.lane.b32.xlu2 %v5645_v14, %s6141_s3 }
 0x362   :  { %v1398_v18 = vpop.permute.xlu2 %1397 }
 0x363   :  { %v7669_v44 = vmul.f32 %v1398_v18, %v1363_v24 }
 0x365   :  { %1436 = vrot.lane.b32.xlu0 %v7669_v44, %s6142_s26 }
 0x36a   :  { %v1392_v28 = vpop.permute.xlu2 %1391 }
 0x36b   :  { %v1394_v2 = vmul.f32 %v1392_v28, %v1348_v54 }
 0x36d   :  { %1402 = vrot.lane.b32.xlu1 %v1394_v2, %s6142_s26 }
 0x3d7   :  { %v1437_v59 = vpop.permute.xlu0 %1436 }
 0x3d8   :  { %5478 = vmatmul.msk.f32.vlgmr.msra.gmra.mxu3 %vm1273_vm0, %v1437_v59 }
 0x3d9   :  { %2057 = vmatpush.msra.mxu3 %v7452_v47 }
 0x3db   :  { %2058 = vmatpush.msra.mxu3 %v7474_v17 }
 0x3dd   :  { %2059 = vmatpush.msra.mxu3 %v7530_v42 }
 0x3df   :  { %v1403_v4 = vpop.permute.xlu1 %1402  ;;  %2060 = vmatpush.msra.mxu3 %v7556_v29 }
 0x3e0   :  { %1406 = vst.msk [vmem:[#allocation4] sm:$0x3] %vm1405_vm1, %v1403_v4  ;;  %5477 = vmatmul.msk.f32.vlgmr.msra.gmra.mxu2 %vm1273_vm0, %v1403_v4 }
 0x3e1   :  { %2033 = vmatpush.msra.mxu2 %v7404_v0 }
 0x3e3   :  { %2034 = vmatpush.msra.mxu2 %v7430_v46 }
 0x3e5   :  { %2035 = vmatpush.msra.mxu2 %v7485_v51 }
 0x3e7   :  { %2036 = vmatpush.msra.mxu2 %v7512_v11 }
 0x45b   :  { %v1457_v20 = vpop.f32.mrf.mxu3 }
 0x45c   :  { %v1467_v9 = vrot.slane %v1457_v20, 4 }
 0x45e   :  { %v1469_v30 = vadd.f32 %v1467_v9, %v1465_v55 }
 0x460   :  { %v1471_v50 = vrot.slane %v1469_v30, 2 }
 0x462   :  { %5646 = vtanh.f32 %v1471_v50  ;;  %v5480_v19 = vmul.f32 -1.442695, %v1471_v50 }
 0x463   :  { %v1433_v16 = vpop.f32.mrf.mxu2 }
 0x464   :  { %v1462_v61 = vrot.slane %v1433_v16, 6 }
 0x466   :  { %v1464_v3 = vadd.f32 %v1462_v61, %v1460_v57  ;;  %v1621_v57 = vld [vmem:[#allocation3 + $0x8] sm:$0xc] }
 0x468   :  { %v5647_v40 = vpop.eup %5646  ;;  %5648 = vtanh.f32 %v1464_v3  ;;  %v5479_v38 = vmul.f32 -1.442695, %v1464_v3 }
 0x469   :  { %1532 = vrot.lane.b32.xlu2 %v5647_v40, %s6141_s3  ;;  %5650 = vpow2.f32 %v5480_v19 }
 0x46e   :  { %v5649_v63 = vpop.eup %5648 }
 0x46f   :  { %1518 = vrot.lane.b32.xlu0 %v5649_v63, %s6141_s3  ;;  %v5651_v58 = vpop.eup %5650 }
 0x470   :  { %v1480_v33 = vadd.f32 1.0, %v5651_v58 }
 0x472   :  { %5652 = vrcp.f32 %v1480_v33  ;;  %v1507_v25 = vand.u32 2147483648, %v1480_v33  ;;  %vm1501_vm3 = vweird.f32 %v1480_v33  ;;  %v1505_v23 = vand.u32 2147483647, %v1480_v33 }
 0x473   :  { %5654 = vpow2.f32 %v5479_v38 }
 0x474   :  { %v1508_v41 = vor.u32 1.1754944e-38, %v1507_v25  ;;  %vm1506_vm5 = vcmp.eq.f32.partialorder %v1505_v23, 8.507059e+37 }
 0x478   :  { %v5653_v35 = vpop.eup %5652 }
 0x479   :  { %v1497_v21 = vmul.f32 %v5653_v35, %v1480_v33  ;;  %vm1502_vm2 = vweird.f32 %v5653_v35  ;;  %v5655_v36 = vpop.eup %5654  ;;  %v1616_v33 = vld [vmem:[#allocation3 + $0x10] sm:$0x30] }
 0x47a   :  { %vm1503_vm4 = vmor %vm1501_vm3, %vm1502_vm2  ;;  %v1479_v37 = vadd.f32 1.0, %v5655_v36 }
 0x47b   :  { %v1498_v22 = vsub.f32 1.0, %v1497_v21 }
 0x47c   :  { %5656 = vrcp.f32 %v1479_v37  ;;  %v1492_v31 = vand.u32 2147483648, %v1479_v37  ;;  %vm1486_vm7 = vweird.f32 %v1479_v37  ;;  %v1490_v27 = vand.u32 2147483647, %v1479_v37 }
 0x47d   :  { %v1499_v6 = vmul.f32 %v5653_v35, %v1498_v22 }
 0x47e   :  { %v1493_v52 = vor.u32 1.1754944e-38, %v1492_v31  ;;  %vm1491_vm9 = vcmp.eq.f32.partialorder %v1490_v27, 8.507059e+37 }
 0x47f   :  { %v1500_v48 = vadd.f32 %v5653_v35, %v1499_v6 }
 0x481   :  { %v1504_v45 = vsel %vm1503_vm4, %v5653_v35, %v1500_v48 }
 0x482   :  { %v1509_v62 = vsel %vm1506_vm5, %v1508_v41, %v1504_v45  ;;  %v5657_v32 = vpop.eup %5656 }
 0x483   :  { %v1482_v5 = vmul.f32 %v5657_v32, %v1479_v37  ;;  %vm1487_vm6 = vweird.f32 %v5657_v32  ;;  %v1530_v43 = vmul.f32 %v1528_v1, %v1509_v62 }
 0x484   :  { %vm1488_vm8 = vmor %vm1486_vm7, %vm1487_vm6 }
 0x485   :  { %v1483_v24 = vsub.f32 1.0, %v1482_v5 }
 0x487   :  { %v1484_v26 = vmul.f32 %v5657_v32, %v1483_v24 }
 0x489   :  { %v1485_v15 = vadd.f32 %v5657_v32, %v1484_v26 }
 0x48b   :  { %v1489_v34 = vsel %vm1488_vm8, %v5657_v32, %v1485_v15 }
 0x48c   :  { %v1494_v12 = vsel %vm1491_vm9, %v1493_v52, %v1489_v34 }
 0x48d   :  { %v1516_v14 = vmul.f32 %v1514_v10, %v1494_v12 }
 0x4c3   :  { %v1533_v53 = vpop.permute.xlu2 %1532 }
 0x4c4   :  { %v1535_v56 = vmul.f32 %v1533_v53, %v1509_v62 }
 0x4c6   :  { %1537 = vrot.lane.b32.xlu1 %v1535_v56, %s6142_s26 }
 0x4e1   :  { %v1519_v54 = vpop.permute.xlu0 %1518 }
 0x4e2   :  { %v1521_v49 = vmul.f32 %v1519_v54, %v1494_v12 }
 0x4e4   :  { %1523 = vrot.lane.b32.xlu2 %v1521_v49, %s6142_s26 }
 0x538   :  { %v1538_v7 = vpop.permute.xlu1 %1537 }
 0x539   :  { %v7690_v13 = vadd.f32 %v1538_v7, %v1530_v43 }
 0x53b   :  { %5658 = vtanh.f32 %v7690_v13  ;;  %v1684_v10 = vrot.slane %v7690_v13, 6 }
 0x53e   :  { %v1524_v18 = vpop.permute.xlu2 %1523 }
 0x53f   :  { %v7694_v28 = vadd.f32 %v1524_v18, %v1516_v14 }
 0x541   :  { %v5659_v2 = vpop.eup %5658  ;;  %5660 = vtanh.f32 %v7694_v28 }
 0x542   :  { %1549 = vrot.lane.b32.xlu0 %v5659_v2, %s6141_s3  ;;  %v1670_v2 = vrot.slane %v7694_v28, 6 }
 0x547   :  { %v5661_v59 = vpop.eup %5660 }
 0x548   :  { %1543 = vrot.lane.b32.xlu1 %v5661_v59, %s6141_s3 }
 0x5b4   :  { %v1550_v8 = vpop.permute.xlu0 %1549 }
 0x5b5   :  { %v7699_v4 = vmul.f32 %v1550_v8, %v1509_v62 }
 0x5b7   :  { %v1591_v20 = vrot.slane %v7699_v4, 2 }
 0x5b9   :  { %1592 = vrot.lane.b32.xlu2 %v1591_v20, %s6142_s26 }
 0x5ba   :  { %v1544_v39 = vpop.permute.xlu1 %1543 }
 0x5bb   :  { %v7703_v9 = vmul.f32 %v1544_v39, %v1494_v12 }
 0x5bd   :  { %v1566_v55 = vrot.slane %v7703_v9, 2 }
 0x5bf   :  { %1567 = vrot.lane.b32.xlu0 %v1566_v55, %s6142_s26 }
 0x613   :  { %v1593_v30 = vpop.permute.xlu2 %1592 }
 0x614   :  { %5482 = vmatmul.msk.f32.vlgmr.msrb.gmra.mxu1 %vm1273_vm0, %v1593_v30 }
 0x615   :  { %2211 = vmatpush.msrb.mxu1 %v7452_v47 }
 0x617   :  { %2212 = vmatpush.msrb.mxu1 %v7474_v17 }
 0x619   :  { %2213 = vmatpush.msrb.mxu1 %v7530_v42 }
 0x61b   :  { %2214 = vmatpush.msrb.mxu1 %v7556_v29 }
 0x631   :  { %v1568_v50 = vpop.permute.xlu0 %1567 }
 0x632   :  { %5481 = vmatmul.msk.f32.vlgmr.msrb.gmra.mxu0 %vm1273_vm0, %v1568_v50 }
 0x633   :  { %2186 = vmatpush.msrb.mxu0 %v7404_v0 }
 0x635   :  { %2187 = vmatpush.msrb.mxu0 %v7430_v46 }
 0x637   :  { %2188 = vmatpush.msrb.mxu0 %v7485_v51 }
 0x639   :  { %2189 = vmatpush.msrb.mxu0 %v7512_v11 }
 0x691   :  { %v1613_v16 = vpop.f32.mrf.mxu1 }
 0x692   :  { %v1623_v61 = vrot.slane %v1613_v16, 6 }
 0x694   :  { %v1625_v3 = vadd.f32 %v1623_v61, %v1621_v57 }
 0x696   :  { %v1627_v40 = vrot.slane %v1625_v3, 6 }
 0x698   :  { %5662 = vtanh.f32 %v1627_v40  ;;  %v5484_v46 = vmul.f32 -1.442695, %v1627_v40 }
 0x69e   :  { %v5663_v63 = vpop.eup %5662 }
 0x69f   :  { %1688 = vrot.lane.b32.xlu1 %v5663_v63, %s6141_s3  ;;  %v6030_v63 = vld [vmem:[%s9099_s8 + $0x18] sm:$0xff] }
 0x6af   :  { %v1588_v19 = vpop.f32.mrf.mxu0 }
 0x6b0   :  { %v1618_v58 = vrot.slane %v1588_v19, 4  ;;  %v6031_v19 = vld [vmem:[%s9099_s8 + $0x10] sm:$0xff] }
 0x6b2   :  { %v1620_v35 = vadd.f32 %v1618_v58, %v1616_v33 }
 0x6b4   :  { %5664 = vtanh.f32 %v1620_v35  ;;  %v5483_v21 = vmul.f32 -1.442695, %v1620_v35 }
 0x6b5   :  { %5666 = vpow2.f32 %v5484_v46  ;;  %v1770_v46 = vld [vmem:[#allocation3 + $0x10] sm:$0xc0] }
 0x6b6   :  { %5668 = vpow2.f32 %v5483_v21 }
 0x6ba   :  { %v5665_v0 = vpop.eup %5664 }
 0x6bb   :  { %1674 = vrot.lane.b32.xlu2 %v5665_v0, %s6141_s3  ;;  %v5667_v38 = vpop.eup %5666 }
 0x6bc   :  { %v1636_v22 = vadd.f32 1.0, %v5667_v38  ;;  %v5669_v6 = vpop.eup %5668 }
 0x6bd   :  { %v1635_v48 = vadd.f32 1.0, %v5669_v6 }
 0x6be   :  { %5670 = vrcp.f32 %v1636_v22  ;;  %v1663_v32 = vand.u32 2147483648, %v1636_v22  ;;  %vm1657_vm11 = vweird.f32 %v1636_v22  ;;  %v1661_v5 = vand.u32 2147483647, %v1636_v22 }
 0x6bf   :  { %5672 = vrcp.f32 %v1635_v48  ;;  %v1648_v31 = vand.u32 2147483648, %v1635_v48  ;;  %vm1642_vm15 = vweird.f32 %v1635_v48  ;;  %v1646_v27 = vand.u32 2147483647, %v1635_v48 }
 0x6c0   :  { %v1664_v15 = vor.u32 1.1754944e-38, %v1663_v32  ;;  %vm1662_vm14 = vcmp.eq.f32.partialorder %v1661_v5, 8.507059e+37 }
 0x6c1   :  { %v1649_v49 = vor.u32 1.1754944e-38, %v1648_v31  ;;  %vm1647_vm3 = vcmp.eq.f32.partialorder %v1646_v27, 8.507059e+37 }
 0x6c4   :  { %v5671_v25 = vpop.eup %5670 }
 0x6c5   :  { %v1653_v36 = vmul.f32 %v5671_v25, %v1636_v22  ;;  %v5673_v23 = vpop.eup %5672  ;;  %vm1658_vm10 = vweird.f32 %v5671_v25 }
 0x6c6   :  { %v1638_v37 = vmul.f32 %v5673_v23, %v1635_v48  ;;  %vm1659_vm12 = vmor %vm1657_vm11, %vm1658_vm10  ;;  %vm1643_vm13 = vweird.f32 %v5673_v23 }
 0x6c7   :  { %v1654_v45 = vsub.f32 1.0, %v1653_v36  ;;  %vm1644_vm2 = vmor %vm1642_vm15, %vm1643_vm13 }
 0x6c8   :  { %v1639_v62 = vsub.f32 1.0, %v1638_v37 }
 0x6c9   :  { %v1655_v41 = vmul.f32 %v5671_v25, %v1654_v45 }
 0x6ca   :  { %v1640_v56 = vmul.f32 %v5673_v23, %v1639_v62 }
 0x6cb   :  { %v1656_v53 = vadd.f32 %v5671_v25, %v1655_v41 }
 0x6cc   :  { %v1641_v26 = vadd.f32 %v5673_v23, %v1640_v56 }
 0x6cd   :  { %v1660_v24 = vsel %vm1659_vm12, %v5671_v25, %v1656_v53 }
 0x6ce   :  { %v1665_v52 = vsel %vm1662_vm14, %v1664_v15, %v1660_v24  ;;  %v1645_v12 = vsel %vm1644_vm2, %v5673_v23, %v1641_v26 }
 0x6cf   :  { %v1650_v43 = vsel %vm1647_vm3, %v1649_v49, %v1645_v12  ;;  %v1686_v14 = vmul.f32 %v1684_v10, %v1665_v52 }
 0x6d0   :  { %v1672_v8 = vmul.f32 %v1670_v2, %v1650_v43 }
 0x711   :  { %v1689_v34 = vpop.permute.xlu1 %1688 }
 0x712   :  { %v1691_v54 = vmul.f32 %v1689_v34, %v1665_v52 }
 0x714   :  { %1693 = vrot.lane.b32.xlu0 %v1691_v54, %s6142_s26 }
 0x715   :  { %v1675_v1 = vpop.permute.xlu2 %1674 }
 0x716   :  { %v1677_v7 = vmul.f32 %v1675_v1, %v1650_v43 }
 0x718   :  { %1679 = vrot.lane.b32.xlu1 %v1677_v7, %s6142_s26 }
 0x786   :  { %v1694_v18 = vpop.permute.xlu0 %1693 }
 0x787   :  { %v7723_v59 = vadd.f32 %v1694_v18, %v1686_v14 }
 0x789   :  { %5674 = vtanh.f32 %v7723_v59  ;;  %v1835_v10 = vrot.slane %v7723_v59, 6 }
 0x78a   :  { %v1680_v20 = vpop.permute.xlu1 %1679 }
 0x78b   :  { %v7726_v39 = vadd.f32 %v1680_v20, %v1672_v8 }
 0x78d   :  { %5676 = vtanh.f32 %v7726_v39  ;;  %v1821_v20 = vrot.slane %v7726_v39, 6 }
 0x78f   :  { %v5675_v55 = vpop.eup %5674 }
 0x790   :  { %1705 = vrot.lane.b32.xlu2 %v5675_v55, %s6141_s3 }
 0x793   :  { %v5677_v30 = vpop.eup %5676 }
 0x794   :  { %1699 = vrot.lane.b32.xlu0 %v5677_v30, %s6141_s3 }
 0x7ea   :  { %v1706_v13 = vpop.permute.xlu2 %1705 }
 0x7eb   :  { %v7731_v50 = vmul.f32 %v1706_v13, %v1665_v52 }
 0x7ed   :  { %v1745_v28 = vrot.slane %v7731_v50, 4 }
 0x7ef   :  { %1746 = vrot.lane.b32.xlu1 %v1745_v28, %s6142_s26 }
 0x806   :  { %v1700_v16 = vpop.permute.xlu0 %1699 }
 0x807   :  { %v7735_v61 = vmul.f32 %v1700_v16, %v1650_v43 }
 0x809   :  { %v1720_v57 = vrot.slane %v7735_v61, 4 }
 0x80b   :  { %1721 = vrot.lane.b32.xlu2 %v1720_v57, %s6142_s26 }
 0x861   :  { %v1747_v3 = vpop.permute.xlu1 %1746 }
 0x862   :  { %5486 = vmatmul.msk.f32.vlgmr.msrb.gmra.mxu3 %vm1273_vm0, %v1747_v3 }
 0x863   :  { %2365 = vmatpush.msrb.mxu3 %v7452_v47 }
 0x865   :  { %v1722_v40 = vpop.permute.xlu2 %1721  ;;  %2366 = vmatpush.msrb.mxu3 %v7474_v17  ;;  %v1775_v17 = vld [vmem:[#allocation3 + $0x8] sm:$0x3] }
 0x866   :  { %5485 = vmatmul.msk.f32.vlgmr.msrb.gmra.mxu2 %vm1273_vm0, %v1722_v40 }
 0x867   :  { %2340 = vmatpush.msrb.mxu2 %v6030_v63  ;;  %2367 = vmatpush.msrb.mxu3 %v7530_v42 }
 0x869   :  { %2341 = vmatpush.msrb.mxu2 %v6031_v19  ;;  %2368 = vmatpush.msrb.mxu3 %v7556_v29 }
 0x86b   :  { %2342 = vmatpush.msrb.mxu2 %v7485_v51 }
 0x86d   :  { %2343 = vmatpush.msrb.mxu2 %v7512_v11 }
 0x8e5   :  { %v1767_v47 = vpop.f32.mrf.mxu3 }
 0x8e6   :  { %v1776_v58 = vadd.f32 %v1775_v17, %v1767_v47 }
 0x8e8   :  { %v1778_v33 = vrot.slane %v1776_v58, 2  ;;  %v1920_v58 = vld [vmem:[#allocation3] sm:$0xc0] }
 0x8e9   :  { %v1742_v35 = vpop.f32.mrf.mxu2 }
 0x8ea   :  { %5678 = vtanh.f32 %v1778_v33  ;;  %v1772_v0 = vrot.slane %v1742_v35, 2  ;;  %v5488_v29 = vmul.f32 -1.442695, %v1778_v33 }
 0x8ec   :  { %v1774_v42 = vadd.f32 %v1772_v0, %v1770_v46  ;;  %v1918_v0 = vld [vmem:[#allocation3 + $0x18] sm:$0x3] }
 0x8ee   :  { %5680 = vtanh.f32 %v1774_v42  ;;  %v5487_v51 = vmul.f32 -1.442695, %v1774_v42 }
 0x8ef   :  { %5682 = vpow2.f32 %v5488_v29 }
 0x8f0   :  { %v5679_v21 = vpop.eup %5678  ;;  %5684 = vpow2.f32 %v5487_v51 }
 0x8f1   :  { %1839 = vrot.lane.b32.xlu0 %v5679_v21, %s6141_s3 }
 0x8f4   :  { %v5681_v38 = vpop.eup %5680 }
 0x8f5   :  { %1825 = vrot.lane.b32.xlu1 %v5681_v38, %s6141_s3  ;;  %v5683_v11 = vpop.eup %5682 }
 0x8f6   :  { %v1787_v22 = vadd.f32 1.0, %v5683_v11  ;;  %v5685_v6 = vpop.eup %5684 }
 0x8f7   :  { %v1786_v48 = vadd.f32 1.0, %v5685_v6 }
 0x8f8   :  { %5686 = vrcp.f32 %v1787_v22  ;;  %v1814_v32 = vand.u32 2147483648, %v1787_v22  ;;  %vm1808_vm5 = vweird.f32 %v1787_v22  ;;  %v1812_v5 = vand.u32 2147483647, %v1787_v22 }
 0x8f9   :  { %5688 = vrcp.f32 %v1786_v48  ;;  %v1799_v31 = vand.u32 2147483648, %v1786_v48  ;;  %vm1793_vm9 = vweird.f32 %v1786_v48  ;;  %v1797_v27 = vand.u32 2147483647, %v1786_v48 }
 0x8fa   :  { %v1815_v15 = vor.u32 1.1754944e-38, %v1814_v32  ;;  %vm1813_vm8 = vcmp.eq.f32.partialorder %v1812_v5, 8.507059e+37 }
 0x8fb   :  { %v1800_v49 = vor.u32 1.1754944e-38, %v1799_v31  ;;  %vm1798_vm11 = vcmp.eq.f32.partialorder %v1797_v27, 8.507059e+37 }
 0x8fe   :  { %v5687_v25 = vpop.eup %5686 }
 0x8ff   :  { %v1804_v36 = vmul.f32 %v5687_v25, %v1787_v22  ;;  %v5689_v23 = vpop.eup %5688  ;;  %vm1809_vm4 = vweird.f32 %v5687_v25 }
 0x900   :  { %v1789_v37 = vmul.f32 %v5689_v23, %v1786_v48  ;;  %vm1810_vm6 = vmor %vm1808_vm5, %vm1809_vm4  ;;  %vm1794_vm7 = vweird.f32 %v5689_v23 }
 0x901   :  { %v1805_v45 = vsub.f32 1.0, %v1804_v36  ;;  %vm1795_vm10 = vmor %vm1793_vm9, %vm1794_vm7 }
 0x902   :  { %v1790_v62 = vsub.f32 1.0, %v1789_v37 }
 0x903   :  { %v1806_v41 = vmul.f32 %v5687_v25, %v1805_v45 }
 0x904   :  { %v1791_v56 = vmul.f32 %v5689_v23, %v1790_v62 }
 0x905   :  { %v1807_v53 = vadd.f32 %v5687_v25, %v1806_v41 }
 0x906   :  { %v1792_v26 = vadd.f32 %v5689_v23, %v1791_v56 }
 0x907   :  { %v1811_v24 = vsel %vm1810_vm6, %v5687_v25, %v1807_v53 }
 0x908   :  { %v1816_v34 = vsel %vm1813_vm8, %v1815_v15, %v1811_v24  ;;  %v1796_v12 = vsel %vm1795_vm10, %v5689_v23, %v1792_v26 }
 0x909   :  { %v1801_v43 = vsel %vm1798_vm11, %v1800_v49, %v1796_v12  ;;  %v1837_v14 = vmul.f32 %v1835_v10, %v1816_v34 }
 0x90a   :  { %v1823_v55 = vmul.f32 %v1821_v20, %v1801_v43 }
 0x963   :  { %v1840_v52 = vpop.permute.xlu0 %1839 }
 0x964   :  { %v1842_v54 = vmul.f32 %v1840_v52, %v1816_v34 }
 0x966   :  { %1844 = vrot.lane.b32.xlu2 %v1842_v54, %s6142_s26 }
 0x967   :  { %v1826_v1 = vpop.permute.xlu1 %1825 }
 0x968   :  { %v1828_v7 = vmul.f32 %v1826_v1, %v1801_v43 }
 0x96a   :  { %1830 = vrot.lane.b32.xlu0 %v1828_v7, %s6142_s26 }
 0x9c0   :  { %v1845_v18 = vpop.permute.xlu2 %1844 }
 0x9c1   :  { %v7758_v2 = vadd.f32 %v1845_v18, %v1837_v14 }
 0x9c3   :  { %5690 = vtanh.f32 %v7758_v2  ;;  %v1983_v10 = vrot.slane %v7758_v2, 6 }
 0x9c9   :  { %v5691_v8 = vpop.eup %5690 }
 0x9ca   :  { %1856 = vrot.lane.b32.xlu1 %v5691_v8, %s6141_s3 }
 0x9dc   :  { %v1831_v30 = vpop.permute.xlu0 %1830 }
 0x9dd   :  { %v7763_v13 = vadd.f32 %v1831_v30, %v1823_v55 }
 0x9df   :  { %5692 = vtanh.f32 %v7763_v13  ;;  %v1969_v14 = vrot.slane %v7763_v13, 6 }
 0x9e5   :  { %v5693_v28 = vpop.eup %5692 }
 0x9e6   :  { %1850 = vrot.lane.b32.xlu2 %v5693_v28, %s6141_s3 }
 0xa3c   :  { %v1857_v59 = vpop.permute.xlu1 %1856 }
 0xa3d   :  { %v1859_v16 = vmul.f32 %v1857_v59, %v1816_v34 }
 0xa3f   :  { %v1866_v57 = vrot.slane %v1859_v16, 6 }
 0xa40   :  { %v1851_v3 = vpop.permute.xlu2 %1850 }
 0xa41   :  { %v7767_v40 = vmul.f32 %v1851_v3, %v1801_v43  ;;  %1867 = vrot.lane.b32.xlu0 %v1866_v57, %s6142_s26 }
 0xa43   :  { %v1871_v63 = vrot.slane %v7767_v40, 6 }
 0xa45   :  { %1872 = vrot.lane.b32.xlu1 %v1871_v63, %s6142_s26 }
 0xab3   :  { %v1868_v39 = vpop.permute.xlu0 %1867 }
 0xab4   :  { %1870 = vst.msk [vmem:[#allocation4 + $0x18] sm:$0x3] %vm1405_vm1, %v1868_v39  ;;  %5490 = vmatmul.msk.f32.vlgmr.msra.gmra.mxu1 %vm1273_vm0, %v1868_v39 }
 0xab7   :  { %v1873_v19 = vpop.permute.xlu1 %1872 }
 0xab8   :  { %5489 = vmatmul.msk.f32.vlgmr.msra.gmra.mxu0 %vm1273_vm0, %v1873_v19 }
 0xb31   :  { %v1915_v47 = vpop.f32.mrf.mxu1 }
 0xb32   :  { %v1922_v17 = vrot.slane %v1915_v47, 2 }
 0xb34   :  { %v1924_v33 = vadd.f32 %v1922_v17, %v1920_v58  ;;  %v2070_v17 = vld [vmem:[#allocation3] sm:$0x30] }
 0xb35   :  { %v1893_v35 = vpop.f32.mrf.mxu0 }
 0xb36   :  { %v1926_v46 = vrot.slane %v1924_v33, 6  ;;  %v1919_v42 = vadd.f32 %v1918_v0, %v1893_v35 }
 0xb38   :  { %5694 = vtanh.f32 %v1926_v46  ;;  %v5492_v29 = vmul.f32 -1.442695, %v1926_v46  ;;  %v5491_v6 = vmul.f32 -1.442695, %v1919_v42 }
 0xb39   :  { %5696 = vtanh.f32 %v1919_v42  ;;  %v2065_v42 = vld [vmem:[#allocation3 + $0x18] sm:$0xc] }
 0xb3a   :  { %5698 = vpow2.f32 %v5492_v29 }
 0xb3e   :  { %v5695_v21 = vpop.eup %5694 }
 0xb3f   :  { %v5697_v38 = vpop.eup %5696  ;;  %1987 = vrot.lane.b32.xlu2 %v5695_v21, %s6141_s3 }
 0xb40   :  { %1973 = vrot.lane.b32.xlu0 %v5697_v38, %s6141_s3  ;;  %v5699_v51 = vpop.eup %5698 }
 0xb41   :  { %v1935_v11 = vadd.f32 1.0, %v5699_v51 }
 0xb43   :  { %5700 = vrcp.f32 %v1935_v11  ;;  %v1962_v41 = vand.u32 2147483648, %v1935_v11  ;;  %vm1956_vm13 = vweird.f32 %v1935_v11  ;;  %v1960_v62 = vand.u32 2147483647, %v1935_v11 }
 0xb44   :  { %5702 = vpow2.f32 %v5491_v6 }
 0xb45   :  { %v1963_v56 = vor.u32 1.1754944e-38, %v1962_v41  ;;  %vm1961_vm15 = vcmp.eq.f32.partialorder %v1960_v62, 8.507059e+37 }
 0xb49   :  { %v5701_v22 = vpop.eup %5700 }
 0xb4a   :  { %v1952_v48 = vmul.f32 %v5701_v22, %v1935_v11  ;;  %v5703_v23 = vpop.eup %5702  ;;  %vm1957_vm12 = vweird.f32 %v5701_v22 }
 0xb4b   :  { %v1934_v45 = vadd.f32 1.0, %v5703_v23  ;;  %vm1958_vm14 = vmor %vm1956_vm13, %vm1957_vm12 }
 0xb4c   :  { %v1953_v25 = vsub.f32 1.0, %v1952_v48 }
 0xb4d   :  { %5704 = vrcp.f32 %v1934_v45  ;;  %v1947_v52 = vand.u32 2147483648, %v1934_v45  ;;  %vm1941_vm3 = vweird.f32 %v1934_v45  ;;  %v1945_v54 = vand.u32 2147483647, %v1934_v45 }
 0xb4e   :  { %v1954_v36 = vmul.f32 %v5701_v22, %v1953_v25 }
 0xb4f   :  { %v1948_v49 = vor.u32 1.1754944e-38, %v1947_v52  ;;  %vm1946_vm5 = vcmp.eq.f32.partialorder %v1945_v54, 8.507059e+37 }
 0xb50   :  { %v1955_v37 = vadd.f32 %v5701_v22, %v1954_v36 }
 0xb52   :  { %v1959_v53 = vsel %vm1958_vm14, %v5701_v22, %v1955_v37 }
 0xb53   :  { %v1964_v5 = vsel %vm1961_vm15, %v1963_v56, %v1959_v53  ;;  %v5705_v26 = vpop.eup %5704 }
 0xb54   :  { %v1937_v15 = vmul.f32 %v5705_v26, %v1934_v45  ;;  %vm1942_vm2 = vweird.f32 %v5705_v26  ;;  %v1985_v18 = vmul.f32 %v1983_v10, %v1964_v5 }
 0xb55   :  { %vm1943_vm4 = vmor %vm1941_vm3, %vm1942_vm2 }
 0xb56   :  { %v1938_v31 = vsub.f32 1.0, %v1937_v15 }
 0xb58   :  { %v1939_v27 = vmul.f32 %v5705_v26, %v1938_v31 }
 0xb5a   :  { %v1940_v34 = vadd.f32 %v5705_v26, %v1939_v27 }
 0xb5c   :  { %v1944_v12 = vsel %vm1943_vm4, %v5705_v26, %v1940_v34 }
 0xb5d   :  { %v1949_v1 = vsel %vm1946_vm5, %v1948_v49, %v1944_v12 }
 0xb5e   :  { %v1971_v20 = vmul.f32 %v1969_v14, %v1949_v1 }
 0xb99   :  { %v1988_v32 = vpop.permute.xlu2 %1987 }
 0xb9a   :  { %v1990_v24 = vmul.f32 %v1988_v32, %v1964_v5 }
 0xb9c   :  { %1992 = vrot.lane.b32.xlu1 %v1990_v24, %s6142_s26 }
 0xbb2   :  { %v1974_v43 = vpop.permute.xlu0 %1973 }
 0xbb3   :  { %v1976_v7 = vmul.f32 %v1974_v43, %v1949_v1 }
 0xbb5   :  { %1978 = vrot.lane.b32.xlu2 %v1976_v7, %s6142_s26 }
 0xc0e   :  { %v1993_v8 = vpop.permute.xlu1 %1992 }
 0xc0f   :  { %v7781_v55 = vadd.f32 %v1993_v8, %v1985_v18  ;;  %v1979_v30 = vpop.permute.xlu2 %1978 }
 0xc10   :  { %v7783_v28 = vadd.f32 %v1979_v30, %v1971_v20 }
 0xc11   :  { %5706 = vtanh.f32 %v7781_v55  ;;  %v2133_v14 = vrot.slane %v7781_v55, 6 }
 0xc12   :  { %5708 = vtanh.f32 %v7783_v28  ;;  %v2119_v10 = vrot.slane %v7783_v28, 6 }
 0xc17   :  { %v5707_v59 = vpop.eup %5706 }
 0xc18   :  { %v5709_v16 = vpop.eup %5708  ;;  %2004 = vrot.lane.b32.xlu0 %v5707_v59, %s6141_s3 }
 0xc19   :  { %1998 = vrot.lane.b32.xlu1 %v5709_v16, %s6141_s3 }
 0xc8a   :  { %v2005_v2 = vpop.permute.xlu0 %2004 }
 0xc8b   :  { %v1999_v13 = vpop.permute.xlu1 %1998  ;;  %v7789_v57 = vmul.f32 %v2005_v2, %v1964_v5 }
 0xc8c   :  { %v2001_v3 = vmul.f32 %v1999_v13, %v1949_v1 }
 0xc8d   :  { %2041 = vrot.lane.b32.xlu2 %v7789_v57, %s6142_s26 }
 0xc8e   :  { %2009 = vrot.lane.b32.xlu0 %v2001_v3, %s6142_s26 }
 0xce7   :  { %v2042_v63 = vpop.permute.xlu2 %2041 }
 0xce8   :  { %5494 = vmatmul.msk.f32.vlgmr.msra.gmra.mxu3 %vm1273_vm0, %v2042_v63 }
 0xd00   :  { %v2010_v39 = vpop.permute.xlu0 %2009 }
 0xd01   :  { %2012 = vst.msk [vmem:[#allocation4 + $0x10] sm:$0x3] %vm1405_vm1, %v2010_v39  ;;  %5493 = vmatmul.msk.f32.vlgmr.msra.gmra.mxu2 %vm1273_vm0, %v2010_v39 }
 0xd6b   :  { %v2062_v19 = vpop.f32.mrf.mxu3 }
 0xd6c   :  { %v2072_v47 = vrot.slane %v2062_v19, 4 }
 0xd6e   :  { %v2074_v58 = vadd.f32 %v2072_v47, %v2070_v17 }
 0xd70   :  { %v2076_v33 = vrot.slane %v2074_v58, 2 }
 0xd72   :  { %5710 = vtanh.f32 %v2076_v33  ;;  %v5496_v51 = vmul.f32 -1.442695, %v2076_v33 }
 0xd78   :  { %v5711_v35 = vpop.eup %5710 }
 0xd79   :  { %2137 = vrot.lane.b32.xlu1 %v5711_v35, %s6141_s3 }
 0xd84   :  { %v2038_v0 = vpop.f32.mrf.mxu2 }
 0xd85   :  { %v2067_v46 = vrot.slane %v2038_v0, 6  ;;  %v2219_v0 = vld [vmem:[#allocation3 + $0x18] sm:$0x30] }
 0xd87   :  { %v2069_v21 = vadd.f32 %v2067_v46, %v2065_v42 }
 0xd89   :  { %5712 = vtanh.f32 %v2069_v21  ;;  %v5495_v29 = vmul.f32 -1.442695, %v2069_v21  ;;  %v2224_v21 = vld [vmem:[#allocation3] sm:$0xc] }
 0xd8b   :  { %5714 = vpow2.f32 %v5495_v29 }
 0xd8c   :  { %5716 = vpow2.f32 %v5496_v51 }
 0xd8f   :  { %v5713_v38 = vpop.eup %5712 }
 0xd90   :  { %2123 = vrot.lane.b32.xlu2 %v5713_v38, %s6141_s3 }
 0xd91   :  { %v5715_v11 = vpop.eup %5714 }
 0xd92   :  { %v5717_v22 = vpop.eup %5716  ;;  %v2084_v6 = vadd.f32 1.0, %v5715_v11 }
 0xd93   :  { %v2085_v48 = vadd.f32 1.0, %v5717_v22 }
 0xd94   :  { %5718 = vrcp.f32 %v2084_v6  ;;  %v2097_v32 = vand.u32 2147483648, %v2084_v6  ;;  %vm2091_vm8 = vweird.f32 %v2084_v6  ;;  %v2095_v24 = vand.u32 2147483647, %v2084_v6 }
 0xd95   :  { %5720 = vrcp.f32 %v2085_v48  ;;  %v2112_v26 = vand.u32 2147483648, %v2085_v48  ;;  %vm2106_vm10 = vweird.f32 %v2085_v48  ;;  %v2110_v15 = vand.u32 2147483647, %v2085_v48 }
 0xd96   :  { %v2098_v27 = vor.u32 1.1754944e-38, %v2097_v32  ;;  %vm2096_vm12 = vcmp.eq.f32.partialorder %v2095_v24, 8.507059e+37 }
 0xd97   :  { %v2113_v52 = vor.u32 1.1754944e-38, %v2112_v26  ;;  %vm2111_vm13 = vcmp.eq.f32.partialorder %v2110_v15, 8.507059e+37 }
 0xd9a   :  { %v5719_v25 = vpop.eup %5718 }
 0xd9b   :  { %v5721_v36 = vpop.eup %5720  ;;  %v2087_v23 = vmul.f32 %v5719_v25, %v2084_v6  ;;  %vm2092_vm6 = vweird.f32 %v5719_v25 }
 0xd9c   :  { %v2102_v45 = vmul.f32 %v5721_v36, %v2085_v48  ;;  %vm2107_vm7 = vweird.f32 %v5721_v36  ;;  %vm2093_vm9 = vmor %vm2091_vm8, %vm2092_vm6 }
 0xd9d   :  { %v2088_v37 = vsub.f32 1.0, %v2087_v23  ;;  %vm2108_vm11 = vmor %vm2106_vm10, %vm2107_vm7 }
 0xd9e   :  { %v2103_v41 = vsub.f32 1.0, %v2102_v45 }
 0xd9f   :  { %v2089_v62 = vmul.f32 %v5719_v25, %v2088_v37 }
 0xda0   :  { %v2104_v53 = vmul.f32 %v5721_v36, %v2103_v41 }
 0xda1   :  { %v2090_v56 = vadd.f32 %v5719_v25, %v2089_v62 }
 0xda2   :  { %v2105_v5 = vadd.f32 %v5721_v36, %v2104_v53 }
 0xda3   :  { %v2094_v31 = vsel %vm2093_vm9, %v5719_v25, %v2090_v56 }
 0xda4   :  { %v2109_v34 = vsel %vm2108_vm11, %v5721_v36, %v2105_v5  ;;  %v2099_v12 = vsel %vm2096_vm12, %v2098_v27, %v2094_v31 }
 0xda5   :  { %v2114_v43 = vsel %vm2111_vm13, %v2113_v52, %v2109_v34  ;;  %v2121_v18 = vmul.f32 %v2119_v10, %v2099_v12 }
 0xda6   :  { %v2135_v20 = vmul.f32 %v2133_v14, %v2114_v43 }
 0xdea   :  { %v2124_v54 = vpop.permute.xlu2 %2123 }
 0xdeb   :  { %v2126_v49 = vmul.f32 %v2124_v54, %v2099_v12  ;;  %v2138_v1 = vpop.permute.xlu1 %2137 }
 0xdec   :  { %v2140_v7 = vmul.f32 %v2138_v1, %v2114_v43 }
 0xded   :  { %2128 = vrot.lane.b32.xlu1 %v2126_v49, %s6142_s26 }
 0xdee   :  { %2142 = vrot.lane.b32.xlu0 %v2140_v7, %s6142_s26 }
 0xe5f   :  { %v2129_v8 = vpop.permute.xlu1 %2128 }
 0xe60   :  { %v7803_v30 = vadd.f32 %v2129_v8, %v2121_v18  ;;  %v2143_v59 = vpop.permute.xlu0 %2142 }
 0xe61   :  { %v7805_v16 = vadd.f32 %v2143_v59, %v2135_v20 }
 0xe62   :  { %5722 = vtanh.f32 %v7803_v30 }
 0xe63   :  { %5724 = vtanh.f32 %v7805_v16  ;;  %v2287_v8 = vrot.slane %v7805_v16, 6 }
 0xe68   :  { %v5723_v2 = vpop.eup %5722 }
 0xe69   :  { %v5725_v13 = vpop.eup %5724  ;;  %2148 = vrot.lane.b32.xlu0 %v5723_v2, %s6141_s3 }
 0xe6a   :  { %2154 = vrot.lane.b32.xlu2 %v5725_v13, %s6141_s3 }
 0xec4   :  { %v2155_v28 = vpop.permute.xlu2 %2154 }
 0xec5   :  { %v7811_v55 = vmul.f32 %v2155_v28, %v2114_v43  ;;  %v2273_v28 = vrot.slane %v7803_v30, 6 }
 0xec7   :  { %v2194_v3 = vrot.slane %v7811_v55, 2 }
 0xec9   :  { %2195 = vrot.lane.b32.xlu1 %v2194_v3, %s6142_s26 }
 0xedb   :  { %v2149_v63 = vpop.permute.xlu0 %2148 }
 0xedc   :  { %v7815_v39 = vmul.f32 %v2149_v63, %v2099_v12 }
 0xede   :  { %v2169_v19 = vrot.slane %v7815_v39, 2 }
 0xee0   :  { %2170 = vrot.lane.b32.xlu2 %v2169_v19, %s6142_s26 }
 0xf3a   :  { %v2171_v47 = vpop.permute.xlu2 %2170 }
 0xf3b   :  { %5497 = vmatmul.msk.f32.vlgmr.msrb.gmra.mxu0 %vm1273_vm0, %v2171_v47  ;;  %v2196_v17 = vpop.permute.xlu1 %2195 }
 0xf3c   :  { %5498 = vmatmul.msk.f32.vlgmr.msrb.gmra.mxu1 %vm1273_vm0, %v2196_v17 }
 0xfb8   :  { %v2191_v58 = vpop.f32.mrf.mxu0 }
 0xfb9   :  { %v2221_v33 = vrot.slane %v2191_v58, 4  ;;  %v2216_v35 = vpop.f32.mrf.mxu1 }
 0xfba   :  { %v2226_v46 = vrot.slane %v2216_v35, 6 }
 0xfbb   :  { %v2223_v42 = vadd.f32 %v2221_v33, %v2219_v0 }
 0xfbc   :  { %v2228_v38 = vadd.f32 %v2226_v46, %v2224_v21 }
 0xfbd   :  { %5726 = vtanh.f32 %v2223_v42  ;;  %v5499_v22 = vmul.f32 -1.442695, %v2223_v42 }
 0xfbe   :  { %v2230_v29 = vrot.slane %v2228_v38, 6  ;;  %v2373_v38 = vld [vmem:[#allocation3 + $0x18] sm:$0xc0] }
 0xfc0   :  { %5728 = vtanh.f32 %v2230_v29  ;;  %v5500_v6 = vmul.f32 -1.442695, %v2230_v29 }
 0xfc1   :  { %5730 = vpow2.f32 %v5499_v22 }
 0xfc2   :  { %5732 = vpow2.f32 %v5500_v6 }
 0xfc3   :  { %v5727_v51 = vpop.eup %5726 }
 0xfc4   :  { %2277 = vrot.lane.b32.xlu1 %v5727_v51, %s6141_s3 }
 0xfc6   :  { %v5729_v11 = vpop.eup %5728 }
 0xfc7   :  { %2291 = vrot.lane.b32.xlu0 %v5729_v11, %s6141_s3  ;;  %v5731_v48 = vpop.eup %5730  ;;  %v2378_v11 = vld [vmem:[#allocation3] sm:$0x3] }
 0xfc8   :  { %v5733_v25 = vpop.eup %5732  ;;  %v2238_v36 = vadd.f32 1.0, %v5731_v48 }
 0xfc9   :  { %v2239_v23 = vadd.f32 1.0, %v5733_v25 }
 0xfca   :  { %5734 = vrcp.f32 %v2238_v36  ;;  %v2251_v26 = vand.u32 2147483648, %v2238_v36  ;;  %vm2245_vm15 = vweird.f32 %v2238_v36  ;;  %v2249_v15 = vand.u32 2147483647, %v2238_v36 }
 0xfcb   :  { %5736 = vrcp.f32 %v2239_v23  ;;  %v2266_v34 = vand.u32 2147483648, %v2239_v23  ;;  %vm2260_vm4 = vweird.f32 %v2239_v23  ;;  %v2264_v54 = vand.u32 2147483647, %v2239_v23 }
 0xfcc   :  { %v2252_v52 = vor.u32 1.1754944e-38, %v2251_v26  ;;  %vm2250_vm5 = vcmp.eq.f32.partialorder %v2249_v15, 8.507059e+37 }
 0xfcd   :  { %v2267_v7 = vor.u32 1.1754944e-38, %v2266_v34  ;;  %vm2265_vm7 = vcmp.eq.f32.partialorder %v2264_v54, 8.507059e+37 }
 0xfd0   :  { %v5735_v45 = vpop.eup %5734 }
 0xfd1   :  { %v5737_v37 = vpop.eup %5736  ;;  %v2241_v41 = vmul.f32 %v5735_v45, %v2238_v36  ;;  %vm2246_vm14 = vweird.f32 %v5735_v45 }
 0xfd2   :  { %v2256_v62 = vmul.f32 %v5737_v37, %v2239_v23  ;;  %vm2247_vm2 = vmor %vm2245_vm15, %vm2246_vm14  ;;  %vm2261_vm3 = vweird.f32 %v5737_v37 }
 0xfd3   :  { %v2242_v53 = vsub.f32 1.0, %v2241_v41  ;;  %vm2262_vm6 = vmor %vm2260_vm4, %vm2261_vm3  ;;  %vm1412_vm3 = vcmask 261126   ;;  %vm1564_vm4 = vcmask 259076  }
 0xfd4   :  { %v2257_v56 = vsub.f32 1.0, %v2256_v62 }
 0xfd5   :  { %v2243_v32 = vmul.f32 %v5735_v45, %v2242_v53 }
 0xfd6   :  { %v2258_v5 = vmul.f32 %v5737_v37, %v2257_v56 }
 0xfd7   :  { %v2244_v24 = vadd.f32 %v5735_v45, %v2243_v32 }
 0xfd8   :  { %v2259_v31 = vadd.f32 %v5737_v37, %v2258_v5 }
 0xfd9   :  { %v2248_v27 = vsel %vm2247_vm2, %v5735_v45, %v2244_v24  ;;  %vm1557_vm2 = vcmask 257026  }
 0xfda   :  { %v2253_v49 = vsel %vm2250_vm5, %v2252_v52, %v2248_v27  ;;  %v2263_v1 = vsel %vm2262_vm6, %v5737_v37, %v2259_v31 }
 0xfdb   :  { %v2268_v10 = vsel %vm2265_vm7, %v2267_v7, %v2263_v1  ;;  %v2275_v3 = vmul.f32 %v2273_v28, %v2253_v49  ;;  %v2014_v28 = vrot.slane %v7789_v57, 2 }
 0xfdc   :  { %v2289_v20 = vmul.f32 %v2287_v8, %v2268_v10 }
0x1036   :  { %v2278_v12 = vpop.permute.xlu1 %2277 }
0x1037   :  { %v2280_v43 = vmul.f32 %v2278_v12, %v2253_v49 }
0x1039   :  { %2282 = vrot.lane.b32.xlu0 %v2280_v43, %s6142_s26  ;;  %v2292_v14 = vpop.permute.xlu0 %2291 }
0x103a   :  { %v2294_v18 = vmul.f32 %v2292_v14, %v2268_v10 }
0x103c   :  { %2296 = vrot.lane.b32.xlu2 %v2294_v18, %s6142_s26 }
0x1096   :  { %v2297_v59 = vpop.permute.xlu2 %2296 }
0x1097   :  { %v7826_v2 = vadd.f32 %v2297_v59, %v2289_v20 }
0x1099   :  { %5738 = vtanh.f32 %v7826_v2 }
0x109f   :  { %v5739_v13 = vpop.eup %5738 }
0x10a0   :  { %2308 = vrot.lane.b32.xlu1 %v5739_v13, %s6141_s3 }
0x10ab   :  { %v2283_v63 = vpop.permute.xlu0 %2282 }
0x10ac   :  { %v7831_v19 = vadd.f32 %v2283_v63, %v2275_v3 }
0x10ae   :  { %5740 = vtanh.f32 %v7831_v19  ;;  %v2424_v3 = vrot.slane %v7831_v19, 6  ;;  %v2509_v19 = vld [vmem:[%s9095_s4 + $0xf8] sm:$0xff] }
0x10af   :  { %2594 = vmatpush.msra.mxu2 %v2509_v19 }
0x10b4   :  { %v5741_v47 = vpop.eup %5740 }
0x10b5   :  { %2302 = vrot.lane.b32.xlu2 %v5741_v47, %s6141_s3  ;;  %v2438_v47 = vrot.slane %v7826_v2, 6  ;;  %v2508_v2 = vld [vmem:[%s9095_s4 + $0xf0] sm:$0xff] }
0x10b6   :  { %2548 = vmatpush.msra.mxu0 %v2508_v2 }
0x110f   :  { %v2303_v16 = vpop.permute.xlu2 %2302 }
0x1110   :  { %v7835_v17 = vmul.f32 %v2303_v16, %v2253_v49 }
0x1112   :  { %v2323_v58 = vrot.slane %v7835_v17, 4  ;;  %v2309_v33 = vpop.permute.xlu1 %2308 }
0x1113   :  { %v7838_v35 = vmul.f32 %v2309_v33, %v2268_v10 }
0x1114   :  { %2324 = vrot.lane.b32.xlu1 %v2323_v58, %s6142_s26 }
0x1115   :  { %v2348_v30 = vrot.slane %v7838_v35, 4 }
0x1117   :  { %2349 = vrot.lane.b32.xlu0 %v2348_v30, %s6142_s26 }
0x1186   :  { %v2325_v0 = vpop.permute.xlu1 %2324 }
0x1187   :  { %5501 = vmatmul.msk.f32.vlgmr.msrb.gmra.mxu2 %vm1273_vm0, %v2325_v0 }
0x1189   :  { %v2350_v46 = vpop.permute.xlu0 %2349 }
0x118a   :  { %5502 = vmatmul.msk.f32.vlgmr.msrb.gmra.mxu3 %vm1273_vm0, %v2350_v46 }
0x120a   :  { %v2345_v42 = vpop.f32.mrf.mxu2 }
0x120b   :  { %v2375_v21 = vrot.slane %v2345_v42, 2  ;;  %v2506_v42 = vld [vmem:[%s9095_s4 + $0xe0] sm:$0xff] }
0x120c   :  { %2549 = vmatpush.msra.mxu0 %v2506_v42 }
0x120d   :  { %v2377_v29 = vadd.f32 %v2375_v21, %v2373_v38  ;;  %v2370_v51 = vpop.f32.mrf.mxu3  ;;  %v2507_v21 = vld [vmem:[%s9095_s4 + $0xe8] sm:$0xff]  ;;  %v2504_v38 = vld [vmem:[%s9095_s4 + $0xd0] sm:$0xff] }
0x120e   :  { %v2379_v22 = vadd.f32 %v2378_v11, %v2370_v51  ;;  %2595 = vmatpush.msra.mxu2 %v2507_v21  ;;  %v2505_v51 = vld [vmem:[%s9095_s4 + $0xd8] sm:$0xff]  ;;  %v2502_v11 = vld [vmem:[%s9095_s4 + $0xc0] sm:$0xff]  ;;  %2550 = vmatpush.msra.mxu0 %v2504_v38 }
0x120f   :  { %5742 = vtanh.f32 %v2377_v29  ;;  %v5503_v37 = vmul.f32 -1.442695, %v2377_v29 }
0x1210   :  { %v2381_v6 = vrot.slane %v2379_v22, 2  ;;  %v2503_v22 = vld [vmem:[%s9095_s4 + $0xc8] sm:$0xff]  ;;  %2596 = vmatpush.msra.mxu2 %v2505_v51  ;;  %2551 = vmatpush.msra.mxu0 %v2502_v11  ;;  %v2525_v51 = vld [vmem:[%s9095_s4 + $0x178] sm:$0xff]  ;;  %v2522_v11 = vld [vmem:[%s9095_s4 + $0x160] sm:$0xff] }
0x1212   :  { %5744 = vtanh.f32 %v2381_v6  ;;  %v5504_v36 = vmul.f32 -1.442695, %v2381_v6  ;;  %v2500_v6 = vld [vmem:[%s9095_s4 + $0xb0] sm:$0xff]  ;;  %2597 = vmatpush.msra.mxu2 %v2503_v22  ;;  %v2523_v22 = vld [vmem:[%s9095_s4 + $0x168] sm:$0xff] }
0x1213   :  { %2552 = vmatpush.msra.mxu0 %v2500_v6  ;;  %v2520_v6 = vld [vmem:[%s9095_s4 + $0x150] sm:$0xff] }
0x1214   :  { %5746 = vpow2.f32 %v5504_v36  ;;  %v2318_v36 = vrot.slane %v7838_v35, 2  ;;  %v1408_v35 = vrot.slane %v7669_v44, 2  ;;  %v2495_v44 = vld [vmem:[%s9095_s4 + $0x88] sm:$0xff] }
0x1215   :  { %v5743_v48 = vpop.eup %5742 }
0x1216   :  { %2428 = vrot.lane.b32.xlu0 %v5743_v48, %s6141_s3  ;;  %v2501_v48 = vld [vmem:[%s9095_s4 + $0xb8] sm:$0xff] }
0x1217   :  { %2598 = vmatpush.msra.mxu2 %v2501_v48  ;;  %v2521_v48 = vld [vmem:[%s9095_s4 + $0x158] sm:$0xff] }
0x1218   :  { %v5745_v25 = vpop.eup %5744 }
0x1219   :  { %2442 = vrot.lane.b32.xlu2 %v5745_v25, %s6141_s3  ;;  %v2499_v25 = vld [vmem:[%s9095_s4 + $0xa8] sm:$0xff] }
0x121a   :  { %v5747_v23 = vpop.eup %5746  ;;  %2599 = vmatpush.msra.mxu2 %v2499_v25  ;;  %v2519_v25 = vld [vmem:[%s9095_s4 + $0x148] sm:$0xff] }
0x121b   :  { %v2390_v45 = vadd.f32 1.0, %v5747_v23  ;;  %v2164_v23 = vrot.slane %v7811_v55, 6  ;;  %v2496_v55 = vld [vmem:[%s9095_s4 + $0x90] sm:$0xff] }
0x121d   :  { %5748 = vrcp.f32 %v2390_v45  ;;  %v2417_v26 = vand.u32 2147483648, %v2390_v45  ;;  %vm2411_vm9 = vweird.f32 %v2390_v45  ;;  %v2415_v15 = vand.u32 2147483647, %v2390_v45 }
0x121e   :  { %5750 = vpow2.f32 %v5503_v37  ;;  %v2490_v37 = vld [vmem:[%s9095_s4 + $0x60] sm:$0xff] }
0x121f   :  { %v2418_v27 = vor.u32 1.1754944e-38, %v2417_v26  ;;  %vm2416_vm11 = vcmp.eq.f32.partialorder %v2415_v15, 8.507059e+37  ;;  %v2482_v26 = vld [vmem:[%s9095_s4 + $0x20] sm:$0xff]  ;;  %v2483_v15 = vld [vmem:[%s9095_s4 + $0x28] sm:$0xff] }
0x1223   :  { %v5749_v41 = vpop.eup %5748 }
0x1224   :  { %v2407_v62 = vmul.f32 %v5749_v41, %v2390_v45  ;;  %v5751_v56 = vpop.eup %5750  ;;  %vm2412_vm8 = vweird.f32 %v5749_v41  ;;  %v2497_v45 = vld [vmem:[%s9095_s4 + $0x98] sm:$0xff] }
0x1225   :  { %v2389_v32 = vadd.f32 1.0, %v5751_v56  ;;  %vm2413_vm10 = vmor %vm2411_vm9, %vm2412_vm8  ;;  %2600 = vmatpush.msra.mxu2 %v2497_v45  ;;  %v2486_v56 = vld [vmem:[%s9095_s4 + $0x40] sm:$0xff]  ;;  %v2513_v45 = vld [vmem:[%s9095_s4 + $0x118] sm:$0xff] }
0x1226   :  { %v2408_v53 = vsub.f32 1.0, %v2407_v62  ;;  %v2488_v62 = vld [vmem:[%s9095_s4 + $0x50] sm:$0xff] }
0x1227   :  { %5752 = vrcp.f32 %v2389_v32  ;;  %v2402_v10 = vand.u32 2147483648, %v2389_v32  ;;  %vm2396_vm13 = vweird.f32 %v2389_v32  ;;  %v2400_v14 = vand.u32 2147483647, %v2389_v32  ;;  %2601 = vmatpush.msra.mxu2 %v2495_v44  ;;  %v2511_v44 = vld [vmem:[%s9095_s4 + $0x108] sm:$0xff] }
0x1228   :  { %v2409_v5 = vmul.f32 %v5749_v41, %v2408_v53  ;;  %v2489_v53 = vld [vmem:[%s9095_s4 + $0x58] sm:$0xff] }
0x1229   :  { %v2403_v8 = vor.u32 1.1754944e-38, %v2402_v10  ;;  %vm2401_vm15 = vcmp.eq.f32.partialorder %v2400_v14, 8.507059e+37  ;;  %v2538_v10 = vld [vmem:[%s9095_s4 + $0x1e0] sm:$0xff] }
0x122a   :  { %v2410_v24 = vadd.f32 %v5749_v41, %v2409_v5  ;;  %v2484_v5 = vld [vmem:[%s9095_s4 + $0x30] sm:$0xff] }
0x122c   :  { %v2414_v31 = vsel %vm2413_vm10, %v5749_v41, %v2410_v24  ;;  %v2491_v41 = vld [vmem:[%s9095_s4 + $0x68] sm:$0xff]  ;;  %v2485_v24 = vld [vmem:[%s9095_s4 + $0x38] sm:$0xff] }
0x122d   :  { %v5753_v34 = vpop.eup %5752  ;;  %v7847_v54 = vsel %vm2416_vm11, %v2418_v27, %v2414_v31  ;;  %v2480_v31 = vld [vmem:[%s9095_s4 + $0x10] sm:$0xff]  ;;  %v2481_v27 = vld [vmem:[%s9095_s4 + $0x18] sm:$0xff] }
0x122e   :  { %v2392_v49 = vmul.f32 %v5753_v34, %v2389_v32  ;;  %vm2397_vm12 = vweird.f32 %v5753_v34  ;;  %v2440_v33 = vmul.f32 %v2438_v47, %v7847_v54  ;;  %v2487_v32 = vld [vmem:[%s9095_s4 + $0x48] sm:$0xff]  ;;  %v2533_v47 = vld [vmem:[%s9095_s4 + $0x1b8] sm:$0xff] }
0x122f   :  { %vm2398_vm14 = vmor %vm2396_vm13, %vm2397_vm12 }
0x1230   :  { %v2393_v1 = vsub.f32 1.0, %v2392_v49 }
0x1232   :  { %v2394_v43 = vmul.f32 %v5753_v34, %v2393_v1 }
0x1234   :  { %v2395_v7 = vadd.f32 %v5753_v34, %v2394_v43  ;;  %v2540_v43 = vld [vmem:[%s9095_s4 + $0x1f0] sm:$0xff] }
0x1235   :  { %2571 = vmatpush.msra.mxu1 %v2540_v43 }
0x1236   :  { %v2399_v18 = vsel %vm2398_vm14, %v5753_v34, %v2395_v7  ;;  %v2478_v34 = vld [vmem:[%s9095_s4] sm:$0xff]  ;;  %v2541_v7 = vld [vmem:[%s9095_s4 + $0x1f8] sm:$0xff] }
0x1237   :  { %v7851_v20 = vsel %vm2401_vm15, %v2403_v8, %v2399_v18  ;;  %2617 = vmatpush.msra.mxu3 %v2541_v7  ;;  %v2539_v18 = vld [vmem:[%s9095_s4 + $0x1e8] sm:$0xff]  ;;  %v2536_v8 = vld [vmem:[%s9095_s4 + $0x1d0] sm:$0xff]  ;;  %2572 = vmatpush.msra.mxu1 %v2538_v10 }
0x1238   :  { %v2426_v63 = vmul.f32 %v2424_v3, %v7851_v20  ;;  %v2532_v3 = vld [vmem:[%s9095_s4 + $0x1b0] sm:$0xff] }
0x1239   :  { %2618 = vmatpush.msra.mxu3 %v2539_v18  ;;  %2573 = vmatpush.msra.mxu1 %v2536_v8 }
0x1273   :  { %v2443_v52 = vpop.permute.xlu2 %2442 }
0x1274   :  { %v2445_v12 = vmul.f32 %v2443_v52, %v7847_v54  ;;  %v2479_v52 = vld [vmem:[%s9095_s4 + $0x8] sm:$0xff] }
0x1276   :  { %2447 = vrot.lane.b32.xlu1 %v2445_v12, %s6142_s26 }
0x1288   :  { %v2429_v59 = vpop.permute.xlu0 %2428 }
0x1289   :  { %v2431_v13 = vmul.f32 %v2429_v59, %v7851_v20 }
0x128b   :  { %2433 = vrot.lane.b32.xlu2 %v2431_v13, %s6142_s26 }
0x1293   :  { %1554 = vrot.lane.b32.xlu2 %v7703_v9, %s6142_s26 }
0x129b   :  { %2015 = vrot.lane.b32.xlu2 %v2014_v28, %s6142_s26  ;;  %v2535_v28 = vld [vmem:[%s9095_s4 + $0x1c8] sm:$0xff] }
0x12e5   :  { %v2434_v16 = vpop.permute.xlu2 %2433 }
0x12e6   :  { %v2436_v58 = vadd.f32 %v2434_v16, %v2426_v63  ;;  %v2530_v16 = vld [vmem:[%s9095_s4 + $0x1a0] sm:$0xff] }
0x12e8   :  { %5754 = vtanh.f32 %v2436_v58  ;;  %v2448_v30 = vpop.permute.xlu1 %2447  ;;  %v2531_v58 = vld [vmem:[%s9095_s4 + $0x1a8] sm:$0xff] }
0x12e9   :  { %v2450_v0 = vadd.f32 %v2448_v30, %v2440_v33  ;;  %v2528_v33 = vld [vmem:[%s9095_s4 + $0x190] sm:$0xff]  ;;  %v2529_v30 = vld [vmem:[%s9095_s4 + $0x198] sm:$0xff] }
0x12eb   :  { %5756 = vtanh.f32 %v2450_v0 }
0x12ed   :  { %v1555_v9 = vpop.permute.xlu2 %1554 }
0x12ee   :  { %v5755_v46 = vpop.eup %5754  ;;  %1558 = vst.msk [vmem:[#allocation4] sm:$0xc] %vm1557_vm2, %v1555_v9  ;;  %v2526_v9 = vld [vmem:[%s9095_s4 + $0x180] sm:$0xff] }
0x12ef   :  { %2453 = vrot.lane.b32.xlu1 %v5755_v46, %s6141_s3  ;;  %v1715_v46 = vrot.slane %v7731_v50, 2 }
0x12f1   :  { %v5757_v57 = vpop.eup %5756 }
0x12f2   :  { %2459 = vrot.lane.b32.xlu0 %v5757_v57, %s6141_s3  ;;  %v2527_v57 = vld [vmem:[%s9095_s4 + $0x188] sm:$0xff] }
0x12f5   :  { %v2016_v29 = vpop.permute.xlu2 %2015 }
0x12f6   :  { %2018 = vst.msk [vmem:[#allocation4 + $0x8] sm:$0xc0] %vm1412_vm3, %v2016_v29  ;;  %v2524_v29 = vld [vmem:[%s9095_s4 + $0x170] sm:$0xff] }
0x12f7   :  { %1861 = vrot.lane.b32.xlu1 %v7767_v40, %s6142_s26  ;;  %v2498_v40 = vld [vmem:[%s9095_s4 + $0xa0] sm:$0xff] }
0x12f8   :  { %2553 = vmatpush.msra.mxu0 %v2498_v40  ;;  %v2518_v40 = vld [vmem:[%s9095_s4 + $0x140] sm:$0xff] }
0x12fa   :  { %1710 = vrot.lane.b32.xlu0 %v7735_v61, %s6142_s26  ;;  %v1560_v61 = vrot.slane %v7699_v4, 6  ;;  %2554 = vmatpush.msra.mxu0 %v2496_v55  ;;  %v2494_v4 = vld [vmem:[%s9095_s4 + $0x80] sm:$0xff]  ;;  %v2512_v55 = vld [vmem:[%s9095_s4 + $0x110] sm:$0xff] }
0x12fc   :  { %2555 = vmatpush.msra.mxu0 %v2494_v4  ;;  %v2510_v4 = vld [vmem:[%s9095_s4 + $0x100] sm:$0xff] }
0x12ff   :  { %2319 = vrot.lane.b32.xlu1 %v2318_v36, %s6142_s26  ;;  %v2516_v36 = vld [vmem:[%s9095_s4 + $0x130] sm:$0xff] }
0x1302   :  { %2165 = vrot.lane.b32.xlu0 %v2164_v23, %s6142_s26  ;;  %v2517_v23 = vld [vmem:[%s9095_s4 + $0x138] sm:$0xff] }
0x1307   :  { %2313 = vrot.lane.b32.xlu1 %v7835_v17, %s6142_s26  ;;  %v2493_v17 = vld [vmem:[%s9095_s4 + $0x78] sm:$0xff] }
0x1308   :  { %2602 = vmatpush.msra.mxu2 %v2493_v17  ;;  %v8091_v17 = vld [vmem:[#allocation5 + $0x10] sm:$0xff] }
0x130a   :  { %2159 = vrot.lane.b32.xlu0 %v7815_v39, %s6142_s26  ;;  %v2492_v39 = vld [vmem:[%s9095_s4 + $0x70] sm:$0xff]  ;;  %2603 = vmatpush.msra.mxu2 %v2491_v41  ;;  %v8097_v41 = vld [vmem:[#allocation5 + $0x8] sm:$0xff] }
0x130b   :  { %2556 = vmatpush.msra.mxu0 %v2492_v39  ;;  %v8089_v39 = vld [vmem:[#allocation5 + $0x18] sm:$0xff] }
0x130c   :  { %2604 = vmatpush.msra.mxu2 %v2489_v53  ;;  %v8107_v53 = vld [vmem:[#allocation7 + $0x10] sm:$0xff] }
0x130d   :  { %2557 = vmatpush.msra.mxu0 %v2490_v37  ;;  %v8093_v37 = vld [vmem:[#allocation7 + $0x18] sm:$0xff] }
0x130e   :  { %2605 = vmatpush.msra.mxu2 %v2487_v32  ;;  %v8113_v32 = vld [vmem:[#allocation7] sm:$0xff] }
0x130f   :  { %1561 = vrot.lane.b32.xlu1 %v1560_v61, %s6142_s26  ;;  %2558 = vmatpush.msra.mxu0 %v2488_v62  ;;  %v2514_v61 = vld [vmem:[%s9095_s4 + $0x120] sm:$0xff] }
0x1310   :  { %2606 = vmatpush.msra.mxu2 %v2485_v24  ;;  %v8105_v62 = vld [vmem:[#allocation5] sm:$0xff] }
0x1311   :  { %2559 = vmatpush.msra.mxu0 %v2486_v56  ;;  %v8109_v56 = vld [vmem:[#allocation7 + $0x8] sm:$0xff] }
0x1312   :  { %1409 = vrot.lane.b32.xlu0 %v1408_v35, %s6142_s26  ;;  %2607 = vmatpush.msra.mxu2 %v2483_v15  ;;  %v2515_v35 = vld [vmem:[%s9095_s4 + $0x128] sm:$0xff] }
0x1313   :  { %2560 = vmatpush.msra.mxu0 %v2484_v5 }
0x1314   :  { %2608 = vmatpush.msra.mxu2 %v2481_v27 }
0x1315   :  { %2561 = vmatpush.msra.mxu0 %v2482_v26 }
0x1316   :  { %2609 = vmatpush.msra.mxu2 %v2479_v52 }
0x1317   :  { %2562 = vmatpush.msra.mxu0 %v2480_v31 }
0x1318   :  { %2801 = vmatpush.msrb.mxu2 %v8089_v39 }
0x1319   :  { %2563 = vmatpush.msra.mxu0 %v2478_v34  ;;  %v2542_v34 = vld [vmem:[%s9096_s5] sm:$0x3] }
0x131a   :  { %2802 = vmatpush.msrb.mxu2 %v8091_v17  ;;  %v2545_v7 = vperm.slane %v2542_v34, 1 }
0x131b   :  { %2664 = vmatpush.msrb.mxu0 %v8089_v39 }
0x131c   :  { %2803 = vmatpush.msrb.mxu2 %v8097_v41 }
0x131d   :  { %2665 = vmatpush.msrb.mxu0 %v8091_v17 }
0x131e   :  { %2804 = vmatpush.msrb.mxu2 %v8105_v62 }
0x131f   :  { %2666 = vmatpush.msrb.mxu0 %v8097_v41 }
0x1321   :  { %2667 = vmatpush.msrb.mxu0 %v8105_v62 }
0x1361   :  { %v2454_v12 = vpop.permute.xlu1 %2453 }
0x1362   :  { %v2456_v49 = vmul.f32 %v2454_v12, %v7851_v20  ;;  %v2537_v20 = vld [vmem:[%s9095_s4 + $0x1d8] sm:$0xff]  ;;  %v2544_v12 = vperm.slane %v2542_v34, 0 }
0x1363   :  { %2619 = vmatpush.msra.mxu3 %v2537_v20 }
0x1364   :  { %2464 = vrot.lane.b32.xlu2 %v2456_v49, %s6142_s26  ;;  %v2460_v1 = vpop.permute.xlu0 %2459 }
0x1365   :  { %v2462_v14 = vmul.f32 %v2460_v1, %v7847_v54  ;;  %v2534_v54 = vld [vmem:[%s9095_s4 + $0x1c0] sm:$0xff]  ;;  %2620 = vmatpush.msra.mxu3 %v2535_v28 }
0x1366   :  { %2574 = vmatpush.msra.mxu1 %v2534_v54 }
0x1367   :  { %v2469_v13 = vrot.slane %v2462_v14, 6  ;;  %2621 = vmatpush.msra.mxu3 %v2533_v47 }
0x1368   :  { %2575 = vmatpush.msra.mxu1 %v2532_v3 }
0x1369   :  { %v1862_v59 = vpop.permute.xlu1 %1861  ;;  %2622 = vmatpush.msra.mxu3 %v2531_v58 }
0x136a   :  { %1864 = vst.msk [vmem:[#allocation4] sm:$0xc0] %vm1412_vm3, %v1862_v59  ;;  %2576 = vmatpush.msra.mxu1 %v2530_v16 }
0x136b   :  { %2623 = vmatpush.msra.mxu3 %v2529_v30 }
0x136c   :  { %2470 = vrot.lane.b32.xlu2 %v2469_v13, %s6142_s26  ;;  %v1711_v63 = vpop.permute.xlu0 %1710  ;;  %2577 = vmatpush.msra.mxu1 %v2528_v33 }
0x136d   :  { %1713 = vst.msk [vmem:[#allocation4] sm:$0x30] %vm1564_vm4, %v1711_v63  ;;  %2624 = vmatpush.msra.mxu3 %v2527_v57 }
0x136e   :  { %2578 = vmatpush.msra.mxu1 %v2526_v9 }
0x136f   :  { %2625 = vmatpush.msra.mxu3 %v2525_v51 }
0x1370   :  { %2579 = vmatpush.msra.mxu1 %v2524_v29 }
0x1371   :  { %v2320_v0 = vpop.permute.xlu1 %2319  ;;  %2626 = vmatpush.msra.mxu3 %v2523_v22 }
0x1372   :  { %2322 = vst.msk [vmem:[#allocation4 + $0x8] sm:$0xc] %vm1557_vm2, %v2320_v0  ;;  %2580 = vmatpush.msra.mxu1 %v2522_v11 }
0x1373   :  { %2627 = vmatpush.msra.mxu3 %v2521_v48 }
0x1374   :  { %1716 = vrot.lane.b32.xlu2 %v1715_v46, %s6142_s26  ;;  %v2166_v2 = vpop.permute.xlu0 %2165  ;;  %v2474_v19 = vld [vmem:[#allocation4] sm:$0xff]  ;;  %2581 = vmatpush.msra.mxu1 %v2520_v6 }
0x1375   :  { %2168 = vst.msk [vmem:[#allocation4 + $0x8] sm:$0x30] %vm1564_vm4, %v2166_v2  ;;  %2564 = vmatmul.f32.vlgmr.msra.gmra.mxu0 %v2474_v19  ;;  %2610 = vmatmul.f32.vlgmr.msra.gmra.mxu2 %v2474_v19 }
0x1376   :  { %2582 = vmatpush.msra.mxu1 %v2518_v40  ;;  %2628 = vmatpush.msra.mxu3 %v2519_v25 }
0x1377   :  { %2954 = vmatpush.msra.mxu0 %v8089_v39  ;;  %3108 = vmatpush.msra.mxu2 %v8089_v39 }
0x1378   :  { %2583 = vmatpush.msra.mxu1 %v2516_v36  ;;  %2629 = vmatpush.msra.mxu3 %v2517_v23 }
0x1379   :  { %v2314_v42 = vpop.permute.xlu1 %2313  ;;  %2955 = vmatpush.msra.mxu0 %v8091_v17  ;;  %3109 = vmatpush.msra.mxu2 %v8091_v17 }
0x137a   :  { %2316 = vst.msk [vmem:[#allocation4 + $0x10] sm:$0x30] %vm1564_vm4, %v2314_v42  ;;  %2584 = vmatpush.msra.mxu1 %v2514_v61  ;;  %2630 = vmatpush.msra.mxu3 %v2515_v35 }
0x137b   :  { %2956 = vmatpush.msra.mxu0 %v8097_v41  ;;  %3110 = vmatpush.msra.mxu2 %v8097_v41 }
0x137c   :  { %v2160_v50 = vpop.permute.xlu0 %2159  ;;  %2585 = vmatpush.msra.mxu1 %v2512_v55  ;;  %2631 = vmatpush.msra.mxu3 %v2513_v45 }
0x137d   :  { %2162 = vst.msk [vmem:[#allocation4 + $0x10] sm:$0xc] %vm1557_vm2, %v2160_v50  ;;  %2957 = vmatpush.msra.mxu0 %v8105_v62  ;;  %3111 = vmatpush.msra.mxu2 %v8105_v62 }
0x137e   :  { %2586 = vmatpush.msra.mxu1 %v2510_v4  ;;  %2632 = vmatpush.msra.mxu3 %v2511_v44 }
0x1380   :  { %2684 = vmatpush.msrb.mxu1 %v8093_v37  ;;  %2825 = vmatpush.msrb.mxu3 %v8093_v37 }
0x1381   :  { %v1562_v21 = vpop.permute.xlu1 %1561 }
0x1382   :  { %1565 = vst.msk [vmem:[#allocation4 + $0x18] sm:$0x30] %vm1564_vm4, %v1562_v21  ;;  %2685 = vmatpush.msrb.mxu1 %v8107_v53  ;;  %2826 = vmatpush.msrb.mxu3 %v8107_v53 }
0x1384   :  { %v1410_v38 = vpop.permute.xlu0 %1409  ;;  %2686 = vmatpush.msrb.mxu1 %v8109_v56  ;;  %2827 = vmatpush.msrb.mxu3 %v8109_v56 }
0x1385   :  { %1413 = vst.msk [vmem:[#allocation4 + $0x18] sm:$0xc0] %vm1412_vm3, %v1410_v38 }
0x1386   :  { %2687 = vmatpush.msrb.mxu1 %v8113_v32  ;;  %2828 = vmatpush.msrb.mxu3 %v8113_v32 }
0x13be   :  { %v2465_v5 = vpop.permute.xlu2 %2464 }
0x13bf   :  { %2467 = vst.msk [vmem:[#allocation4 + $0x10] sm:$0xc0] %vm1412_vm3, %v2465_v5 }
0x13c6   :  { %v2471_v24 = vpop.permute.xlu2 %2470  ;;  %v2476_v26 = vld [vmem:[#allocation4 + $0x10] sm:$0xff] }
0x13c7   :  { %2473 = vst.msk [vmem:[#allocation4 + $0x8] sm:$0x3] %vm1405_vm1, %v2471_v24  ;;  %2567 = vmatmul.f32.gmra.mxu0 %v2476_v26  ;;  %2613 = vmatmul.f32.gmra.mxu2 %v2476_v26 }
0x13ce   :  { %v1717_v15 = vpop.permute.xlu2 %1716  ;;  %v2475_v31 = vld [vmem:[#allocation4 + $0x8] sm:$0xff] }
0x13cf   :  { %1719 = vst.msk [vmem:[#allocation4 + $0x18] sm:$0xc] %vm1557_vm2, %v1717_v15  ;;  %2587 = vmatmul.f32.vlgmr.msra.gmra.mxu1 %v2475_v31  ;;  %2633 = vmatmul.f32.vlgmr.msra.gmra.mxu3 %v2475_v31 }
0x13d0   :  { %2668 = vmatmul.f32.vlgmr.msrb.gmra.mxu0 %v6140_v60  ;;  %2979 = vmatpush.msra.mxu1 %v8093_v37 }
0x13d1   :  { %3133 = vmatpush.msra.mxu3 %v8093_v37  ;;  %3259 = vmatpush.msrb.mxu0 %v8089_v39 }
0x13d2   :  { %2980 = vmatpush.msra.mxu1 %v8107_v53 }
0x13d3   :  { %3134 = vmatpush.msra.mxu3 %v8107_v53  ;;  %3260 = vmatpush.msrb.mxu0 %v8091_v17 }
0x13d4   :  { %2981 = vmatpush.msra.mxu1 %v8109_v56 }
0x13d5   :  { %3135 = vmatpush.msra.mxu3 %v8109_v56  ;;  %3261 = vmatpush.msrb.mxu0 %v8097_v41 }
0x13d6   :  { %v2477_v27 = vld [vmem:[#allocation4 + $0x18] sm:$0xff]  ;;  %2982 = vmatpush.msra.mxu1 %v8113_v32 }
0x13d7   :  { %2590 = vmatmul.f32.gmra.mxu1 %v2477_v27  ;;  %2636 = vmatmul.f32.gmra.mxu3 %v2477_v27 }
0x13d8   :  { %3136 = vmatpush.msra.mxu3 %v8113_v32  ;;  %3262 = vmatpush.msrb.mxu0 %v8105_v62 }
0x13df   :  { %2688 = vmatmul.f32.vlgmr.msrb.gmra.mxu1 %v6140_v60 }
0x13e0   :  { %3281 = vmatpush.msrb.mxu1 %v8093_v37 }
0x13e2   :  { %3282 = vmatpush.msrb.mxu1 %v8107_v53 }
0x13e4   :  { %3283 = vmatpush.msrb.mxu1 %v8109_v56 }
0x13e6   :  { %3284 = vmatpush.msrb.mxu1 %v8113_v32 }
0x13f2   :  { %v2565_v52 = vpop.f32.mrf.mxu0 }
0x13f3   :  { %v2566_v49 = vadd.f32 %v2565_v52, %v2544_v12 }
0x13f8   :  { %v2611_v14 = vpop.f32.mrf.mxu2 }
0x13f9   :  { %v2612_v18 = vadd.f32 %v2611_v14, %v2545_v7 }
0x1444   :  { %v2568_v1 = vpop.f32.mrf.mxu0 }
0x1445   :  { %v2569_v20 = vadd.f32 %v2568_v1, %v2544_v12 }
0x144a   :  { %v2614_v3 = vpop.f32.mrf.mxu2 }
0x144b   :  { %v2615_v16 = vadd.f32 %v2614_v3, %v2545_v7 }
0x144c   :  { %v2588_v43 = vpop.f32.mrf.mxu1 }
0x144d   :  { %v2589_v10 = vadd.f32 %v2588_v43, %v2566_v49  ;;  %v2669_v13 = vpop.f32.mrf.mxu0 }
0x144f   :  { %2640 = vst [vmem:[#allocation3 + $0x10] sm:$0xff] %v2589_v10 }
0x1452   :  { %v2634_v8 = vpop.f32.mrf.mxu3 }
0x1453   :  { %v2635_v59 = vadd.f32 %v2634_v8, %v2612_v18 }
0x1454   :  { %v2591_v54 = vpop.f32.mrf.mxu1 }
0x1455   :  { %2641 = vst [vmem:[#allocation3] sm:$0xff] %v2635_v59  ;;  %v2592_v28 = vadd.f32 %v2591_v54, %v2569_v20 }
0x1456   :  { %v2692_v63 = vld [vmem:[#allocation3 + $0x10] sm:$0x3] }
0x1457   :  { %2642 = vst [vmem:[#allocation3 + $0x18] sm:$0xff] %v2592_v28  ;;  %v2693_v47 = vadd.f32 %v2692_v63, %v2669_v13 }
0x1459   :  { %5758 = vtanh.f32 %v2693_v47  ;;  %v5505_v42 = vmul.f32 -1.442695, %v2693_v47 }
0x145a   :  { %v2637_v58 = vpop.f32.mrf.mxu3 }
0x145b   :  { %v2638_v33 = vadd.f32 %v2637_v58, %v2615_v16  ;;  %v2833_v58 = vld [vmem:[#allocation3 + $0x10] sm:$0xc] }
0x145c   :  { %v2689_v30 = vpop.f32.mrf.mxu1 }
0x145d   :  { %2643 = vst [vmem:[#allocation3 + $0x8] sm:$0xff] %v2638_v33  ;;  %v2696_v9 = vrot.slane %v2689_v30, 2 }
0x145f   :  { %v5759_v0 = vpop.eup %5758 }
0x1460   :  { %2744 = vrot.lane.b32.xlu1 %v5759_v0, %s6141_s3 }
0x1464   :  { %v2694_v46 = vld [vmem:[#allocation3 + $0x8] sm:$0xc0] }
0x1465   :  { %v2698_v57 = vadd.f32 %v2696_v9, %v2694_v46  ;;  %v2838_v46 = vld [vmem:[#allocation3 + $0x8] sm:$0x30] }
0x1467   :  { %v2700_v2 = vrot.slane %v2698_v57, 6 }
0x1469   :  { %5760 = vtanh.f32 %v2700_v2  ;;  %v5506_v38 = vmul.f32 -1.442695, %v2700_v2 }
0x146a   :  { %5762 = vpow2.f32 %v5505_v42 }
0x146f   :  { %v5761_v19 = vpop.eup %5760 }
0x1470   :  { %2755 = vrot.lane.b32.xlu0 %v5761_v19, %s6141_s3  ;;  %v5763_v50 = vpop.eup %5762 }
0x1471   :  { %v2708_v21 = vadd.f32 1.0, %v5763_v50 }
0x1473   :  { %5764 = vrcp.f32 %v2708_v21  ;;  %v2721_v36 = vand.u32 2147483648, %v2708_v21  ;;  %vm2715_vm6 = vweird.f32 %v2708_v21  ;;  %v2719_v23 = vand.u32 2147483647, %v2708_v21 }
0x1474   :  { %5766 = vpow2.f32 %v5506_v38 }
0x1475   :  { %v2722_v55 = vor.u32 1.1754944e-38, %v2721_v36  ;;  %vm2720_vm8 = vcmp.eq.f32.partialorder %v2719_v23, 8.507059e+37 }
0x1479   :  { %v5765_v29 = vpop.eup %5764 }
0x147a   :  { %v5767_v51 = vpop.eup %5766  ;;  %v2711_v11 = vmul.f32 %v5765_v29, %v2708_v21  ;;  %vm2716_vm5 = vweird.f32 %v5765_v29 }
0x147b   :  { %v2709_v22 = vadd.f32 1.0, %v5767_v51  ;;  %vm2717_vm7 = vmor %vm2715_vm6, %vm2716_vm5 }
0x147c   :  { %v2712_v6 = vsub.f32 1.0, %v2711_v11 }
0x147d   :  { %5768 = vrcp.f32 %v2709_v22  ;;  %v2736_v15 = vand.u32 2147483648, %v2709_v22  ;;  %vm2730_vm10 = vweird.f32 %v2709_v22  ;;  %v2734_v31 = vand.u32 2147483647, %v2709_v22 }
0x147e   :  { %v2713_v48 = vmul.f32 %v5765_v29, %v2712_v6 }
0x147f   :  { %v2737_v34 = vor.u32 1.1754944e-38, %v2736_v15  ;;  %vm2735_vm12 = vcmp.eq.f32.partialorder %v2734_v31, 8.507059e+37 }
0x1480   :  { %v2714_v40 = vadd.f32 %v5765_v29, %v2713_v48 }
0x1482   :  { %v2718_v61 = vsel %vm2717_vm7, %v5765_v29, %v2714_v40 }
0x1483   :  { %v5769_v25 = vpop.eup %5768  ;;  %v2723_v4 = vsel %vm2720_vm8, %v2722_v55, %v2718_v61 }
0x1484   :  { %v2726_v35 = vmul.f32 %v5769_v25, %v2709_v22  ;;  %vm2731_vm9 = vweird.f32 %v5769_v25  ;;  %v2742_v10 = vmul.f32 0.0, %v2723_v4 }
0x1485   :  { %vm2732_vm11 = vmor %vm2730_vm10, %vm2731_vm9 }
0x1486   :  { %v2727_v5 = vsub.f32 1.0, %v2726_v35 }
0x1488   :  { %v2728_v24 = vmul.f32 %v5769_v25, %v2727_v5 }
0x148a   :  { %v2729_v26 = vadd.f32 %v5769_v25, %v2728_v24 }
0x148c   :  { %v2733_v27 = vsel %vm2732_vm11, %v5769_v25, %v2729_v26 }
0x148d   :  { %v2738_v12 = vsel %vm2735_vm12, %v2737_v34, %v2733_v27 }
0x148e   :  { %v2753_v1 = vmul.f32 0.0, %v2738_v12 }
0x14d2   :  { %v2745_v45 = vpop.permute.xlu1 %2744 }
0x14d3   :  { %v2747_v44 = vmul.f32 %v2745_v45, %v2723_v4 }
0x14d5   :  { %2749 = vrot.lane.b32.xlu0 %v2747_v44, %s6142_s26 }
0x14e2   :  { %v2756_v52 = vpop.permute.xlu0 %2755 }
0x14e3   :  { %v2758_v49 = vmul.f32 %v2756_v52, %v2738_v12 }
0x14e5   :  { %2760 = vrot.lane.b32.xlu2 %v2758_v49, %s6142_s26 }
0x153f   :  { %v2761_v43 = vpop.permute.xlu2 %2760 }
0x1540   :  { %v8157_v7 = vadd.f32 %v2761_v43, %v2753_v1 }
0x1542   :  { %5770 = vtanh.f32 %v8157_v7 }
0x1547   :  { %v2750_v14 = vpop.permute.xlu0 %2749 }
0x1548   :  { %v5771_v18 = vpop.eup %5770  ;;  %v8160_v8 = vadd.f32 %v2750_v14, %v2742_v10 }
0x1549   :  { %2772 = vrot.lane.b32.xlu1 %v5771_v18, %s6141_s3 }
0x154a   :  { %5772 = vtanh.f32 %v8160_v8  ;;  %v2887_v1 = vrot.slane %v8160_v8, 6 }
0x1550   :  { %v5773_v20 = vpop.eup %5772 }
0x1551   :  { %2766 = vrot.lane.b32.xlu2 %v5773_v20, %s6141_s3  ;;  %v2901_v20 = vrot.slane %v8157_v7, 6 }
0x15ab   :  { %v2767_v59 = vpop.permute.xlu2 %2766 }
0x15ac   :  { %v2769_v54 = vmul.f32 %v2767_v59, %v2723_v4 }
0x15ae   :  { %2777 = vrot.lane.b32.xlu1 %v2769_v54, %s6142_s26 }
0x15bb   :  { %v2773_v13 = vpop.permute.xlu1 %2772 }
0x15bc   :  { %v8166_v28 = vmul.f32 %v2773_v13, %v2738_v12 }
0x15be   :  { %2809 = vrot.lane.b32.xlu0 %v8166_v28, %s6142_s26 }
0x1620   :  { %v2778_v3 = vpop.permute.xlu1 %2777 }
0x1621   :  { %2780 = vst.msk [vmem:[#allocation4] sm:$0x3] %vm1405_vm1, %v2778_v3  ;;  %5507 = vmatmul.msk.f32.vlgmr.msrb.gmra.mxu2 %vm1273_vm0, %v2778_v3 }
0x1622   :  { %3404 = vmatpush.msrb.mxu2 %v8089_v39 }
0x1624   :  { %3405 = vmatpush.msrb.mxu2 %v8091_v17 }
0x1626   :  { %3406 = vmatpush.msrb.mxu2 %v8097_v41 }
0x1628   :  { %3407 = vmatpush.msrb.mxu2 %v8105_v62 }
0x1630   :  { %v2810_v63 = vpop.permute.xlu0 %2809 }
0x1631   :  { %5508 = vmatmul.msk.f32.vlgmr.msrb.gmra.mxu3 %vm1273_vm0, %v2810_v63 }
0x1632   :  { %3428 = vmatpush.msrb.mxu3 %v8093_v37 }
0x1634   :  { %3429 = vmatpush.msrb.mxu3 %v8107_v53 }
0x1636   :  { %3430 = vmatpush.msrb.mxu3 %v8109_v56 }
0x1638   :  { %3431 = vmatpush.msrb.mxu3 %v8113_v32 }
0x16a4   :  { %v2806_v47 = vpop.f32.mrf.mxu2 }
0x16a5   :  { %v2835_v16 = vrot.slane %v2806_v47, 6 }
0x16a7   :  { %v2837_v33 = vadd.f32 %v2835_v16, %v2833_v58 }
0x16a9   :  { %5774 = vtanh.f32 %v2837_v33  ;;  %v5509_v50 = vmul.f32 -1.442695, %v2837_v33 }
0x16af   :  { %v5775_v30 = vpop.eup %5774 }
0x16b0   :  { %2891 = vrot.lane.b32.xlu0 %v5775_v30, %s6141_s3 }
0x16b4   :  { %v2830_v0 = vpop.f32.mrf.mxu3 }
0x16b5   :  { %v2840_v9 = vrot.slane %v2830_v0, 4 }
0x16b7   :  { %v2842_v57 = vadd.f32 %v2840_v9, %v2838_v46  ;;  %v2992_v46 = vld [vmem:[#allocation3 + $0x8] sm:$0xc] }
0x16b9   :  { %v2844_v2 = vrot.slane %v2842_v57, 2 }
0x16bb   :  { %5776 = vtanh.f32 %v2844_v2  ;;  %v5510_v42 = vmul.f32 -1.442695, %v2844_v2 }
0x16bd   :  { %5778 = vpow2.f32 %v5510_v42 }
0x16be   :  { %5780 = vpow2.f32 %v5509_v50  ;;  %v2987_v50 = vld [vmem:[#allocation3 + $0x10] sm:$0x30] }
0x16c1   :  { %v5777_v19 = vpop.eup %5776 }
0x16c2   :  { %2905 = vrot.lane.b32.xlu2 %v5777_v19, %s6141_s3 }
0x16c3   :  { %v5779_v21 = vpop.eup %5778 }
0x16c4   :  { %v2853_v38 = vadd.f32 1.0, %v5779_v21  ;;  %v5781_v29 = vpop.eup %5780 }
0x16c5   :  { %v2852_v51 = vadd.f32 1.0, %v5781_v29 }
0x16c6   :  { %5782 = vrcp.f32 %v2853_v38  ;;  %v2880_v61 = vand.u32 2147483648, %v2853_v38  ;;  %vm2874_vm14 = vweird.f32 %v2853_v38  ;;  %v2878_v35 = vand.u32 2147483647, %v2853_v38 }
0x16c7   :  { %5784 = vrcp.f32 %v2852_v51  ;;  %v2865_v26 = vand.u32 2147483648, %v2852_v51  ;;  %vm2859_vm7 = vweird.f32 %v2852_v51  ;;  %v2863_v31 = vand.u32 2147483647, %v2852_v51 }
0x16c8   :  { %v2881_v4 = vor.u32 1.1754944e-38, %v2880_v61  ;;  %vm2879_vm5 = vcmp.eq.f32.partialorder %v2878_v35, 8.507059e+37 }
0x16c9   :  { %v2866_v34 = vor.u32 1.1754944e-38, %v2865_v26  ;;  %vm2864_vm9 = vcmp.eq.f32.partialorder %v2863_v31, 8.507059e+37 }
0x16cc   :  { %v5783_v11 = vpop.eup %5782 }
0x16cd   :  { %v2870_v22 = vmul.f32 %v5783_v11, %v2853_v38  ;;  %v5785_v6 = vpop.eup %5784  ;;  %vm2875_vm13 = vweird.f32 %v5783_v11 }
0x16ce   :  { %v2855_v40 = vmul.f32 %v5785_v6, %v2852_v51  ;;  %vm2876_vm15 = vmor %vm2874_vm14, %vm2875_vm13  ;;  %vm2860_vm6 = vweird.f32 %v5785_v6 }
0x16cf   :  { %v2871_v48 = vsub.f32 1.0, %v2870_v22  ;;  %vm2861_vm8 = vmor %vm2859_vm7, %vm2860_vm6 }
0x16d0   :  { %v2856_v36 = vsub.f32 1.0, %v2855_v40 }
0x16d1   :  { %v2872_v25 = vmul.f32 %v5783_v11, %v2871_v48 }
0x16d2   :  { %v2857_v55 = vmul.f32 %v5785_v6, %v2856_v36 }
0x16d3   :  { %v2873_v23 = vadd.f32 %v5783_v11, %v2872_v25 }
0x16d4   :  { %v2858_v44 = vadd.f32 %v5785_v6, %v2857_v55 }
0x16d5   :  { %v2877_v45 = vsel %vm2876_vm15, %v5783_v11, %v2873_v23 }
0x16d6   :  { %v2882_v24 = vsel %vm2879_vm5, %v2881_v4, %v2877_v45  ;;  %v2862_v27 = vsel %vm2861_vm8, %v5785_v6, %v2858_v44 }
0x16d7   :  { %v2867_v12 = vsel %vm2864_vm9, %v2866_v34, %v2862_v27  ;;  %v2903_v59 = vmul.f32 %v2901_v20, %v2882_v24 }
0x16d8   :  { %v2889_v43 = vmul.f32 %v2887_v1, %v2867_v12 }
0x171c   :  { %v2906_v5 = vpop.permute.xlu2 %2905 }
0x171d   :  { %v2908_v15 = vmul.f32 %v2906_v5, %v2882_v24 }
0x171f   :  { %2910 = vrot.lane.b32.xlu1 %v2908_v15, %s6142_s26 }
0x1722   :  { %v2892_v52 = vpop.permute.xlu0 %2891 }
0x1723   :  { %v2894_v49 = vmul.f32 %v2892_v52, %v2867_v12 }
0x1725   :  { %2896 = vrot.lane.b32.xlu2 %v2894_v49, %s6142_s26 }
0x177f   :  { %v2897_v10 = vpop.permute.xlu2 %2896 }
0x1780   :  { %v8186_v14 = vadd.f32 %v2897_v10, %v2889_v43 }
0x1782   :  { %5786 = vtanh.f32 %v8186_v14 }
0x1788   :  { %v5787_v18 = vpop.eup %5786 }
0x1789   :  { %2916 = vrot.lane.b32.xlu1 %v5787_v18, %s6141_s3 }
0x1791   :  { %v2911_v54 = vpop.permute.xlu1 %2910 }
0x1792   :  { %v8191_v13 = vadd.f32 %v2911_v54, %v2903_v59  ;;  %v3041_v59 = vrot.slane %v8186_v14, 6 }
0x1794   :  { %5788 = vtanh.f32 %v8191_v13 }
0x179a   :  { %v5789_v3 = vpop.eup %5788 }
0x179b   :  { %2922 = vrot.lane.b32.xlu0 %v5789_v3, %s6141_s3 }
0x17fb   :  { %v2917_v8 = vpop.permute.xlu1 %2916 }
0x17fc   :  { %v8195_v63 = vmul.f32 %v2917_v8, %v2867_v12 }
0x17fe   :  { %v2937_v47 = vrot.slane %v8195_v63, 2 }
0x1800   :  { %2938 = vrot.lane.b32.xlu0 %v2937_v47, %s6142_s26 }
0x180d   :  { %v2923_v16 = vpop.permute.xlu0 %2922 }
0x180e   :  { %v8199_v58 = vmul.f32 %v2923_v16, %v2882_v24  ;;  %v3055_v16 = vrot.slane %v8191_v13, 6 }
0x1810   :  { %v2962_v7 = vrot.slane %v8199_v58, 2 }
0x1812   :  { %2963 = vrot.lane.b32.xlu2 %v2962_v7, %s6142_s26 }
0x186c   :  { %v2964_v33 = vpop.permute.xlu2 %2963 }
0x186d   :  { %5512 = vmatmul.msk.f32.vlgmr.msra.gmra.mxu1 %vm1273_vm0, %v2964_v33 }
0x186e   :  { %3582 = vmatpush.msra.mxu1 %v8093_v37 }
0x1870   :  { %3583 = vmatpush.msra.mxu1 %v8107_v53 }
0x1872   :  { %v2939_v30 = vpop.permute.xlu0 %2938  ;;  %3584 = vmatpush.msra.mxu1 %v8109_v56 }
0x1873   :  { %5511 = vmatmul.msk.f32.vlgmr.msra.gmra.mxu0 %vm1273_vm0, %v2939_v30 }
0x1874   :  { %3557 = vmatpush.msra.mxu0 %v8089_v39  ;;  %3585 = vmatpush.msra.mxu1 %v8113_v32 }
0x1876   :  { %3558 = vmatpush.msra.mxu0 %v8091_v17 }
0x1878   :  { %3559 = vmatpush.msra.mxu0 %v8097_v41 }
0x187a   :  { %3560 = vmatpush.msra.mxu0 %v8105_v62 }
0x18ea   :  { %v2984_v0 = vpop.f32.mrf.mxu1 }
0x18eb   :  { %v2994_v9 = vrot.slane %v2984_v0, 6 }
0x18ed   :  { %v2996_v57 = vadd.f32 %v2994_v9, %v2992_v46 }
0x18ef   :  { %v2998_v2 = vrot.slane %v2996_v57, 6 }
0x18f0   :  { %v2959_v19 = vpop.f32.mrf.mxu0 }
0x18f1   :  { %5790 = vtanh.f32 %v2998_v2  ;;  %v2989_v42 = vrot.slane %v2959_v19, 4  ;;  %v5514_v6 = vmul.f32 -1.442695, %v2998_v2 }
0x18f3   :  { %v2991_v21 = vadd.f32 %v2989_v42, %v2987_v50 }
0x18f5   :  { %5792 = vtanh.f32 %v2991_v21  ;;  %v5513_v51 = vmul.f32 -1.442695, %v2991_v21 }
0x18f7   :  { %v5791_v38 = vpop.eup %5790  ;;  %5794 = vpow2.f32 %v5513_v51 }
0x18f8   :  { %3059 = vrot.lane.b32.xlu1 %v5791_v38, %s6141_s3 }
0x18fb   :  { %v5793_v29 = vpop.eup %5792 }
0x18fc   :  { %3045 = vrot.lane.b32.xlu2 %v5793_v29, %s6141_s3 }
0x18fd   :  { %v5795_v11 = vpop.eup %5794 }
0x18fe   :  { %v3006_v22 = vadd.f32 1.0, %v5795_v11 }
0x1900   :  { %5796 = vrcp.f32 %v3006_v22  ;;  %v3019_v55 = vand.u32 2147483648, %v3006_v22  ;;  %vm3013_vm11 = vweird.f32 %v3006_v22  ;;  %v3017_v45 = vand.u32 2147483647, %v3006_v22 }
0x1901   :  { %5798 = vpow2.f32 %v5514_v6 }
0x1902   :  { %v3020_v5 = vor.u32 1.1754944e-38, %v3019_v55  ;;  %vm3018_vm13 = vcmp.eq.f32.partialorder %v3017_v45, 8.507059e+37 }
0x1906   :  { %v5797_v48 = vpop.eup %5796 }
0x1907   :  { %v3009_v40 = vmul.f32 %v5797_v48, %v3006_v22  ;;  %v5799_v25 = vpop.eup %5798  ;;  %vm3014_vm10 = vweird.f32 %v5797_v48 }
0x1908   :  { %v3007_v23 = vadd.f32 1.0, %v5799_v25  ;;  %vm3015_vm12 = vmor %vm3013_vm11, %vm3014_vm10 }
0x1909   :  { %v3010_v36 = vsub.f32 1.0, %v3009_v40 }
0x190a   :  { %5800 = vrcp.f32 %v3007_v23  ;;  %v3034_v12 = vand.u32 2147483648, %v3007_v23  ;;  %vm3028_vm15 = vweird.f32 %v3007_v23  ;;  %v3032_v49 = vand.u32 2147483647, %v3007_v23 }
0x190b   :  { %v3011_v61 = vmul.f32 %v5797_v48, %v3010_v36 }
0x190c   :  { %v3035_v43 = vor.u32 1.1754944e-38, %v3034_v12  ;;  %vm3033_vm6 = vcmp.eq.f32.partialorder %v3032_v49, 8.507059e+37 }
0x190d   :  { %v3012_v35 = vadd.f32 %v5797_v48, %v3011_v61 }
0x190f   :  { %v3016_v4 = vsel %vm3015_vm12, %v5797_v48, %v3012_v35 }
0x1910   :  { %v5801_v44 = vpop.eup %5800  ;;  %v3021_v26 = vsel %vm3018_vm13, %v3020_v5, %v3016_v4 }
0x1911   :  { %v3024_v31 = vmul.f32 %v5801_v44, %v3007_v23  ;;  %vm3029_vm14 = vweird.f32 %v5801_v44  ;;  %v3043_v54 = vmul.f32 %v3041_v59, %v3021_v26 }
0x1912   :  { %vm3030_vm5 = vmor %vm3028_vm15, %vm3029_vm14 }
0x1913   :  { %v3025_v27 = vsub.f32 1.0, %v3024_v31 }
0x1915   :  { %v3026_v34 = vmul.f32 %v5801_v44, %v3025_v27 }
0x1917   :  { %v3027_v52 = vadd.f32 %v5801_v44, %v3026_v34 }
0x1919   :  { %v3031_v1 = vsel %vm3030_vm5, %v5801_v44, %v3027_v52 }
0x191a   :  { %v3036_v10 = vsel %vm3033_vm6, %v3035_v43, %v3031_v1 }
0x191b   :  { %v3057_v7 = vmul.f32 %v3055_v16, %v3036_v10 }
0x1956   :  { %v3046_v24 = vpop.permute.xlu2 %3045 }
0x1957   :  { %v3048_v15 = vmul.f32 %v3046_v24, %v3021_v26 }
0x1959   :  { %3050 = vrot.lane.b32.xlu1 %v3048_v15, %s6142_s26 }
0x196a   :  { %v3060_v18 = vpop.permute.xlu1 %3059 }
0x196b   :  { %v3062_v20 = vmul.f32 %v3060_v18, %v3036_v10 }
0x196d   :  { %3064 = vrot.lane.b32.xlu0 %v3062_v20, %s6142_s26 }
0x19cb   :  { %v3051_v3 = vpop.permute.xlu1 %3050 }
0x19cc   :  { %v8218_v8 = vadd.f32 %v3051_v3, %v3043_v54 }
0x19ce   :  { %5802 = vtanh.f32 %v8218_v8  ;;  %v3192_v54 = vrot.slane %v8218_v8, 6 }
0x19d4   :  { %v5803_v47 = vpop.eup %5802 }
0x19d5   :  { %3070 = vrot.lane.b32.xlu0 %v5803_v47, %s6141_s3 }
0x19df   :  { %v3065_v33 = vpop.permute.xlu0 %3064 }
0x19e0   :  { %v8223_v30 = vadd.f32 %v3065_v33, %v3057_v7 }
0x19e2   :  { %5804 = vtanh.f32 %v8223_v30  ;;  %v3206_v18 = vrot.slane %v8223_v30, 6 }
0x19e8   :  { %v5805_v0 = vpop.eup %5804 }
0x19e9   :  { %3076 = vrot.lane.b32.xlu2 %v5805_v0, %s6141_s3 }
0x1a43   :  { %v3077_v14 = vpop.permute.xlu2 %3076 }
0x1a44   :  { %v8227_v9 = vmul.f32 %v3077_v14, %v3036_v10 }
0x1a46   :  { %v3116_v46 = vrot.slane %v8227_v9, 4 }
0x1a47   :  { %v3071_v57 = vpop.permute.xlu0 %3070 }
0x1a48   :  { %v8230_v2 = vmul.f32 %v3071_v57, %v3021_v26  ;;  %3117 = vrot.lane.b32.xlu1 %v3116_v46, %s6142_s26 }
0x1a4a   :  { %v3091_v13 = vrot.slane %v8230_v2, 4 }
0x1a4c   :  { %3092 = vrot.lane.b32.xlu2 %v3091_v13, %s6142_s26 }
0x1aa6   :  { %v3093_v19 = vpop.permute.xlu2 %3092 }
0x1aa7   :  { %5515 = vmatmul.msk.f32.vlgmr.msra.gmra.mxu2 %vm1273_vm0, %v3093_v19 }
0x1aa8   :  { %3711 = vmatpush.msra.mxu2 %v8089_v39  ;;  %v3141_v39 = vld [vmem:[#allocation3 + $0x10] sm:$0xc0] }
0x1aaa   :  { %3712 = vmatpush.msra.mxu2 %v8091_v17 }
0x1aac   :  { %3713 = vmatpush.msra.mxu2 %v8097_v41 }
0x1aae   :  { %3714 = vmatpush.msra.mxu2 %v8105_v62  ;;  %v3146_v62 = vld [vmem:[#allocation3 + $0x8] sm:$0x3] }
0x1aba   :  { %v3118_v42 = vpop.permute.xlu1 %3117 }
0x1abb   :  { %5516 = vmatmul.msk.f32.vlgmr.msra.gmra.mxu3 %vm1273_vm0, %v3118_v42 }
0x1abc   :  { %3736 = vmatpush.msra.mxu3 %v8093_v37 }
0x1abe   :  { %3737 = vmatpush.msra.mxu3 %v8107_v53 }
0x1ac0   :  { %3738 = vmatpush.msra.mxu3 %v8109_v56 }
0x1ac2   :  { %3739 = vmatpush.msra.mxu3 %v8113_v32 }
0x1b2a   :  { %v3113_v50 = vpop.f32.mrf.mxu2 }
0x1b2b   :  { %v3143_v21 = vrot.slane %v3113_v50, 2 }
0x1b2d   :  { %v3145_v38 = vadd.f32 %v3143_v21, %v3141_v39  ;;  %v3289_v21 = vld [vmem:[#allocation3 + $0x18] sm:$0x3] }
0x1b2f   :  { %5806 = vtanh.f32 %v3145_v38  ;;  %v5517_v53 = vmul.f32 -1.442695, %v3145_v38 }
0x1b35   :  { %v5807_v17 = vpop.eup %5806 }
0x1b36   :  { %3196 = vrot.lane.b32.xlu1 %v5807_v17, %s6141_s3 }
0x1b3e   :  { %v3138_v41 = vpop.f32.mrf.mxu3 }
0x1b3f   :  { %v3147_v29 = vadd.f32 %v3146_v62, %v3138_v41  ;;  %v3291_v62 = vld [vmem:[#allocation3] sm:$0xc0] }
0x1b41   :  { %v3149_v51 = vrot.slane %v3147_v29, 2 }
0x1b43   :  { %5808 = vtanh.f32 %v3149_v51  ;;  %v5518_v11 = vmul.f32 -1.442695, %v3149_v51 }
0x1b44   :  { %5810 = vpow2.f32 %v5517_v53 }
0x1b49   :  { %v5809_v37 = vpop.eup %5808 }
0x1b4a   :  { %3210 = vrot.lane.b32.xlu0 %v5809_v37, %s6141_s3  ;;  %v5811_v56 = vpop.eup %5810 }
0x1b4b   :  { %v3157_v32 = vadd.f32 1.0, %v5811_v56 }
0x1b4d   :  { %5812 = vrcp.f32 %v3157_v32  ;;  %v3170_v61 = vand.u32 2147483648, %v3157_v32  ;;  %vm3164_vm8 = vweird.f32 %v3157_v32  ;;  %v3168_v35 = vand.u32 2147483647, %v3157_v32 }
0x1b4e   :  { %5814 = vpow2.f32 %v5518_v11 }
0x1b4f   :  { %v3171_v4 = vor.u32 1.1754944e-38, %v3170_v61  ;;  %vm3169_vm10 = vcmp.eq.f32.partialorder %v3168_v35, 8.507059e+37 }
0x1b53   :  { %v5813_v22 = vpop.eup %5812 }
0x1b54   :  { %v3160_v6 = vmul.f32 %v5813_v22, %v3157_v32  ;;  %v5815_v48 = vpop.eup %5814  ;;  %vm3165_vm7 = vweird.f32 %v5813_v22 }
0x1b55   :  { %v3158_v25 = vadd.f32 1.0, %v5815_v48  ;;  %vm3166_vm9 = vmor %vm3164_vm8, %vm3165_vm7 }
0x1b56   :  { %v3161_v40 = vsub.f32 1.0, %v3160_v6 }
0x1b57   :  { %5816 = vrcp.f32 %v3158_v25  ;;  %v3185_v34 = vand.u32 2147483648, %v3158_v25  ;;  %vm3179_vm12 = vweird.f32 %v3158_v25  ;;  %v3183_v52 = vand.u32 2147483647, %v3158_v25 }
0x1b58   :  { %v3162_v36 = vmul.f32 %v5813_v22, %v3161_v40 }
0x1b59   :  { %v3186_v49 = vor.u32 1.1754944e-38, %v3185_v34  ;;  %vm3184_vm14 = vcmp.eq.f32.partialorder %v3183_v52, 8.507059e+37 }
0x1b5a   :  { %v3163_v23 = vadd.f32 %v5813_v22, %v3162_v36 }
0x1b5c   :  { %v3167_v55 = vsel %vm3166_vm9, %v5813_v22, %v3163_v23 }
0x1b5d   :  { %v5817_v45 = vpop.eup %5816  ;;  %v3172_v44 = vsel %vm3169_vm10, %v3171_v4, %v3167_v55 }
0x1b5e   :  { %v3175_v26 = vmul.f32 %v5817_v45, %v3158_v25  ;;  %vm3180_vm11 = vweird.f32 %v5817_v45  ;;  %v3194_v47 = vmul.f32 %v3192_v54, %v3172_v44 }
0x1b5f   :  { %vm3181_vm13 = vmor %vm3179_vm12, %vm3180_vm11 }
0x1b60   :  { %v3176_v15 = vsub.f32 1.0, %v3175_v26 }
0x1b62   :  { %v3177_v31 = vmul.f32 %v5817_v45, %v3176_v15 }
0x1b64   :  { %v3178_v27 = vadd.f32 %v5817_v45, %v3177_v31 }
0x1b66   :  { %v3182_v12 = vsel %vm3181_vm13, %v5817_v45, %v3178_v27 }
0x1b67   :  { %v3187_v43 = vsel %vm3184_vm14, %v3186_v49, %v3182_v12 }
0x1b68   :  { %v3208_v20 = vmul.f32 %v3206_v18, %v3187_v43 }
0x1ba8   :  { %v3197_v5 = vpop.permute.xlu1 %3196 }
0x1ba9   :  { %v3199_v24 = vmul.f32 %v3197_v5, %v3172_v44 }
0x1bab   :  { %3201 = vrot.lane.b32.xlu0 %v3199_v24, %s6142_s26 }
0x1bbc   :  { %v3211_v1 = vpop.permute.xlu0 %3210 }
0x1bbd   :  { %v3213_v10 = vmul.f32 %v3211_v1, %v3187_v43 }
0x1bbf   :  { %3215 = vrot.lane.b32.xlu2 %v3213_v10, %s6142_s26 }
0x1c19   :  { %v3216_v59 = vpop.permute.xlu2 %3215 }
0x1c1a   :  { %v8251_v3 = vadd.f32 %v3216_v59, %v3208_v20 }
0x1c1c   :  { %5818 = vtanh.f32 %v8251_v3 }
0x1c1d   :  { %v3202_v16 = vpop.permute.xlu0 %3201 }
0x1c1e   :  { %v8254_v7 = vadd.f32 %v3202_v16, %v3194_v47  ;;  %v3354_v16 = vrot.slane %v8251_v3, 6 }
0x1c20   :  { %5820 = vtanh.f32 %v8254_v7  ;;  %v3340_v18 = vrot.slane %v8254_v7, 6 }
0x1c22   :  { %v5819_v33 = vpop.eup %5818 }
0x1c23   :  { %3227 = vrot.lane.b32.xlu1 %v5819_v33, %s6141_s3 }
0x1c26   :  { %v5821_v0 = vpop.eup %5820 }
0x1c27   :  { %3221 = vrot.lane.b32.xlu2 %v5821_v0, %s6141_s3 }
0x1c81   :  { %v3222_v30 = vpop.permute.xlu2 %3221 }
0x1c82   :  { %v8259_v14 = vmul.f32 %v3222_v30, %v3172_v44 }
0x1c84   :  { %v3242_v8 = vrot.slane %v8259_v14, 6 }
0x1c86   :  { %3243 = vrot.lane.b32.xlu1 %v3242_v8, %s6142_s26 }
0x1c95   :  { %v3228_v46 = vpop.permute.xlu1 %3227 }
0x1c96   :  { %v3230_v57 = vmul.f32 %v3228_v46, %v3187_v43 }
0x1c98   :  { %v3237_v13 = vrot.slane %v3230_v57, 6 }
0x1c9a   :  { %3238 = vrot.lane.b32.xlu0 %v3237_v13, %s6142_s26 }
0x1cf8   :  { %v3244_v19 = vpop.permute.xlu1 %3243 }
0x1cf9   :  { %5519 = vmatmul.msk.f32.vlgmr.msrb.gmra.mxu0 %vm1273_vm0, %v3244_v19 }
0x1d0c   :  { %v3239_v42 = vpop.permute.xlu0 %3238 }
0x1d0d   :  { %3241 = vst.msk [vmem:[#allocation4 + $0x18] sm:$0x3] %vm1405_vm1, %v3239_v42  ;;  %5520 = vmatmul.msk.f32.vlgmr.msrb.gmra.mxu1 %vm1273_vm0, %v3239_v42 }
0x1d76   :  { %v3264_v50 = vpop.f32.mrf.mxu0 }
0x1d77   :  { %v3290_v39 = vadd.f32 %v3289_v21, %v3264_v50 }
0x1d79   :  { %5822 = vtanh.f32 %v3290_v39  ;;  %v5521_v53 = vmul.f32 -1.442695, %v3290_v39 }
0x1d7f   :  { %v5823_v38 = vpop.eup %5822 }
0x1d80   :  { %3344 = vrot.lane.b32.xlu0 %v5823_v38, %s6141_s3  ;;  %v3436_v38 = vld [vmem:[#allocation3 + $0x18] sm:$0xc] }
0x1d8a   :  { %v3286_v17 = vpop.f32.mrf.mxu1 }
0x1d8b   :  { %v3293_v41 = vrot.slane %v3286_v17, 2  ;;  %v3441_v17 = vld [vmem:[#allocation3] sm:$0x30] }
0x1d8d   :  { %v3295_v29 = vadd.f32 %v3293_v41, %v3291_v62 }
0x1d8f   :  { %v3297_v51 = vrot.slane %v3295_v29, 6 }
0x1d91   :  { %5824 = vtanh.f32 %v3297_v51  ;;  %v5522_v56 = vmul.f32 -1.442695, %v3297_v51 }
0x1d92   :  { %5826 = vpow2.f32 %v5521_v53 }
0x1d93   :  { %5828 = vpow2.f32 %v5522_v56 }
0x1d97   :  { %v5825_v37 = vpop.eup %5824 }
0x1d98   :  { %3358 = vrot.lane.b32.xlu2 %v5825_v37, %s6141_s3  ;;  %v5827_v32 = vpop.eup %5826 }
0x1d99   :  { %v5829_v11 = vpop.eup %5828  ;;  %v3305_v22 = vadd.f32 1.0, %v5827_v32 }
0x1d9a   :  { %v3306_v6 = vadd.f32 1.0, %v5829_v11 }
0x1d9b   :  { %5830 = vrcp.f32 %v3305_v22  ;;  %vm3312_vm6 = vweird.f32 %v3305_v22  ;;  %v3318_v5 = vand.u32 2147483648, %v3305_v22  ;;  %v3316_v26 = vand.u32 2147483647, %v3305_v22 }
0x1d9c   :  { %5832 = vrcp.f32 %v3306_v6  ;;  %v3333_v44 = vand.u32 2147483648, %v3306_v6  ;;  %vm3327_vm7 = vweird.f32 %v3306_v6  ;;  %v3331_v24 = vand.u32 2147483647, %v3306_v6 }
0x1d9d   :  { %v3319_v34 = vor.u32 1.1754944e-38, %v3318_v5  ;;  %vm3317_vm11 = vcmp.eq.f32.partialorder %v3316_v26, 8.507059e+37 }
0x1d9e   :  { %v3334_v27 = vor.u32 1.1754944e-38, %v3333_v44  ;;  %vm3332_vm10 = vcmp.eq.f32.partialorder %v3331_v24, 8.507059e+37 }
0x1da1   :  { %v5831_v48 = vpop.eup %5830 }
0x1da2   :  { %v5833_v40 = vpop.eup %5832  ;;  %v3308_v36 = vmul.f32 %v5831_v48, %v3305_v22  ;;  %vm3313_vm15 = vweird.f32 %v5831_v48 }
0x1da3   :  { %v3323_v25 = vmul.f32 %v5833_v40, %v3306_v6  ;;  %vm3328_vm5 = vweird.f32 %v5833_v40  ;;  %vm3314_vm8 = vmor %vm3312_vm6, %vm3313_vm15 }
0x1da4   :  { %v3309_v61 = vsub.f32 1.0, %v3308_v36  ;;  %vm3329_vm9 = vmor %vm3327_vm7, %vm3328_vm5 }
0x1da5   :  { %v3324_v23 = vsub.f32 1.0, %v3323_v25 }
0x1da6   :  { %v3310_v55 = vmul.f32 %v5831_v48, %v3309_v61 }
0x1da7   :  { %v3325_v35 = vmul.f32 %v5833_v40, %v3324_v23 }
0x1da8   :  { %v3311_v4 = vadd.f32 %v5831_v48, %v3310_v55 }
0x1da9   :  { %v3326_v45 = vadd.f32 %v5833_v40, %v3325_v35 }
0x1daa   :  { %v3315_v31 = vsel %vm3314_vm8, %v5831_v48, %v3311_v4 }
0x1dab   :  { %v3330_v15 = vsel %vm3329_vm9, %v5833_v40, %v3326_v45  ;;  %v3320_v1 = vsel %vm3317_vm11, %v3319_v34, %v3315_v31 }
0x1dac   :  { %v3335_v12 = vsel %vm3332_vm10, %v3334_v27, %v3330_v15  ;;  %v3342_v20 = vmul.f32 %v3340_v18, %v3320_v1 }
0x1dad   :  { %v3356_v33 = vmul.f32 %v3354_v16, %v3335_v12 }
0x1df2   :  { %v3359_v52 = vpop.permute.xlu2 %3358  ;;  %v3345_v49 = vpop.permute.xlu0 %3344 }
0x1df3   :  { %v3361_v43 = vmul.f32 %v3359_v52, %v3335_v12  ;;  %v3347_v10 = vmul.f32 %v3345_v49, %v3320_v1 }
0x1df5   :  { %3363 = vrot.lane.b32.xlu1 %v3361_v43, %s6142_s26  ;;  %3349 = vrot.lane.b32.xlu2 %v3347_v10, %s6142_s26 }
0x1e4f   :  { %v3350_v59 = vpop.permute.xlu2 %3349 }
0x1e50   :  { %v8272_v54 = vadd.f32 %v3350_v59, %v3342_v20 }
0x1e52   :  { %5834 = vtanh.f32 %v8272_v54  ;;  %v3490_v18 = vrot.slane %v8272_v54, 6 }
0x1e58   :  { %v5835_v47 = vpop.eup %5834 }
0x1e59   :  { %3369 = vrot.lane.b32.xlu1 %v5835_v47, %s6141_s3 }
0x1e67   :  { %v3364_v0 = vpop.permute.xlu1 %3363 }
0x1e68   :  { %v8277_v30 = vadd.f32 %v3364_v0, %v3356_v33 }
0x1e6a   :  { %5836 = vtanh.f32 %v8277_v30  ;;  %v3504_v33 = vrot.slane %v8277_v30, 6 }
0x1e70   :  { %v5837_v8 = vpop.eup %5836 }
0x1e71   :  { %3375 = vrot.lane.b32.xlu0 %v5837_v8, %s6141_s3 }
0x1ecb   :  { %v3370_v7 = vpop.permute.xlu1 %3369 }
0x1ecc   :  { %v3372_v46 = vmul.f32 %v3370_v7, %v3320_v1 }
0x1ece   :  { %3380 = vrot.lane.b32.xlu0 %v3372_v46, %s6142_s26 }
0x1ee3   :  { %v3376_v57 = vpop.permute.xlu0 %3375 }
0x1ee4   :  { %v8282_v13 = vmul.f32 %v3376_v57, %v3335_v12 }
0x1ee6   :  { %3412 = vrot.lane.b32.xlu2 %v8282_v13, %s6142_s26 }
0x1f40   :  { %v3413_v3 = vpop.permute.xlu2 %3412  ;;  %v3381_v19 = vpop.permute.xlu0 %3380 }
0x1f41   :  { %3383 = vst.msk [vmem:[#allocation4 + $0x10] sm:$0x3] %vm1405_vm1, %v3381_v19  ;;  %5523 = vmatmul.msk.f32.vlgmr.msrb.gmra.mxu2 %vm1273_vm0, %v3381_v19  ;;  %5524 = vmatmul.msk.f32.vlgmr.msrb.gmra.mxu3 %vm1273_vm0, %v3413_v3 }
0x1fc4   :  { %v3409_v42 = vpop.f32.mrf.mxu2  ;;  %v3433_v50 = vpop.f32.mrf.mxu3 }
0x1fc5   :  { %v3438_v21 = vrot.slane %v3409_v42, 6  ;;  %v3443_v39 = vrot.slane %v3433_v50, 4 }
0x1fc7   :  { %v3440_v41 = vadd.f32 %v3438_v21, %v3436_v38  ;;  %v3445_v62 = vadd.f32 %v3443_v39, %v3441_v17  ;;  %v3590_v17 = vld [vmem:[#allocation3 + $0x18] sm:$0x30] }
0x1fc9   :  { %5838 = vtanh.f32 %v3440_v41  ;;  %v3447_v29 = vrot.slane %v3445_v62, 2  ;;  %v5525_v53 = vmul.f32 -1.442695, %v3440_v41 }
0x1fcb   :  { %5840 = vtanh.f32 %v3447_v29  ;;  %v5526_v6 = vmul.f32 -1.442695, %v3447_v29 }
0x1fcc   :  { %5842 = vpow2.f32 %v5525_v53 }
0x1fcf   :  { %v5839_v51 = vpop.eup %5838 }
0x1fd0   :  { %3494 = vrot.lane.b32.xlu2 %v5839_v51, %s6141_s3 }
0x1fd1   :  { %v5841_v37 = vpop.eup %5840 }
0x1fd2   :  { %3508 = vrot.lane.b32.xlu1 %v5841_v37, %s6141_s3  ;;  %v5843_v56 = vpop.eup %5842  ;;  %v3595_v37 = vld [vmem:[#allocation3] sm:$0xc] }
0x1fd3   :  { %v3455_v32 = vadd.f32 1.0, %v5843_v56 }
0x1fd5   :  { %5844 = vrcp.f32 %v3455_v32  ;;  %v3468_v23 = vand.u32 2147483648, %v3455_v32  ;;  %vm3462_vm13 = vweird.f32 %v3455_v32  ;;  %v3466_v35 = vand.u32 2147483647, %v3455_v32 }
0x1fd6   :  { %5846 = vpow2.f32 %v5526_v6 }
0x1fd7   :  { %v3469_v45 = vor.u32 1.1754944e-38, %v3468_v23  ;;  %vm3467_vm15 = vcmp.eq.f32.partialorder %v3466_v35, 8.507059e+37 }
0x1fdb   :  { %v5845_v11 = vpop.eup %5844 }
0x1fdc   :  { %v3458_v22 = vmul.f32 %v5845_v11, %v3455_v32  ;;  %v5847_v25 = vpop.eup %5846  ;;  %vm3463_vm12 = vweird.f32 %v5845_v11 }
0x1fdd   :  { %v3456_v61 = vadd.f32 1.0, %v5847_v25  ;;  %vm3464_vm14 = vmor %vm3462_vm13, %vm3463_vm12 }
0x1fde   :  { %v3459_v48 = vsub.f32 1.0, %v3458_v22 }
0x1fdf   :  { %5848 = vrcp.f32 %v3456_v61  ;;  %v3483_v34 = vand.u32 2147483648, %v3456_v61  ;;  %vm3477_vm6 = vweird.f32 %v3456_v61  ;;  %v3481_v52 = vand.u32 2147483647, %v3456_v61 }
0x1fe0   :  { %v3460_v40 = vmul.f32 %v5845_v11, %v3459_v48 }
0x1fe1   :  { %v3484_v49 = vor.u32 1.1754944e-38, %v3483_v34  ;;  %vm3482_vm8 = vcmp.eq.f32.partialorder %v3481_v52, 8.507059e+37 }
0x1fe2   :  { %v3461_v36 = vadd.f32 %v5845_v11, %v3460_v40 }
0x1fe4   :  { %v3465_v55 = vsel %vm3464_vm14, %v5845_v11, %v3461_v36 }
0x1fe5   :  { %v3470_v44 = vsel %vm3467_vm15, %v3469_v45, %v3465_v55  ;;  %v5849_v24 = vpop.eup %5848 }
0x1fe6   :  { %v3473_v26 = vmul.f32 %v5849_v24, %v3456_v61  ;;  %vm3478_vm5 = vweird.f32 %v5849_v24  ;;  %v3492_v20 = vmul.f32 %v3490_v18, %v3470_v44 }
0x1fe7   :  { %vm3479_vm7 = vmor %vm3477_vm6, %vm3478_vm5 }
0x1fe8   :  { %v3474_v15 = vsub.f32 1.0, %v3473_v26 }
0x1fea   :  { %v3475_v31 = vmul.f32 %v5849_v24, %v3474_v15 }
0x1fec   :  { %v3476_v27 = vadd.f32 %v5849_v24, %v3475_v31 }
0x1fee   :  { %v3480_v12 = vsel %vm3479_vm7, %v5849_v24, %v3476_v27 }
0x1fef   :  { %v3485_v1 = vsel %vm3482_vm8, %v3484_v49, %v3480_v12 }
0x1ff0   :  { %v3506_v0 = vmul.f32 %v3504_v33, %v3485_v1 }
0x202a   :  { %v3495_v4 = vpop.permute.xlu2 %3494 }
0x202b   :  { %v3497_v5 = vmul.f32 %v3495_v4, %v3470_v44 }
0x202d   :  { %3499 = vrot.lane.b32.xlu1 %v3497_v5, %s6142_s26 }
0x2044   :  { %v3509_v43 = vpop.permute.xlu1 %3508 }
0x2045   :  { %v3511_v10 = vmul.f32 %v3509_v43, %v3485_v1 }
0x2047   :  { %3513 = vrot.lane.b32.xlu0 %v3511_v10, %s6142_s26 }
0x209f   :  { %v3500_v59 = vpop.permute.xlu1 %3499 }
0x20a0   :  { %v8294_v47 = vadd.f32 %v3500_v59, %v3492_v20 }
0x20a2   :  { %5850 = vtanh.f32 %v8294_v47 }
0x20a8   :  { %v5851_v16 = vpop.eup %5850 }
0x20a9   :  { %3519 = vrot.lane.b32.xlu0 %v5851_v16, %s6141_s3  ;;  %v3644_v16 = vrot.slane %v8294_v47, 6 }
0x20b9   :  { %v3514_v8 = vpop.permute.xlu0 %3513 }
0x20ba   :  { %v8299_v7 = vadd.f32 %v3514_v8, %v3506_v0 }
0x20bc   :  { %5852 = vtanh.f32 %v8299_v7 }
0x20c2   :  { %v5853_v46 = vpop.eup %5852 }
0x20c3   :  { %3525 = vrot.lane.b32.xlu2 %v5853_v46, %s6141_s3  ;;  %v3658_v46 = vrot.slane %v8299_v7, 6 }
0x211b   :  { %v3520_v54 = vpop.permute.xlu0 %3519 }
0x211c   :  { %v8303_v57 = vmul.f32 %v3520_v54, %v3470_v44 }
0x211d   :  { %v3526_v19 = vpop.permute.xlu2 %3525 }
0x211e   :  { %v3540_v3 = vrot.slane %v8303_v57, 2  ;;  %v8306_v42 = vmul.f32 %v3526_v19, %v3485_v1 }
0x2120   :  { %3541 = vrot.lane.b32.xlu2 %v3540_v3, %s6142_s26  ;;  %v3565_v30 = vrot.slane %v8306_v42, 2 }
0x2122   :  { %3566 = vrot.lane.b32.xlu1 %v3565_v30, %s6142_s26 }
0x217a   :  { %v3542_v50 = vpop.permute.xlu2 %3541 }
0x217b   :  { %5527 = vmatmul.msk.f32.vlgmr.msra.gmra.mxu0 %vm1273_vm0, %v3542_v50 }
0x2194   :  { %v3567_v21 = vpop.permute.xlu1 %3566 }
0x2195   :  { %5528 = vmatmul.msk.f32.vlgmr.msra.gmra.mxu1 %vm1273_vm0, %v3567_v21 }
0x21f8   :  { %v3562_v39 = vpop.f32.mrf.mxu0 }
0x21f9   :  { %v3592_v38 = vrot.slane %v3562_v39, 4 }
0x21fb   :  { %v3594_v41 = vadd.f32 %v3592_v38, %v3590_v17 }
0x21fd   :  { %5854 = vtanh.f32 %v3594_v41  ;;  %v5529_v11 = vmul.f32 -1.442695, %v3594_v41 }
0x2203   :  { %v5855_v62 = vpop.eup %5854 }
0x2204   :  { %3648 = vrot.lane.b32.xlu1 %v5855_v62, %s6141_s3 }
0x2212   :  { %v3587_v29 = vpop.f32.mrf.mxu1 }
0x2213   :  { %v3597_v51 = vrot.slane %v3587_v29, 6 }
0x2215   :  { %v3599_v53 = vadd.f32 %v3597_v51, %v3595_v37  ;;  %v3744_v37 = vld [vmem:[#allocation3 + $0x18] sm:$0xc0] }
0x2217   :  { %v3601_v56 = vrot.slane %v3599_v53, 6 }
0x2219   :  { %5856 = vtanh.f32 %v3601_v56  ;;  %v5530_v25 = vmul.f32 -1.442695, %v3601_v56 }
0x221a   :  { %5858 = vpow2.f32 %v5529_v11  ;;  %v3749_v11 = vld [vmem:[#allocation3] sm:$0x3] }
0x221f   :  { %v5857_v32 = vpop.eup %5856 }
0x2220   :  { %3662 = vrot.lane.b32.xlu0 %v5857_v32, %s6141_s3  ;;  %v5859_v22 = vpop.eup %5858 }
0x2221   :  { %v3609_v6 = vadd.f32 1.0, %v5859_v22 }
0x2223   :  { %5860 = vrcp.f32 %v3609_v6  ;;  %v3622_v55 = vand.u32 2147483648, %v3609_v6  ;;  %vm3616_vm10 = vweird.f32 %v3609_v6  ;;  %v3620_v45 = vand.u32 2147483647, %v3609_v6 }
0x2224   :  { %5862 = vpow2.f32 %v5530_v25 }
0x2225   :  { %v3623_v5 = vor.u32 1.1754944e-38, %v3622_v55  ;;  %vm3621_vm12 = vcmp.eq.f32.partialorder %v3620_v45, 8.507059e+37 }
0x2229   :  { %v5861_v48 = vpop.eup %5860 }
0x222a   :  { %v3612_v40 = vmul.f32 %v5861_v48, %v3609_v6  ;;  %vm3617_vm9 = vweird.f32 %v5861_v48  ;;  %v5863_v35 = vpop.eup %5862 }
0x222b   :  { %vm3618_vm11 = vmor %vm3616_vm10, %vm3617_vm9  ;;  %v3610_v4 = vadd.f32 1.0, %v5863_v35 }
0x222c   :  { %v3613_v36 = vsub.f32 1.0, %v3612_v40 }
0x222d   :  { %5864 = vrcp.f32 %v3610_v4  ;;  %v3637_v49 = vand.u32 2147483648, %v3610_v4  ;;  %vm3631_vm14 = vweird.f32 %v3610_v4  ;;  %v3635_v1 = vand.u32 2147483647, %v3610_v4 }
0x222e   :  { %v3614_v23 = vmul.f32 %v5861_v48, %v3613_v36 }
0x222f   :  { %v3638_v10 = vor.u32 1.1754944e-38, %v3637_v49  ;;  %vm3636_vm5 = vcmp.eq.f32.partialorder %v3635_v1, 8.507059e+37 }
0x2230   :  { %v3615_v61 = vadd.f32 %v5861_v48, %v3614_v23 }
0x2232   :  { %v3619_v44 = vsel %vm3618_vm11, %v5861_v48, %v3615_v61 }
0x2233   :  { %v3624_v24 = vsel %vm3621_vm12, %v3623_v5, %v3619_v44  ;;  %v5865_v31 = vpop.eup %5864 }
0x2234   :  { %v3627_v27 = vmul.f32 %v5865_v31, %v3610_v4  ;;  %vm3632_vm13 = vweird.f32 %v5865_v31  ;;  %v3646_v33 = vmul.f32 %v3644_v16, %v3624_v24 }
0x2235   :  { %vm3633_vm15 = vmor %vm3631_vm14, %vm3632_vm13 }
0x2236   :  { %v3628_v34 = vsub.f32 1.0, %v3627_v27 }
0x2238   :  { %v3629_v52 = vmul.f32 %v5865_v31, %v3628_v34 }
0x223a   :  { %v3630_v12 = vadd.f32 %v5865_v31, %v3629_v52 }
0x223c   :  { %v3634_v43 = vsel %vm3633_vm15, %v5865_v31, %v3630_v12 }
0x223d   :  { %v3639_v20 = vsel %vm3636_vm5, %v3638_v10, %v3634_v43 }
0x223e   :  { %v3660_v54 = vmul.f32 %v3658_v46, %v3639_v20 }
0x2276   :  { %v3649_v26 = vpop.permute.xlu1 %3648 }
0x2277   :  { %v3651_v15 = vmul.f32 %v3649_v26, %v3624_v24 }
0x2279   :  { %3653 = vrot.lane.b32.xlu0 %v3651_v15, %s6142_s26 }
0x2292   :  { %v3663_v18 = vpop.permute.xlu0 %3662 }
0x2293   :  { %v3665_v59 = vmul.f32 %v3663_v18, %v3639_v20 }
0x2295   :  { %3667 = vrot.lane.b32.xlu2 %v3665_v59, %s6142_s26 }
0x22eb   :  { %v3654_v0 = vpop.permute.xlu0 %3653 }
0x22ec   :  { %v8318_v8 = vadd.f32 %v3654_v0, %v3646_v33 }
0x22ee   :  { %5866 = vtanh.f32 %v8318_v8 }
0x22ef   :  { %v3668_v3 = vpop.permute.xlu2 %3667 }
0x22f0   :  { %v8322_v19 = vadd.f32 %v3668_v3, %v3660_v54  ;;  %v3385_v54 = vrot.slane %v8282_v13, 2  ;;  %v3795_v3 = vrot.slane %v8318_v8, 6 }
0x22f2   :  { %5868 = vtanh.f32 %v8322_v19  ;;  %v3809_v13 = vrot.slane %v8322_v19, 6  ;;  %v2782_v19 = vrot.slane %v8166_v28, 2  ;;  %v3878_v28 = vld [vmem:[%s9097_s6 + $0xe8] sm:$0xff] }
0x22f4   :  { %v5867_v30 = vpop.eup %5866 }
0x22f5   :  { %3673 = vrot.lane.b32.xlu2 %v5867_v30, %s6141_s3 }
0x22f8   :  { %v5869_v50 = vpop.eup %5868 }
0x22f9   :  { %3679 = vrot.lane.b32.xlu1 %v5869_v50, %s6141_s3 }
0x234f   :  { %v3674_v47 = vpop.permute.xlu2 %3673 }
0x2350   :  { %v8327_v21 = vmul.f32 %v3674_v47, %v3624_v24 }
0x2352   :  { %v3694_v39 = vrot.slane %v8327_v21, 4 }
0x2354   :  { %3695 = vrot.lane.b32.xlu1 %v3694_v39, %s6142_s26 }
0x236b   :  { %v3680_v7 = vpop.permute.xlu1 %3679 }
0x236c   :  { %v8331_v38 = vmul.f32 %v3680_v7, %v3639_v20 }
0x236e   :  { %v3719_v17 = vrot.slane %v8331_v38, 4 }
0x2370   :  { %3720 = vrot.lane.b32.xlu0 %v3719_v17, %s6142_s26 }
0x23c6   :  { %v3696_v41 = vpop.permute.xlu1 %3695 }
0x23c7   :  { %5531 = vmatmul.msk.f32.vlgmr.msra.gmra.mxu2 %vm1273_vm0, %v3696_v41 }
0x23e2   :  { %v3721_v62 = vpop.permute.xlu0 %3720 }
0x23e3   :  { %5532 = vmatmul.msk.f32.vlgmr.msra.gmra.mxu3 %vm1273_vm0, %v3721_v62 }
0x244a   :  { %v3716_v29 = vpop.f32.mrf.mxu2 }
0x244b   :  { %v3746_v51 = vrot.slane %v3716_v29, 2 }
0x244d   :  { %v3748_v53 = vadd.f32 %v3746_v51, %v3744_v37  ;;  %v2932_v51 = vrot.slane %v8199_v58, 6  ;;  %v3879_v58 = vld [vmem:[%s9097_s6 + $0xf0] sm:$0xff]  ;;  %v3874_v37 = vld [vmem:[%s9097_s6 + $0xc8] sm:$0xff] }
0x244e   :  { %3919 = vmatpush.msrb.mxu0 %v3879_v58  ;;  %v3895_v58 = vld [vmem:[%s9097_s6 + $0x170] sm:$0xff] }
0x244f   :  { %5870 = vtanh.f32 %v3748_v53  ;;  %v5533_v40 = vmul.f32 -1.442695, %v3748_v53  ;;  %v3871_v53 = vld [vmem:[%s9097_s6 + $0xb0] sm:$0xff] }
0x2455   :  { %v5871_v56 = vpop.eup %5870 }
0x2456   :  { %3799 = vrot.lane.b32.xlu0 %v5871_v56, %s6141_s3  ;;  %v3872_v56 = vld [vmem:[%s9097_s6 + $0xb8] sm:$0xff] }
0x2466   :  { %v3741_v32 = vpop.f32.mrf.mxu3 }
0x2467   :  { %v3750_v22 = vadd.f32 %v3749_v11, %v3741_v32  ;;  %v3869_v32 = vld [vmem:[%s9097_s6 + $0xa0] sm:$0xff]  ;;  %v3870_v11 = vld [vmem:[%s9097_s6 + $0xa8] sm:$0xff] }
0x2469   :  { %v3752_v6 = vrot.slane %v3750_v22, 2  ;;  %v3867_v22 = vld [vmem:[%s9097_s6 + $0x90] sm:$0xff] }
0x246b   :  { %5872 = vtanh.f32 %v3752_v6  ;;  %v5534_v25 = vmul.f32 -1.442695, %v3752_v6  ;;  %v3868_v6 = vld [vmem:[%s9097_s6 + $0x98] sm:$0xff] }
0x246c   :  { %5874 = vpow2.f32 %v5533_v40  ;;  %v3866_v40 = vld [vmem:[%s9097_s6 + $0x88] sm:$0xff] }
0x246d   :  { %5876 = vpow2.f32 %v5534_v25  ;;  %v3863_v25 = vld [vmem:[%s9097_s6 + $0x70] sm:$0xff] }
0x2471   :  { %v5873_v48 = vpop.eup %5872 }
0x2472   :  { %3813 = vrot.lane.b32.xlu2 %v5873_v48, %s6141_s3  ;;  %v5875_v36 = vpop.eup %5874  ;;  %v3865_v48 = vld [vmem:[%s9097_s6 + $0x80] sm:$0xff] }
0x2473   :  { %v3760_v23 = vadd.f32 1.0, %v5875_v36  ;;  %v5877_v61 = vpop.eup %5876  ;;  %v3864_v36 = vld [vmem:[%s9097_s6 + $0x78] sm:$0xff] }
0x2474   :  { %v3761_v35 = vadd.f32 1.0, %v5877_v61  ;;  %v3861_v61 = vld [vmem:[%s9097_s6 + $0x60] sm:$0xff] }
0x2475   :  { %5878 = vrcp.f32 %v3760_v23  ;;  %v3773_v31 = vand.u32 2147483648, %v3760_v23  ;;  %vm3767_vm7 = vweird.f32 %v3760_v23  ;;  %v3771_v34 = vand.u32 2147483647, %v3760_v23 }
0x2476   :  { %5880 = vrcp.f32 %v3761_v35  ;;  %v3788_v1 = vand.u32 2147483648, %v3761_v35  ;;  %vm3782_vm11 = vweird.f32 %v3761_v35  ;;  %v3786_v18 = vand.u32 2147483647, %v3761_v35 }
0x2477   :  { %v3774_v12 = vor.u32 1.1754944e-38, %v3773_v31  ;;  %vm3772_vm10 = vcmp.eq.f32.partialorder %v3771_v34, 8.507059e+37  ;;  %v3854_v31 = vld [vmem:[%s9097_s6 + $0x28] sm:$0xff]  ;;  %v3851_v34 = vld [vmem:[%s9097_s6 + $0x10] sm:$0xff] }
0x2478   :  { %v3789_v16 = vor.u32 1.1754944e-38, %v3788_v1  ;;  %vm3787_vm13 = vcmp.eq.f32.partialorder %v3786_v18, 8.507059e+37 }
0x247b   :  { %v5879_v55 = vpop.eup %5878 }
0x247c   :  { %v3763_v45 = vmul.f32 %v5879_v55, %v3760_v23  ;;  %v5881_v4 = vpop.eup %5880  ;;  %vm3768_vm6 = vweird.f32 %v5879_v55 }
0x247d   :  { %v3778_v5 = vmul.f32 %v5881_v4, %v3761_v35  ;;  %vm3769_vm8 = vmor %vm3767_vm7, %vm3768_vm6  ;;  %vm3783_vm9 = vweird.f32 %v5881_v4  ;;  %v3862_v35 = vld [vmem:[%s9097_s6 + $0x68] sm:$0xff] }
0x247e   :  { %v3764_v44 = vsub.f32 1.0, %v3763_v45  ;;  %vm3784_vm12 = vmor %vm3782_vm11, %vm3783_vm9  ;;  %v3859_v45 = vld [vmem:[%s9097_s6 + $0x50] sm:$0xff] }
0x247f   :  { %v3779_v26 = vsub.f32 1.0, %v3778_v5  ;;  %v3858_v5 = vld [vmem:[%s9097_s6 + $0x48] sm:$0xff] }
0x2480   :  { %v3765_v24 = vmul.f32 %v5879_v55, %v3764_v44  ;;  %v3857_v44 = vld [vmem:[%s9097_s6 + $0x40] sm:$0xff] }
0x2481   :  { %v3780_v27 = vmul.f32 %v5881_v4, %v3779_v26  ;;  %v3856_v26 = vld [vmem:[%s9097_s6 + $0x38] sm:$0xff] }
0x2482   :  { %v3766_v15 = vadd.f32 %v5879_v55, %v3765_v24  ;;  %v3855_v24 = vld [vmem:[%s9097_s6 + $0x30] sm:$0xff] }
0x2483   :  { %v3781_v49 = vadd.f32 %v5881_v4, %v3780_v27 }
0x2484   :  { %v3770_v52 = vsel %vm3769_vm8, %v5879_v55, %v3766_v15  ;;  %v3853_v15 = vld [vmem:[%s9097_s6 + $0x20] sm:$0xff] }
0x2485   :  { %v8339_v10 = vsel %vm3772_vm10, %v3774_v12, %v3770_v52  ;;  %v3785_v59 = vsel %vm3784_vm12, %v5881_v4, %v3781_v49  ;;  %v3860_v4 = vld [vmem:[%s9097_s6 + $0x58] sm:$0xff]  ;;  %v3849_v12 = vld [vmem:[%s9097_s6] sm:$0xff]  ;;  %v3850_v49 = vld [vmem:[%s9097_s6 + $0x8] sm:$0xff] }
0x2486   :  { %v8343_v0 = vsel %vm3787_vm13, %v3789_v16, %v3785_v59  ;;  %v3797_v30 = vmul.f32 %v3795_v3, %v8339_v10  ;;  %v3852_v52 = vld [vmem:[%s9097_s6 + $0x18] sm:$0xff] }
0x2487   :  { %v3811_v8 = vmul.f32 %v3809_v13, %v8343_v0  ;;  %v3903_v13 = vld [vmem:[%s9097_s6 + $0x1b0] sm:$0xff] }
0x24c8   :  { %v3800_v43 = vpop.permute.xlu0 %3799 }
0x24c9   :  { %v3802_v20 = vmul.f32 %v3800_v43, %v8339_v10 }
0x24cb   :  { %3804 = vrot.lane.b32.xlu2 %v3802_v20, %s6142_s26 }
0x24cc   :  { %v3814_v33 = vpop.permute.xlu2 %3813 }
0x24cd   :  { %v3816_v46 = vmul.f32 %v3814_v33, %v8343_v0  ;;  %v3086_v33 = vrot.slane %v8227_v9, 2  ;;  %v3912_v9 = vld [vmem:[%s9097_s6 + $0x1f8] sm:$0xff] }
0x24ce   :  { %3988 = vmatpush.msrb.mxu3 %v3912_v9 }
0x24cf   :  { %3818 = vrot.lane.b32.xlu1 %v3816_v46, %s6142_s26 }
0x24d3   :  { %2927 = vrot.lane.b32.xlu2 %v8195_v63, %s6142_s26  ;;  %v3689_v63 = vrot.slane %v8331_v38, 2  ;;  %v3873_v38 = vld [vmem:[%s9097_s6 + $0xc0] sm:$0xff] }
0x24db   :  { %3386 = vrot.lane.b32.xlu2 %v3385_v54, %s6142_s26 }
0x2525   :  { %v3805_v50 = vpop.permute.xlu2 %3804 }
0x2526   :  { %v3807_v47 = vadd.f32 %v3805_v50, %v3797_v30  ;;  %v3911_v30 = vld [vmem:[%s9097_s6 + $0x1f0] sm:$0xff]  ;;  %v3909_v50 = vld [vmem:[%s9097_s6 + $0x1e0] sm:$0xff] }
0x2527   :  { %3942 = vmatpush.msrb.mxu1 %v3911_v30 }
0x2528   :  { %5882 = vtanh.f32 %v3807_v47  ;;  %v3910_v47 = vld [vmem:[%s9097_s6 + $0x1e8] sm:$0xff] }
0x2529   :  { %3943 = vmatpush.msrb.mxu1 %v3909_v50  ;;  %3989 = vmatpush.msrb.mxu3 %v3910_v47 }
0x252d   :  { %v2928_v39 = vpop.permute.xlu2 %2927 }
0x252e   :  { %v5883_v7 = vpop.eup %5882  ;;  %2930 = vst.msk [vmem:[#allocation4] sm:$0xc] %vm1557_vm2, %v2928_v39  ;;  %v3907_v39 = vld [vmem:[%s9097_s6 + $0x1d0] sm:$0xff] }
0x252f   :  { %3824 = vrot.lane.b32.xlu1 %v5883_v7, %s6141_s3  ;;  %v3908_v7 = vld [vmem:[%s9097_s6 + $0x1d8] sm:$0xff]  ;;  %3944 = vmatpush.msrb.mxu1 %v3907_v39 }
0x2530   :  { %3990 = vmatpush.msrb.mxu3 %v3908_v7 }
0x2535   :  { %v3387_v17 = vpop.permute.xlu2 %3386 }
0x2536   :  { %3389 = vst.msk [vmem:[#allocation4 + $0x8] sm:$0xc0] %vm1412_vm3, %v3387_v17  ;;  %v3905_v17 = vld [vmem:[%s9097_s6 + $0x1c0] sm:$0xff] }
0x2537   :  { %3232 = vrot.lane.b32.xlu1 %v8259_v14, %s6142_s26  ;;  %v3535_v14 = vrot.slane %v8306_v42, 6  ;;  %v3876_v42 = vld [vmem:[%s9097_s6 + $0xd8] sm:$0xff]  ;;  %3945 = vmatpush.msrb.mxu1 %v3905_v17 }
0x2539   :  { %3946 = vmatpush.msrb.mxu1 %v3903_v13 }
0x253f   :  { %3690 = vrot.lane.b32.xlu1 %v3689_v63, %s6142_s26  ;;  %v3906_v63 = vld [vmem:[%s9097_s6 + $0x1c8] sm:$0xff] }
0x2540   :  { %3991 = vmatpush.msrb.mxu3 %v3906_v63 }
0x2541   :  { %v3819_v41 = vpop.permute.xlu1 %3818 }
0x2542   :  { %v3821_v62 = vadd.f32 %v3819_v41, %v3811_v8  ;;  %v3904_v8 = vld [vmem:[%s9097_s6 + $0x1b8] sm:$0xff]  ;;  %v3901_v41 = vld [vmem:[%s9097_s6 + $0x1a0] sm:$0xff] }
0x2543   :  { %3992 = vmatpush.msrb.mxu3 %v3904_v8  ;;  %3947 = vmatpush.msrb.mxu1 %v3901_v41 }
0x2544   :  { %5884 = vtanh.f32 %v3821_v62  ;;  %v3902_v62 = vld [vmem:[%s9097_s6 + $0x1a8] sm:$0xff] }
0x2545   :  { %3993 = vmatpush.msrb.mxu3 %v3902_v62 }
0x2547   :  { %3684 = vrot.lane.b32.xlu1 %v8327_v21, %s6142_s26  ;;  %v3880_v21 = vld [vmem:[%s9097_s6 + $0xf8] sm:$0xff] }
0x2548   :  { %3965 = vmatpush.msrb.mxu2 %v3880_v21  ;;  %v3896_v21 = vld [vmem:[%s9097_s6 + $0x178] sm:$0xff] }
0x254a   :  { %v5885_v29 = vpop.eup %5884  ;;  %3966 = vmatpush.msrb.mxu2 %v3878_v28  ;;  %v3894_v28 = vld [vmem:[%s9097_s6 + $0x168] sm:$0xff] }
0x254b   :  { %3830 = vrot.lane.b32.xlu0 %v5885_v29, %s6141_s3  ;;  %v3899_v29 = vld [vmem:[%s9097_s6 + $0x190] sm:$0xff] }
0x254c   :  { %3967 = vmatpush.msrb.mxu2 %v3876_v42  ;;  %3948 = vmatpush.msrb.mxu1 %v3899_v29  ;;  %v3892_v42 = vld [vmem:[%s9097_s6 + $0x158] sm:$0xff] }
0x254e   :  { %3968 = vmatpush.msrb.mxu2 %v3874_v37  ;;  %v3890_v37 = vld [vmem:[%s9097_s6 + $0x148] sm:$0xff] }
0x254f   :  { %2933 = vrot.lane.b32.xlu1 %v2932_v51, %s6142_s26  ;;  %v3900_v51 = vld [vmem:[%s9097_s6 + $0x198] sm:$0xff] }
0x2550   :  { %3969 = vmatpush.msrb.mxu2 %v3872_v56  ;;  %3994 = vmatpush.msrb.mxu3 %v3900_v51  ;;  %v3887_v56 = vld [vmem:[%s9097_s6 + $0x130] sm:$0xff] }
0x2552   :  { %3970 = vmatpush.msrb.mxu2 %v3870_v11  ;;  %v3885_v11 = vld [vmem:[%s9097_s6 + $0x120] sm:$0xff] }
0x2553   :  { %3081 = vrot.lane.b32.xlu0 %v8230_v2, %s6142_s26  ;;  %v3877_v2 = vld [vmem:[%s9097_s6 + $0xe0] sm:$0xff] }
0x2554   :  { %3920 = vmatpush.msrb.mxu0 %v3877_v2  ;;  %3971 = vmatpush.msrb.mxu2 %v3868_v6  ;;  %v3893_v2 = vld [vmem:[%s9097_s6 + $0x160] sm:$0xff]  ;;  %v3883_v6 = vld [vmem:[%s9097_s6 + $0x110] sm:$0xff] }
0x2556   :  { %3972 = vmatpush.msrb.mxu2 %v3866_v40  ;;  %v3881_v40 = vld [vmem:[%s9097_s6 + $0x100] sm:$0xff] }
0x2558   :  { %3973 = vmatpush.msrb.mxu2 %v3864_v36 }
0x255a   :  { %3974 = vmatpush.msrb.mxu2 %v3862_v35  ;;  %v8586_v35 = vld [vmem:[#allocation10 + $0x18] sm:$0xff] }
0x255b   :  { %3536 = vrot.lane.b32.xlu0 %v3535_v14, %s6142_s26  ;;  %v3897_v14 = vld [vmem:[%s9097_s6 + $0x180] sm:$0xff] }
0x255c   :  { %3975 = vmatpush.msrb.mxu2 %v3860_v4  ;;  %3949 = vmatpush.msrb.mxu1 %v3897_v14  ;;  %v8600_v4 = vld [vmem:[#allocation10 + $0x10] sm:$0xff] }
0x255e   :  { %3976 = vmatpush.msrb.mxu2 %v3858_v5  ;;  %3950 = vmatpush.msrb.mxu1 %v3895_v58  ;;  %v8607_v5 = vld [vmem:[#allocation10] sm:$0xff] }
0x2560   :  { %3977 = vmatpush.msrb.mxu2 %v3856_v26  ;;  %3951 = vmatpush.msrb.mxu1 %v3893_v2 }
0x2562   :  { %3978 = vmatpush.msrb.mxu2 %v3854_v31 }
0x2563   :  { %3530 = vrot.lane.b32.xlu0 %v8303_v57, %s6142_s26  ;;  %v3875_v57 = vld [vmem:[%s9097_s6 + $0xd0] sm:$0xff] }
0x2564   :  { %3921 = vmatpush.msrb.mxu0 %v3875_v57  ;;  %3979 = vmatpush.msrb.mxu2 %v3852_v52  ;;  %v3891_v57 = vld [vmem:[%s9097_s6 + $0x150] sm:$0xff] }
0x2565   :  { %3952 = vmatpush.msrb.mxu1 %v3891_v57 }
0x2566   :  { %3922 = vmatpush.msrb.mxu0 %v3873_v38  ;;  %3980 = vmatpush.msrb.mxu2 %v3850_v49  ;;  %v3889_v38 = vld [vmem:[%s9097_s6 + $0x140] sm:$0xff] }
0x2567   :  { %3953 = vmatpush.msrb.mxu1 %v3889_v38 }
0x2568   :  { %3923 = vmatpush.msrb.mxu0 %v3871_v53 }
0x2569   :  { %3954 = vmatpush.msrb.mxu1 %v3887_v56 }
0x256a   :  { %3924 = vmatpush.msrb.mxu0 %v3869_v32  ;;  %v3888_v32 = vld [vmem:[%s9097_s6 + $0x138] sm:$0xff] }
0x256b   :  { %2783 = vrot.lane.b32.xlu0 %v2782_v19, %s6142_s26  ;;  %v3898_v19 = vld [vmem:[%s9097_s6 + $0x188] sm:$0xff]  ;;  %3955 = vmatpush.msrb.mxu1 %v3885_v11 }
0x256c   :  { %3925 = vmatpush.msrb.mxu0 %v3867_v22  ;;  %3995 = vmatpush.msrb.mxu3 %v3898_v19  ;;  %v3886_v22 = vld [vmem:[%s9097_s6 + $0x128] sm:$0xff] }
0x256d   :  { %3956 = vmatpush.msrb.mxu1 %v3883_v6 }
0x256e   :  { %3926 = vmatpush.msrb.mxu0 %v3865_v48  ;;  %3996 = vmatpush.msrb.mxu3 %v3896_v21  ;;  %v3884_v48 = vld [vmem:[%s9097_s6 + $0x118] sm:$0xff] }
0x256f   :  { %3957 = vmatpush.msrb.mxu1 %v3881_v40 }
0x2570   :  { %3927 = vmatpush.msrb.mxu0 %v3863_v25  ;;  %3997 = vmatpush.msrb.mxu3 %v3894_v28  ;;  %v3882_v25 = vld [vmem:[%s9097_s6 + $0x108] sm:$0xff] }
0x2571   :  { %4055 = vmatpush.msra.mxu1 %v8586_v35 }
0x2572   :  { %3928 = vmatpush.msrb.mxu0 %v3861_v61  ;;  %3998 = vmatpush.msrb.mxu3 %v3892_v42  ;;  %v8584_v61 = vld [vmem:[#allocation9 + $0x10] sm:$0xff] }
0x2573   :  { %4056 = vmatpush.msra.mxu1 %v8600_v4 }
0x2574   :  { %3929 = vmatpush.msrb.mxu0 %v3859_v45  ;;  %3999 = vmatpush.msrb.mxu3 %v3890_v37  ;;  %v8598_v45 = vld [vmem:[#allocation9] sm:$0xff] }
0x2576   :  { %3930 = vmatpush.msrb.mxu0 %v3857_v44  ;;  %4000 = vmatpush.msrb.mxu3 %v3888_v32  ;;  %v8602_v44 = vld [vmem:[#allocation10 + $0x8] sm:$0xff] }
0x2577   :  { %4057 = vmatpush.msra.mxu1 %v8602_v44 }
0x2578   :  { %3931 = vmatpush.msrb.mxu0 %v3855_v24  ;;  %4001 = vmatpush.msrb.mxu3 %v3886_v22 }
0x2579   :  { %4058 = vmatpush.msra.mxu1 %v8607_v5 }
0x257a   :  { %3932 = vmatpush.msrb.mxu0 %v3853_v15  ;;  %4002 = vmatpush.msrb.mxu3 %v3884_v48 }
0x257c   :  { %3933 = vmatpush.msrb.mxu0 %v3851_v34  ;;  %4003 = vmatpush.msrb.mxu3 %v3882_v25 }
0x257e   :  { %3934 = vmatpush.msrb.mxu0 %v3849_v12  ;;  %4196 = vmatpush.msra.mxu3 %v8586_v35 }
0x2580   :  { %4197 = vmatpush.msra.mxu3 %v8600_v4 }
0x2582   :  { %4198 = vmatpush.msra.mxu3 %v8602_v44 }
0x2584   :  { %4199 = vmatpush.msra.mxu3 %v8607_v5 }
0x25a1   :  { %v3825_v23 = vpop.permute.xlu1 %3824 }
0x25a2   :  { %v3827_v55 = vmul.f32 %v3825_v23, %v8339_v10  ;;  %v8582_v23 = vld [vmem:[#allocation9 + $0x18] sm:$0xff] }
0x25a3   :  { %4035 = vmatpush.msra.mxu0 %v8582_v23  ;;  %4172 = vmatpush.msra.mxu2 %v8582_v23 }
0x25a4   :  { %3835 = vrot.lane.b32.xlu2 %v3827_v55, %s6142_s26  ;;  %v8590_v55 = vld [vmem:[#allocation9 + $0x8] sm:$0xff] }
0x25a5   :  { %4036 = vmatpush.msra.mxu0 %v8584_v61  ;;  %4173 = vmatpush.msra.mxu2 %v8584_v61 }
0x25a7   :  { %4037 = vmatpush.msra.mxu0 %v8590_v55  ;;  %4174 = vmatpush.msra.mxu2 %v8590_v55 }
0x25a9   :  { %v3233_v27 = vpop.permute.xlu1 %3232  ;;  %4038 = vmatpush.msra.mxu0 %v8598_v45  ;;  %4175 = vmatpush.msra.mxu2 %v8598_v45 }
0x25aa   :  { %3235 = vst.msk [vmem:[#allocation4] sm:$0xc0] %vm1412_vm3, %v3233_v27  ;;  %v3913_v27 = vld [vmem:[%s9098_s7] sm:$0x3] }
0x25ab   :  { %v3915_v52 = vperm.slane %v3913_v27, 0 }
0x25b1   :  { %v3691_v1 = vpop.permute.xlu1 %3690 }
0x25b2   :  { %3693 = vst.msk [vmem:[#allocation4 + $0x8] sm:$0xc] %vm1557_vm2, %v3691_v1 }
0x25b9   :  { %v3685_v43 = vpop.permute.xlu1 %3684 }
0x25ba   :  { %3687 = vst.msk [vmem:[#allocation4 + $0x10] sm:$0x30] %vm1564_vm4, %v3685_v43  ;;  %v3916_v43 = vperm.slane %v3913_v27, 1 }
0x25bd   :  { %v3831_v10 = vpop.permute.xlu0 %3830 }
0x25be   :  { %v3833_v18 = vmul.f32 %v3831_v10, %v8343_v0 }
0x25c0   :  { %v3840_v20 = vrot.slane %v3833_v18, 6 }
0x25c1   :  { %v2934_v59 = vpop.permute.xlu1 %2933 }
0x25c2   :  { %2936 = vst.msk [vmem:[#allocation4 + $0x18] sm:$0x30] %vm1564_vm4, %v2934_v59  ;;  %3841 = vrot.lane.b32.xlu2 %v3840_v20, %s6142_s26 }
0x25c5   :  { %v3082_v16 = vpop.permute.xlu0 %3081 }
0x25c6   :  { %3084 = vst.msk [vmem:[#allocation4] sm:$0x30] %vm1564_vm4, %v3082_v16 }
0x25ca   :  { %3087 = vrot.lane.b32.xlu2 %v3086_v33, %s6142_s26 }
0x25cd   :  { %v3537_v46 = vpop.permute.xlu0 %3536  ;;  %v3845_v54 = vld [vmem:[#allocation4] sm:$0xff] }
0x25ce   :  { %3539 = vst.msk [vmem:[#allocation4 + $0x8] sm:$0x30] %vm1564_vm4, %v3537_v46  ;;  %3935 = vmatmul.f32.vlgmr.msrb.gmra.mxu0 %v3845_v54  ;;  %3981 = vmatmul.f32.vlgmr.msrb.gmra.mxu2 %v3845_v54 }
0x25cf   :  { %4325 = vmatpush.msrb.mxu0 %v8582_v23  ;;  %4479 = vmatpush.msrb.mxu2 %v8582_v23 }
0x25d1   :  { %4326 = vmatpush.msrb.mxu0 %v8584_v61  ;;  %4480 = vmatpush.msrb.mxu2 %v8584_v61 }
0x25d3   :  { %4327 = vmatpush.msrb.mxu0 %v8590_v55  ;;  %4481 = vmatpush.msrb.mxu2 %v8590_v55 }
0x25d5   :  { %v3531_v0 = vpop.permute.xlu0 %3530  ;;  %4328 = vmatpush.msrb.mxu0 %v8598_v45  ;;  %4482 = vmatpush.msrb.mxu2 %v8598_v45 }
0x25d6   :  { %3533 = vst.msk [vmem:[#allocation4 + $0x10] sm:$0xc] %vm1557_vm2, %v3531_v0 }
0x25dd   :  { %v2784_v3 = vpop.permute.xlu0 %2783 }
0x25de   :  { %2786 = vst.msk [vmem:[#allocation4 + $0x18] sm:$0xc0] %vm1412_vm3, %v2784_v3 }
0x25fe   :  { %v3836_v53 = vpop.permute.xlu2 %3835 }
0x25ff   :  { %3838 = vst.msk [vmem:[#allocation4 + $0x10] sm:$0xc0] %vm1412_vm3, %v3836_v53 }
0x2606   :  { %v3847_v36 = vld [vmem:[#allocation4 + $0x10] sm:$0xff] }
0x2607   :  { %3938 = vmatmul.f32.gmra.mxu0 %v3847_v36  ;;  %3984 = vmatmul.f32.gmra.mxu2 %v3847_v36 }
0x260f   :  { %4039 = vmatmul.f32.vlgmr.msra.gmra.mxu0 %v6140_v60 }
0x2610   :  { %4630 = vmatpush.msra.mxu0 %v8582_v23 }
0x2612   :  { %4631 = vmatpush.msra.mxu0 %v8584_v61 }
0x2614   :  { %4632 = vmatpush.msra.mxu0 %v8590_v55 }
0x2616   :  { %4633 = vmatpush.msra.mxu0 %v8598_v45 }
0x261c   :  { %v3842_v24 = vpop.permute.xlu2 %3841 }
0x261d   :  { %3844 = vst.msk [vmem:[#allocation4 + $0x8] sm:$0x3] %vm1405_vm1, %v3842_v24 }
0x2624   :  { %v3088_v26 = vpop.permute.xlu2 %3087  ;;  %v3846_v15 = vld [vmem:[#allocation4 + $0x8] sm:$0xff] }
0x2625   :  { %3090 = vst.msk [vmem:[#allocation4 + $0x18] sm:$0xc] %vm1557_vm2, %v3088_v26  ;;  %3958 = vmatmul.f32.vlgmr.msrb.gmra.mxu1 %v3846_v15  ;;  %4004 = vmatmul.f32.vlgmr.msrb.gmra.mxu3 %v3846_v15 }
0x2626   :  { %4350 = vmatpush.msrb.mxu1 %v8586_v35  ;;  %4504 = vmatpush.msrb.mxu3 %v8586_v35 }
0x2628   :  { %4351 = vmatpush.msrb.mxu1 %v8600_v4  ;;  %4505 = vmatpush.msrb.mxu3 %v8600_v4 }
0x262a   :  { %4352 = vmatpush.msrb.mxu1 %v8602_v44  ;;  %4506 = vmatpush.msrb.mxu3 %v8602_v44 }
0x262c   :  { %v3848_v31 = vld [vmem:[#allocation4 + $0x18] sm:$0xff]  ;;  %4353 = vmatpush.msrb.mxu1 %v8607_v5  ;;  %4507 = vmatpush.msrb.mxu3 %v8607_v5 }
0x262d   :  { %3961 = vmatmul.f32.gmra.mxu1 %v3848_v31  ;;  %4007 = vmatmul.f32.gmra.mxu3 %v3848_v31 }
0x2635   :  { %4059 = vmatmul.f32.vlgmr.msra.gmra.mxu1 %v6140_v60 }
0x2636   :  { %4652 = vmatpush.msra.mxu1 %v8586_v35 }
0x2638   :  { %4653 = vmatpush.msra.mxu1 %v8600_v4 }
0x263a   :  { %4654 = vmatpush.msra.mxu1 %v8602_v44 }
0x263c   :  { %4655 = vmatpush.msra.mxu1 %v8607_v5 }
0x264b   :  { %v3936_v34 = vpop.f32.mrf.mxu0 }
0x264c   :  { %v3937_v12 = vadd.f32 %v3936_v34, %v3915_v52 }
0x2651   :  { %v3982_v60 = vpop.f32.mrf.mxu2 }
0x2652   :  { %v3983_v18 = vadd.f32 %v3982_v60, %v3916_v43 }
0x2684   :  { %v3939_v49 = vpop.f32.mrf.mxu0 }
0x2685   :  { %v3940_v59 = vadd.f32 %v3939_v49, %v3915_v52 }
0x268a   :  { %v3985_v0 = vpop.f32.mrf.mxu2 }
0x268b   :  { %v3986_v9 = vadd.f32 %v3985_v0, %v3916_v43 }
0x268c   :  { %v4040_v46 = vpop.f32.mrf.mxu0 }
0x26a2   :  { %v3959_v1 = vpop.f32.mrf.mxu1 }
0x26a3   :  { %v3960_v10 = vadd.f32 %v3959_v1, %v3937_v12 }
0x26a5   :  { %4011 = vst [vmem:[#allocation3 + $0x10] sm:$0xff] %v3960_v10 }
0x26a8   :  { %v4005_v20 = vpop.f32.mrf.mxu3 }
0x26a9   :  { %v4006_v16 = vadd.f32 %v4005_v20, %v3983_v18 }
0x26aa   :  { %v3962_v33 = vpop.f32.mrf.mxu1 }
0x26ab   :  { %4012 = vst [vmem:[#allocation3] sm:$0xff] %v4006_v16  ;;  %v3963_v54 = vadd.f32 %v3962_v33, %v3940_v59 }
0x26ac   :  { %v4063_v3 = vld [vmem:[#allocation3 + $0x10] sm:$0x3] }
0x26ad   :  { %4013 = vst [vmem:[#allocation3 + $0x18] sm:$0xff] %v3963_v54  ;;  %v4064_v30 = vadd.f32 %v4063_v3, %v4040_v46 }
0x26af   :  { %5886 = vtanh.f32 %v4064_v30  ;;  %v5535_v62 = vmul.f32 -1.442695, %v4064_v30 }
0x26b0   :  { %v4008_v50 = vpop.f32.mrf.mxu3 }
0x26b1   :  { %v4009_v47 = vadd.f32 %v4008_v50, %v3986_v9  ;;  %v4204_v9 = vld [vmem:[#allocation3 + $0x10] sm:$0xc] }
0x26b2   :  { %v4060_v39 = vpop.f32.mrf.mxu1 }
0x26b3   :  { %4014 = vst [vmem:[#allocation3 + $0x8] sm:$0xff] %v4009_v47  ;;  %v4067_v17 = vrot.slane %v4060_v39, 2 }
0x26b5   :  { %v5887_v7 = vpop.eup %5886 }
0x26b6   :  { %4115 = vrot.lane.b32.xlu1 %v5887_v7, %s6141_s3 }
0x26ba   :  { %v4065_v63 = vld [vmem:[#allocation3 + $0x8] sm:$0xc0] }
0x26bb   :  { %v4069_v13 = vadd.f32 %v4067_v17, %v4065_v63  ;;  %v4209_v17 = vld [vmem:[#allocation3 + $0x8] sm:$0x30] }
0x26bd   :  { %v4071_v8 = vrot.slane %v4069_v13, 6 }
0x26bf   :  { %5888 = vtanh.f32 %v4071_v8  ;;  %v5536_v14 = vmul.f32 -1.442695, %v4071_v8 }
0x26c0   :  { %5890 = vpow2.f32 %v5535_v62 }
0x26c5   :  { %v5889_v41 = vpop.eup %5888 }
0x26c6   :  { %4126 = vrot.lane.b32.xlu0 %v5889_v41, %s6141_s3  ;;  %v5891_v29 = vpop.eup %5890 }
0x26c7   :  { %v4079_v51 = vadd.f32 1.0, %v5891_v29 }
0x26c9   :  { %5892 = vrcp.f32 %v4079_v51  ;;  %v4092_v37 = vand.u32 2147483648, %v4079_v51  ;;  %vm4086_vm15 = vweird.f32 %v4079_v51  ;;  %v4090_v53 = vand.u32 2147483647, %v4079_v51 }
0x26ca   :  { %5894 = vpow2.f32 %v5536_v14 }
0x26cb   :  { %v4093_v11 = vor.u32 1.1754944e-38, %v4092_v37  ;;  %vm4091_vm6 = vcmp.eq.f32.partialorder %v4090_v53, 8.507059e+37 }
0x26cf   :  { %v5893_v19 = vpop.eup %5892 }
0x26d0   :  { %v5895_v58 = vpop.eup %5894  ;;  %v4082_v21 = vmul.f32 %v5893_v19, %v4079_v51  ;;  %vm4087_vm14 = vweird.f32 %v5893_v19 }
0x26d1   :  { %v4080_v2 = vadd.f32 1.0, %v5895_v58  ;;  %vm4088_vm5 = vmor %vm4086_vm15, %vm4087_vm14 }
0x26d2   :  { %v4083_v28 = vsub.f32 1.0, %v4082_v21 }
0x26d3   :  { %5896 = vrcp.f32 %v4080_v2  ;;  %v4107_v24 = vand.u32 2147483648, %v4080_v2  ;;  %vm4101_vm8 = vweird.f32 %v4080_v2  ;;  %v4105_v26 = vand.u32 2147483647, %v4080_v2 }
0x26d4   :  { %v4084_v57 = vmul.f32 %v5893_v19, %v4083_v28 }
0x26d5   :  { %v4108_v31 = vor.u32 1.1754944e-38, %v4107_v24  ;;  %vm4106_vm10 = vcmp.eq.f32.partialorder %v4105_v26, 8.507059e+37 }
0x26d6   :  { %v4085_v42 = vadd.f32 %v5893_v19, %v4084_v57 }
0x26d8   :  { %v4089_v56 = vsel %vm4088_vm5, %v5893_v19, %v4085_v42 }
0x26d9   :  { %v5897_v38 = vpop.eup %5896  ;;  %v4094_v22 = vsel %vm4091_vm6, %v4093_v11, %v4089_v56 }
0x26da   :  { %v4097_v32 = vmul.f32 %v5897_v38, %v4080_v2  ;;  %vm4102_vm7 = vweird.f32 %v5897_v38  ;;  %v4113_v43 = vmul.f32 0.0, %v4094_v22 }
0x26db   :  { %vm4103_vm9 = vmor %vm4101_vm8, %vm4102_vm7 }
0x26dc   :  { %v4098_v40 = vsub.f32 1.0, %v4097_v32 }
0x26de   :  { %v4099_v25 = vmul.f32 %v5897_v38, %v4098_v40 }
0x26e0   :  { %v4100_v36 = vadd.f32 %v5897_v38, %v4099_v25 }
0x26e2   :  { %v4104_v15 = vsel %vm4103_vm9, %v5897_v38, %v4100_v36 }
0x26e3   :  { %v4109_v34 = vsel %vm4106_vm10, %v4108_v31, %v4104_v15 }
0x26e4   :  { %v4124_v12 = vmul.f32 0.0, %v4109_v34 }
0x2728   :  { %v4116_v6 = vpop.permute.xlu1 %4115 }
0x2729   :  { %v4118_v48 = vmul.f32 %v4116_v6, %v4094_v22 }
0x272b   :  { %4120 = vrot.lane.b32.xlu0 %v4118_v48, %s6142_s26 }
0x2738   :  { %v4127_v27 = vpop.permute.xlu0 %4126 }
0x2739   :  { %v4129_v52 = vmul.f32 %v4127_v27, %v4109_v34 }
0x273b   :  { %4131 = vrot.lane.b32.xlu2 %v4129_v52, %s6142_s26 }
0x2795   :  { %v4132_v49 = vpop.permute.xlu2 %4131 }
0x2796   :  { %v8649_v1 = vadd.f32 %v4132_v49, %v4124_v12 }
0x2798   :  { %5898 = vtanh.f32 %v8649_v1 }
0x279d   :  { %v4121_v10 = vpop.permute.xlu0 %4120 }
0x279e   :  { %v5899_v60 = vpop.eup %5898  ;;  %v8652_v18 = vadd.f32 %v4121_v10, %v4113_v43 }
0x279f   :  { %4143 = vrot.lane.b32.xlu1 %v5899_v60, %s6141_s3  ;;  %v4272_v60 = vrot.slane %v8649_v1, 6 }
0x27a0   :  { %5900 = vtanh.f32 %v8652_v18  ;;  %v4258_v52 = vrot.slane %v8652_v18, 6 }
0x27a6   :  { %v5901_v20 = vpop.eup %5900 }
0x27a7   :  { %4137 = vrot.lane.b32.xlu2 %v5901_v20, %s6141_s3 }
0x2801   :  { %v4138_v59 = vpop.permute.xlu2 %4137 }
0x2802   :  { %v4140_v16 = vmul.f32 %v4138_v59, %v4094_v22 }
0x2804   :  { %4148 = vrot.lane.b32.xlu1 %v4140_v16, %s6142_s26 }
0x2811   :  { %v4144_v33 = vpop.permute.xlu1 %4143 }
0x2812   :  { %v8658_v46 = vmul.f32 %v4144_v33, %v4109_v34 }
0x2814   :  { %4180 = vrot.lane.b32.xlu0 %v8658_v46, %s6142_s26 }
0x2876   :  { %v4149_v54 = vpop.permute.xlu1 %4148 }
0x2877   :  { %4151 = vst.msk [vmem:[#allocation4] sm:$0x3] %vm1405_vm1, %v4149_v54  ;;  %5537 = vmatmul.msk.f32.vlgmr.msra.gmra.mxu2 %vm1273_vm0, %v4149_v54 }
0x2878   :  { %4775 = vmatpush.msra.mxu2 %v8582_v23 }
0x287a   :  { %4776 = vmatpush.msra.mxu2 %v8584_v61 }
0x287c   :  { %4777 = vmatpush.msra.mxu2 %v8590_v55 }
0x287e   :  { %4778 = vmatpush.msra.mxu2 %v8598_v45 }
0x2886   :  { %v4181_v0 = vpop.permute.xlu0 %4180 }
0x2887   :  { %5538 = vmatmul.msk.f32.vlgmr.msra.gmra.mxu3 %vm1273_vm0, %v4181_v0 }
0x2888   :  { %4799 = vmatpush.msra.mxu3 %v8586_v35 }
0x288a   :  { %4800 = vmatpush.msra.mxu3 %v8600_v4 }
0x288c   :  { %4801 = vmatpush.msra.mxu3 %v8602_v44 }
0x288e   :  { %4802 = vmatpush.msra.mxu3 %v8607_v5 }
0x28fa   :  { %v4177_v3 = vpop.f32.mrf.mxu2 }
0x28fb   :  { %v4206_v30 = vrot.slane %v4177_v3, 6 }
0x28fd   :  { %v4208_v50 = vadd.f32 %v4206_v30, %v4204_v9 }
0x28ff   :  { %5902 = vtanh.f32 %v4208_v50  ;;  %v5539_v62 = vmul.f32 -1.442695, %v4208_v50 }
0x2905   :  { %v5903_v47 = vpop.eup %5902 }
0x2906   :  { %4262 = vrot.lane.b32.xlu0 %v5903_v47, %s6141_s3 }
0x290a   :  { %v4201_v39 = vpop.f32.mrf.mxu3 }
0x290b   :  { %v4211_v7 = vrot.slane %v4201_v39, 4 }
0x290d   :  { %v4213_v63 = vadd.f32 %v4211_v7, %v4209_v17  ;;  %v4363_v7 = vld [vmem:[#allocation3 + $0x8] sm:$0xc] }
0x290f   :  { %v4215_v13 = vrot.slane %v4213_v63, 2 }
0x2911   :  { %5904 = vtanh.f32 %v4215_v13  ;;  %v5540_v41 = vmul.f32 -1.442695, %v4215_v13 }
0x2913   :  { %5906 = vpow2.f32 %v5540_v41  ;;  %v4358_v41 = vld [vmem:[#allocation3 + $0x10] sm:$0x30] }
0x2914   :  { %5908 = vpow2.f32 %v5539_v62 }
0x2917   :  { %v5905_v8 = vpop.eup %5904 }
0x2918   :  { %4276 = vrot.lane.b32.xlu2 %v5905_v8, %s6141_s3 }
0x2919   :  { %v5907_v29 = vpop.eup %5906 }
0x291a   :  { %v4224_v51 = vadd.f32 1.0, %v5907_v29  ;;  %v5909_v14 = vpop.eup %5908 }
0x291b   :  { %v4223_v19 = vadd.f32 1.0, %v5909_v14 }
0x291c   :  { %5910 = vrcp.f32 %v4224_v51  ;;  %v4251_v53 = vand.u32 2147483648, %v4224_v51  ;;  %vm4245_vm12 = vweird.f32 %v4224_v51  ;;  %v4249_v56 = vand.u32 2147483647, %v4224_v51 }
0x291d   :  { %5912 = vrcp.f32 %v4223_v19  ;;  %v4236_v25 = vand.u32 2147483648, %v4223_v19  ;;  %vm4230_vm5 = vweird.f32 %v4223_v19  ;;  %v4234_v24 = vand.u32 2147483647, %v4223_v19 }
0x291e   :  { %v4252_v22 = vor.u32 1.1754944e-38, %v4251_v53  ;;  %vm4250_vm14 = vcmp.eq.f32.partialorder %v4249_v56, 8.507059e+37 }
0x291f   :  { %v4237_v15 = vor.u32 1.1754944e-38, %v4236_v25  ;;  %vm4235_vm7 = vcmp.eq.f32.partialorder %v4234_v24, 8.507059e+37 }
0x2922   :  { %v5911_v58 = vpop.eup %5910 }
0x2923   :  { %v4241_v21 = vmul.f32 %v5911_v58, %v4224_v51  ;;  %v5913_v2 = vpop.eup %5912  ;;  %vm4246_vm11 = vweird.f32 %v5911_v58 }
0x2924   :  { %v4226_v57 = vmul.f32 %v5913_v2, %v4223_v19  ;;  %vm4247_vm13 = vmor %vm4245_vm12, %vm4246_vm11  ;;  %vm4231_vm15 = vweird.f32 %v5913_v2 }
0x2925   :  { %v4242_v28 = vsub.f32 1.0, %v4241_v21  ;;  %vm4232_vm6 = vmor %vm4230_vm5, %vm4231_vm15 }
0x2926   :  { %v4227_v38 = vsub.f32 1.0, %v4226_v57 }
0x2927   :  { %v4243_v42 = vmul.f32 %v5911_v58, %v4242_v28 }
0x2928   :  { %v4228_v32 = vmul.f32 %v5913_v2, %v4227_v38 }
0x2929   :  { %v4244_v37 = vadd.f32 %v5911_v58, %v4243_v42 }
0x292a   :  { %v4229_v6 = vadd.f32 %v5913_v2, %v4228_v32 }
0x292b   :  { %v4248_v11 = vsel %vm4247_vm13, %v5911_v58, %v4244_v37 }
0x292c   :  { %v4253_v40 = vsel %vm4250_vm14, %v4252_v22, %v4248_v11  ;;  %v4233_v26 = vsel %vm4232_vm6, %v5913_v2, %v4229_v6 }
0x292d   :  { %v4238_v27 = vsel %vm4235_vm7, %v4237_v15, %v4233_v26  ;;  %v4274_v20 = vmul.f32 %v4272_v60, %v4253_v40 }
0x292e   :  { %v4260_v12 = vmul.f32 %v4258_v52, %v4238_v27 }
0x2972   :  { %v4277_v48 = vpop.permute.xlu2 %4276 }
0x2973   :  { %v4279_v36 = vmul.f32 %v4277_v48, %v4253_v40 }
0x2975   :  { %4281 = vrot.lane.b32.xlu1 %v4279_v36, %s6142_s26 }
0x2978   :  { %v4263_v31 = vpop.permute.xlu0 %4262 }
0x2979   :  { %v4265_v34 = vmul.f32 %v4263_v31, %v4238_v27 }
0x297b   :  { %4267 = vrot.lane.b32.xlu2 %v4265_v34, %s6142_s26 }
0x29d5   :  { %v4268_v49 = vpop.permute.xlu2 %4267 }
0x29d6   :  { %v8678_v43 = vadd.f32 %v4268_v49, %v4260_v12 }
0x29d8   :  { %5914 = vtanh.f32 %v8678_v43  ;;  %v4412_v60 = vrot.slane %v8678_v43, 6 }
0x29de   :  { %v5915_v10 = vpop.eup %5914 }
0x29df   :  { %4287 = vrot.lane.b32.xlu1 %v5915_v10, %s6141_s3 }
0x29e7   :  { %v4282_v59 = vpop.permute.xlu1 %4281 }
0x29e8   :  { %v8683_v16 = vadd.f32 %v4282_v59, %v4274_v20 }
0x29ea   :  { %5916 = vtanh.f32 %v8683_v16 }
0x29f0   :  { %v5917_v33 = vpop.eup %5916 }
0x29f1   :  { %4293 = vrot.lane.b32.xlu0 %v5917_v33, %s6141_s3 }
0x2a51   :  { %v4288_v18 = vpop.permute.xlu1 %4287 }
0x2a52   :  { %v8687_v54 = vmul.f32 %v4288_v18, %v4238_v27 }
0x2a54   :  { %v4308_v0 = vrot.slane %v8687_v54, 2 }
0x2a56   :  { %4309 = vrot.lane.b32.xlu0 %v4308_v0, %s6142_s26  ;;  %v4426_v0 = vrot.slane %v8683_v16, 6 }
0x2a63   :  { %v4294_v3 = vpop.permute.xlu0 %4293 }
0x2a64   :  { %v8691_v30 = vmul.f32 %v4294_v3, %v4253_v40 }
0x2a66   :  { %v4333_v1 = vrot.slane %v8691_v30, 2 }
0x2a68   :  { %4334 = vrot.lane.b32.xlu2 %v4333_v1, %s6142_s26 }
0x2ac2   :  { %v4335_v9 = vpop.permute.xlu2 %4334 }
0x2ac3   :  { %5542 = vmatmul.msk.f32.vlgmr.msrb.gmra.mxu1 %vm1273_vm0, %v4335_v9 }
0x2ac4   :  { %4953 = vmatpush.msrb.mxu1 %v8586_v35 }
0x2ac6   :  { %4954 = vmatpush.msrb.mxu1 %v8600_v4 }
0x2ac8   :  { %v4310_v50 = vpop.permute.xlu0 %4309  ;;  %4955 = vmatpush.msrb.mxu1 %v8602_v44 }
0x2ac9   :  { %5541 = vmatmul.msk.f32.vlgmr.msrb.gmra.mxu0 %vm1273_vm0, %v4310_v50 }
0x2aca   :  { %4928 = vmatpush.msrb.mxu0 %v8582_v23  ;;  %4956 = vmatpush.msrb.mxu1 %v8607_v5 }
0x2acc   :  { %4929 = vmatpush.msrb.mxu0 %v8584_v61 }
0x2ace   :  { %4930 = vmatpush.msrb.mxu0 %v8590_v55 }
0x2ad0   :  { %4931 = vmatpush.msrb.mxu0 %v8598_v45 }
0x2b40   :  { %v4355_v47 = vpop.f32.mrf.mxu1 }
0x2b41   :  { %v4365_v39 = vrot.slane %v4355_v47, 6 }
0x2b43   :  { %v4367_v17 = vadd.f32 %v4365_v39, %v4363_v7 }
0x2b45   :  { %v4369_v63 = vrot.slane %v4367_v17, 6 }
0x2b46   :  { %v4330_v13 = vpop.f32.mrf.mxu0 }
0x2b47   :  { %5918 = vtanh.f32 %v4369_v63  ;;  %v4360_v8 = vrot.slane %v4330_v13, 4  ;;  %v5544_v21 = vmul.f32 -1.442695, %v4369_v63 }
0x2b49   :  { %v4362_v62 = vadd.f32 %v4360_v8, %v4358_v41 }
0x2b4b   :  { %5920 = vtanh.f32 %v4362_v62  ;;  %v5543_v14 = vmul.f32 -1.442695, %v4362_v62 }
0x2b4d   :  { %v5919_v29 = vpop.eup %5918  ;;  %5922 = vpow2.f32 %v5543_v14 }
0x2b4e   :  { %4430 = vrot.lane.b32.xlu1 %v5919_v29, %s6141_s3 }
0x2b51   :  { %v5921_v51 = vpop.eup %5920 }
0x2b52   :  { %4416 = vrot.lane.b32.xlu2 %v5921_v51, %s6141_s3 }
0x2b53   :  { %v5923_v19 = vpop.eup %5922 }
0x2b54   :  { %v4377_v58 = vadd.f32 1.0, %v5923_v19 }
0x2b56   :  { %5924 = vrcp.f32 %v4377_v58  ;;  %v4390_v56 = vand.u32 2147483648, %v4377_v58  ;;  %vm4384_vm9 = vweird.f32 %v4377_v58  ;;  %v4388_v32 = vand.u32 2147483647, %v4377_v58 }
0x2b57   :  { %5926 = vpow2.f32 %v5544_v21 }
0x2b58   :  { %v4391_v6 = vor.u32 1.1754944e-38, %v4390_v56  ;;  %vm4389_vm11 = vcmp.eq.f32.partialorder %v4388_v32, 8.507059e+37 }
0x2b5c   :  { %v5925_v2 = vpop.eup %5924 }
0x2b5d   :  { %v4380_v28 = vmul.f32 %v5925_v2, %v4377_v58  ;;  %v5927_v57 = vpop.eup %5926  ;;  %vm4385_vm8 = vweird.f32 %v5925_v2 }
0x2b5e   :  { %v4378_v38 = vadd.f32 1.0, %v5927_v57  ;;  %vm4386_vm10 = vmor %vm4384_vm9, %vm4385_vm8 }
0x2b5f   :  { %v4381_v42 = vsub.f32 1.0, %v4380_v28 }
0x2b60   :  { %5928 = vrcp.f32 %v4378_v38  ;;  %v4405_v31 = vand.u32 2147483648, %v4378_v38  ;;  %vm4399_vm13 = vweird.f32 %v4378_v38  ;;  %v4403_v27 = vand.u32 2147483647, %v4378_v38 }
0x2b61   :  { %v4382_v37 = vmul.f32 %v5925_v2, %v4381_v42 }
0x2b62   :  { %v4406_v52 = vor.u32 1.1754944e-38, %v4405_v31  ;;  %vm4404_vm15 = vcmp.eq.f32.partialorder %v4403_v27, 8.507059e+37 }
0x2b63   :  { %v4383_v53 = vadd.f32 %v5925_v2, %v4382_v37 }
0x2b65   :  { %v4387_v11 = vsel %vm4386_vm10, %v5925_v2, %v4383_v53 }
0x2b66   :  { %v5929_v22 = vpop.eup %5928  ;;  %v4392_v40 = vsel %vm4389_vm11, %v4391_v6, %v4387_v11 }
0x2b67   :  { %v4395_v36 = vmul.f32 %v5929_v22, %v4378_v38  ;;  %vm4400_vm12 = vweird.f32 %v5929_v22  ;;  %v4414_v20 = vmul.f32 %v4412_v60, %v4392_v40 }
0x2b68   :  { %vm4401_vm14 = vmor %vm4399_vm13, %vm4400_vm12 }
0x2b69   :  { %v4396_v24 = vsub.f32 1.0, %v4395_v36 }
0x2b6b   :  { %v4397_v26 = vmul.f32 %v5929_v22, %v4396_v24 }
0x2b6d   :  { %v4398_v15 = vadd.f32 %v5929_v22, %v4397_v26 }
0x2b6f   :  { %v4402_v34 = vsel %vm4401_vm14, %v5929_v22, %v4398_v15 }
0x2b70   :  { %v4407_v12 = vsel %vm4404_vm15, %v4406_v52, %v4402_v34 }
0x2b71   :  { %v4428_v3 = vmul.f32 %v4426_v0, %v4407_v12 }
0x2bac   :  { %v4417_v48 = vpop.permute.xlu2 %4416 }
0x2bad   :  { %v4419_v25 = vmul.f32 %v4417_v48, %v4392_v40 }
0x2baf   :  { %4421 = vrot.lane.b32.xlu1 %v4419_v25, %s6142_s26 }
0x2bc0   :  { %v4431_v49 = vpop.permute.xlu1 %4430 }
0x2bc1   :  { %v4433_v10 = vmul.f32 %v4431_v49, %v4407_v12 }
0x2bc3   :  { %4435 = vrot.lane.b32.xlu0 %v4433_v10, %s6142_s26 }
0x2c21   :  { %v4422_v59 = vpop.permute.xlu1 %4421 }
0x2c22   :  { %v8710_v33 = vadd.f32 %v4422_v59, %v4414_v20 }
0x2c24   :  { %5930 = vtanh.f32 %v8710_v33  ;;  %v4563_v60 = vrot.slane %v8710_v33, 6 }
0x2c2a   :  { %v5931_v18 = vpop.eup %5930 }
0x2c2b   :  { %4441 = vrot.lane.b32.xlu0 %v5931_v18, %s6141_s3 }
0x2c35   :  { %v4436_v1 = vpop.permute.xlu0 %4435 }
0x2c36   :  { %v8715_v9 = vadd.f32 %v4436_v1, %v4428_v3 }
0x2c38   :  { %5932 = vtanh.f32 %v8715_v9 }
0x2c3e   :  { %v5933_v50 = vpop.eup %5932 }
0x2c3f   :  { %4447 = vrot.lane.b32.xlu2 %v5933_v50, %s6141_s3 }
0x2c99   :  { %v4448_v43 = vpop.permute.xlu2 %4447 }
0x2c9a   :  { %v8719_v47 = vmul.f32 %v4448_v43, %v4407_v12  ;;  %v4577_v12 = vrot.slane %v8715_v9, 6 }
0x2c9c   :  { %v4487_v39 = vrot.slane %v8719_v47, 4 }
0x2c9d   :  { %v4442_v7 = vpop.permute.xlu0 %4441 }
0x2c9e   :  { %v8722_v17 = vmul.f32 %v4442_v7, %v4392_v40  ;;  %4488 = vrot.lane.b32.xlu1 %v4487_v39, %s6142_s26 }
0x2ca0   :  { %v4462_v16 = vrot.slane %v8722_v17, 4 }
0x2ca2   :  { %4463 = vrot.lane.b32.xlu2 %v4462_v16, %s6142_s26 }
0x2cfc   :  { %v4464_v63 = vpop.permute.xlu2 %4463 }
0x2cfd   :  { %5545 = vmatmul.msk.f32.vlgmr.msrb.gmra.mxu2 %vm1273_vm0, %v4464_v63 }
0x2cfe   :  { %5082 = vmatpush.msrb.mxu2 %v8582_v23  ;;  %v4512_v23 = vld [vmem:[#allocation3 + $0x10] sm:$0xc0] }
0x2d00   :  { %5083 = vmatpush.msrb.mxu2 %v8584_v61 }
0x2d02   :  { %5084 = vmatpush.msrb.mxu2 %v8590_v55 }
0x2d04   :  { %5085 = vmatpush.msrb.mxu2 %v8598_v45  ;;  %v4517_v45 = vld [vmem:[#allocation3 + $0x8] sm:$0x3] }
0x2d10   :  { %v4489_v13 = vpop.permute.xlu1 %4488 }
0x2d11   :  { %5546 = vmatmul.msk.f32.vlgmr.msrb.gmra.mxu3 %vm1273_vm0, %v4489_v13 }
0x2d12   :  { %5107 = vmatpush.msrb.mxu3 %v8586_v35 }
0x2d14   :  { %5108 = vmatpush.msrb.mxu3 %v8600_v4 }
0x2d16   :  { %5109 = vmatpush.msrb.mxu3 %v8602_v44 }
0x2d18   :  { %5110 = vmatpush.msrb.mxu3 %v8607_v5 }
0x2d80   :  { %v4484_v8 = vpop.f32.mrf.mxu2 }
0x2d81   :  { %v4514_v41 = vrot.slane %v4484_v8, 2  ;;  %v4660_v8 = vld [vmem:[#allocation3 + $0x18] sm:$0x3] }
0x2d83   :  { %v4516_v62 = vadd.f32 %v4514_v41, %v4512_v23 }
0x2d85   :  { %5934 = vtanh.f32 %v4516_v62  ;;  %v5547_v4 = vmul.f32 -1.442695, %v4516_v62 }
0x2d8b   :  { %v5935_v61 = vpop.eup %5934 }
0x2d8c   :  { %4567 = vrot.lane.b32.xlu1 %v5935_v61, %s6141_s3 }
0x2d94   :  { %v4509_v55 = vpop.f32.mrf.mxu3 }
0x2d95   :  { %v4518_v29 = vadd.f32 %v4517_v45, %v4509_v55  ;;  %v4662_v55 = vld [vmem:[#allocation3] sm:$0xc0] }
0x2d97   :  { %v4520_v51 = vrot.slane %v4518_v29, 2 }
0x2d99   :  { %5936 = vtanh.f32 %v4520_v51  ;;  %v5548_v14 = vmul.f32 -1.442695, %v4520_v51 }
0x2d9a   :  { %5938 = vpow2.f32 %v5547_v4 }
0x2d9f   :  { %v5937_v35 = vpop.eup %5936 }
0x2da0   :  { %4581 = vrot.lane.b32.xlu0 %v5937_v35, %s6141_s3  ;;  %v5939_v44 = vpop.eup %5938 }
0x2da1   :  { %v4528_v5 = vadd.f32 1.0, %v5939_v44 }
0x2da3   :  { %5940 = vrcp.f32 %v4528_v5  ;;  %v4541_v38 = vand.u32 2147483648, %v4528_v5  ;;  %vm4535_vm6 = vweird.f32 %v4528_v5  ;;  %v4539_v37 = vand.u32 2147483647, %v4528_v5 }
0x2da4   :  { %5942 = vpow2.f32 %v5548_v14 }
0x2da5   :  { %v4542_v32 = vor.u32 1.1754944e-38, %v4541_v38  ;;  %vm4540_vm8 = vcmp.eq.f32.partialorder %v4539_v37, 8.507059e+37 }
0x2da9   :  { %v5941_v19 = vpop.eup %5940 }
0x2daa   :  { %v4531_v58 = vmul.f32 %v5941_v19, %v4528_v5  ;;  %v5943_v21 = vpop.eup %5942  ;;  %vm4536_vm5 = vweird.f32 %v5941_v19 }
0x2dab   :  { %v4529_v28 = vadd.f32 1.0, %v5943_v21  ;;  %vm4537_vm7 = vmor %vm4535_vm6, %vm4536_vm5 }
0x2dac   :  { %v4532_v2 = vsub.f32 1.0, %v4531_v58 }
0x2dad   :  { %5944 = vrcp.f32 %v4529_v28  ;;  %v4556_v24 = vand.u32 2147483648, %v4529_v28  ;;  %vm4550_vm10 = vweird.f32 %v4529_v28  ;;  %v4554_v26 = vand.u32 2147483647, %v4529_v28 }
0x2dae   :  { %v4533_v57 = vmul.f32 %v5941_v19, %v4532_v2 }
0x2daf   :  { %v4557_v31 = vor.u32 1.1754944e-38, %v4556_v24  ;;  %vm4555_vm12 = vcmp.eq.f32.partialorder %v4554_v26, 8.507059e+37 }
0x2db0   :  { %v4534_v42 = vadd.f32 %v5941_v19, %v4533_v57 }
0x2db2   :  { %v4538_v53 = vsel %vm4537_vm7, %v5941_v19, %v4534_v42 }
0x2db3   :  { %v5945_v56 = vpop.eup %5944  ;;  %v4543_v11 = vsel %vm4540_vm8, %v4542_v32, %v4538_v53 }
0x2db4   :  { %v4546_v48 = vmul.f32 %v5945_v56, %v4529_v28  ;;  %vm4551_vm9 = vweird.f32 %v5945_v56  ;;  %v4565_v59 = vmul.f32 %v4563_v60, %v4543_v11 }
0x2db5   :  { %vm4552_vm11 = vmor %vm4550_vm10, %vm4551_vm9 }
0x2db6   :  { %v4547_v40 = vsub.f32 1.0, %v4546_v48 }
0x2db8   :  { %v4548_v25 = vmul.f32 %v5945_v56, %v4547_v40 }
0x2dba   :  { %v4549_v36 = vadd.f32 %v5945_v56, %v4548_v25 }
0x2dbc   :  { %v4553_v15 = vsel %vm4552_vm11, %v5945_v56, %v4549_v36 }
0x2dbd   :  { %v4558_v34 = vsel %vm4555_vm12, %v4557_v31, %v4553_v15 }
0x2dbe   :  { %v4579_v49 = vmul.f32 %v4577_v12, %v4558_v34 }
0x2dfe   :  { %v4568_v22 = vpop.permute.xlu1 %4567 }
0x2dff   :  { %v4570_v6 = vmul.f32 %v4568_v22, %v4543_v11 }
0x2e01   :  { %4572 = vrot.lane.b32.xlu0 %v4570_v6, %s6142_s26 }
0x2e12   :  { %v4582_v27 = vpop.permute.xlu0 %4581 }
0x2e13   :  { %v4584_v52 = vmul.f32 %v4582_v27, %v4558_v34 }
0x2e15   :  { %4586 = vrot.lane.b32.xlu2 %v4584_v52, %s6142_s26 }
0x2e6f   :  { %v4587_v10 = vpop.permute.xlu2 %4586 }
0x2e70   :  { %v8743_v20 = vadd.f32 %v4587_v10, %v4579_v49 }
0x2e72   :  { %5946 = vtanh.f32 %v8743_v20 }
0x2e73   :  { %v4573_v18 = vpop.permute.xlu0 %4572 }
0x2e74   :  { %v8746_v0 = vadd.f32 %v4573_v18, %v4565_v59  ;;  %v4725_v59 = vrot.slane %v8743_v20, 6 }
0x2e76   :  { %5948 = vtanh.f32 %v8746_v0  ;;  %v4711_v52 = vrot.slane %v8746_v0, 6 }
0x2e78   :  { %v5947_v3 = vpop.eup %5946 }
0x2e79   :  { %4598 = vrot.lane.b32.xlu1 %v5947_v3, %s6141_s3 }
0x2e7c   :  { %v5949_v1 = vpop.eup %5948 }
0x2e7d   :  { %4592 = vrot.lane.b32.xlu2 %v5949_v1, %s6141_s3 }
0x2ed7   :  { %v4593_v9 = vpop.permute.xlu2 %4592 }
0x2ed8   :  { %v8751_v50 = vmul.f32 %v4593_v9, %v4543_v11 }
0x2eda   :  { %v4613_v33 = vrot.slane %v8751_v50, 6 }
0x2edc   :  { %4614 = vrot.lane.b32.xlu1 %v4613_v33, %s6142_s26 }
0x2eeb   :  { %v4599_v43 = vpop.permute.xlu1 %4598 }
0x2eec   :  { %v4601_v39 = vmul.f32 %v4599_v43, %v4558_v34 }
0x2eee   :  { %v4608_v7 = vrot.slane %v4601_v39, 6 }
0x2ef0   :  { %4609 = vrot.lane.b32.xlu0 %v4608_v7, %s6142_s26 }
0x2f4e   :  { %v4615_v16 = vpop.permute.xlu1 %4614 }
0x2f4f   :  { %5549 = vmatmul.msk.f32.vlgmr.msra.gmra.mxu0 %vm1273_vm0, %v4615_v16 }
0x2f62   :  { %v4610_v63 = vpop.permute.xlu0 %4609 }
0x2f63   :  { %4612 = vst.msk [vmem:[#allocation4 + $0x18] sm:$0x3] %vm1405_vm1, %v4610_v63  ;;  %5550 = vmatmul.msk.f32.vlgmr.msra.gmra.mxu1 %vm1273_vm0, %v4610_v63 }
0x2fcc   :  { %v4635_v13 = vpop.f32.mrf.mxu0 }
0x2fcd   :  { %v4661_v41 = vadd.f32 %v4660_v8, %v4635_v13 }
0x2fcf   :  { %5950 = vtanh.f32 %v4661_v41  ;;  %v5551_v35 = vmul.f32 -1.442695, %v4661_v41  ;;  %v4807_v41 = vld [vmem:[#allocation3 + $0x18] sm:$0xc] }
0x2fd5   :  { %v5951_v23 = vpop.eup %5950 }
0x2fd6   :  { %4715 = vrot.lane.b32.xlu0 %v5951_v23, %s6141_s3  ;;  %v4812_v23 = vld [vmem:[#allocation3] sm:$0x30] }
0x2fe0   :  { %v4657_v62 = vpop.f32.mrf.mxu1 }
0x2fe1   :  { %v4664_v61 = vrot.slane %v4657_v62, 2 }
0x2fe3   :  { %v4666_v45 = vadd.f32 %v4664_v61, %v4662_v55 }
0x2fe5   :  { %v4668_v29 = vrot.slane %v4666_v45, 6 }
0x2fe7   :  { %5952 = vtanh.f32 %v4668_v29  ;;  %v5552_v4 = vmul.f32 -1.442695, %v4668_v29 }
0x2fe8   :  { %5954 = vpow2.f32 %v5551_v35 }
0x2fe9   :  { %5956 = vpow2.f32 %v5552_v4 }
0x2fed   :  { %v5953_v51 = vpop.eup %5952 }
0x2fee   :  { %4729 = vrot.lane.b32.xlu2 %v5953_v51, %s6141_s3  ;;  %v5955_v44 = vpop.eup %5954 }
0x2fef   :  { %v5957_v5 = vpop.eup %5956  ;;  %v4676_v14 = vadd.f32 1.0, %v5955_v44 }
0x2ff0   :  { %v4677_v19 = vadd.f32 1.0, %v5957_v5 }
0x2ff1   :  { %5958 = vrcp.f32 %v4676_v14  ;;  %vm4683_vm15 = vweird.f32 %v4676_v14  ;;  %v4689_v11 = vand.u32 2147483648, %v4676_v14  ;;  %v4687_v6 = vand.u32 2147483647, %v4676_v14 }
0x2ff2   :  { %5960 = vrcp.f32 %v4677_v19  ;;  %v4704_v32 = vand.u32 2147483648, %v4677_v19  ;;  %vm4698_vm5 = vweird.f32 %v4677_v19  ;;  %v4702_v22 = vand.u32 2147483647, %v4677_v19 }
0x2ff3   :  { %v4690_v36 = vor.u32 1.1754944e-38, %v4689_v11  ;;  %vm4688_vm9 = vcmp.eq.f32.partialorder %v4687_v6, 8.507059e+37 }
0x2ff4   :  { %v4705_v25 = vor.u32 1.1754944e-38, %v4704_v32  ;;  %vm4703_vm8 = vcmp.eq.f32.partialorder %v4702_v22, 8.507059e+37 }
0x2ff7   :  { %v5959_v58 = vpop.eup %5958 }
0x2ff8   :  { %v5961_v21 = vpop.eup %5960  ;;  %v4679_v28 = vmul.f32 %v5959_v58, %v4676_v14  ;;  %vm4684_vm13 = vweird.f32 %v5959_v58 }
0x2ff9   :  { %v4694_v2 = vmul.f32 %v5961_v21, %v4677_v19  ;;  %vm4699_vm14 = vweird.f32 %v5961_v21  ;;  %vm4685_vm6 = vmor %vm4683_vm15, %vm4684_vm13 }
0x2ffa   :  { %v4680_v42 = vsub.f32 1.0, %v4679_v28  ;;  %vm4700_vm7 = vmor %vm4698_vm5, %vm4699_vm14 }
0x2ffb   :  { %v4695_v57 = vsub.f32 1.0, %v4694_v2 }
0x2ffc   :  { %v4681_v37 = vmul.f32 %v5959_v58, %v4680_v42 }
0x2ffd   :  { %v4696_v38 = vmul.f32 %v5961_v21, %v4695_v57 }
0x2ffe   :  { %v4682_v56 = vadd.f32 %v5959_v58, %v4681_v37 }
0x2fff   :  { %v4697_v53 = vadd.f32 %v5961_v21, %v4696_v38 }
0x3000   :  { %v4686_v40 = vsel %vm4685_vm6, %v5959_v58, %v4682_v56 }
0x3001   :  { %v4701_v48 = vsel %vm4700_vm7, %v5961_v21, %v4697_v53  ;;  %v4691_v31 = vsel %vm4688_vm9, %v4690_v36, %v4686_v40 }
0x3002   :  { %v4706_v26 = vsel %vm4703_vm8, %v4705_v25, %v4701_v48  ;;  %v4713_v12 = vmul.f32 %v4711_v52, %v4691_v31 }
0x3003   :  { %v4727_v18 = vmul.f32 %v4725_v59, %v4706_v26 }
0x3048   :  { %v4730_v24 = vpop.permute.xlu2 %4729  ;;  %v4716_v15 = vpop.permute.xlu0 %4715 }
0x3049   :  { %v4732_v27 = vmul.f32 %v4730_v24, %v4706_v26  ;;  %v4718_v34 = vmul.f32 %v4716_v15, %v4691_v31 }
0x304b   :  { %4734 = vrot.lane.b32.xlu1 %v4732_v27, %s6142_s26  ;;  %4720 = vrot.lane.b32.xlu2 %v4718_v34, %s6142_s26 }
0x30a5   :  { %v4721_v49 = vpop.permute.xlu2 %4720 }
0x30a6   :  { %v8764_v10 = vadd.f32 %v4721_v49, %v4713_v12 }
0x30a8   :  { %5962 = vtanh.f32 %v8764_v10  ;;  %v4861_v34 = vrot.slane %v8764_v10, 6 }
0x30ae   :  { %v5963_v60 = vpop.eup %5962 }
0x30af   :  { %4740 = vrot.lane.b32.xlu1 %v5963_v60, %s6141_s3 }
0x30bd   :  { %v4735_v3 = vpop.permute.xlu1 %4734 }
0x30be   :  { %v8769_v1 = vadd.f32 %v4735_v3, %v4727_v18 }
0x30c0   :  { %5964 = vtanh.f32 %v8769_v1  ;;  %v4875_v59 = vrot.slane %v8769_v1, 6 }
0x30c6   :  { %v5965_v9 = vpop.eup %5964 }
0x30c7   :  { %4746 = vrot.lane.b32.xlu0 %v5965_v9, %s6141_s3 }
0x3121   :  { %v4741_v0 = vpop.permute.xlu1 %4740 }
0x3122   :  { %v4743_v33 = vmul.f32 %v4741_v0, %v4691_v31 }
0x3124   :  { %4751 = vrot.lane.b32.xlu0 %v4743_v33, %s6142_s26 }
0x3139   :  { %v4747_v43 = vpop.permute.xlu0 %4746 }
0x313a   :  { %v8774_v39 = vmul.f32 %v4747_v43, %v4706_v26 }
0x313c   :  { %4783 = vrot.lane.b32.xlu2 %v8774_v39, %s6142_s26 }
0x3196   :  { %v4784_v20 = vpop.permute.xlu2 %4783  ;;  %v4752_v7 = vpop.permute.xlu0 %4751 }
0x3197   :  { %4754 = vst.msk [vmem:[#allocation4 + $0x10] sm:$0x3] %vm1405_vm1, %v4752_v7  ;;  %5553 = vmatmul.msk.f32.vlgmr.msra.gmra.mxu2 %vm1273_vm0, %v4752_v7  ;;  %5554 = vmatmul.msk.f32.vlgmr.msra.gmra.mxu3 %vm1273_vm0, %v4784_v20 }
0x321a   :  { %v4780_v16 = vpop.f32.mrf.mxu2  ;;  %v4804_v63 = vpop.f32.mrf.mxu3 }
0x321b   :  { %v4809_v13 = vrot.slane %v4780_v16, 6  ;;  %v4814_v8 = vrot.slane %v4804_v63, 4 }
0x321d   :  { %v4811_v62 = vadd.f32 %v4809_v13, %v4807_v41  ;;  %v4816_v61 = vadd.f32 %v4814_v8, %v4812_v23  ;;  %v4961_v41 = vld [vmem:[#allocation3 + $0x18] sm:$0x30] }
0x321f   :  { %5966 = vtanh.f32 %v4811_v62  ;;  %v4818_v55 = vrot.slane %v4816_v61, 2  ;;  %v5555_v51 = vmul.f32 -1.442695, %v4811_v62 }
0x3221   :  { %5968 = vtanh.f32 %v4818_v55  ;;  %v5556_v14 = vmul.f32 -1.442695, %v4818_v55 }
0x3222   :  { %5970 = vpow2.f32 %v5555_v51 }
0x3225   :  { %v5967_v45 = vpop.eup %5966 }
0x3226   :  { %4865 = vrot.lane.b32.xlu2 %v5967_v45, %s6141_s3  ;;  %v4966_v45 = vld [vmem:[#allocation3] sm:$0xc] }
0x3227   :  { %v5969_v29 = vpop.eup %5968 }
0x3228   :  { %4879 = vrot.lane.b32.xlu1 %v5969_v29, %s6141_s3  ;;  %v5971_v35 = vpop.eup %5970 }
0x3229   :  { %v4826_v4 = vadd.f32 1.0, %v5971_v35 }
0x322b   :  { %5972 = vrcp.f32 %v4826_v4  ;;  %v4839_v28 = vand.u32 2147483648, %v4826_v4  ;;  %vm4833_vm11 = vweird.f32 %v4826_v4  ;;  %v4837_v42 = vand.u32 2147483647, %v4826_v4 }
0x322c   :  { %5974 = vpow2.f32 %v5556_v14 }
0x322d   :  { %v4840_v37 = vor.u32 1.1754944e-38, %v4839_v28  ;;  %vm4838_vm13 = vcmp.eq.f32.partialorder %v4837_v42, 8.507059e+37 }
0x3231   :  { %v5973_v44 = vpop.eup %5972 }
0x3232   :  { %v4829_v5 = vmul.f32 %v5973_v44, %v4826_v4  ;;  %v5975_v21 = vpop.eup %5974  ;;  %vm4834_vm10 = vweird.f32 %v5973_v44 }
0x3233   :  { %v4827_v57 = vadd.f32 1.0, %v5975_v21  ;;  %vm4835_vm12 = vmor %vm4833_vm11, %vm4834_vm10 }
0x3234   :  { %v4830_v19 = vsub.f32 1.0, %v4829_v5 }
0x3235   :  { %5976 = vrcp.f32 %v4827_v57  ;;  %v4854_v25 = vand.u32 2147483648, %v4827_v57  ;;  %vm4848_vm15 = vweird.f32 %v4827_v57  ;;  %v4852_v36 = vand.u32 2147483647, %v4827_v57 }
0x3236   :  { %v4831_v58 = vmul.f32 %v5973_v44, %v4830_v19 }
0x3237   :  { %v4855_v26 = vor.u32 1.1754944e-38, %v4854_v25  ;;  %vm4853_vm6 = vcmp.eq.f32.partialorder %v4852_v36, 8.507059e+37 }
0x3238   :  { %v4832_v2 = vadd.f32 %v5973_v44, %v4831_v58 }
0x323a   :  { %v4836_v38 = vsel %vm4835_vm12, %v5973_v44, %v4832_v2 }
0x323b   :  { %v4841_v56 = vsel %vm4838_vm13, %v4840_v37, %v4836_v38  ;;  %v5977_v11 = vpop.eup %5976 }
0x323c   :  { %v4844_v22 = vmul.f32 %v5977_v11, %v4827_v57  ;;  %vm4849_vm14 = vweird.f32 %v5977_v11  ;;  %v4863_v52 = vmul.f32 %v4861_v34, %v4841_v56 }
0x323d   :  { %vm4850_vm5 = vmor %vm4848_vm15, %vm4849_vm14 }
0x323e   :  { %v4845_v6 = vsub.f32 1.0, %v4844_v22 }
0x3240   :  { %v4846_v48 = vmul.f32 %v5977_v11, %v4845_v6 }
0x3242   :  { %v4847_v40 = vadd.f32 %v5977_v11, %v4846_v48 }
0x3244   :  { %v4851_v24 = vsel %vm4850_vm5, %v5977_v11, %v4847_v40 }
0x3245   :  { %v4856_v15 = vsel %vm4853_vm6, %v4855_v26, %v4851_v24 }
0x3246   :  { %v4877_v18 = vmul.f32 %v4875_v59, %v4856_v15 }
0x3280   :  { %v4866_v53 = vpop.permute.xlu2 %4865 }
0x3281   :  { %v4868_v32 = vmul.f32 %v4866_v53, %v4841_v56 }
0x3283   :  { %4870 = vrot.lane.b32.xlu1 %v4868_v32, %s6142_s26 }
0x329a   :  { %v4880_v31 = vpop.permute.xlu1 %4879 }
0x329b   :  { %v4882_v27 = vmul.f32 %v4880_v31, %v4856_v15 }
0x329d   :  { %4884 = vrot.lane.b32.xlu0 %v4882_v27, %s6142_s26 }
0x32f5   :  { %v4871_v12 = vpop.permute.xlu1 %4870 }
0x32f6   :  { %v8786_v49 = vadd.f32 %v4871_v12, %v4863_v52 }
0x32f8   :  { %5978 = vtanh.f32 %v8786_v49  ;;  %v5015_v12 = vrot.slane %v8786_v49, 6 }
0x32fe   :  { %v5979_v60 = vpop.eup %5978 }
0x32ff   :  { %4890 = vrot.lane.b32.xlu0 %v5979_v60, %s6141_s3 }
0x330f   :  { %v4885_v3 = vpop.permute.xlu0 %4884 }
0x3310   :  { %v8791_v9 = vadd.f32 %v4885_v3, %v4877_v18 }
0x3312   :  { %5980 = vtanh.f32 %v8791_v9  ;;  %v5029_v3 = vrot.slane %v8791_v9, 6 }
0x3318   :  { %v5981_v0 = vpop.eup %5980 }
0x3319   :  { %4896 = vrot.lane.b32.xlu2 %v5981_v0, %s6141_s3 }
0x3371   :  { %v4891_v10 = vpop.permute.xlu0 %4890 }
0x3372   :  { %v8795_v33 = vmul.f32 %v4891_v10, %v4841_v56 }
0x3373   :  { %v4897_v20 = vpop.permute.xlu2 %4896 }
0x3374   :  { %v4911_v43 = vrot.slane %v8795_v33, 2  ;;  %v8798_v7 = vmul.f32 %v4897_v20, %v4856_v15 }
0x3376   :  { %4912 = vrot.lane.b32.xlu2 %v4911_v43, %s6142_s26  ;;  %v4936_v1 = vrot.slane %v8798_v7, 2 }
0x3378   :  { %4937 = vrot.lane.b32.xlu1 %v4936_v1, %s6142_s26 }
0x33d0   :  { %v4913_v16 = vpop.permute.xlu2 %4912 }
0x33d1   :  { %5557 = vmatmul.msk.f32.vlgmr.msrb.gmra.mxu0 %vm1273_vm0, %v4913_v16 }
0x33ea   :  { %v4938_v63 = vpop.permute.xlu1 %4937 }
0x33eb   :  { %5558 = vmatmul.msk.f32.vlgmr.msrb.gmra.mxu1 %vm1273_vm0, %v4938_v63 }
0x344e   :  { %v4933_v13 = vpop.f32.mrf.mxu0 }
0x344f   :  { %v4963_v8 = vrot.slane %v4933_v13, 4 }
0x3451   :  { %v4965_v23 = vadd.f32 %v4963_v8, %v4961_v41 }
0x3453   :  { %5982 = vtanh.f32 %v4965_v23  ;;  %v5559_v4 = vmul.f32 -1.442695, %v4965_v23 }
0x3459   :  { %v5983_v62 = vpop.eup %5982 }
0x345a   :  { %5019 = vrot.lane.b32.xlu1 %v5983_v62, %s6141_s3 }
0x3468   :  { %v4958_v61 = vpop.f32.mrf.mxu1 }
0x3469   :  { %v4968_v55 = vrot.slane %v4958_v61, 6 }
0x346b   :  { %v4970_v29 = vadd.f32 %v4968_v55, %v4966_v45  ;;  %v5115_v55 = vld [vmem:[#allocation3 + $0x18] sm:$0xc0] }
0x346d   :  { %v4972_v51 = vrot.slane %v4970_v29, 6 }
0x346f   :  { %5984 = vtanh.f32 %v4972_v51  ;;  %v5560_v58 = vmul.f32 -1.442695, %v4972_v51 }
0x3470   :  { %5986 = vpow2.f32 %v5559_v4 }
0x3475   :  { %v5985_v35 = vpop.eup %5984 }
0x3476   :  { %5033 = vrot.lane.b32.xlu0 %v5985_v35, %s6141_s3  ;;  %v5987_v44 = vpop.eup %5986  ;;  %v5120_v35 = vld [vmem:[#allocation3] sm:$0x3] }
0x3477   :  { %v4980_v5 = vadd.f32 1.0, %v5987_v44 }
0x3479   :  { %5988 = vrcp.f32 %v4980_v5  ;;  %v4993_v42 = vand.u32 2147483648, %v4980_v5  ;;  %vm4987_vm8 = vweird.f32 %v4980_v5  ;;  %v4991_v38 = vand.u32 2147483647, %v4980_v5 }
0x347a   :  { %5990 = vpow2.f32 %v5560_v58 }
0x347b   :  { %v4994_v56 = vor.u32 1.1754944e-38, %v4993_v42  ;;  %vm4992_vm10 = vcmp.eq.f32.partialorder %v4991_v38, 8.507059e+37 }
0x347f   :  { %v5989_v14 = vpop.eup %5988 }
0x3480   :  { %v4983_v19 = vmul.f32 %v5989_v14, %v4980_v5  ;;  %vm4988_vm7 = vweird.f32 %v5989_v14  ;;  %v5991_v57 = vpop.eup %5990 }
0x3481   :  { %vm4989_vm9 = vmor %vm4987_vm8, %vm4988_vm7  ;;  %v4981_v37 = vadd.f32 1.0, %v5991_v57 }
0x3482   :  { %v4984_v21 = vsub.f32 1.0, %v4983_v19 }
0x3483   :  { %5992 = vrcp.f32 %v4981_v37  ;;  %v5008_v24 = vand.u32 2147483648, %v4981_v37  ;;  %vm5002_vm12 = vweird.f32 %v4981_v37  ;;  %v5006_v26 = vand.u32 2147483647, %v4981_v37 }
0x3484   :  { %v4985_v2 = vmul.f32 %v5989_v14, %v4984_v21 }
0x3485   :  { %v5009_v31 = vor.u32 1.1754944e-38, %v5008_v24  ;;  %vm5007_vm14 = vcmp.eq.f32.partialorder %v5006_v26, 8.507059e+37 }
0x3486   :  { %v4986_v28 = vadd.f32 %v5989_v14, %v4985_v2 }
0x3488   :  { %v4990_v53 = vsel %vm4989_vm9, %v5989_v14, %v4986_v28 }
0x3489   :  { %v4995_v32 = vsel %vm4992_vm10, %v4994_v56, %v4990_v53  ;;  %v5993_v6 = vpop.eup %5992 }
0x348a   :  { %v4998_v48 = vmul.f32 %v5993_v6, %v4981_v37  ;;  %vm5003_vm11 = vweird.f32 %v5993_v6  ;;  %v5017_v60 = vmul.f32 %v5015_v12, %v4995_v32 }
0x348b   :  { %vm5004_vm13 = vmor %vm5002_vm12, %vm5003_vm11 }
0x348c   :  { %v4999_v40 = vsub.f32 1.0, %v4998_v48 }
0x348e   :  { %v5000_v25 = vmul.f32 %v5993_v6, %v4999_v40 }
0x3490   :  { %v5001_v36 = vadd.f32 %v5993_v6, %v5000_v25 }
0x3492   :  { %v5005_v15 = vsel %vm5004_vm13, %v5993_v6, %v5001_v36 }
0x3493   :  { %v5010_v34 = vsel %vm5007_vm14, %v5009_v31, %v5005_v15 }
0x3494   :  { %v5031_v0 = vmul.f32 %v5029_v3, %v5010_v34  ;;  %v4756_v3 = vrot.slane %v8774_v39, 2 }
0x34cc   :  { %v5020_v11 = vpop.permute.xlu1 %5019 }
0x34cd   :  { %v5022_v22 = vmul.f32 %v5020_v11, %v4995_v32 }
0x34cf   :  { %5024 = vrot.lane.b32.xlu0 %v5022_v22, %s6142_s26 }
0x34e8   :  { %v5034_v27 = vpop.permute.xlu0 %5033 }
0x34e9   :  { %v5036_v52 = vmul.f32 %v5034_v27, %v5010_v34 }
0x34eb   :  { %5038 = vrot.lane.b32.xlu2 %v5036_v52, %s6142_s26 }
0x3541   :  { %v5025_v59 = vpop.permute.xlu0 %5024 }
0x3542   :  { %v8810_v18 = vadd.f32 %v5025_v59, %v5017_v60 }
0x3544   :  { %5994 = vtanh.f32 %v8810_v18 }
0x3545   :  { %v5039_v10 = vpop.permute.xlu2 %5038 }
0x3546   :  { %v8814_v43 = vadd.f32 %v5039_v10, %v5031_v0  ;;  %v5166_v0 = vrot.slane %v8810_v18, 6 }
0x3548   :  { %5996 = vtanh.f32 %v8814_v43  ;;  %v5180_v39 = vrot.slane %v8814_v43, 6  ;;  %v4153_v43 = vrot.slane %v8658_v46, 2  ;;  %v5249_v46 = vld [vmem:[%s9105_s14 + $0xe8] sm:$0xff] }
0x354a   :  { %v5995_v20 = vpop.eup %5994 }
0x354b   :  { %5044 = vrot.lane.b32.xlu2 %v5995_v20, %s6141_s3 }
0x354e   :  { %v5997_v1 = vpop.eup %5996 }
0x354f   :  { %5050 = vrot.lane.b32.xlu1 %v5997_v1, %s6141_s3 }
0x35a5   :  { %v5045_v49 = vpop.permute.xlu2 %5044 }
0x35a6   :  { %v8819_v16 = vmul.f32 %v5045_v49, %v4995_v32 }
0x35a8   :  { %v5065_v63 = vrot.slane %v8819_v16, 4 }
0x35aa   :  { %5066 = vrot.lane.b32.xlu1 %v5065_v63, %s6142_s26 }
0x35c1   :  { %v5051_v9 = vpop.permute.xlu1 %5050 }
0x35c2   :  { %v8823_v13 = vmul.f32 %v5051_v9, %v5010_v34 }
0x35c4   :  { %v5090_v8 = vrot.slane %v8823_v13, 4 }
0x35c6   :  { %5091 = vrot.lane.b32.xlu0 %v5090_v8, %s6142_s26 }
0x361c   :  { %v5067_v41 = vpop.permute.xlu1 %5066 }
0x361d   :  { %5561 = vmatmul.msk.f32.vlgmr.msrb.gmra.mxu2 %vm1273_vm0, %v5067_v41 }
0x3638   :  { %v5092_v23 = vpop.permute.xlu0 %5091 }
0x3639   :  { %5562 = vmatmul.msk.f32.vlgmr.msrb.gmra.mxu3 %vm1273_vm0, %v5092_v23 }
0x36a0   :  { %v5087_v62 = vpop.f32.mrf.mxu2 }
0x36a1   :  { %v5117_v61 = vrot.slane %v5087_v62, 2  ;;  %v4303_v62 = vrot.slane %v8691_v30, 6  ;;  %v5250_v30 = vld [vmem:[%s9105_s14 + $0xf0] sm:$0xff] }
0x36a2   :  { %5290 = vmatpush.msra.mxu0 %v5250_v30  ;;  %v5267_v30 = vld [vmem:[%s9105_s14 + $0x178] sm:$0xff] }
0x36a3   :  { %v5119_v45 = vadd.f32 %v5117_v61, %v5115_v55  ;;  %v5245_v61 = vld [vmem:[%s9105_s14 + $0xc8] sm:$0xff]  ;;  %v5242_v55 = vld [vmem:[%s9105_s14 + $0xb0] sm:$0xff] }
0x36a5   :  { %5998 = vtanh.f32 %v5119_v45  ;;  %v5563_v14 = vmul.f32 -1.442695, %v5119_v45  ;;  %v5243_v45 = vld [vmem:[%s9105_s14 + $0xb8] sm:$0xff] }
0x36ab   :  { %v5999_v29 = vpop.eup %5998 }
0x36ac   :  { %5170 = vrot.lane.b32.xlu0 %v5999_v29, %s6141_s3  ;;  %v5240_v29 = vld [vmem:[%s9105_s14 + $0xa0] sm:$0xff] }
0x36bc   :  { %v5112_v51 = vpop.f32.mrf.mxu3 }
0x36bd   :  { %v5121_v4 = vadd.f32 %v5120_v35, %v5112_v51  ;;  %v5241_v51 = vld [vmem:[%s9105_s14 + $0xa8] sm:$0xff]  ;;  %v5238_v35 = vld [vmem:[%s9105_s14 + $0x90] sm:$0xff] }
0x36bf   :  { %v5123_v44 = vrot.slane %v5121_v4, 2  ;;  %v5239_v4 = vld [vmem:[%s9105_s14 + $0x98] sm:$0xff] }
0x36c1   :  { %6000 = vtanh.f32 %v5123_v44  ;;  %v5564_v19 = vmul.f32 -1.442695, %v5123_v44  ;;  %v5236_v44 = vld [vmem:[%s9105_s14 + $0x80] sm:$0xff] }
0x36c2   :  { %6002 = vpow2.f32 %v5563_v14  ;;  %v5234_v14 = vld [vmem:[%s9105_s14 + $0x70] sm:$0xff] }
0x36c3   :  { %6004 = vpow2.f32 %v5564_v19  ;;  %v5235_v19 = vld [vmem:[%s9105_s14 + $0x78] sm:$0xff] }
0x36c7   :  { %v6001_v5 = vpop.eup %6000 }
0x36c8   :  { %5184 = vrot.lane.b32.xlu2 %v6001_v5, %s6141_s3  ;;  %v6003_v58 = vpop.eup %6002  ;;  %v5237_v5 = vld [vmem:[%s9105_s14 + $0x88] sm:$0xff] }
0x36c9   :  { %v5131_v21 = vadd.f32 1.0, %v6003_v58  ;;  %v6005_v2 = vpop.eup %6004 }
0x36ca   :  { %v5132_v28 = vadd.f32 1.0, %v6005_v2  ;;  %v5233_v2 = vld [vmem:[%s9105_s14 + $0x68] sm:$0xff] }
0x36cb   :  { %6006 = vrcp.f32 %v5131_v21  ;;  %v5144_v22 = vand.u32 2147483648, %v5131_v21  ;;  %vm5138_vm15 = vweird.f32 %v5131_v21  ;;  %v5142_v48 = vand.u32 2147483647, %v5131_v21 }
0x36cc   :  { %6008 = vrcp.f32 %v5132_v28  ;;  %v5159_v24 = vand.u32 2147483648, %v5132_v28  ;;  %vm5153_vm8 = vweird.f32 %v5132_v28  ;;  %v5157_v31 = vand.u32 2147483647, %v5132_v28 }
0x36cd   :  { %v5145_v25 = vor.u32 1.1754944e-38, %v5144_v22  ;;  %vm5143_vm7 = vcmp.eq.f32.partialorder %v5142_v48, 8.507059e+37  ;;  %v5223_v48 = vld [vmem:[%s9105_s14 + $0x18] sm:$0xff] }
0x36ce   :  { %v5160_v52 = vor.u32 1.1754944e-38, %v5159_v24  ;;  %vm5158_vm10 = vcmp.eq.f32.partialorder %v5157_v31, 8.507059e+37 }
0x36d1   :  { %v6007_v57 = vpop.eup %6006 }
0x36d2   :  { %v5134_v42 = vmul.f32 %v6007_v57, %v5131_v21  ;;  %v6009_v38 = vpop.eup %6008  ;;  %vm5139_vm0 = vweird.f32 %v6007_v57  ;;  %v5232_v21 = vld [vmem:[%s9105_s14 + $0x60] sm:$0xff] }
0x36d3   :  { %v5149_v53 = vmul.f32 %v6009_v38, %v5132_v28  ;;  %vm5140_vm5 = vmor %vm5138_vm15, %vm5139_vm0  ;;  %vm5154_vm6 = vweird.f32 %v6009_v38 }
0x36d4   :  { %v5135_v37 = vsub.f32 1.0, %v5134_v42  ;;  %vm5155_vm9 = vmor %vm5153_vm8, %vm5154_vm6  ;;  %v5231_v42 = vld [vmem:[%s9105_s14 + $0x58] sm:$0xff] }
0x36d5   :  { %v5150_v32 = vsub.f32 1.0, %v5149_v53  ;;  %v5226_v53 = vld [vmem:[%s9105_s14 + $0x30] sm:$0xff] }
0x36d6   :  { %v5136_v56 = vmul.f32 %v6007_v57, %v5135_v37  ;;  %v5229_v37 = vld [vmem:[%s9105_s14 + $0x48] sm:$0xff] }
0x36d7   :  { %v5151_v6 = vmul.f32 %v6009_v38, %v5150_v32  ;;  %v5224_v32 = vld [vmem:[%s9105_s14 + $0x20] sm:$0xff] }
0x36d8   :  { %v5137_v11 = vadd.f32 %v6007_v57, %v5136_v56  ;;  %v5227_v56 = vld [vmem:[%s9105_s14 + $0x38] sm:$0xff] }
0x36d9   :  { %v5152_v36 = vadd.f32 %v6009_v38, %v5151_v6  ;;  %v5222_v6 = vld [vmem:[%s9105_s14 + $0x10] sm:$0xff] }
0x36da   :  { %v5141_v40 = vsel %vm5140_vm5, %v6007_v57, %v5137_v11  ;;  %v5230_v57 = vld [vmem:[%s9105_s14 + $0x50] sm:$0xff]  ;;  %v5225_v11 = vld [vmem:[%s9105_s14 + $0x28] sm:$0xff] }
0x36db   :  { %v8831_v15 = vsel %vm5143_vm7, %v5145_v25, %v5141_v40  ;;  %v5156_v34 = vsel %vm5155_vm9, %v6009_v38, %v5152_v36  ;;  %v5228_v38 = vld [vmem:[%s9105_s14 + $0x40] sm:$0xff]  ;;  %v5221_v25 = vld [vmem:[%s9105_s14 + $0x8] sm:$0xff] }
0x36dc   :  { %v8835_v60 = vsel %vm5158_vm10, %v5160_v52, %v5156_v34  ;;  %v5168_v10 = vmul.f32 %v5166_v0, %v8831_v15  ;;  %v5220_v40 = vld [vmem:[%s9105_s14] sm:$0xff]  ;;  %v4457_v52 = vrot.slane %v8719_v47, 2  ;;  %v5282_v0 = vld [vmem:[%s9105_s14 + $0x1f0] sm:$0xff]  ;;  %v5283_v47 = vld [vmem:[%s9105_s14 + $0x1f8] sm:$0xff] }
0x36dd   :  { %v5182_v18 = vmul.f32 %v5180_v39, %v8835_v60  ;;  %5313 = vmatpush.msra.mxu1 %v5282_v0  ;;  %5359 = vmatpush.msra.mxu3 %v5283_v47  ;;  %v5275_v39 = vld [vmem:[%s9105_s14 + $0x1b8] sm:$0xff] }
0x371e   :  { %v5171_v26 = vpop.permute.xlu0 %5170 }
0x371f   :  { %v5173_v27 = vmul.f32 %v5171_v26, %v8831_v15 }
0x3721   :  { %5175 = vrot.lane.b32.xlu2 %v5173_v27, %s6142_s26 }
0x3722   :  { %v5185_v12 = vpop.permute.xlu2 %5184 }
0x3723   :  { %v5187_v59 = vmul.f32 %v5185_v12, %v8835_v60 }
0x3725   :  { %5189 = vrot.lane.b32.xlu1 %v5187_v59, %s6142_s26 }
0x3729   :  { %4298 = vrot.lane.b32.xlu2 %v8687_v54, %s6142_s26  ;;  %v5060_v54 = vrot.slane %v8823_v13, 2  ;;  %v5244_v13 = vld [vmem:[%s9105_s14 + $0xc0] sm:$0xff] }
0x3731   :  { %4757 = vrot.lane.b32.xlu2 %v4756_v3, %s6142_s26 }
0x377b   :  { %v5176_v20 = vpop.permute.xlu2 %5175 }
0x377c   :  { %v5178_v1 = vadd.f32 %v5176_v20, %v5168_v10  ;;  %v5280_v10 = vld [vmem:[%s9105_s14 + $0x1e0] sm:$0xff]  ;;  %v5281_v20 = vld [vmem:[%s9105_s14 + $0x1e8] sm:$0xff] }
0x377d   :  { %5314 = vmatpush.msra.mxu1 %v5280_v10  ;;  %5360 = vmatpush.msra.mxu3 %v5281_v20 }
0x377e   :  { %6010 = vtanh.f32 %v5178_v1  ;;  %v5278_v1 = vld [vmem:[%s9105_s14 + $0x1d0] sm:$0xff] }
0x377f   :  { %5315 = vmatpush.msra.mxu1 %v5278_v1 }
0x3783   :  { %v4299_v49 = vpop.permute.xlu2 %4298 }
0x3784   :  { %v6011_v63 = vpop.eup %6010  ;;  %4301 = vst.msk [vmem:[#allocation4] sm:$0xc] %vm1557_vm2, %v4299_v49  ;;  %v5279_v49 = vld [vmem:[%s9105_s14 + $0x1d8] sm:$0xff] }
0x3785   :  { %5195 = vrot.lane.b32.xlu1 %v6011_v63, %s6141_s3  ;;  %v5276_v63 = vld [vmem:[%s9105_s14 + $0x1c0] sm:$0xff]  ;;  %5361 = vmatpush.msra.mxu3 %v5279_v49 }
0x3786   :  { %5316 = vmatpush.msra.mxu1 %v5276_v63 }
0x378b   :  { %v4758_v9 = vpop.permute.xlu2 %4757 }
0x378c   :  { %4760 = vst.msk [vmem:[#allocation4 + $0x8] sm:$0xc0] %vm1412_vm3, %v4758_v9  ;;  %v5277_v9 = vld [vmem:[%s9105_s14 + $0x1c8] sm:$0xff] }
0x378d   :  { %4603 = vrot.lane.b32.xlu1 %v8751_v50, %s6142_s26  ;;  %v4906_v50 = vrot.slane %v8798_v7, 6  ;;  %v5247_v7 = vld [vmem:[%s9105_s14 + $0xd8] sm:$0xff]  ;;  %5362 = vmatpush.msra.mxu3 %v5277_v9 }
0x378f   :  { %5363 = vmatpush.msra.mxu3 %v5275_v39 }
0x3795   :  { %5061 = vrot.lane.b32.xlu1 %v5060_v54, %s6142_s26  ;;  %v5274_v54 = vld [vmem:[%s9105_s14 + $0x1b0] sm:$0xff] }
0x3796   :  { %5317 = vmatpush.msra.mxu1 %v5274_v54 }
0x3797   :  { %v5190_v8 = vpop.permute.xlu1 %5189 }
0x3798   :  { %v5192_v41 = vadd.f32 %v5190_v8, %v5182_v18  ;;  %v5272_v18 = vld [vmem:[%s9105_s14 + $0x1a0] sm:$0xff]  ;;  %v5273_v8 = vld [vmem:[%s9105_s14 + $0x1a8] sm:$0xff] }
0x3799   :  { %5318 = vmatpush.msra.mxu1 %v5272_v18  ;;  %5364 = vmatpush.msra.mxu3 %v5273_v8 }
0x379a   :  { %6012 = vtanh.f32 %v5192_v41  ;;  %v5270_v41 = vld [vmem:[%s9105_s14 + $0x190] sm:$0xff] }
0x379b   :  { %5319 = vmatpush.msra.mxu1 %v5270_v41 }
0x379d   :  { %5055 = vrot.lane.b32.xlu1 %v8819_v16, %s6142_s26  ;;  %v5251_v16 = vld [vmem:[%s9105_s14 + $0xf8] sm:$0xff] }
0x379e   :  { %5336 = vmatpush.msra.mxu2 %v5251_v16  ;;  %v5264_v16 = vld [vmem:[%s9105_s14 + $0x160] sm:$0xff] }
0x37a0   :  { %v6013_v23 = vpop.eup %6012  ;;  %5337 = vmatpush.msra.mxu2 %v5249_v46  ;;  %v5262_v46 = vld [vmem:[%s9105_s14 + $0x150] sm:$0xff] }
0x37a1   :  { %5201 = vrot.lane.b32.xlu0 %v6013_v23, %s6141_s3  ;;  %v5271_v23 = vld [vmem:[%s9105_s14 + $0x198] sm:$0xff] }
0x37a2   :  { %5338 = vmatpush.msra.mxu2 %v5247_v7  ;;  %5365 = vmatpush.msra.mxu3 %v5271_v23  ;;  %v5260_v7 = vld [vmem:[%s9105_s14 + $0x140] sm:$0xff] }
0x37a4   :  { %5339 = vmatpush.msra.mxu2 %v5245_v61 }
0x37a5   :  { %4304 = vrot.lane.b32.xlu1 %v4303_v62, %s6142_s26  ;;  %v5268_v62 = vld [vmem:[%s9105_s14 + $0x180] sm:$0xff] }
0x37a6   :  { %5340 = vmatpush.msra.mxu2 %v5243_v45  ;;  %5320 = vmatpush.msra.mxu1 %v5268_v62  ;;  %v5259_v45 = vld [vmem:[%s9105_s14 + $0x138] sm:$0xff] }
0x37a8   :  { %5341 = vmatpush.msra.mxu2 %v5241_v51  ;;  %v5257_v51 = vld [vmem:[%s9105_s14 + $0x128] sm:$0xff] }
0x37a9   :  { %4452 = vrot.lane.b32.xlu0 %v8722_v17, %s6142_s26  ;;  %v5248_v17 = vld [vmem:[%s9105_s14 + $0xe0] sm:$0xff] }
0x37aa   :  { %5291 = vmatpush.msra.mxu0 %v5248_v17  ;;  %5342 = vmatpush.msra.mxu2 %v5239_v4  ;;  %v5265_v17 = vld [vmem:[%s9105_s14 + $0x168] sm:$0xff]  ;;  %v5255_v4 = vld [vmem:[%s9105_s14 + $0x118] sm:$0xff] }
0x37ac   :  { %5343 = vmatpush.msra.mxu2 %v5237_v5  ;;  %v5253_v5 = vld [vmem:[%s9105_s14 + $0x108] sm:$0xff] }
0x37ae   :  { %5344 = vmatpush.msra.mxu2 %v5235_v19 }
0x37b0   :  { %5345 = vmatpush.msra.mxu2 %v5233_v2 }
0x37b1   :  { %4907 = vrot.lane.b32.xlu0 %v4906_v50, %s6142_s26  ;;  %v5269_v50 = vld [vmem:[%s9105_s14 + $0x188] sm:$0xff] }
0x37b2   :  { %5346 = vmatpush.msra.mxu2 %v5231_v42  ;;  %5366 = vmatpush.msra.mxu3 %v5269_v50 }
0x37b4   :  { %5347 = vmatpush.msra.mxu2 %v5229_v37  ;;  %5367 = vmatpush.msra.mxu3 %v5267_v30 }
0x37b6   :  { %5348 = vmatpush.msra.mxu2 %v5227_v56  ;;  %5368 = vmatpush.msra.mxu3 %v5265_v17 }
0x37b8   :  { %5349 = vmatpush.msra.mxu2 %v5225_v11 }
0x37b9   :  { %4901 = vrot.lane.b32.xlu0 %v8795_v33, %s6142_s26  ;;  %v5246_v33 = vld [vmem:[%s9105_s14 + $0xd0] sm:$0xff] }
0x37ba   :  { %5292 = vmatpush.msra.mxu0 %v5246_v33  ;;  %5350 = vmatpush.msra.mxu2 %v5223_v48  ;;  %v5263_v33 = vld [vmem:[%s9105_s14 + $0x158] sm:$0xff] }
0x37bb   :  { %5369 = vmatpush.msra.mxu3 %v5263_v33 }
0x37bc   :  { %5293 = vmatpush.msra.mxu0 %v5244_v13  ;;  %5351 = vmatpush.msra.mxu2 %v5221_v25  ;;  %v5261_v13 = vld [vmem:[%s9105_s14 + $0x148] sm:$0xff] }
0x37bd   :  { %5370 = vmatpush.msra.mxu3 %v5261_v13 }
0x37be   :  { %5294 = vmatpush.msra.mxu0 %v5242_v55  ;;  %v5258_v55 = vld [vmem:[%s9105_s14 + $0x130] sm:$0xff] }
0x37bf   :  { %5371 = vmatpush.msra.mxu3 %v5259_v45 }
0x37c0   :  { %5295 = vmatpush.msra.mxu0 %v5240_v29  ;;  %v5256_v29 = vld [vmem:[%s9105_s14 + $0x120] sm:$0xff] }
0x37c1   :  { %4154 = vrot.lane.b32.xlu0 %v4153_v43, %s6142_s26  ;;  %v5266_v43 = vld [vmem:[%s9105_s14 + $0x170] sm:$0xff]  ;;  %5372 = vmatpush.msra.mxu3 %v5257_v51 }
0x37c2   :  { %5296 = vmatpush.msra.mxu0 %v5238_v35  ;;  %5321 = vmatpush.msra.mxu1 %v5266_v43  ;;  %v5254_v35 = vld [vmem:[%s9105_s14 + $0x110] sm:$0xff] }
0x37c3   :  { %5373 = vmatpush.msra.mxu3 %v5255_v4 }
0x37c4   :  { %5297 = vmatpush.msra.mxu0 %v5236_v44  ;;  %5322 = vmatpush.msra.mxu1 %v5264_v16  ;;  %v5252_v44 = vld [vmem:[%s9105_s14 + $0x100] sm:$0xff] }
0x37c5   :  { %5374 = vmatpush.msra.mxu3 %v5253_v5 }
0x37c6   :  { %5298 = vmatpush.msra.mxu0 %v5234_v14  ;;  %5323 = vmatpush.msra.mxu1 %v5262_v46 }
0x37c8   :  { %5299 = vmatpush.msra.mxu0 %v5232_v21  ;;  %5324 = vmatpush.msra.mxu1 %v5260_v7 }
0x37ca   :  { %5300 = vmatpush.msra.mxu0 %v5230_v57  ;;  %5325 = vmatpush.msra.mxu1 %v5258_v55 }
0x37cc   :  { %5301 = vmatpush.msra.mxu0 %v5228_v38  ;;  %5326 = vmatpush.msra.mxu1 %v5256_v29 }
0x37ce   :  { %5302 = vmatpush.msra.mxu0 %v5226_v53  ;;  %5327 = vmatpush.msra.mxu1 %v5254_v35 }
0x37d0   :  { %5303 = vmatpush.msra.mxu0 %v5224_v32  ;;  %5328 = vmatpush.msra.mxu1 %v5252_v44 }
0x37d2   :  { %5304 = vmatpush.msra.mxu0 %v5222_v6 }
0x37d4   :  { %5305 = vmatpush.msra.mxu0 %v5220_v40 }
0x37f7   :  { %v5196_v58 = vpop.permute.xlu1 %5195 }
0x37f8   :  { %v5198_v28 = vmul.f32 %v5196_v58, %v8831_v15 }
0x37fa   :  { %5206 = vrot.lane.b32.xlu2 %v5198_v28, %s6142_s26  ;;  %v5284_v28 = vld [vmem:[%s9106_s15] sm:$0x3] }
0x37fb   :  { %v5286_v57 = vperm.slane %v5284_v28, 0  ;;  %v5287_v53 = vperm.slane %v5284_v28, 1 }
0x37ff   :  { %v4604_v22 = vpop.permute.xlu1 %4603 }
0x3800   :  { %4606 = vst.msk [vmem:[#allocation4] sm:$0xc0] %vm1412_vm3, %v4604_v22 }
0x3807   :  { %v5062_v36 = vpop.permute.xlu1 %5061 }
0x3808   :  { %5064 = vst.msk [vmem:[#allocation4 + $0x8] sm:$0xc] %vm1557_vm2, %v5062_v36 }
0x380f   :  { %v5056_v24 = vpop.permute.xlu1 %5055 }
0x3810   :  { %5058 = vst.msk [vmem:[#allocation4 + $0x10] sm:$0x30] %vm1564_vm4, %v5056_v24 }
0x3813   :  { %v5202_v26 = vpop.permute.xlu0 %5201 }
0x3814   :  { %v5204_v15 = vmul.f32 %v5202_v26, %v8835_v60 }
0x3816   :  { %v5211_v31 = vrot.slane %v5204_v15, 6 }
0x3817   :  { %v4305_v27 = vpop.permute.xlu1 %4304 }
0x3818   :  { %4307 = vst.msk [vmem:[#allocation4 + $0x18] sm:$0x30] %vm1564_vm4, %v4305_v27  ;;  %5212 = vrot.lane.b32.xlu2 %v5211_v31, %s6142_s26 }
0x381b   :  { %v4453_v34 = vpop.permute.xlu0 %4452 }
0x381c   :  { %4455 = vst.msk [vmem:[#allocation4] sm:$0x30] %vm1564_vm4, %v4453_v34 }
0x3820   :  { %4458 = vrot.lane.b32.xlu2 %v4457_v52, %s6142_s26 }
0x3823   :  { %v4908_v12 = vpop.permute.xlu0 %4907  ;;  %v5216_v59 = vld [vmem:[#allocation4] sm:$0xff] }
0x3824   :  { %4910 = vst.msk [vmem:[#allocation4 + $0x8] sm:$0x30] %vm1564_vm4, %v4908_v12  ;;  %5306 = vmatmul.f32.vlgmr.msra.gmra.mxu0 %v5216_v59  ;;  %5352 = vmatmul.f32.vlgmr.msra.gmra.mxu2 %v5216_v59 }
0x382b   :  { %v4902_v60 = vpop.permute.xlu0 %4901 }
0x382c   :  { %4904 = vst.msk [vmem:[#allocation4 + $0x10] sm:$0xc] %vm1557_vm2, %v4902_v60 }
0x3833   :  { %v4155_v3 = vpop.permute.xlu0 %4154 }
0x3834   :  { %4157 = vst.msk [vmem:[#allocation4 + $0x18] sm:$0xc0] %vm1412_vm3, %v4155_v3 }
0x3854   :  { %v5207_v61 = vpop.permute.xlu2 %5206 }
0x3855   :  { %5209 = vst.msk [vmem:[#allocation4 + $0x10] sm:$0xc0] %vm1412_vm3, %v5207_v61 }
0x385c   :  { %v5218_v14 = vld [vmem:[#allocation4 + $0x10] sm:$0xff] }
0x385d   :  { %5309 = vmatmul.f32.gmra.mxu0 %v5218_v14  ;;  %5355 = vmatmul.f32.gmra.mxu2 %v5218_v14 }
0x3872   :  { %v5213_v19 = vpop.permute.xlu2 %5212 }
0x3873   :  { %5215 = vst.msk [vmem:[#allocation4 + $0x8] sm:$0x3] %vm1405_vm1, %v5213_v19 }
0x387a   :  { %v4459_v58 = vpop.permute.xlu2 %4458  ;;  %v5217_v21 = vld [vmem:[#allocation4 + $0x8] sm:$0xff] }
0x387b   :  { %4461 = vst.msk [vmem:[#allocation4 + $0x18] sm:$0xc] %vm1557_vm2, %v4459_v58  ;;  %5329 = vmatmul.f32.vlgmr.msra.gmra.mxu1 %v5217_v21  ;;  %5375 = vmatmul.f32.vlgmr.msra.gmra.mxu3 %v5217_v21 }
0x3882   :  { %v5219_v2 = vld [vmem:[#allocation4 + $0x18] sm:$0xff] }
0x3883   :  { %5332 = vmatmul.f32.gmra.mxu1 %v5219_v2  ;;  %5378 = vmatmul.f32.gmra.mxu3 %v5219_v2 }
0x38a1   :  { %v5307_v42 = vpop.f32.mrf.mxu0 }
0x38a2   :  { %v5308_v38 = vadd.f32 %v5307_v42, %v5286_v57 }
0x38a7   :  { %v5353_v32 = vpop.f32.mrf.mxu2 }
0x38a8   :  { %v5354_v6 = vadd.f32 %v5353_v32, %v5287_v53 }
0x38da   :  { %v5310_v22 = vpop.f32.mrf.mxu0 }
0x38db   :  { %v5311_v40 = vadd.f32 %v5310_v22, %v5286_v57 }
0x38e0   :  { %v5356_v15 = vpop.f32.mrf.mxu2 }
0x38e1   :  { %v5357_v52 = vadd.f32 %v5356_v15, %v5287_v53 }
0x38f8   :  { %v5330_v37 = vpop.f32.mrf.mxu1 }
0x38f9   :  { %v5331_v56 = vadd.f32 %v5330_v37, %v5308_v38 }
0x38fb   :  { %v5565_v11 = vmul.f32 -1.442695, %v5331_v56 }
0x38fd   :  { %6014 = vpow2.f32 %v5565_v11 }
0x38fe   :  { %v5376_v48 = vpop.f32.mrf.mxu3 }
0x38ff   :  { %v5377_v25 = vadd.f32 %v5376_v48, %v5354_v6 }
0x3900   :  { %v5333_v36 = vpop.f32.mrf.mxu1 }
0x3901   :  { %v5566_v24 = vmul.f32 -1.442695, %v5377_v25  ;;  %v5334_v26 = vadd.f32 %v5333_v36, %v5311_v40 }
0x3903   :  { %v6015_v31 = vpop.eup %6014  ;;  %6016 = vpow2.f32 %v5566_v24  ;;  %v5567_v27 = vmul.f32 -1.442695, %v5334_v26 }
0x3904   :  { %v5394_v34 = vadd.f32 1.0, %v6015_v31 }
0x3905   :  { %6018 = vpow2.f32 %v5567_v27 }
0x3906   :  { %6020 = vrcp.f32 %v5394_v34  ;;  %v5379_v12 = vpop.f32.mrf.mxu3  ;;  %v5409_v63 = vand.u32 2147483648, %v5394_v34  ;;  %v5407_v39 = vand.u32 2147483647, %v5394_v34  ;;  %vm5403_vm2 = vweird.f32 %v5394_v34 }
0x3907   :  { %v5380_v59 = vadd.f32 %v5379_v12, %v5357_v52 }
0x3908   :  { %v5410_v62 = vor.u32 1.1754944e-38, %v5409_v63  ;;  %vm5408_vm4 = vcmp.eq.f32.partialorder %v5407_v39, 8.507059e+37 }
0x3909   :  { %v6017_v60 = vpop.eup %6016  ;;  %v5568_v3 = vmul.f32 -1.442695, %v5380_v59 }
0x390a   :  { %v5395_v0 = vadd.f32 1.0, %v6017_v60 }
0x390b   :  { %v6019_v47 = vpop.eup %6018  ;;  %6022 = vpow2.f32 %v5568_v3 }
0x390c   :  { %v6021_v10 = vpop.eup %6020  ;;  %6024 = vrcp.f32 %v5395_v0  ;;  %v5396_v1 = vadd.f32 1.0, %v6019_v47  ;;  %v5424_v17 = vand.u32 2147483648, %v5395_v0  ;;  %v5422_v7 = vand.u32 2147483647, %v5395_v0 }
0x390d   :  { %v5399_v20 = vmul.f32 %v6021_v10, %v5394_v34  ;;  %vm5404_vm1 = vweird.f32 %v6021_v10  ;;  %vm5418_vm12 = vweird.f32 %v5395_v0 }
0x390e   :  { %6026 = vrcp.f32 %v5396_v1  ;;  %vm5405_vm3 = vmor %vm5403_vm2, %vm5404_vm1  ;;  %v5439_v55 = vand.u32 2147483648, %v5396_v1  ;;  %v5425_v29 = vor.u32 1.1754944e-38, %v5424_v17  ;;  %v5437_v35 = vand.u32 2147483647, %v5396_v1 }
0x390f   :  { %v5400_v49 = vsub.f32 1.0, %v5399_v20  ;;  %vm5423_vm0 = vcmp.eq.f32.partialorder %v5422_v7, 8.507059e+37  ;;  %vm5433_vm15 = vweird.f32 %v5396_v1 }
0x3910   :  { %v5440_v19 = vor.u32 1.1754944e-38, %v5439_v55  ;;  %vm5438_vm6 = vcmp.eq.f32.partialorder %v5437_v35, 8.507059e+37 }
0x3911   :  { %v6023_v9 = vpop.eup %6022  ;;  %v5401_v54 = vmul.f32 %v6021_v10, %v5400_v49 }
0x3912   :  { %v6025_v18 = vpop.eup %6024  ;;  %v5397_v8 = vadd.f32 1.0, %v6023_v9 }
0x3913   :  { %v5402_v41 = vadd.f32 %v6021_v10, %v5401_v54  ;;  %v5414_v23 = vmul.f32 %v6025_v18, %v5395_v0  ;;  %vm5419_vm11 = vweird.f32 %v6025_v18 }
0x3914   :  { %6028 = vrcp.f32 %v5397_v8  ;;  %v6027_v50 = vpop.eup %6026  ;;  %vm5420_vm13 = vmor %vm5418_vm12, %vm5419_vm11  ;;  %v5454_v2 = vand.u32 2147483648, %v5397_v8  ;;  %v5452_v42 = vand.u32 2147483647, %v5397_v8  ;;  %vm5448_vm8 = vweird.f32 %v5397_v8 }
0x3915   :  { %v5406_v43 = vsel %vm5405_vm3, %v6021_v10, %v5402_v41  ;;  %v5415_v30 = vsub.f32 1.0, %v5414_v23  ;;  %v5429_v46 = vmul.f32 %v6027_v50, %v5396_v1  ;;  %vm5434_vm14 = vweird.f32 %v6027_v50 }
0x3916   :  { %v5411_v16 = vsel %vm5408_vm4, %v5410_v62, %v5406_v43  ;;  %vm5435_vm5 = vmor %vm5433_vm15, %vm5434_vm14  ;;  %v5455_v37 = vor.u32 1.1754944e-38, %v5454_v2  ;;  %vm5453_vm10 = vcmp.eq.f32.partialorder %v5452_v42, 8.507059e+37 }
0x3917   :  { %5458 = vst [vmem:[%s9107_s16] sm:$0xff] %v5411_v16  ;;  %v5416_v33 = vmul.f32 %v6025_v18, %v5415_v30  ;;  %v5430_v13 = vsub.f32 1.0, %v5429_v46 }
0x3919   :  { %v5417_v61 = vadd.f32 %v6025_v18, %v5416_v33  ;;  %v5431_v51 = vmul.f32 %v6027_v50, %v5430_v13 }
0x391a   :  { %v6029_v45 = vpop.eup %6028 }
0x391b   :  { %v5421_v4 = vsel %vm5420_vm13, %v6025_v18, %v5417_v61  ;;  %v5444_v44 = vmul.f32 %v6029_v45, %v5397_v8  ;;  %v5432_v14 = vadd.f32 %v6027_v50, %v5431_v51  ;;  %vm5449_vm7 = vweird.f32 %v6029_v45 }
0x391c   :  { %v5426_v5 = vsel %vm5423_vm0, %v5425_v29, %v5421_v4  ;;  %vm5450_vm9 = vmor %vm5448_vm8, %vm5449_vm7 }
0x391d   :  { %5459 = vst [vmem:[%s9107_s16 + $0x8] sm:$0xff] %v5426_v5  ;;  %v5445_v58 = vsub.f32 1.0, %v5444_v44  ;;  %v5436_v21 = vsel %vm5435_vm5, %v6027_v50, %v5432_v14 }
0x391e   :  { %v5441_v28 = vsel %vm5438_vm6, %v5440_v19, %v5436_v21 }
0x391f   :  { %v5446_v57 = vmul.f32 %v6029_v45, %v5445_v58  ;;  %5460 = vst [vmem:[%s9107_s16 + $0x10] sm:$0xff] %v5441_v28 }
0x3921   :  { %v5447_v38 = vadd.f32 %v6029_v45, %v5446_v57 }
0x3923   :  { %v5451_v53 = vsel %vm5450_vm9, %v6029_v45, %v5447_v38 }
0x3924   :  { %v5456_v56 = vsel %vm5453_vm10, %v5455_v37, %v5451_v53 }
0x3925   :  { %5461 = vst [vmem:[%s9107_s16 + $0x18] sm:$0xff] %v5456_v56 }
0x3926   :  { %5470 = vsyncpa [#allocation6], 1 }
0x3927   :  { %5471 = vsyncpa [#allocation8], 1 }
0x3928   :  { %5472 = vsyncpa [#allocation11], 1 }

</bundles_post_ra>
